<compile_context>
chip_gen: v7x
topology: tpu7x:2x2x1
jax: 0.10.0
libtpu: 0.0.40
codegen_flags: <defaults>
</compile_context>

<pallas_src>
import jax
import jax.numpy as jnp
from jax.experimental import pallas as pl
from jax.experimental.pallas import tpu as pltpu


# ---------------------------------------------------------------------------
# Fused kernel: per-point MLP (conv1..conv5 + folded BN + ReLU) -> running max
# over points (VMEM scratch accumulator) -> classification head on the final
# point tile of each batch element.
# ---------------------------------------------------------------------------
def _pointnet_kernel(x_ref,
                     w1_ref, b1_ref, w2_ref, b2_ref, w3_ref, b3_ref,
                     w4_ref, b4_ref, w5_ref, b5_ref,
                     w6_ref, b6_ref, w7_ref, b7_ref,
                     o_ref, acc_ref):
    nt = pl.program_id(1)

    @pl.when(nt == 0)
    def _():
        acc_ref[...] = jnp.full_like(acc_ref, -jnp.inf)

    # (3, tile_n): channels on sublanes, points on lanes.
    h = x_ref[0].astype(jnp.bfloat16)

    def layer(h, w_ref, b_ref):
        # (C_out, C_in) @ (C_in, tile_n) on the MXU, f32 accumulate.
        # BN scale is already folded into w, so only bias + ReLU remain (VPU).
        y = jnp.dot(w_ref[...], h, preferred_element_type=jnp.float32)
        return jnp.maximum(y + b_ref[...], 0.0)

    h = layer(h, w1_ref, b1_ref).astype(jnp.bfloat16)   # (64,  tile_n)
    h = layer(h, w2_ref, b2_ref).astype(jnp.bfloat16)   # (64,  tile_n)
    h = layer(h, w3_ref, b3_ref).astype(jnp.bfloat16)   # (64,  tile_n)
    h = layer(h, w4_ref, b4_ref).astype(jnp.bfloat16)   # (128, tile_n)
    h = layer(h, w5_ref, b5_ref)                        # (emb, tile_n) f32

    # Global max-pool over points: lane reduce (XLU — off the MXU/VPU slots)
    # into the grid-resident f32 scratch accumulator.
    part = jnp.max(h, axis=-1, keepdims=True)           # (emb, 1)
    acc_ref[...] = jnp.maximum(acc_ref[...], part)

    # Fused classification head, only once the max over all points is complete.
    @pl.when(nt == pl.num_programs(1) - 1)
    def _():
        feat = acc_ref[...].astype(jnp.bfloat16)         # (emb, 1)
        h6 = jnp.dot(w6_ref[...], feat,
                     preferred_element_type=jnp.float32)  # (512, 1)
        h6 = jnp.maximum(h6 + b6_ref[...], 0.0)
        # TODO(synk): nn.Dropout() is identity in eval mode; no RNG mask applied.
        logits = jnp.dot(w7_ref[...], h6.astype(jnp.bfloat16),
                         preferred_element_type=jnp.float32) + b7_ref[...]
        o_ref[...] = logits[None]                        # (1, out_ch, 1)


def pointnet_forward(x, params, tile_n=None):
    """x: (B, 3, N) float32 (PyTorch Conv1d NCW layout). Returns (B, out_ch) f32."""
    B, c_in, N = x.shape
    if tile_n is None:
        if N <= 2048:
            tile_n = N
        else:
            candidates = [t for t in (2048, 1024, 512, 256, 128) if N % t == 0]
            assert candidates, f"N={N} must be a multiple of 128 for tiling"
            tile_n = candidates[0]
    assert N % tile_n == 0
    assert tile_n == N or tile_n % 128 == 0

    emb = params["w5"].shape[0]
    out_ch = params["w7"].shape[0]

    weight_keys = ("w1", "b1", "w2", "b2", "w3", "b3", "w4", "b4",
                   "w5", "b5", "w6", "b6", "w7", "b7")
    weight_args = [params[k] for k in weight_keys]

    def full_spec(a):
        nd = a.ndim
        # Whole array as one resident VMEM block (constant index map -> no
        # re-fetch across grid steps).
        return pl.BlockSpec(a.shape, lambda b, n, _nd=nd: (0,) * _nd)

    in_specs = [pl.BlockSpec((1, c_in, tile_n), lambda b, n: (b, 0, n))]
    in_specs += [full_spec(a) for a in weight_args]

    out = pl.pallas_call(
        _pointnet_kernel,
        out_shape=jax.ShapeDtypeStruct((B, out_ch, 1), jnp.float32),
        grid_spec=pltpu.PrefetchScalarGridSpec(
            num_scalar_prefetch=0,
            grid=(B, N // tile_n),
            in_specs=in_specs,
            out_specs=pl.BlockSpec((1, out_ch, 1), lambda b, n: (b, 0, 0)),
            scratch_shapes=[pltpu.VMEM((emb, 1), jnp.float32)],
        ),
        compiler_params=pltpu.CompilerParams(
            dimension_semantics=("parallel", "arbitrary")),
    )(x, *weight_args)

    return out.reshape(B, out_ch)


def init_params(key, emb_dims=128, output_channels=40):
    """Deterministic synthetic parameters in kernel layout.

    Conv/Linear weights are stored as (C_out, C_in) with the eval-mode
    BatchNorm scale (running_mean=0, running_var=1, eps=1e-5) pre-folded and
    cast to bf16 for the MXU; biases are f32 column vectors (C_out, 1).
    """
    eps = 1e-5
    dims = [3, 64, 64, 64, 128, emb_dims]
    keys = iter(jax.random.split(key, 32))
    params = {}
    # conv1..conv5 (bias=False) with bn1..bn5 folded.
    for i in range(1, 6):
        cin, cout = dims[i - 1], dims[i]
        w = jax.random.normal(next(keys), (cout, cin), jnp.float32) / jnp.sqrt(cin)
        gamma = 1.0 + 0.1 * jax.random.normal(next(keys), (cout,), jnp.float32)
        beta = 0.1 * jax.random.normal(next(keys), (cout,), jnp.float32)
        scale = gamma / jnp.sqrt(1.0 + eps)            # folded BN scale
        params[f"w{i}"] = (w * scale[:, None]).astype(jnp.bfloat16)
        params[f"b{i}"] = beta[:, None]                # folded BN bias (mean=0)
    # linear1 (emb -> 512, bias=False) + bn6 folded, stored (512, emb).
    w6 = jax.random.normal(next(keys), (512, emb_dims), jnp.float32) / jnp.sqrt(emb_dims)
    gamma6 = 1.0 + 0.1 * jax.random.normal(next(keys), (512,), jnp.float32)
    beta6 = 0.1 * jax.random.normal(next(keys), (512,), jnp.float32)
    scale6 = gamma6 / jnp.sqrt(1.0 + eps)
    params["w6"] = (w6 * scale6[:, None]).astype(jnp.bfloat16)
    params["b6"] = beta6[:, None]
    # linear2 (512 -> output_channels, with bias), stored (out, 512).
    params["w7"] = (jax.random.normal(next(keys), (output_channels, 512), jnp.float32)
                    / jnp.sqrt(512.0)).astype(jnp.bfloat16)
    params["b7"] = 0.01 * jax.random.normal(next(keys), (output_channels, 1), jnp.float32)
    return params


if __name__ == "__main__":
    key = jax.random.PRNGKey(0)
    kx, kp = jax.random.split(key)

    B, N = 2, 2048                      # 2 clouds, 2048 points each
    x = jax.random.normal(kx, (B, 3, N), jnp.float32)   # PyTorch NCW layout
    params = init_params(kp, emb_dims=128, output_channels=40)

    out = pointnet_forward(x, params)   # default tile_n -> 2048 (1 reduction step)
    out = jax.block_until_ready(out)
    assert out.shape == (B, 40) and out.dtype == jnp.float32
    assert bool(jnp.all(jnp.isfinite(out)))
    print("KERNEL_OK")
</pallas_src>

<mosaic_0001>
module attributes {stable_mosaic.version = 11 : i64} {
  func.func @_pointnet_kernel(%arg0: i32, %arg1: i32, %arg2: memref<1x3x2048xf32, #tpu.memory_space<vmem>>, %arg3: memref<64x3xbf16, #tpu.memory_space<vmem>>, %arg4: memref<64x1xf32, #tpu.memory_space<vmem>>, %arg5: memref<64x64xbf16, #tpu.memory_space<vmem>>, %arg6: memref<64x1xf32, #tpu.memory_space<vmem>>, %arg7: memref<64x64xbf16, #tpu.memory_space<vmem>>, %arg8: memref<64x1xf32, #tpu.memory_space<vmem>>, %arg9: memref<128x64xbf16, #tpu.memory_space<vmem>>, %arg10: memref<128x1xf32, #tpu.memory_space<vmem>>, %arg11: memref<128x128xbf16, #tpu.memory_space<vmem>>, %arg12: memref<128x1xf32, #tpu.memory_space<vmem>>, %arg13: memref<512x128xbf16, #tpu.memory_space<vmem>>, %arg14: memref<512x1xf32, #tpu.memory_space<vmem>>, %arg15: memref<40x512xbf16, #tpu.memory_space<vmem>>, %arg16: memref<40x1xf32, #tpu.memory_space<vmem>>, %arg17: memref<1x40x1xf32, #tpu.memory_space<vmem>>, %arg18: memref<128x1xf32, #tpu.memory_space<vmem>>) attributes {dimension_semantics = [#tpu.dimension_semantics<parallel>, #tpu.dimension_semantics<arbitrary>], iteration_bounds = array<i64: 2, 1>, scalar_prefetch = 0 : i64, scratch_operands = 1 : i64, tpu.core_type = #tpu.core_type<tc>, window_params = [{transform_indices = @transform_0, window_bounds = array<i64: 1, 3, 2048>}, {pipeline_mode = #tpu.pipeline_mode<synchronous>, transform_indices = @transform_1, window_bounds = array<i64: 64, 3>}, {pipeline_mode = #tpu.pipeline_mode<synchronous>, transform_indices = @transform_2, window_bounds = array<i64: 64, 1>}, {pipeline_mode = #tpu.pipeline_mode<synchronous>, transform_indices = @transform_3, window_bounds = array<i64: 64, 64>}, {pipeline_mode = #tpu.pipeline_mode<synchronous>, transform_indices = @transform_4, window_bounds = array<i64: 64, 1>}, {pipeline_mode = #tpu.pipeline_mode<synchronous>, transform_indices = @transform_5, window_bounds = array<i64: 64, 64>}, {pipeline_mode = #tpu.pipeline_mode<synchronous>, transform_indices = @transform_6, window_bounds = array<i64: 64, 1>}, {pipeline_mode = #tpu.pipeline_mode<synchronous>, transform_indices = @transform_7, window_bounds = array<i64: 128, 64>}, {pipeline_mode = #tpu.pipeline_mode<synchronous>, transform_indices = @transform_8, window_bounds = array<i64: 128, 1>}, {pipeline_mode = #tpu.pipeline_mode<synchronous>, transform_indices = @transform_9, window_bounds = array<i64: 128, 128>}, {pipeline_mode = #tpu.pipeline_mode<synchronous>, transform_indices = @transform_10, window_bounds = array<i64: 128, 1>}, {pipeline_mode = #tpu.pipeline_mode<synchronous>, transform_indices = @transform_11, window_bounds = array<i64: 512, 128>}, {pipeline_mode = #tpu.pipeline_mode<synchronous>, transform_indices = @transform_12, window_bounds = array<i64: 512, 1>}, {pipeline_mode = #tpu.pipeline_mode<synchronous>, transform_indices = @transform_13, window_bounds = array<i64: 40, 512>}, {pipeline_mode = #tpu.pipeline_mode<synchronous>, transform_indices = @transform_14, window_bounds = array<i64: 40, 1>}, {transform_indices = @transform_15, window_bounds = array<i64: 1, 40, 1>}]} {
    %c0_i32 = arith.constant 0 : i32
    %0 = arith.cmpi eq, %arg1, %c0_i32 : i32
    %1 = arith.extui %0 : i1 to i32
    %c0_i32_0 = arith.constant 0 : i32
    %2 = arith.cmpi ne, %1, %c0_i32_0 : i32
    scf.if %2 {
      %cst_39 = arith.constant 0xFF800000 : f32
      %53 = vector.broadcast %cst_39 : f32 to vector<128x1xf32>
      %c0_40 = arith.constant 0 : index
      %c0_41 = arith.constant 0 : index
      %54 = vector.load %arg18[%c0_40, %c0_41] : memref<128x1xf32, #tpu.memory_space<vmem>>, vector<128x1xf32>
      tpu.vector_store %arg18[%c0_40, %c0_41], %53 {strides = array<i32>} : memref<128x1xf32, #tpu.memory_space<vmem>>, vector<128x1xf32>,
    } else {
    }
    %c0 = arith.constant 0 : index
    %c0_1 = arith.constant 0 : index
    %c0_2 = arith.constant 0 : index
    %3 = vector.load %arg2[%c0, %c0_1, %c0_2] : memref<1x3x2048xf32, #tpu.memory_space<vmem>>, vector<1x3x2048xf32>
    %4 = vector.shape_cast %3 : vector<1x3x2048xf32> to vector<3x2048xf32>
    %5 = arith.truncf %4 : vector<3x2048xf32> to vector<3x2048xbf16>
    %c0_3 = arith.constant 0 : index
    %c0_4 = arith.constant 0 : index
    %6 = vector.load %arg3[%c0_3, %c0_4] : memref<64x3xbf16, #tpu.memory_space<vmem>>, vector<64x3xbf16>
    %cst = arith.constant dense<0.000000e+00> : vector<64x2048xf32>
    %7 = tpu.matmul %6, %5, %cst {dimension_numbers = #tpu.dot_dimension_numbers<[1], [0], [0], [1], [0, 0, 1, 1], [], []>} : vector<64x3xbf16>, vector<3x2048xbf16>, vector<64x2048xf32> -> vector<64x2048xf32>
    %c0_5 = arith.constant 0 : index
    %c0_6 = arith.constant 0 : index
    %8 = vector.load %arg4[%c0_5, %c0_6] : memref<64x1xf32, #tpu.memory_space<vmem>>, vector<64x1xf32>
    %9 = vector.broadcast %8 : vector<64x1xf32> to vector<64x2048xf32>
    %10 = arith.addf %7, %9 : vector<64x2048xf32>
    %cst_7 = arith.constant 0.000000e+00 : f32
    %11 = vector.broadcast %cst_7 : f32 to vector<64x2048xf32>
    %12 = arith.maximumf %10, %11 : vector<64x2048xf32>
    %13 = arith.truncf %12 : vector<64x2048xf32> to vector<64x2048xbf16>
    %c0_8 = arith.constant 0 : index
    %c0_9 = arith.constant 0 : index
    %14 = vector.load %arg5[%c0_8, %c0_9] : memref<64x64xbf16, #tpu.memory_space<vmem>>, vector<64x64xbf16>
    %cst_10 = arith.constant dense<0.000000e+00> : vector<64x2048xf32>
    %15 = tpu.matmul %14, %13, %cst_10 {dimension_numbers = #tpu.dot_dimension_numbers<[1], [0], [0], [1], [0, 0, 1, 1], [], []>} : vector<64x64xbf16>, vector<64x2048xbf16>, vector<64x2048xf32> -> vector<64x2048xf32>
    %c0_11 = arith.constant 0 : index
    %c0_12 = arith.constant 0 : index
    %16 = vector.load %arg6[%c0_11, %c0_12] : memref<64x1xf32, #tpu.memory_space<vmem>>, vector<64x1xf32>
    %17 = vector.broadcast %16 : vector<64x1xf32> to vector<64x2048xf32>
    %18 = arith.addf %15, %17 : vector<64x2048xf32>
    %cst_13 = arith.constant 0.000000e+00 : f32
    %19 = vector.broadcast %cst_13 : f32 to vector<64x2048xf32>
    %20 = arith.maximumf %18, %19 : vector<64x2048xf32>
    %21 = arith.truncf %20 : vector<64x2048xf32> to vector<64x2048xbf16>
    %c0_14 = arith.constant 0 : index
    %c0_15 = arith.constant 0 : index
    %22 = vector.load %arg7[%c0_14, %c0_15] : memref<64x64xbf16, #tpu.memory_space<vmem>>, vector<64x64xbf16>
    %cst_16 = arith.constant dense<0.000000e+00> : vector<64x2048xf32>
    %23 = tpu.matmul %22, %21, %cst_16 {dimension_numbers = #tpu.dot_dimension_numbers<[1], [0], [0], [1], [0, 0, 1, 1], [], []>} : vector<64x64xbf16>, vector<64x2048xbf16>, vector<64x2048xf32> -> vector<64x2048xf32>
    %c0_17 = arith.constant 0 : index
    %c0_18 = arith.constant 0 : index
    %24 = vector.load %arg8[%c0_17, %c0_18] : memref<64x1xf32, #tpu.memory_space<vmem>>, vector<64x1xf32>
    %25 = vector.broadcast %24 : vector<64x1xf32> to vector<64x2048xf32>
    %26 = arith.addf %23, %25 : vector<64x2048xf32>
    %cst_19 = arith.constant 0.000000e+00 : f32
    %27 = vector.broadcast %cst_19 : f32 to vector<64x2048xf32>
    %28 = arith.maximumf %26, %27 : vector<64x2048xf32>
    %29 = arith.truncf %28 : vector<64x2048xf32> to vector<64x2048xbf16>
    %c0_20 = arith.constant 0 : index
    %c0_21 = arith.constant 0 : index
    %30 = vector.load %arg9[%c0_20, %c0_21] : memref<128x64xbf16, #tpu.memory_space<vmem>>, vector<128x64xbf16>
    %cst_22 = arith.constant dense<0.000000e+00> : vector<128x2048xf32>
    %31 = tpu.matmul %30, %29, %cst_22 {dimension_numbers = #tpu.dot_dimension_numbers<[1], [0], [0], [1], [0, 0, 1, 1], [], []>} : vector<128x64xbf16>, vector<64x2048xbf16>, vector<128x2048xf32> -> vector<128x2048xf32>
    %c0_23 = arith.constant 0 : index
    %c0_24 = arith.constant 0 : index
    %32 = vector.load %arg10[%c0_23, %c0_24] : memref<128x1xf32, #tpu.memory_space<vmem>>, vector<128x1xf32>
    %33 = vector.broadcast %32 : vector<128x1xf32> to vector<128x2048xf32>
    %34 = arith.addf %31, %33 : vector<128x2048xf32>
    %cst_25 = arith.constant 0.000000e+00 : f32
    %35 = vector.broadcast %cst_25 : f32 to vector<128x2048xf32>
    %36 = arith.maximumf %34, %35 : vector<128x2048xf32>
    %37 = arith.truncf %36 : vector<128x2048xf32> to vector<128x2048xbf16>
    %c0_26 = arith.constant 0 : index
    %c0_27 = arith.constant 0 : index
    %38 = vector.load %arg11[%c0_26, %c0_27] : memref<128x128xbf16, #tpu.memory_space<vmem>>, vector<128x128xbf16>
    %cst_28 = arith.constant dense<0.000000e+00> : vector<128x2048xf32>
    %39 = tpu.matmul %38, %37, %cst_28 {dimension_numbers = #tpu.dot_dimension_numbers<[1], [0], [0], [1], [0, 0, 1, 1], [], []>} : vector<128x128xbf16>, vector<128x2048xbf16>, vector<128x2048xf32> -> vector<128x2048xf32>
    %c0_29 = arith.constant 0 : index
    %c0_30 = arith.constant 0 : index
    %40 = vector.load %arg12[%c0_29, %c0_30] : memref<128x1xf32, #tpu.memory_space<vmem>>, vector<128x1xf32>
    %41 = vector.broadcast %40 : vector<128x1xf32> to vector<128x2048xf32>
    %42 = arith.addf %39, %41 : vector<128x2048xf32>
    %cst_31 = arith.constant 0.000000e+00 : f32
    %43 = vector.broadcast %cst_31 : f32 to vector<128x2048xf32>
    %44 = arith.maximumf %42, %43 : vector<128x2048xf32>
    %cst_32 = arith.constant dense<0xFF800000> : vector<128xf32>
    %45 = vector.multi_reduction <maximumf>, %44, %cst_32 [1] : vector<128x2048xf32> to vector<128xf32>
    %46 = vector.shape_cast %45 : vector<128xf32> to vector<128x1xf32>
    %c0_33 = arith.constant 0 : index
    %c0_34 = arith.constant 0 : index
    %47 = vector.load %arg18[%c0_33, %c0_34] : memref<128x1xf32, #tpu.memory_space<vmem>>, vector<128x1xf32>
    %48 = arith.maximumf %47, %46 : vector<128x1xf32>
    %c0_35 = arith.constant 0 : index
    %c0_36 = arith.constant 0 : index
    %49 = vector.load %arg18[%c0_35, %c0_36] : memref<128x1xf32, #tpu.memory_space<vmem>>, vector<128x1xf32>
    tpu.vector_store %arg18[%c0_35, %c0_36], %48 {strides = array<i32>} : memref<128x1xf32, #tpu.memory_space<vmem>>, vector<128x1xf32>,
    %c0_i32_37 = arith.constant 0 : i32
    %50 = arith.cmpi eq, %arg1, %c0_i32_37 : i32
    %51 = arith.extui %50 : i1 to i32
    %c0_i32_38 = arith.constant 0 : i32
    %52 = arith.cmpi ne, %51, %c0_i32_38 : i32
    scf.if %52 {
      %c0_39 = arith.constant 0 : index
      %c0_40 = arith.constant 0 : index
      %53 = vector.load %arg18[%c0_39, %c0_40] : memref<128x1xf32, #tpu.memory_space<vmem>>, vector<128x1xf32>
      %54 = arith.truncf %53 : vector<128x1xf32> to vector<128x1xbf16>
      %c0_41 = arith.constant 0 : index
      %c0_42 = arith.constant 0 : index
      %55 = vector.load %arg13[%c0_41, %c0_42] : memref<512x128xbf16, #tpu.memory_space<vmem>>, vector<512x128xbf16>
      %cst_43 = arith.constant dense<0.000000e+00> : vector<512x1xf32>
      %56 = tpu.matmul %55, %54, %cst_43 {dimension_numbers = #tpu.dot_dimension_numbers<[1], [0], [0], [1], [0, 0, 1, 1], [], []>} : vector<512x128xbf16>, vector<128x1xbf16>, vector<512x1xf32> -> vector<512x1xf32>
      %c0_44 = arith.constant 0 : index
      %c0_45 = arith.constant 0 : index
      %57 = vector.load %arg14[%c0_44, %c0_45] : memref<512x1xf32, #tpu.memory_space<vmem>>, vector<512x1xf32>
      %58 = arith.addf %56, %57 : vector<512x1xf32>
      %cst_46 = arith.constant 0.000000e+00 : f32
      %59 = vector.broadcast %cst_46 : f32 to vector<512x1xf32>
      %60 = arith.maximumf %58, %59 : vector<512x1xf32>
      %c0_47 = arith.constant 0 : index
      %c0_48 = arith.constant 0 : index
      %61 = vector.load %arg15[%c0_47, %c0_48] : memref<40x512xbf16, #tpu.memory_space<vmem>>, vector<40x512xbf16>
      %62 = arith.truncf %60 : vector<512x1xf32> to vector<512x1xbf16>
      %cst_49 = arith.constant dense<0.000000e+00> : vector<40x1xf32>
      %63 = tpu.matmul %61, %62, %cst_49 {dimension_numbers = #tpu.dot_dimension_numbers<[1], [0], [0], [1], [0, 0, 1, 1], [], []>} : vector<40x512xbf16>, vector<512x1xbf16>, vector<40x1xf32> -> vector<40x1xf32>
      %c0_50 = arith.constant 0 : index
      %c0_51 = arith.constant 0 : index
      %64 = vector.load %arg16[%c0_50, %c0_51] : memref<40x1xf32, #tpu.memory_space<vmem>>, vector<40x1xf32>
      %65 = arith.addf %63, %64 : vector<40x1xf32>
      %66 = vector.shape_cast %65 : vector<40x1xf32> to vector<1x40x1xf32>
      %c0_52 = arith.constant 0 : index
      %c0_53 = arith.constant 0 : index
      %c0_54 = arith.constant 0 : index
      %67 = vector.load %arg17[%c0_52, %c0_53, %c0_54] : memref<1x40x1xf32, #tpu.memory_space<vmem>>, vector<1x40x1xf32>
      tpu.vector_store %arg17[%c0_52, %c0_53, %c0_54], %66 {strides = array<i32>} : memref<1x40x1xf32, #tpu.memory_space<vmem>>, vector<1x40x1xf32>,
    } else {
    }
    return
  }
  func.func @transform_0(%arg0: i32, %arg1: i32) -> (i32, i32, i32) {
    %c0_i32 = arith.constant 0 : i32
    %c0_i32_0 = arith.constant 0 : i32
    return %arg0, %c0_i32, %arg1 : i32, i32, i32
  }
  func.func @transform_1(%arg0: i32, %arg1: i32) -> (i32, i32) {
    %c0_i32 = arith.constant 0 : i32
    %c0_i32_0 = arith.constant 0 : i32
    %c0_i32_1 = arith.constant 0 : i32
    return %c0_i32, %c0_i32_0 : i32, i32
  }
  func.func @transform_2(%arg0: i32, %arg1: i32) -> (i32, i32) {
    %c0_i32 = arith.constant 0 : i32
    %c0_i32_0 = arith.constant 0 : i32
    %c0_i32_1 = arith.constant 0 : i32
    return %c0_i32, %c0_i32_0 : i32, i32
  }
  func.func @transform_3(%arg0: i32, %arg1: i32) -> (i32, i32) {
    %c0_i32 = arith.constant 0 : i32
    %c0_i32_0 = arith.constant 0 : i32
    %c0_i32_1 = arith.constant 0 : i32
    return %c0_i32, %c0_i32_0 : i32, i32
  }
  func.func @transform_4(%arg0: i32, %arg1: i32) -> (i32, i32) {
    %c0_i32 = arith.constant 0 : i32
    %c0_i32_0 = arith.constant 0 : i32
    %c0_i32_1 = arith.constant 0 : i32
    return %c0_i32, %c0_i32_0 : i32, i32
  }
  func.func @transform_5(%arg0: i32, %arg1: i32) -> (i32, i32) {
    %c0_i32 = arith.constant 0 : i32
    %c0_i32_0 = arith.constant 0 : i32
    %c0_i32_1 = arith.constant 0 : i32
    return %c0_i32, %c0_i32_0 : i32, i32
  }
  func.func @transform_6(%arg0: i32, %arg1: i32) -> (i32, i32) {
    %c0_i32 = arith.constant 0 : i32
    %c0_i32_0 = arith.constant 0 : i32
    %c0_i32_1 = arith.constant 0 : i32
    return %c0_i32, %c0_i32_0 : i32, i32
  }
  func.func @transform_7(%arg0: i32, %arg1: i32) -> (i32, i32) {
    %c0_i32 = arith.constant 0 : i32
    %c0_i32_0 = arith.constant 0 : i32
    %c0_i32_1 = arith.constant 0 : i32
    return %c0_i32, %c0_i32_0 : i32, i32
  }
  func.func @transform_8(%arg0: i32, %arg1: i32) -> (i32, i32) {
    %c0_i32 = arith.constant 0 : i32
    %c0_i32_0 = arith.constant 0 : i32
    %c0_i32_1 = arith.constant 0 : i32
    return %c0_i32, %c0_i32_0 : i32, i32
  }
  func.func @transform_9(%arg0: i32, %arg1: i32) -> (i32, i32) {
    %c0_i32 = arith.constant 0 : i32
    %c0_i32_0 = arith.constant 0 : i32
    %c0_i32_1 = arith.constant 0 : i32
    return %c0_i32, %c0_i32_0 : i32, i32
  }
  func.func @transform_10(%arg0: i32, %arg1: i32) -> (i32, i32) {
    %c0_i32 = arith.constant 0 : i32
    %c0_i32_0 = arith.constant 0 : i32
    %c0_i32_1 = arith.constant 0 : i32
    return %c0_i32, %c0_i32_0 : i32, i32
  }
  func.func @transform_11(%arg0: i32, %arg1: i32) -> (i32, i32) {
    %c0_i32 = arith.constant 0 : i32
    %c0_i32_0 = arith.constant 0 : i32
    %c0_i32_1 = arith.constant 0 : i32
    return %c0_i32, %c0_i32_0 : i32, i32
  }
  func.func @transform_12(%arg0: i32, %arg1: i32) -> (i32, i32) {
    %c0_i32 = arith.constant 0 : i32
    %c0_i32_0 = arith.constant 0 : i32
    %c0_i32_1 = arith.constant 0 : i32
    return %c0_i32, %c0_i32_0 : i32, i32
  }
  func.func @transform_13(%arg0: i32, %arg1: i32) -> (i32, i32) {
    %c0_i32 = arith.constant 0 : i32
    %c0_i32_0 = arith.constant 0 : i32
    %c0_i32_1 = arith.constant 0 : i32
    return %c0_i32, %c0_i32_0 : i32, i32
  }
  func.func @transform_14(%arg0: i32, %arg1: i32) -> (i32, i32) {
    %c0_i32 = arith.constant 0 : i32
    %c0_i32_0 = arith.constant 0 : i32
    %c0_i32_1 = arith.constant 0 : i32
    return %c0_i32, %c0_i32_0 : i32, i32
  }
  func.func @transform_15(%arg0: i32, %arg1: i32) -> (i32, i32, i32) {
    %c0_i32 = arith.constant 0 : i32
    %c0_i32_0 = arith.constant 0 : i32
    %c0_i32_1 = arith.constant 0 : i32
    return %arg0, %c0_i32, %c0_i32_0 : i32, i32, i32
  }
}

</mosaic_0001>

<bundles_post_ra>
// kernel: tpu_custom_call.1
= control target key start
LH: loop header
LB: loop body
LE: loop exit
PB: predicated region body
PF: predicated region fallthrough
CT: control target
= control target key end

     0   :  { %s7999_s18 = smov 0   ;;  %s8001_s19 = smov 0   ;;  %s10950_s0 = inlined_call_operand.vmem [shape: f32[2,3,2048], index: 0, kind: input, shape index: {}]   ;;  %s10951_s1 = inlined_call_operand.vmem [shape: bf16[64,3], index: 1, kind: input, shape index: {}]   ;;  %s10952_s2 = inlined_call_operand.vmem [shape: f32[64,1], index: 2, kind: input, shape index: {}]   ;;  %s10953_s3 = inlined_call_operand.vmem [shape: bf16[64,64], index: 3, kind: input, shape index: {}]   ;;  %s10954_s4 = inlined_call_operand.vmem [shape: f32[64,1], index: 4, kind: input, shape index: {}]   ;;  %s10955_s5 = inlined_call_operand.vmem [shape: bf16[64,64], index: 5, kind: input, shape index: {}]   ;;  %s10956_s6 = inlined_call_operand.vmem [shape: f32[64,1], index: 6, kind: input, shape index: {}]   ;;  %s10957_s7 = inlined_call_operand.vmem [shape: bf16[128,64], index: 7, kind: input, shape index: {}]   ;;  %s10958_s8 = inlined_call_operand.vmem [shape: f32[128,1], index: 8, kind: input, shape index: {}]   ;;  %s10959_s9 = inlined_call_operand.vmem [shape: bf16[128,128], index: 9, kind: input, shape index: {}]   ;;  %s10960_s10 = inlined_call_operand.vmem [shape: f32[128,1], index: 10, kind: input, shape index: {}]   ;;  %s10961_s11 = inlined_call_operand.vmem [shape: bf16[512,128], index: 11, kind: input, shape index: {}]   ;;  %s10962_s12 = inlined_call_operand.vmem [shape: f32[512,1], index: 12, kind: input, shape index: {}]   ;;  %s10963_s13 = inlined_call_operand.vmem [shape: bf16[40,512], index: 13, kind: input, shape index: {}]   ;;  %s10964_s14 = inlined_call_operand.vmem [shape: f32[40,1], index: 14, kind: input, shape index: {}]   ;;  %s10965_s15 = inlined_call_operand.vmem [shape: f32[2,40,1], index: 15, kind: output, shape index: {}]  }
   0x1   :  { %s8003_s20 = smov 0  }
   0x2 LB: > { %s37_s21 = sadd.s32 1, %s7910_s19  ;;  %p7335_p0 = scmp.ge.s32.totalorder %s7914_s20, 1  ;;  %s7914_s20 = sphi %s8003_s20, %s25_s20   ;;  %s7910_s19 = sphi %s8001_s19, %s10967_s19   ;;  %s7906_s18 = sphi %s7999_s18, %s10966_s18  }
   0x3   : > { %p39_p1 = scmp.ge.s32.totalorder %s37_s21, 2  ;;  %p456_p2 = scmp.lt.s32.totalorder %s7914_s20, 3 }
   0x5   : > { %s10969_s21 = smov (%p39_p1, %s37_s21), 0  ;;  %p457_p3 = pnand %p7335_p0, %p456_p2 }
   0x6   : > { %p509_p4 = scmp.lt.s32.totalorder (!%p457_p3), %s7906_s18, 1  ;;  %vm682_vm0 = vcmask (!%p457_p3), 1040384   ;;  %v7916_v0 = vmov (!%p457_p3), 0   ;;  %vm683_vm1 = vcmask (!%p457_p3), 1041408   ;;  %v7917_v1 = vmov (!%p457_p3), 65535   ;;  %v601_v3 = vld [vmem:[%s10952_s2] sm:$0xff] (!%p457_p3) }
   0x7   : > { %460 = sbr.rel (%p457_p3) target bundleno = 2299 (0x8fb), region = 80  ;;  %766 = vmatprep.mubr.bf16.mxu1 (!%p457_p3), %v7916_v0  ;;  %912 = vmatprep.mubr.bf16.mxu0 (!%p457_p3), %v7916_v0  ;;  %v684_v2 = vsel (!%p457_p3), %vm682_vm0, 4294967295, %v7917_v1  ;;  %v603_v4 = vld [vmem:[%s10952_s2 + $0x10] sm:$0xff] (!%p457_p3)  ;;  %v602_v5 = vld [vmem:[%s10952_s2 + $0x8] sm:$0xff] (!%p457_p3)  ;;  %v604_v7 = vld [vmem:[%s10952_s2 + $0x18] sm:$0xff] (!%p457_p3)  ;;  %vm669_vm2 = vcmask (!%p457_p3), 23552  }
   0x8   : > { %7790 = vset.pattern.permute.xlu0 (!%p457_p3), %v7916_v0  ;;  %7791 = vset.pattern.permute.xlu1 (!%p457_p3), %v7916_v0  ;;  %v8038_v6 = vsel (!%p457_p3), %vm683_vm1, %v684_v2, 0  ;;  %v605_v16 = vld [vmem:[%s10952_s2 + $0x20] sm:$0xff] (!%p457_p3)  ;;  %v606_v20 = vld [vmem:[%s10952_s2 + $0x28] sm:$0xff] (!%p457_p3)  ;;  %v607_v29 = vld [vmem:[%s10952_s2 + $0x30] sm:$0xff] (!%p457_p3)  ;;  %vm1586_vm3 = vcmask (!%p457_p3), 523264   ;;  %vm528_vm4 = vcmask (!%p457_p3), 7168  }
   0x9   : > { %611 = vperm.xlu0 (!%p457_p3), %7790, %v601_v3   ;;  %621 = vperm.xlu1 (!%p457_p3), %7791, %v603_v4   ;;  %v8064_v32 = vld [vmem:[%s10951_s1] sm:$0xff] (!%p457_p3)   ;;  %v608_v33 = vld [vmem:[%s10952_s2 + $0x38] sm:$0xff] (!%p457_p3)  ;;  %v1519_v42 = vld [vmem:[%s10954_s4 + $0x8] sm:$0xff] (!%p457_p3) }
   0xa   : > { %v1518_v38 = vld [vmem:[%s10954_s4] sm:$0xff] (!%p457_p3)  ;;  %v1520_v45 = vld [vmem:[%s10954_s4 + $0x10] sm:$0xff] (!%p457_p3)  ;;  %v8102_v48 = vld [vmem:[%s10951_s1 + $0x8] sm:$0xff] (!%p457_p3)  }
   0xb   : > { %v1521_v49 = vld [vmem:[%s10954_s4 + $0x18] sm:$0xff] (!%p457_p3)  ;;  %v1522_v50 = vld [vmem:[%s10954_s4 + $0x20] sm:$0xff] (!%p457_p3)  ;;  %v1523_v51 = vld [vmem:[%s10954_s4 + $0x28] sm:$0xff] (!%p457_p3) }
   0xc   : > { %v1524_v52 = vld [vmem:[%s10954_s4 + $0x30] sm:$0xff] (!%p457_p3)  ;;  %v1525_v55 = vld [vmem:[%s10954_s4 + $0x38] sm:$0xff] (!%p457_p3)  ;;  %v2383_v60 = vld [vmem:[%s10956_s6] sm:$0xff] (!%p457_p3) }
   0xd   : > { %616 = vperm.xlu0 (!%p457_p3), %7790, %v602_v5   ;;  %626 = vperm.xlu1 (!%p457_p3), %7791, %v604_v7   ;;  %v8126_v54 = vld [vmem:[%s10951_s1 + $0x10] sm:$0xff] (!%p457_p3)   ;;  %v2384_v61 = vld [vmem:[%s10956_s6 + $0x8] sm:$0xff] (!%p457_p3)  ;;  %v8155_v1 = vld [vmem:[%s10951_s1 + $0x18] sm:$0xff] (!%p457_p3)  }
   0xe   : > { %s10971_s18 = smov (!%p509_p4, %s7906_s18), 1  ;;  %v2385_v63 = vld [vmem:[%s10956_s6 + $0x10] sm:$0xff]  ;;  %v2386_v2 = vld [vmem:[%s10956_s6 + $0x18] sm:$0xff]  ;;  %v2387_v4 = vld [vmem:[%s10956_s6 + $0x20] sm:$0xff] }
   0xf   : > { %s7573_s26 = sshll.u32 %s10971_s18, 6  ;;  %v2388_v5 = vld [vmem:[%s10956_s6 + $0x28] sm:$0xff] }
  0x10   : > { %s8036_s16 = scalar_lea.vmem %s10950_s0, %s7573_s26  ;;  %s7762_s26 = smul.u32 40, %s10971_s18 }
  0x11   : > { %v545_v8 = vld [vmem:[%s8036_s16] sm:$0x77]  ;;  %v547_v9 = vld [vmem:[%s8036_s16 + $0x10] sm:$0x77]  ;;  %v546_v10 = vld [vmem:[%s8036_s16 + $0x8] sm:$0x77]  ;;  %631 = vperm.xlu0 %7790, %v605_v16   ;;  %636 = vperm.xlu1 %7791, %v606_v20  }
  0x12   : > { %v561_v11 = vcombine.high %v545_v8, %v545_v8  ;;  %v563_v12 = vcombine.high %v547_v9, %v547_v9  ;;  %v577_v13 = vpack.c.bf16 %v545_v8, %v545_v8  ;;  %v581_v14 = vpack.c.bf16 %v547_v9, %v547_v9  ;;  %v549_v21 = vld [vmem:[%s8036_s16 + $0x20] sm:$0x77]  ;;  %v8072_v36 = vld [vmem:[%s8036_s16 + $0x18] sm:$0x77]  ;;  %v8075_v37 = vld [vmem:[%s8036_s16 + $0x30] sm:$0x77]  ;;  %s522_s30 = scalar_lea.vmem %s10965_s15, %s7762_s26 }
  0x13   : > { %v562_v15 = vcombine.high %v546_v10, %v546_v10  ;;  %v579_v19 = vpack.c.bf16 %v546_v10, %v546_v10  ;;  %v565_v25 = vcombine.high %v549_v21, %v549_v21  ;;  %v585_v30 = vpack.c.bf16 %v549_v21, %v549_v21  ;;  %v552_v53 = vld [vmem:[%s8036_s16 + $0x38] sm:$0x77]  ;;  %v8161_v3 = vld [vmem:[%s8036_s16 + $0x28] sm:$0x77]  ;;  %v2389_v8 = vld [vmem:[%s10956_s6 + $0x30] sm:$0xff] }
  0x14   : > { %v578_v17 = vpack.c.bf16 %v561_v11, %v561_v11  ;;  %v582_v18 = vpack.c.bf16 %v563_v12, %v563_v12  ;;  %v687_v22 = vand.u32 %v8038_v6, %v577_v13  ;;  %v699_v23 = vand.u32 %v8038_v6, %v581_v14  ;;  %v2390_v9 = vld [vmem:[%s10956_s6 + $0x38] sm:$0xff]  ;;  %v3255_v13 = vld [vmem:[%s10958_s8] sm:$0xff]  ;;  %v3256_v14 = vld [vmem:[%s10958_s8 + $0x8] sm:$0xff] }
  0x15   : > { %v580_v24 = vpack.c.bf16 %v562_v15, %v562_v15  ;;  %v586_v31 = vpack.c.bf16 %v565_v25, %v565_v25  ;;  %v693_v34 = vand.u32 %v8038_v6, %v579_v19  ;;  %641 = vperm.xlu0 %7790, %v607_v29   ;;  %646 = vperm.xlu1 %7791, %v608_v33   ;;  %v3258_v19 = vld [vmem:[%s10958_s8 + $0x18] sm:$0xff]  ;;  %v3259_v20 = vld [vmem:[%s10958_s8 + $0x20] sm:$0xff]  ;;  %v3260_v21 = vld [vmem:[%s10958_s8 + $0x28] sm:$0xff] }
  0x16   : > { %v690_v26 = vand.u32 %v8038_v6, %v578_v17  ;;  %v702_v27 = vand.u32 %v8038_v6, %v582_v18  ;;  %v711_v39 = vand.u32 %v8038_v6, %v585_v30  ;;  %v564_v40 = vcombine.high %v8072_v36, %v8072_v36  ;;  %v3257_v18 = vld [vmem:[%s10958_s8 + $0x10] sm:$0xff]  ;;  %v3264_v25 = vld [vmem:[%s10958_s8 + $0x48] sm:$0xff]  ;;  %v3270_v33 = vld [vmem:[%s10958_s8 + $0x78] sm:$0xff] }
  0x17   : > { %v696_v28 = vand.u32 %v8038_v6, %v580_v24  ;;  %v714_v35 = vand.u32 %v8038_v6, %v586_v31  ;;  %v567_v41 = vcombine.high %v8075_v37, %v8075_v37  ;;  %v568_v56 = vcombine.high %v552_v53, %v552_v53  ;;  %v3263_v24 = vld [vmem:[%s10958_s8 + $0x40] sm:$0xff]  ;;  %v3268_v29 = vld [vmem:[%s10958_s8 + $0x68] sm:$0xff]  ;;  %v3269_v31 = vld [vmem:[%s10958_s8 + $0x70] sm:$0xff] }
  0x18   : > { %734 = vmatprep.subr.bf16.mxu1 %v690_v26  ;;  %880 = vmatprep.subr.bf16.mxu0 %v702_v27  ;;  %v584_v43 = vpack.c.bf16 %v564_v40, %v564_v40  ;;  %v591_v57 = vpack.c.bf16 %v552_v53, %v552_v53  ;;  %v566_v7 = vcombine.high %v8161_v3, %v8161_v3  ;;  %v3265_v26 = vld [vmem:[%s10958_s8 + $0x50] sm:$0xff]  ;;  %v3266_v27 = vld [vmem:[%s10958_s8 + $0x58] sm:$0xff] }
  0x19   : > { %735 = vmatpush1.bf16.msra.mxu1 %v687_v22  ;;  %881 = vmatpush1.bf16.msra.mxu0 %v699_v23  ;;  %v590_v44 = vpack.c.bf16 %v567_v41, %v567_v41  ;;  %v592_v58 = vpack.c.bf16 %v568_v56, %v568_v56  ;;  %v583_v10 = vpack.c.bf16 %v8072_v36, %v8072_v36  ;;  %v3261_v22 = vld [vmem:[%s10958_s8 + $0x30] sm:$0xff]  ;;  %v3262_v23 = vld [vmem:[%s10958_s8 + $0x38] sm:$0xff]  ;;  %v4720_v36 = vld [vmem:[%s10960_s10 + $0x8] sm:$0xff] }
  0x1a   : > { %807 = vmatprep.subr.bf16.mxu1 %v696_v28  ;;  %1026 = vmatprep.subr.bf16.mxu0 %v714_v35  ;;  %v708_v46 = vand.u32 %v8038_v6, %v584_v43  ;;  %v8132_v59 = vand.u32 %v8038_v6, %v591_v57  ;;  %v589_v11 = vpack.c.bf16 %v8075_v37, %v8075_v37  ;;  %v3267_v28 = vld [vmem:[%s10958_s8 + $0x60] sm:$0xff]  ;;  %v4722_v37 = vld [vmem:[%s10960_s10 + $0x18] sm:$0xff]  ;;  %v4725_v40 = vld [vmem:[%s10960_s10 + $0x30] sm:$0xff] }
  0x1b   : > { %1528 = vperm.xlu0 %7790, %v1518_v38   ;;  %1533 = vperm.xlu1 %7791, %v1519_v42   ;;  %v726_v47 = vand.u32 %v8038_v6, %v590_v44  ;;  %v8141_v62 = vand.u32 %v8038_v6, %v592_v58  ;;  %v588_v12 = vpack.c.bf16 %v566_v7, %v566_v7  ;;  %v4719_v35 = vld [vmem:[%s10960_s10] sm:$0xff]  ;;  %v4726_v41 = vld [vmem:[%s10960_s10 + $0x38] sm:$0xff]  ;;  %v4728_v43 = vld [vmem:[%s10960_s10 + $0x48] sm:$0xff] }
  0x1c   : > { %7343 = vmatmul.mubr.msk.bf16.vlgmr.msra.gmra.mrb[0].mxu1 %vm669_vm2, %v8064_v32  ;;  %7351 = vmatmul.mubr.msk.bf16.vlgmr.msra.gmra.mrb[0].mxu0 %vm669_vm2, %v8064_v32  ;;  %v705_v15 = vand.u32 %v8038_v6, %v583_v10  ;;  %v723_v16 = vand.u32 %v8038_v6, %v589_v11  ;;  %v587_v30 = vpack.c.bf16 %v8161_v3, %v8161_v3  ;;  %v4723_v38 = vld [vmem:[%s10960_s10 + $0x20] sm:$0xff]  ;;  %v4729_v44 = vld [vmem:[%s10960_s10 + $0x50] sm:$0xff] }
  0x1d   : > { %776 = vmatprep.mubr.bf16.mxu1 %v7916_v0  ;;  %808 = vmatpush1.bf16.msra.mxu1 %v693_v34  ;;  %v720_v17 = vand.u32 %v8038_v6, %v588_v12  ;;  %v4727_v42 = vld [vmem:[%s10960_s10 + $0x40] sm:$0xff] }
  0x1e   : > { %922 = vmatprep.mubr.bf16.mxu0 %v7916_v0  ;;  %1027 = vmatpush1.bf16.msra.mxu0 %v711_v39  ;;  %v717_v34 = vand.u32 %v8038_v6, %v587_v30  ;;  %v4721_v6 = vld [vmem:[%s10960_s10 + $0x10] sm:$0xff]  ;;  %v4724_v39 = vld [vmem:[%s10960_s10 + $0x28] sm:$0xff] }
  0x1f   : > { %953 = vmatprep.subr.bf16.mxu1 %v708_v46  ;;  %1172 = vmatprep.subr.bf16.mxu0 %v726_v47  ;;  %v4731_v46 = vld [vmem:[%s10960_s10 + $0x60] sm:$0xff]  ;;  %v4732_v47 = vld [vmem:[%s10960_s10 + $0x68] sm:$0xff] }
  0x20   : > { %1538 = vperm.xlu0 %7790, %v1520_v45   ;;  %1543 = vperm.xlu1 %7791, %v1521_v49   ;;  %v4730_v45 = vld [vmem:[%s10960_s10 + $0x58] sm:$0xff]  ;;  %v4733_v49 = vld [vmem:[%s10960_s10 + $0x70] sm:$0xff] }
  0x24   : > { %7344 = vmatmul.mubr.msk.bf16.gmra.mrb[4].mxu1 %vm669_vm2, %v8102_v48  ;;  %7352 = vmatmul.mubr.msk.bf16.gmra.mrb[4].mxu0 %vm669_vm2, %v8102_v48 }
  0x25   : > { %786 = vmatprep.mubr.bf16.mxu1 %v7916_v0  ;;  %932 = vmatprep.mubr.bf16.mxu0 %v7916_v0 }
  0x26   : > { %1548 = vperm.xlu0 %7790, %v1522_v50   ;;  %1553 = vperm.xlu1 %7791, %v1523_v51   ;;  %v4734_v50 = vld [vmem:[%s10960_s10 + $0x78] sm:$0xff] }
  0x2a   : > { %1558 = vperm.xlu0 %7790, %v1524_v52   ;;  %1563 = vperm.xlu1 %7791, %v1525_v55  }
  0x2c   : > { %7345 = vmatmul.mubr.msk.bf16.gmra.mrb[8].mxu1 %vm669_vm2, %v8126_v54  ;;  %7353 = vmatmul.mubr.msk.bf16.gmra.mrb[8].mxu0 %vm669_vm2, %v8126_v54 }
  0x2d   : > { %796 = vmatprep.mubr.bf16.mxu1 %v7916_v0  ;;  %942 = vmatprep.mubr.bf16.mxu0 %v7916_v0 }
  0x2e   : > { %2393 = vperm.xlu0 %7790, %v2383_v60   ;;  %2398 = vperm.xlu1 %7791, %v2384_v61  }
  0x32   : > { %2403 = vperm.xlu0 %7790, %v2385_v63   ;;  %2408 = vperm.xlu1 %7791, %v2386_v2  }
  0x34   : > { %7346 = vmatmul.mubr.msk.bf16.gmra.mrb[12].mxu1 %vm669_vm2, %v8155_v1  ;;  %7354 = vmatmul.mubr.msk.bf16.gmra.mrb[12].mxu0 %vm669_vm2, %v8155_v1 }
  0x35   : > { %839 = vmatprep.mubr.bf16.mxu1 %v7916_v0  ;;  %1058 = vmatprep.mubr.bf16.mxu0 %v7916_v0 }
  0x36   : > { %2413 = vperm.xlu0 %7790, %v2387_v4   ;;  %2418 = vperm.xlu1 %7791, %v2388_v5  }
  0x3a   : > { %2423 = vperm.xlu0 %7790, %v2389_v8   ;;  %2428 = vperm.xlu1 %7791, %v2390_v9  }
  0x3c   : > { %7347 = vmatmul.mubr.msk.bf16.vlgmr.msra.gmra.mrb[16].mxu1 %vm669_vm2, %v8064_v32  ;;  %7359 = vmatmul.mubr.msk.bf16.vlgmr.msra.gmra.mrb[16].mxu0 %vm669_vm2, %v8064_v32 }
  0x3d   : > { %849 = vmatprep.mubr.bf16.mxu1 %v7916_v0  ;;  %1068 = vmatprep.mubr.bf16.mxu0 %v7916_v0 }
  0x3e   : > { %3273 = vperm.xlu0 %7790, %v3255_v13   ;;  %954 = vmatpush1.bf16.msra.mxu1 %v705_v15 }
  0x3f   : > { %3278 = vperm.xlu1 %7791, %v3256_v14   ;;  %1173 = vmatpush1.bf16.msra.mxu0 %v723_v16 }
  0x40   : > { %1099 = vmatprep.subr.bf16.mxu1 %v720_v17 }
  0x42   : > { %3283 = vperm.xlu0 %7790, %v3257_v18  }
  0x43   : > { %3288 = vperm.xlu1 %7791, %v3258_v19  }
  0x44   : > { %7348 = vmatmul.mubr.msk.bf16.gmra.mrb[20].mxu1 %vm669_vm2, %v8102_v48  ;;  %7360 = vmatmul.mubr.msk.bf16.gmra.mrb[20].mxu0 %vm669_vm2, %v8102_v48 }
  0x45   : > { %859 = vmatprep.mubr.bf16.mxu1 %v7916_v0  ;;  %1078 = vmatprep.mubr.bf16.mxu0 %v7916_v0 }
  0x46   : > { %3293 = vperm.xlu0 %7790, %v3259_v20  }
  0x47   : > { %3298 = vperm.xlu1 %7791, %v3260_v21  }
  0x4a   : > { %3303 = vperm.xlu0 %7790, %v3261_v22  }
  0x4b   : > { %3308 = vperm.xlu1 %7791, %v3262_v23  }
  0x4c   : > { %7349 = vmatmul.mubr.msk.bf16.gmra.mrb[24].mxu1 %vm669_vm2, %v8126_v54  ;;  %7361 = vmatmul.mubr.msk.bf16.gmra.mrb[24].mxu0 %vm669_vm2, %v8126_v54 }
  0x4d   : > { %869 = vmatprep.mubr.bf16.mxu1 %v7916_v0  ;;  %1088 = vmatprep.mubr.bf16.mxu0 %v7916_v0 }
  0x4e   : > { %3313 = vperm.xlu0 %7790, %v3263_v24  }
  0x4f   : > { %3318 = vperm.xlu1 %7791, %v3264_v25  }
  0x52   : > { %3323 = vperm.xlu0 %7790, %v3265_v26  }
  0x53   : > { %3328 = vperm.xlu1 %7791, %v3266_v27  }
  0x54   : > { %7350 = vmatmul.mubr.msk.bf16.gmra.mrb[28].mxu1 %vm669_vm2, %v8155_v1  ;;  %7362 = vmatmul.mubr.msk.bf16.gmra.mrb[28].mxu0 %vm669_vm2, %v8155_v1 }
  0x55   : > { %985 = vmatprep.mubr.bf16.mxu1 %v7916_v0  ;;  %1204 = vmatprep.mubr.bf16.mxu0 %v7916_v0 }
  0x56   : > { %3333 = vperm.xlu0 %7790, %v3267_v28  }
  0x57   : > { %3338 = vperm.xlu1 %7791, %v3268_v29  }
  0x5a   : > { %3343 = vperm.xlu0 %7790, %v3269_v31  }
  0x5b   : > { %3348 = vperm.xlu1 %7791, %v3270_v33  }
  0x5c   : > { %7355 = vmatmul.mubr.msk.bf16.vlgmr.msra.gmra.mrb[32].mxu1 %vm669_vm2, %v8064_v32  ;;  %7367 = vmatmul.mubr.msk.bf16.vlgmr.msra.gmra.mrb[32].mxu0 %vm669_vm2, %v8064_v32 }
  0x5d   : > { %995 = vmatprep.mubr.bf16.mxu1 %v7916_v0  ;;  %1214 = vmatprep.mubr.bf16.mxu0 %v7916_v0 }
  0x5e   : > { %4737 = vperm.xlu0 %7790, %v4719_v35   ;;  %1100 = vmatpush1.bf16.msra.mxu1 %v717_v34 }
  0x5f   : > { %4742 = vperm.xlu1 %7791, %v4720_v36   ;;  %1245 = vmatprep.subr.bf16.mxu1 %v8141_v62 }
  0x62   : > { %4747 = vperm.xlu0 %7790, %v4721_v6  }
  0x63   : > { %4752 = vperm.xlu1 %7791, %v4722_v37  }
  0x64   : > { %7356 = vmatmul.mubr.msk.bf16.gmra.mrb[36].mxu1 %vm669_vm2, %v8102_v48  ;;  %7368 = vmatmul.mubr.msk.bf16.gmra.mrb[36].mxu0 %vm669_vm2, %v8102_v48 }
  0x65   : > { %1005 = vmatprep.mubr.bf16.mxu1 %v7916_v0  ;;  %1224 = vmatprep.mubr.bf16.mxu0 %v7916_v0 }
  0x66   : > { %4757 = vperm.xlu0 %7790, %v4723_v38  }
  0x67   : > { %4762 = vperm.xlu1 %7791, %v4724_v39  }
  0x6a   : > { %4767 = vperm.xlu0 %7790, %v4725_v40  }
  0x6b   : > { %4772 = vperm.xlu1 %7791, %v4726_v41  }
  0x6c   : > { %7357 = vmatmul.mubr.msk.bf16.gmra.mrb[40].mxu1 %vm669_vm2, %v8126_v54  ;;  %7369 = vmatmul.mubr.msk.bf16.gmra.mrb[40].mxu0 %vm669_vm2, %v8126_v54 }
  0x6d   : > { %1015 = vmatprep.mubr.bf16.mxu1 %v7916_v0  ;;  %1234 = vmatprep.mubr.bf16.mxu0 %v7916_v0 }
  0x6e   : > { %4777 = vperm.xlu0 %7790, %v4727_v42  }
  0x6f   : > { %4782 = vperm.xlu1 %7791, %v4728_v43  }
  0x72   : > { %4787 = vperm.xlu0 %7790, %v4729_v44  }
  0x73   : > { %4792 = vperm.xlu1 %7791, %v4730_v45  }
  0x74   : > { %7358 = vmatmul.mubr.msk.bf16.gmra.mrb[44].mxu1 %vm669_vm2, %v8155_v1  ;;  %7370 = vmatmul.mubr.msk.bf16.gmra.mrb[44].mxu0 %vm669_vm2, %v8155_v1 }
  0x75   : > { %1131 = vmatprep.mubr.bf16.mxu1 %v7916_v0  ;;  %1631 = vmatprep.mubr.bf16.mxu0 %v7916_v0 }
  0x76   : > { %4797 = vperm.xlu0 %7790, %v4731_v46  }
  0x77   : > { %4802 = vperm.xlu1 %7791, %v4732_v47  }
  0x7a   : > { %4807 = vperm.xlu0 %7790, %v4733_v49  }
  0x7b   : > { %4812 = vperm.xlu1 %7791, %v4734_v50  }
  0x7c   : > { %7363 = vmatmul.mubr.msk.bf16.vlgmr.msra.gmra.mrb[48].mxu1 %vm669_vm2, %v8064_v32 }
  0x7d   : > { %1141 = vmatprep.mubr.bf16.mxu1 %v7916_v0  ;;  %1246 = vmatpush1.bf16.msra.mxu1 %v8132_v59 }
  0x84   : > { %7364 = vmatmul.mubr.msk.bf16.gmra.mrb[52].mxu1 %vm669_vm2, %v8102_v48 }
  0x85   : > { %1151 = vmatprep.mubr.bf16.mxu1 %v7916_v0 }
  0x88   : > { %v8363_v51 = vpop.permute.xlu0 %611  ;;  %v8367_v52 = vpop.permute.xlu1 %621 }
  0x8c   : > { %7365 = vmatmul.mubr.msk.bf16.gmra.mrb[56].mxu1 %vm669_vm2, %v8126_v54  ;;  %v8377_v14 = vpop.permute.xlu1 %626 }
  0x8d   : > { %1161 = vmatprep.mubr.bf16.mxu1 %v7916_v0 }
  0x90   : > { %v8393_v44 = vpop.permute.xlu1 %636 }
  0x94   : > { %7366 = vmatmul.mubr.msk.bf16.gmra.mrb[60].mxu1 %vm669_vm2, %v8155_v1 }
  0x95   : > { %1277 = vmatprep.mubr.bf16.mxu1 %v7916_v0 }
  0x9c   : > { %7371 = vmatmul.mubr.msk.bf16.vlgmr.msra.gmra.mrb[64].mxu1 %vm669_vm2, %v8064_v32  ;;  %v8365_v32 = vpop.permute.xlu0 %616 }
  0x9d   : > { %1287 = vmatprep.mubr.bf16.mxu1 %v7916_v0 }
  0xa0   : > { %v8391_v43 = vpop.permute.xlu0 %631 }
  0xa4   : > { %7372 = vmatmul.mubr.msk.bf16.gmra.mrb[68].mxu1 %vm669_vm2, %v8102_v48 }
  0xa5   : > { %1297 = vmatprep.mubr.bf16.mxu1 %v7916_v0 }
  0xac   : > { %7373 = vmatmul.mubr.msk.bf16.gmra.mrb[72].mxu1 %vm669_vm2, %v8126_v54 }
  0xad   : > { %1307 = vmatprep.mubr.bf16.mxu1 %v7916_v0 }
  0xb4   : > { %7374 = vmatmul.mubr.msk.bf16.gmra.mrb[76].mxu1 %vm669_vm2, %v8155_v1 }
  0xb5   : > { %1704 = vmatprep.mubr.bf16.mxu1 %v7916_v0 }
  0xef   : > { %v768_v53 = vpop.f32.mrb[0].mxu1  ;;  %v914_v48 = vpop.f32.mrb[0].mxu0 }
  0xf0   : > { %v769_v55 = vadd.f32 %v768_v53, %v8363_v51  ;;  %v770_v56 = vpop.f32.mrb[1].mxu1  ;;  %v915_v54 = vadd.f32 %v914_v48, %v8363_v51  ;;  %v916_v57 = vpop.f32.mrb[1].mxu0 }
  0xf1   : > { %v771_v58 = vadd.f32 %v770_v56, %v8363_v51  ;;  %v772_v59 = vpop.f32.mrb[2].mxu1  ;;  %v917_v60 = vadd.f32 %v916_v57, %v8363_v51  ;;  %v918_v61 = vpop.f32.mrb[2].mxu0 }
  0xf2   : > { %v773_v62 = vadd.f32 %v772_v59, %v8365_v32  ;;  %v774_v63 = vpop.f32.mrb[3].mxu1  ;;  %v1322_v1 = vmax.f32 %v915_v54, 0.0  ;;  %v919_v2 = vadd.f32 %v918_v61, %v8365_v32  ;;  %v920_v3 = vpop.f32.mrb[3].mxu0  ;;  %v1318_v8 = vmax.f32 %v769_v55, 0.0 }
  0xf3   : > { %v775_v4 = vadd.f32 %v774_v63, %v8365_v32  ;;  %v1323_v5 = vmax.f32 %v917_v60, 0.0  ;;  %v921_v7 = vadd.f32 %v920_v3, %v8365_v32  ;;  %v1319_v11 = vmax.f32 %v771_v58, 0.0 }
  0xf4   : > { %v1334_v9 = vmax.f32 %v773_v62, 0.0  ;;  %v1338_v10 = vmax.f32 %v919_v2, 0.0 }
  0xf5   : > { %v1335_v12 = vmax.f32 %v775_v4, 0.0  ;;  %v1339_v13 = vmax.f32 %v921_v7, 0.0 }
  0xf6   : > { %v1446_v15 = vpack.c.bf16 %v1334_v9, %v1318_v8  ;;  %v8379_v16 = vpack.c.bf16 %v1338_v10, %v1322_v1 }
  0xf7   : > { %v778_v17 = vpop.f32.mrb[4].mxu1  ;;  %v1447_v18 = vpack.c.bf16 %v1335_v12, %v1319_v11  ;;  %v924_v19 = vpop.f32.mrb[4].mxu0  ;;  %v8381_v20 = vpack.c.bf16 %v1339_v13, %v1323_v5 }
  0xf8   : > { %v779_v21 = vadd.f32 %v778_v17, %v8367_v52  ;;  %v780_v22 = vpop.f32.mrb[5].mxu1  ;;  %v925_v23 = vadd.f32 %v924_v19, %v8367_v52  ;;  %v926_v24 = vpop.f32.mrb[5].mxu0 }
  0xf9   : > { %v781_v25 = vadd.f32 %v780_v22, %v8367_v52  ;;  %v782_v26 = vpop.f32.mrb[6].mxu1  ;;  %1599 = vmatprep.subr.bf16.mxu0 %v1447_v18  ;;  %v927_v27 = vadd.f32 %v926_v24, %v8367_v52  ;;  %v928_v28 = vpop.f32.mrb[6].mxu0 }
  0xfa   : > { %v783_v29 = vadd.f32 %v782_v26, %v8377_v14  ;;  %v784_v30 = vpop.f32.mrb[7].mxu1  ;;  %1600 = vmatpush1.bf16.msra.mxu0 %v1446_v15  ;;  %v1354_v31 = vmax.f32 %v925_v23, 0.0  ;;  %v929_v33 = vadd.f32 %v928_v28, %v8377_v14  ;;  %v930_v34 = vpop.f32.mrb[7].mxu0  ;;  %v1350_v37 = vmax.f32 %v779_v21, 0.0 }
  0xfb   : > { %v785_v35 = vadd.f32 %v784_v30, %v8377_v14  ;;  %v1355_v36 = vmax.f32 %v927_v27, 0.0  ;;  %v931_v6 = vadd.f32 %v930_v34, %v8377_v14  ;;  %v1351_v40 = vmax.f32 %v781_v25, 0.0  ;;  %v8407_v13 = vpop.permute.xlu0 %641  ;;  %v8409_v15 = vpop.permute.xlu1 %646 }
  0xfc   : > { %v1366_v38 = vmax.f32 %v783_v29, 0.0  ;;  %v1370_v39 = vmax.f32 %v929_v33, 0.0 }
  0xfd   : > { %v1367_v41 = vmax.f32 %v785_v35, 0.0  ;;  %v1371_v42 = vmax.f32 %v931_v6, 0.0 }
  0xfe   : > { %v1462_v45 = vpack.c.bf16 %v1366_v38, %v1350_v37  ;;  %v8395_v46 = vpack.c.bf16 %v1370_v39, %v1354_v31 }
  0xff   : > { %v788_v47 = vpop.f32.mrb[8].mxu1  ;;  %v1463_v49 = vpack.c.bf16 %v1367_v41, %v1351_v40  ;;  %v934_v50 = vpop.f32.mrb[8].mxu0  ;;  %v8397_v53 = vpack.c.bf16 %v1371_v42, %v1355_v36 }
 0x100   : > { %v789_v48 = vadd.f32 %v788_v47, %v8391_v43  ;;  %v790_v55 = vpop.f32.mrb[9].mxu1  ;;  %v935_v56 = vadd.f32 %v934_v50, %v8391_v43  ;;  %v936_v54 = vpop.f32.mrb[9].mxu0 }
 0x101   : > { %v791_v57 = vadd.f32 %v790_v55, %v8391_v43  ;;  %v792_v58 = vpop.f32.mrb[10].mxu1  ;;  %1601 = vmatprep.subr.bf16.mxu0 %v1463_v49  ;;  %v937_v59 = vadd.f32 %v936_v54, %v8391_v43  ;;  %v938_v60 = vpop.f32.mrb[10].mxu0 }
 0x102   : > { %v793_v61 = vadd.f32 %v792_v58, %v8393_v44  ;;  %v794_v62 = vpop.f32.mrb[11].mxu1  ;;  %1602 = vmatpush1.bf16.msra.mxu0 %v1462_v45  ;;  %v1386_v63 = vmax.f32 %v935_v56, 0.0  ;;  %v939_v1 = vadd.f32 %v938_v60, %v8393_v44  ;;  %v940_v2 = vpop.f32.mrb[11].mxu0  ;;  %v1382_v7 = vmax.f32 %v789_v48, 0.0 }
 0x103   : > { %v795_v3 = vadd.f32 %v794_v62, %v8393_v44  ;;  %v1387_v4 = vmax.f32 %v937_v59, 0.0  ;;  %v941_v5 = vadd.f32 %v940_v2, %v8393_v44  ;;  %v1383_v10 = vmax.f32 %v791_v57, 0.0 }
 0x104   : > { %v1398_v8 = vmax.f32 %v793_v61, 0.0  ;;  %v1402_v9 = vmax.f32 %v939_v1, 0.0 }
 0x105   : > { %v1399_v11 = vmax.f32 %v795_v3, 0.0  ;;  %v1403_v12 = vmax.f32 %v941_v5, 0.0  ;;  %v8434_v3 = vld [vmem:[%s10953_s3] sm:$0xff]  }
 0x106   : > { %v1478_v17 = vpack.c.bf16 %v1398_v8, %v1382_v7  ;;  %v8411_v18 = vpack.c.bf16 %v1402_v9, %v1386_v63 }
 0x107   : > { %v798_v19 = vpop.f32.mrb[12].mxu1  ;;  %v944_v21 = vpop.f32.mrb[12].mxu0  ;;  %v1479_v22 = vpack.c.bf16 %v1399_v11, %v1383_v10  ;;  %v8413_v23 = vpack.c.bf16 %v1403_v12, %v1387_v4 }
 0x108   : > { %v799_v24 = vadd.f32 %v798_v19, %v8407_v13  ;;  %v800_v25 = vpop.f32.mrb[13].mxu1  ;;  %v945_v26 = vadd.f32 %v944_v21, %v8407_v13  ;;  %v946_v27 = vpop.f32.mrb[13].mxu0 }
 0x109   : > { %v801_v28 = vadd.f32 %v800_v25, %v8407_v13  ;;  %v802_v29 = vpop.f32.mrb[14].mxu1  ;;  %1603 = vmatprep.subr.bf16.mxu0 %v1479_v22  ;;  %v947_v30 = vadd.f32 %v946_v27, %v8407_v13  ;;  %v948_v31 = vpop.f32.mrb[14].mxu0 }
 0x10a   : > { %v803_v33 = vadd.f32 %v802_v29, %v8409_v15  ;;  %v1418_v34 = vmax.f32 %v945_v26, 0.0  ;;  %v804_v35 = vpop.f32.mrb[15].mxu1  ;;  %1604 = vmatpush1.bf16.msra.mxu0 %v1478_v17  ;;  %v949_v36 = vadd.f32 %v948_v31, %v8409_v15  ;;  %v950_v6 = vpop.f32.mrb[15].mxu0  ;;  %v1414_v40 = vmax.f32 %v799_v24, 0.0 }
 0x10b   : > { %v805_v37 = vadd.f32 %v804_v35, %v8409_v15  ;;  %v1419_v38 = vmax.f32 %v947_v30, 0.0  ;;  %v951_v39 = vadd.f32 %v950_v6, %v8409_v15  ;;  %v1415_v45 = vmax.f32 %v801_v28, 0.0 }
 0x10c   : > { %v1430_v41 = vmax.f32 %v803_v33, 0.0  ;;  %v1434_v42 = vmax.f32 %v949_v36, 0.0 }
 0x10d   : > { %v1431_v47 = vmax.f32 %v805_v37, 0.0  ;;  %v1435_v49 = vmax.f32 %v951_v39, 0.0 }
 0x10e   : > { %v1494_v50 = vpack.c.bf16 %v1430_v41, %v1414_v40  ;;  %v8423_v48 = vpack.c.bf16 %v1434_v42, %v1418_v34 }
 0x10f   : > { %v841_v55 = vpop.f32.mrb[16].mxu1  ;;  %v1060_v56 = vpop.f32.mrb[16].mxu0  ;;  %v1495_v54 = vpack.c.bf16 %v1431_v47, %v1415_v45  ;;  %v8425_v57 = vpack.c.bf16 %v1435_v49, %v1419_v38  ;;  %v8455_v38 = vld [vmem:[%s10953_s3 + $0x8] sm:$0xff]  }
 0x110   : > { %v842_v58 = vadd.f32 %v841_v55, %v8363_v51  ;;  %v1061_v59 = vadd.f32 %v1060_v56, %v8363_v51  ;;  %v843_v60 = vpop.f32.mrb[17].mxu1  ;;  %v1062_v61 = vpop.f32.mrb[17].mxu0 }
 0x111   : > { %v844_v62 = vadd.f32 %v843_v60, %v8363_v51  ;;  %v1063_v63 = vadd.f32 %v1062_v61, %v8363_v51  ;;  %v845_v1 = vpop.f32.mrb[18].mxu1  ;;  %v1064_v2 = vpop.f32.mrb[18].mxu0  ;;  %1605 = vmatprep.subr.bf16.mxu0 %v1495_v54 }
 0x112   : > { %v1326_v4 = vmax.f32 %v1061_v59, 0.0  ;;  %v846_v5 = vadd.f32 %v845_v1, %v8365_v32  ;;  %v1065_v7 = vadd.f32 %v1064_v2, %v8365_v32  ;;  %v847_v8 = vpop.f32.mrb[19].mxu1  ;;  %v1066_v9 = vpop.f32.mrb[19].mxu0  ;;  %1606 = vmatpush1.bf16.msra.mxu0 %v1494_v50  ;;  %v1320_v17 = vmax.f32 %v842_v58, 0.0 }
 0x113   : > { %v1327_v10 = vmax.f32 %v1063_v63, 0.0  ;;  %v848_v11 = vadd.f32 %v847_v8, %v8365_v32  ;;  %v1067_v12 = vadd.f32 %v1066_v9, %v8365_v32  ;;  %1745 = vmatprep.subr.bf16.mxu0 %v8381_v20  ;;  %v1321_v22 = vmax.f32 %v844_v62, 0.0 }
 0x114   : > { %v1336_v19 = vmax.f32 %v846_v5, 0.0  ;;  %v1342_v21 = vmax.f32 %v1065_v7, 0.0 }
 0x115   : > { %v1337_v24 = vmax.f32 %v848_v11, 0.0  ;;  %v1343_v25 = vmax.f32 %v1067_v12, 0.0  ;;  %7379 = vmatmul.mubr.msk.bf16.vlgmr.msra.gmra.mrb[48].mxu0 %vm1586_vm3, %v8434_v3 }
 0x116   : > { %v1448_v26 = vpack.c.bf16 %v1336_v19, %v1320_v17  ;;  %v8443_v27 = vpack.c.bf16 %v1342_v21, %v1326_v4  ;;  %1746 = vmatpush1.bf16.msra.mxu0 %v8379_v16  ;;  %1641 = vmatprep.mubr.bf16.mxu0 %v7916_v0 }
 0x117   : > { %v851_v28 = vpop.f32.mrb[20].mxu1  ;;  %v1070_v29 = vpop.f32.mrb[20].mxu0  ;;  %v1449_v30 = vpack.c.bf16 %v1337_v24, %v1321_v22  ;;  %1747 = vmatprep.subr.bf16.mxu0 %v8397_v53  ;;  %v1455_v20 = vpack.c.bf16 %v1343_v25, %v1327_v10 }
 0x118   : > { %v852_v31 = vadd.f32 %v851_v28, %v8367_v52  ;;  %v1071_v33 = vadd.f32 %v1070_v29, %v8367_v52  ;;  %v853_v34 = vpop.f32.mrb[21].mxu1  ;;  %v1072_v35 = vpop.f32.mrb[21].mxu0 }
 0x119   : > { %v854_v36 = vadd.f32 %v853_v34, %v8367_v52  ;;  %v1073_v6 = vadd.f32 %v1072_v35, %v8367_v52  ;;  %v855_v37 = vpop.f32.mrb[22].mxu1  ;;  %v1074_v16 = vpop.f32.mrb[22].mxu0  ;;  %1672 = vmatprep.subr.bf16.mxu1 %v1449_v30 }
 0x11a   : > { %v1358_v53 = vmax.f32 %v1071_v33, 0.0  ;;  %v856_v39 = vadd.f32 %v855_v37, %v8377_v14  ;;  %v1075_v40 = vadd.f32 %v1074_v16, %v8377_v14  ;;  %v857_v41 = vpop.f32.mrb[23].mxu1  ;;  %v1076_v42 = vpop.f32.mrb[23].mxu0  ;;  %1673 = vmatpush1.bf16.msra.mxu1 %v1448_v26  ;;  %1748 = vmatpush1.bf16.msra.mxu0 %v8395_v46  ;;  %v1352_v50 = vmax.f32 %v852_v31, 0.0 }
 0x11b   : > { %v1359_v45 = vmax.f32 %v1073_v6, 0.0  ;;  %v858_v47 = vadd.f32 %v857_v41, %v8377_v14  ;;  %v1077_v49 = vadd.f32 %v1076_v42, %v8377_v14  ;;  %1749 = vmatprep.subr.bf16.mxu0 %v8413_v23  ;;  %v1353_v54 = vmax.f32 %v854_v36, 0.0 }
 0x11c   : > { %v1368_v55 = vmax.f32 %v856_v39, 0.0  ;;  %v1374_v56 = vmax.f32 %v1075_v40, 0.0 }
 0x11d   : > { %v1369_v58 = vmax.f32 %v858_v47, 0.0  ;;  %v1375_v59 = vmax.f32 %v1077_v49, 0.0  ;;  %7380 = vmatmul.mubr.msk.bf16.gmra.mrb[52].mxu0 %vm1586_vm3, %v8455_v38 }
 0x11e   : > { %v1464_v60 = vpack.c.bf16 %v1368_v55, %v1352_v50  ;;  %v8465_v61 = vpack.c.bf16 %v1374_v56, %v1358_v53  ;;  %1750 = vmatpush1.bf16.msra.mxu0 %v8411_v18  ;;  %1651 = vmatprep.mubr.bf16.mxu0 %v7916_v0 }
 0x11f   : > { %v861_v46 = vpop.f32.mrb[24].mxu1  ;;  %v1080_v62 = vpop.f32.mrb[24].mxu0  ;;  %1751 = vmatprep.subr.bf16.mxu0 %v8425_v57  ;;  %v1465_v23 = vpack.c.bf16 %v1369_v58, %v1353_v54  ;;  %v8470_v63 = vpack.c.bf16 %v1375_v59, %v1359_v45  ;;  %v8479_v57 = vld [vmem:[%s10953_s3 + $0x10] sm:$0xff]   ;;  %v8500_v45 = vld [vmem:[%s10953_s3 + $0x18] sm:$0xff]  }
 0x120   : > { %v862_v1 = vadd.f32 %v861_v46, %v8391_v43  ;;  %v1081_v2 = vadd.f32 %v1080_v62, %v8391_v43  ;;  %v863_v4 = vpop.f32.mrb[25].mxu1  ;;  %v1082_v5 = vpop.f32.mrb[25].mxu0 }
 0x121   : > { %v864_v7 = vadd.f32 %v863_v4, %v8391_v43  ;;  %v1083_v8 = vadd.f32 %v1082_v5, %v8391_v43  ;;  %v865_v18 = vpop.f32.mrb[26].mxu1  ;;  %v1084_v9 = vpop.f32.mrb[26].mxu0  ;;  %1674 = vmatprep.subr.bf16.mxu1 %v1465_v23 }
 0x122   : > { %v866_v10 = vadd.f32 %v865_v18, %v8393_v44  ;;  %v1085_v11 = vadd.f32 %v1084_v9, %v8393_v44  ;;  %v867_v12 = vpop.f32.mrb[27].mxu1  ;;  %v1086_v17 = vpop.f32.mrb[27].mxu0  ;;  %1675 = vmatpush1.bf16.msra.mxu1 %v1464_v60  ;;  %1752 = vmatpush1.bf16.msra.mxu0 %v8423_v48  ;;  %v1384_v22 = vmax.f32 %v862_v1, 0.0  ;;  %v1390_v24 = vmax.f32 %v1081_v2, 0.0 }
 0x123   : > { %v868_v19 = vadd.f32 %v867_v12, %v8393_v44  ;;  %v1087_v21 = vadd.f32 %v1086_v17, %v8393_v44  ;;  %1891 = vmatprep.subr.bf16.mxu0 %v1455_v20  ;;  %v1385_v28 = vmax.f32 %v864_v7, 0.0  ;;  %v1391_v29 = vmax.f32 %v1083_v8, 0.0 }
 0x124   : > { %v1400_v25 = vmax.f32 %v866_v10, 0.0  ;;  %v1406_v26 = vmax.f32 %v1085_v11, 0.0 }
 0x125   : > { %v1401_v30 = vmax.f32 %v868_v19, 0.0  ;;  %v1407_v31 = vmax.f32 %v1087_v21, 0.0  ;;  %7381 = vmatmul.mubr.msk.bf16.gmra.mrb[56].mxu0 %vm1586_vm3, %v8479_v57 }
 0x126   : > { %v1480_v33 = vpack.c.bf16 %v1400_v25, %v1384_v22  ;;  %v8488_v34 = vpack.c.bf16 %v1406_v26, %v1390_v24  ;;  %1661 = vmatprep.mubr.bf16.mxu0 %v7916_v0 }
 0x127   : > { %v871_v48 = vpop.f32.mrb[28].mxu1  ;;  %v1090_v35 = vpop.f32.mrb[28].mxu0  ;;  %v1481_v36 = vpack.c.bf16 %v1401_v30, %v1385_v28  ;;  %v8491_v20 = vpack.c.bf16 %v1407_v31, %v1391_v29 }
 0x128   : > { %v872_v6 = vadd.f32 %v871_v48, %v8407_v13  ;;  %v1091_v37 = vadd.f32 %v1090_v35, %v8407_v13  ;;  %v873_v16 = vpop.f32.mrb[29].mxu1  ;;  %v1092_v53 = vpop.f32.mrb[29].mxu0 }
 0x129   : > { %v874_v39 = vadd.f32 %v873_v16, %v8407_v13  ;;  %v1093_v40 = vadd.f32 %v1092_v53, %v8407_v13  ;;  %v875_v41 = vpop.f32.mrb[30].mxu1  ;;  %v1094_v42 = vpop.f32.mrb[30].mxu0  ;;  %1676 = vmatprep.subr.bf16.mxu1 %v1481_v36 }
 0x12a   : > { %v876_v47 = vadd.f32 %v875_v41, %v8409_v15  ;;  %v1095_v49 = vadd.f32 %v1094_v42, %v8409_v15  ;;  %v877_v50 = vpop.f32.mrb[31].mxu1  ;;  %v1096_v55 = vpop.f32.mrb[31].mxu0  ;;  %1677 = vmatpush1.bf16.msra.mxu1 %v1480_v33  ;;  %v1416_v58 = vmax.f32 %v872_v6, 0.0  ;;  %v1422_v59 = vmax.f32 %v1091_v37, 0.0 }
 0x12b   : > { %v878_v56 = vadd.f32 %v877_v50, %v8409_v15  ;;  %v1097_v54 = vadd.f32 %v1096_v55, %v8409_v15  ;;  %v1417_v62 = vmax.f32 %v874_v39, 0.0  ;;  %v1423_v23 = vmax.f32 %v1093_v40, 0.0 }
 0x12c   : > { %v1432_v60 = vmax.f32 %v876_v47, 0.0  ;;  %v1438_v46 = vmax.f32 %v1095_v49, 0.0 }
 0x12d   : > { %v1433_v1 = vmax.f32 %v878_v56, 0.0  ;;  %v1439_v2 = vmax.f32 %v1097_v54, 0.0  ;;  %7382 = vmatmul.mubr.msk.bf16.gmra.mrb[60].mxu0 %vm1586_vm3, %v8500_v45 }
 0x12e   : > { %v1496_v4 = vpack.c.bf16 %v1432_v60, %v1416_v58  ;;  %v8508_v5 = vpack.c.bf16 %v1438_v46, %v1422_v59  ;;  %1777 = vmatprep.mubr.bf16.mxu0 %v7916_v0 }
 0x12f   : > { %v987_v7 = vpop.f32.mrb[32].mxu1  ;;  %v1206_v8 = vpop.f32.mrb[32].mxu0  ;;  %v1497_v18 = vpack.c.bf16 %v1433_v1, %v1417_v62  ;;  %v8511_v9 = vpack.c.bf16 %v1439_v2, %v1423_v23 }
 0x130   : > { %v988_v10 = vadd.f32 %v987_v7, %v8363_v51  ;;  %v1207_v11 = vadd.f32 %v1206_v8, %v8363_v51  ;;  %v989_v12 = vpop.f32.mrb[33].mxu1  ;;  %v1208_v17 = vpop.f32.mrb[33].mxu0 }
 0x131   : > { %v990_v19 = vadd.f32 %v989_v12, %v8363_v51  ;;  %v1209_v21 = vadd.f32 %v1208_v17, %v8363_v51  ;;  %v991_v22 = vpop.f32.mrb[34].mxu1  ;;  %v1210_v24 = vpop.f32.mrb[34].mxu0  ;;  %1678 = vmatprep.subr.bf16.mxu1 %v1497_v18 }
 0x132   : > { %v992_v25 = vadd.f32 %v991_v22, %v8365_v32  ;;  %v1211_v26 = vadd.f32 %v1210_v24, %v8365_v32  ;;  %v993_v28 = vpop.f32.mrb[35].mxu1  ;;  %v1212_v29 = vpop.f32.mrb[35].mxu0  ;;  %1679 = vmatpush1.bf16.msra.mxu1 %v1496_v4  ;;  %v1324_v33 = vmax.f32 %v988_v10, 0.0  ;;  %v1330_v48 = vmax.f32 %v1207_v11, 0.0 }
 0x133   : > { %v994_v30 = vadd.f32 %v993_v28, %v8365_v32  ;;  %v1213_v31 = vadd.f32 %v1212_v29, %v8365_v32  ;;  %v1325_v6 = vmax.f32 %v990_v19, 0.0  ;;  %v1331_v37 = vmax.f32 %v1209_v21, 0.0 }
 0x134   : > { %v1340_v35 = vmax.f32 %v992_v25, 0.0  ;;  %v1346_v36 = vmax.f32 %v1211_v26, 0.0 }
 0x135   : > { %v1341_v16 = vmax.f32 %v994_v30, 0.0  ;;  %v1347_v53 = vmax.f32 %v1213_v31, 0.0  ;;  %7383 = vmatmul.mubr.msk.bf16.vlgmr.msra.gmra.mrb[80].mxu1 %vm1586_vm3, %v8434_v3  ;;  %7387 = vmatmul.mubr.msk.bf16.vlgmr.msra.gmra.mrb[64].mxu0 %vm1586_vm3, %v8434_v3 }
 0x136   : > { %v1452_v39 = vpack.c.bf16 %v1340_v35, %v1324_v33  ;;  %v8525_v40 = vpack.c.bf16 %v1346_v36, %v1330_v48  ;;  %1892 = vmatpush1.bf16.msra.mxu0 %v8443_v27  ;;  %1714 = vmatprep.mubr.bf16.mxu1 %v7916_v0 }
 0x137   : > { %1893 = vmatprep.subr.bf16.mxu0 %v8470_v63  ;;  %v997_v41 = vpop.f32.mrb[36].mxu1  ;;  %v1216_v42 = vpop.f32.mrb[36].mxu0  ;;  %v1453_v47 = vpack.c.bf16 %v1341_v16, %v1325_v6  ;;  %1787 = vmatprep.mubr.bf16.mxu0 %v7916_v0  ;;  %v1459_v49 = vpack.c.bf16 %v1347_v53, %v1331_v37 }
 0x138   : > { %v998_v50 = vadd.f32 %v997_v41, %v8367_v52  ;;  %v1217_v55 = vadd.f32 %v1216_v42, %v8367_v52  ;;  %v999_v56 = vpop.f32.mrb[37].mxu1  ;;  %v1218_v54 = vpop.f32.mrb[37].mxu0 }
 0x139   : > { %v1000_v58 = vadd.f32 %v999_v56, %v8367_v52  ;;  %v1219_v27 = vadd.f32 %v1218_v54, %v8367_v52  ;;  %v1001_v59 = vpop.f32.mrb[38].mxu1  ;;  %v1220_v60 = vpop.f32.mrb[38].mxu0  ;;  %1818 = vmatprep.subr.bf16.mxu1 %v1453_v47 }
 0x13a   : > { %v1002_v63 = vadd.f32 %v1001_v59, %v8377_v14  ;;  %v1221_v46 = vadd.f32 %v1220_v60, %v8377_v14  ;;  %1894 = vmatpush1.bf16.msra.mxu0 %v8465_v61  ;;  %v1003_v62 = vpop.f32.mrb[39].mxu1  ;;  %v1222_v23 = vpop.f32.mrb[39].mxu0  ;;  %1819 = vmatpush1.bf16.msra.mxu1 %v1452_v39  ;;  %v1356_v4 = vmax.f32 %v998_v50, 0.0  ;;  %v1362_v7 = vmax.f32 %v1217_v55, 0.0 }
 0x13b   : > { %v1004_v1 = vadd.f32 %v1003_v62, %v8377_v14  ;;  %v1223_v2 = vadd.f32 %v1222_v23, %v8377_v14  ;;  %1895 = vmatprep.subr.bf16.mxu0 %v8491_v20  ;;  %v1357_v10 = vmax.f32 %v1000_v58, 0.0  ;;  %v1363_v11 = vmax.f32 %v1219_v27, 0.0 }
 0x13c   : > { %v1372_v8 = vmax.f32 %v1002_v63, 0.0  ;;  %v1378_v18 = vmax.f32 %v1221_v46, 0.0 }
 0x13d   : > { %v1373_v12 = vmax.f32 %v1004_v1, 0.0  ;;  %v1379_v17 = vmax.f32 %v1223_v2, 0.0  ;;  %7384 = vmatmul.mubr.msk.bf16.gmra.mrb[84].mxu1 %vm1586_vm3, %v8455_v38  ;;  %7388 = vmatmul.mubr.msk.bf16.gmra.mrb[68].mxu0 %vm1586_vm3, %v8455_v38 }
 0x13e   : > { %v1468_v61 = vpack.c.bf16 %v1372_v8, %v1356_v4  ;;  %v8545_v19 = vpack.c.bf16 %v1378_v18, %v1362_v7  ;;  %1896 = vmatpush1.bf16.msra.mxu0 %v8488_v34  ;;  %1724 = vmatprep.mubr.bf16.mxu1 %v7916_v0 }
 0x13f   : > { %1897 = vmatprep.subr.bf16.mxu0 %v8511_v9  ;;  %v1007_v20 = vpop.f32.mrb[40].mxu1  ;;  %v1226_v21 = vpop.f32.mrb[40].mxu0  ;;  %v1469_v22 = vpack.c.bf16 %v1373_v12, %v1357_v10  ;;  %1797 = vmatprep.mubr.bf16.mxu0 %v7916_v0  ;;  %v8551_v24 = vpack.c.bf16 %v1379_v17, %v1363_v11 }
 0x140   : > { %v1008_v25 = vadd.f32 %v1007_v20, %v8391_v43  ;;  %v1227_v26 = vadd.f32 %v1226_v21, %v8391_v43  ;;  %v1009_v28 = vpop.f32.mrb[41].mxu1  ;;  %v1228_v29 = vpop.f32.mrb[41].mxu0 }
 0x141   : > { %v1010_v30 = vadd.f32 %v1009_v28, %v8391_v43  ;;  %v1229_v34 = vadd.f32 %v1228_v29, %v8391_v43  ;;  %v1011_v31 = vpop.f32.mrb[42].mxu1  ;;  %v1230_v33 = vpop.f32.mrb[42].mxu0  ;;  %1820 = vmatprep.subr.bf16.mxu1 %v1469_v22 }
 0x142   : > { %v1012_v9 = vadd.f32 %v1011_v31, %v8393_v44  ;;  %v1231_v48 = vadd.f32 %v1230_v33, %v8393_v44  ;;  %1898 = vmatpush1.bf16.msra.mxu0 %v8508_v5  ;;  %v1013_v35 = vpop.f32.mrb[43].mxu1  ;;  %v1232_v36 = vpop.f32.mrb[43].mxu0  ;;  %1821 = vmatpush1.bf16.msra.mxu1 %v1468_v61  ;;  %v1388_v16 = vmax.f32 %v1008_v25, 0.0  ;;  %v1394_v53 = vmax.f32 %v1227_v26, 0.0 }
 0x143   : > { %v1014_v6 = vadd.f32 %v1013_v35, %v8393_v44  ;;  %v1233_v37 = vadd.f32 %v1232_v36, %v8393_v44  ;;  %2037 = vmatprep.subr.bf16.mxu0 %v1459_v49  ;;  %v1389_v42 = vmax.f32 %v1010_v30, 0.0  ;;  %v1395_v47 = vmax.f32 %v1229_v34, 0.0 }
 0x144   : > { %v1404_v39 = vmax.f32 %v1012_v9, 0.0  ;;  %v1410_v41 = vmax.f32 %v1231_v48, 0.0 }
 0x145   : > { %v1405_v50 = vmax.f32 %v1014_v6, 0.0  ;;  %v1411_v55 = vmax.f32 %v1233_v37, 0.0  ;;  %7385 = vmatmul.mubr.msk.bf16.gmra.mrb[88].mxu1 %vm1586_vm3, %v8479_v57  ;;  %7389 = vmatmul.mubr.msk.bf16.gmra.mrb[72].mxu0 %vm1586_vm3, %v8479_v57 }
 0x146   : > { %v1484_v5 = vpack.c.bf16 %v1404_v39, %v1388_v16  ;;  %v8566_v56 = vpack.c.bf16 %v1410_v41, %v1394_v53  ;;  %1734 = vmatprep.mubr.bf16.mxu1 %v7916_v0  ;;  %1807 = vmatprep.mubr.bf16.mxu0 %v7916_v0 }
 0x147   : > { %v1017_v49 = vpop.f32.mrb[44].mxu1  ;;  %v1236_v54 = vpop.f32.mrb[44].mxu0  ;;  %v1485_v58 = vpack.c.bf16 %v1405_v50, %v1389_v42  ;;  %v8570_v27 = vpack.c.bf16 %v1411_v55, %v1395_v47 }
 0x148   : > { %v1018_v59 = vadd.f32 %v1017_v49, %v8407_v13  ;;  %v1237_v60 = vadd.f32 %v1236_v54, %v8407_v13  ;;  %v1019_v63 = vpop.f32.mrb[45].mxu1  ;;  %v1238_v46 = vpop.f32.mrb[45].mxu0 }
 0x149   : > { %v1020_v62 = vadd.f32 %v1019_v63, %v8407_v13  ;;  %v1239_v23 = vadd.f32 %v1238_v46, %v8407_v13  ;;  %v1021_v1 = vpop.f32.mrb[46].mxu1  ;;  %v1240_v2 = vpop.f32.mrb[46].mxu0  ;;  %1822 = vmatprep.subr.bf16.mxu1 %v1485_v58 }
 0x14a   : > { %v1022_v4 = vadd.f32 %v1021_v1, %v8409_v15  ;;  %v1241_v7 = vadd.f32 %v1240_v2, %v8409_v15  ;;  %v1023_v8 = vpop.f32.mrb[47].mxu1  ;;  %v1242_v18 = vpop.f32.mrb[47].mxu0  ;;  %1823 = vmatpush1.bf16.msra.mxu1 %v1484_v5  ;;  %v1420_v12 = vmax.f32 %v1018_v59, 0.0  ;;  %v1426_v17 = vmax.f32 %v1237_v60, 0.0 }
 0x14b   : > { %v1024_v10 = vadd.f32 %v1023_v8, %v8409_v15  ;;  %v1243_v11 = vadd.f32 %v1242_v18, %v8409_v15  ;;  %v1421_v21 = vmax.f32 %v1020_v62, 0.0  ;;  %v1427_v22 = vmax.f32 %v1239_v23, 0.0 }
 0x14c   : > { %v1436_v61 = vmax.f32 %v1022_v4, 0.0  ;;  %v1442_v20 = vmax.f32 %v1241_v7, 0.0 }
 0x14d   : > { %v1437_v25 = vmax.f32 %v1024_v10, 0.0  ;;  %v1443_v26 = vmax.f32 %v1243_v11, 0.0  ;;  %7386 = vmatmul.mubr.msk.bf16.gmra.mrb[92].mxu1 %vm1586_vm3, %v8500_v45  ;;  %7390 = vmatmul.mubr.msk.bf16.gmra.mrb[76].mxu0 %vm1586_vm3, %v8500_v45 }
 0x14e   : > { %v1500_v28 = vpack.c.bf16 %v1436_v61, %v1420_v12  ;;  %v1506_v29 = vpack.c.bf16 %v1442_v20, %v1426_v17  ;;  %1850 = vmatprep.mubr.bf16.mxu1 %v7916_v0  ;;  %1923 = vmatprep.mubr.bf16.mxu0 %v7916_v0 }
 0x14f   : > { %v1133_v30 = vpop.f32.mrb[48].mxu1  ;;  %v1501_v34 = vpack.c.bf16 %v1437_v25, %v1421_v21  ;;  %v1507_v31 = vpack.c.bf16 %v1443_v26, %v1427_v22 }
 0x150   : > { %v1134_v33 = vadd.f32 %v1133_v30, %v8363_v51  ;;  %v1135_v9 = vpop.f32.mrb[49].mxu1 }
 0x151   : > { %v1136_v48 = vadd.f32 %v1135_v9, %v8363_v51  ;;  %v1137_v35 = vpop.f32.mrb[50].mxu1  ;;  %1824 = vmatprep.subr.bf16.mxu1 %v1501_v34 }
 0x152   : > { %v1138_v36 = vadd.f32 %v1137_v35, %v8365_v32  ;;  %v1139_v6 = vpop.f32.mrb[51].mxu1  ;;  %1825 = vmatpush1.bf16.msra.mxu1 %v1500_v28  ;;  %v1328_v16 = vmax.f32 %v1134_v33, 0.0 }
 0x153   : > { %v1140_v37 = vadd.f32 %v1139_v6, %v8365_v32  ;;  %v1329_v39 = vmax.f32 %v1136_v48, 0.0 }
 0x154   : > { %v1344_v53 = vmax.f32 %v1138_v36, 0.0 }
 0x155   : > { %v1345_v41 = vmax.f32 %v1140_v37, 0.0  ;;  %7391 = vmatmul.mubr.msk.bf16.vlgmr.msra.gmra.mrb[96].mxu1 %vm1586_vm3, %v8434_v3  ;;  %7395 = vmatmul.mubr.msk.bf16.vlgmr.msra.gmra.mrb[80].mxu0 %vm1586_vm3, %v8434_v3 }
 0x156   : > { %v1456_v42 = vpack.c.bf16 %v1344_v53, %v1328_v16  ;;  %2038 = vmatpush1.bf16.msra.mxu0 %v8525_v40  ;;  %1860 = vmatprep.mubr.bf16.mxu1 %v7916_v0 }
 0x157   : > { %2039 = vmatprep.subr.bf16.mxu0 %v8551_v24  ;;  %v1143_v47 = vpop.f32.mrb[52].mxu1  ;;  %v1457_v50 = vpack.c.bf16 %v1345_v41, %v1329_v39  ;;  %1933 = vmatprep.mubr.bf16.mxu0 %v7916_v0 }
 0x158   : > { %v1144_v55 = vadd.f32 %v1143_v47, %v8367_v52  ;;  %v1145_v5 = vpop.f32.mrb[53].mxu1 }
 0x159   : > { %v1146_v49 = vadd.f32 %v1145_v5, %v8367_v52  ;;  %v1147_v54 = vpop.f32.mrb[54].mxu1  ;;  %1964 = vmatprep.subr.bf16.mxu1 %v1457_v50 }
 0x15a   : > { %v1148_v58 = vadd.f32 %v1147_v54, %v8377_v14  ;;  %2040 = vmatpush1.bf16.msra.mxu0 %v8545_v19  ;;  %v1149_v40 = vpop.f32.mrb[55].mxu1  ;;  %1965 = vmatpush1.bf16.msra.mxu1 %v1456_v42  ;;  %v1360_v24 = vmax.f32 %v1144_v55, 0.0 }
 0x15b   : > { %v1150_v59 = vadd.f32 %v1149_v40, %v8377_v14  ;;  %2041 = vmatprep.subr.bf16.mxu0 %v8570_v27  ;;  %v1361_v63 = vmax.f32 %v1146_v49, 0.0 }
 0x15c   : > { %v1376_v60 = vmax.f32 %v1148_v58, 0.0 }
 0x15d   : > { %v1377_v46 = vmax.f32 %v1150_v59, 0.0  ;;  %7392 = vmatmul.mubr.msk.bf16.gmra.mrb[100].mxu1 %vm1586_vm3, %v8455_v38  ;;  %7396 = vmatmul.mubr.msk.bf16.gmra.mrb[84].mxu0 %vm1586_vm3, %v8455_v38 }
 0x15e   : > { %v1472_v62 = vpack.c.bf16 %v1376_v60, %v1360_v24  ;;  %2042 = vmatpush1.bf16.msra.mxu0 %v8566_v56  ;;  %1870 = vmatprep.mubr.bf16.mxu1 %v7916_v0 }
 0x15f   : > { %2043 = vmatprep.subr.bf16.mxu0 %v1507_v31  ;;  %v1153_v19 = vpop.f32.mrb[56].mxu1  ;;  %v1473_v23 = vpack.c.bf16 %v1377_v46, %v1361_v63  ;;  %1943 = vmatprep.mubr.bf16.mxu0 %v7916_v0 }
 0x160   : > { %v1154_v27 = vadd.f32 %v1153_v19, %v8391_v43  ;;  %v1155_v1 = vpop.f32.mrb[57].mxu1 }
 0x161   : > { %v1156_v2 = vadd.f32 %v1155_v1, %v8391_v43  ;;  %v1157_v4 = vpop.f32.mrb[58].mxu1  ;;  %1966 = vmatprep.subr.bf16.mxu1 %v1473_v23 }
 0x162   : > { %v1158_v7 = vadd.f32 %v1157_v4, %v8393_v44  ;;  %2044 = vmatpush1.bf16.msra.mxu0 %v1506_v29  ;;  %v1159_v8 = vpop.f32.mrb[59].mxu1  ;;  %1967 = vmatpush1.bf16.msra.mxu1 %v1472_v62  ;;  %v1392_v18 = vmax.f32 %v1154_v27, 0.0 }
 0x163   : > { %v1160_v56 = vadd.f32 %v1159_v8, %v8393_v44  ;;  %v1393_v11 = vmax.f32 %v1156_v2, 0.0 }
 0x164   : > { %v1408_v10 = vmax.f32 %v1158_v7, 0.0 }
 0x165   : > { %v1409_v12 = vmax.f32 %v1160_v56, 0.0  ;;  %7393 = vmatmul.mubr.msk.bf16.gmra.mrb[104].mxu1 %vm1586_vm3, %v8479_v57  ;;  %7397 = vmatmul.mubr.msk.bf16.gmra.mrb[88].mxu0 %vm1586_vm3, %v8479_v57 }
 0x166   : > { %v1488_v17 = vpack.c.bf16 %v1408_v10, %v1392_v18  ;;  %1880 = vmatprep.mubr.bf16.mxu1 %v7916_v0  ;;  %1953 = vmatprep.mubr.bf16.mxu0 %v7916_v0 }
 0x167   : > { %v1163_v61 = vpop.f32.mrb[60].mxu1  ;;  %v1489_v20 = vpack.c.bf16 %v1409_v12, %v1393_v11 }
 0x168   : > { %v1164_v21 = vadd.f32 %v1163_v61, %v8407_v13  ;;  %v1165_v22 = vpop.f32.mrb[61].mxu1 }
 0x169   : > { %v1166_v25 = vadd.f32 %v1165_v22, %v8407_v13  ;;  %v1167_v26 = vpop.f32.mrb[62].mxu1  ;;  %1968 = vmatprep.subr.bf16.mxu1 %v1489_v20 }
 0x16a   : > { %v1168_v28 = vadd.f32 %v1167_v26, %v8409_v15  ;;  %v1169_v29 = vpop.f32.mrb[63].mxu1  ;;  %1969 = vmatpush1.bf16.msra.mxu1 %v1488_v17  ;;  %v1424_v34 = vmax.f32 %v1164_v21, 0.0 }
 0x16b   : > { %v1170_v30 = vadd.f32 %v1169_v29, %v8409_v15  ;;  %v1425_v33 = vmax.f32 %v1166_v25, 0.0 }
 0x16c   : > { %v1440_v31 = vmax.f32 %v1168_v28, 0.0 }
 0x16d   : > { %v1441_v9 = vmax.f32 %v1170_v30, 0.0  ;;  %7394 = vmatmul.mubr.msk.bf16.gmra.mrb[108].mxu1 %vm1586_vm3, %v8500_v45  ;;  %7398 = vmatmul.mubr.msk.bf16.gmra.mrb[92].mxu0 %vm1586_vm3, %v8500_v45 }
 0x16e   : > { %v1504_v48 = vpack.c.bf16 %v1440_v31, %v1424_v34  ;;  %1996 = vmatprep.mubr.bf16.mxu1 %v7916_v0  ;;  %2069 = vmatprep.mubr.bf16.mxu0 %v7916_v0 }
 0x16f   : > { %v1279_v35 = vpop.f32.mrb[64].mxu1  ;;  %v1505_v36 = vpack.c.bf16 %v1441_v9, %v1425_v33 }
 0x170   : > { %v1280_v6 = vadd.f32 %v1279_v35, %v8363_v51  ;;  %v1281_v37 = vpop.f32.mrb[65].mxu1 }
 0x171   : > { %v1282_v16 = vadd.f32 %v1281_v37, %v8363_v51  ;;  %v1283_v53 = vpop.f32.mrb[66].mxu1  ;;  %1970 = vmatprep.subr.bf16.mxu1 %v1505_v36  ;;  %v8686_v36 = vpop.permute.xlu1 %1533 }
 0x172   : > { %v1284_v39 = vadd.f32 %v1283_v53, %v8365_v32  ;;  %v1285_v41 = vpop.f32.mrb[67].mxu1  ;;  %1971 = vmatpush1.bf16.msra.mxu1 %v1504_v48  ;;  %v1332_v47 = vmax.f32 %v1280_v6, 0.0 }
 0x173   : > { %v1286_v42 = vadd.f32 %v1285_v41, %v8365_v32  ;;  %v1333_v55 = vmax.f32 %v1282_v16, 0.0 }
 0x174   : > { %v1348_v50 = vmax.f32 %v1284_v39, 0.0 }
 0x175   : > { %v1349_v5 = vmax.f32 %v1286_v42, 0.0  ;;  %7399 = vmatmul.mubr.msk.bf16.vlgmr.msra.gmra.mrb[112].mxu1 %vm1586_vm3, %v8434_v3  ;;  %7403 = vmatmul.mubr.msk.bf16.vlgmr.msra.gmra.mrb[96].mxu0 %vm1586_vm3, %v8434_v3 }
 0x176   : > { %v1460_v49 = vpack.c.bf16 %v1348_v50, %v1332_v47  ;;  %2006 = vmatprep.mubr.bf16.mxu1 %v7916_v0  ;;  %2079 = vmatprep.mubr.bf16.mxu0 %v7916_v0 }
 0x177   : > { %v1289_v51 = vpop.f32.mrb[68].mxu1  ;;  %v1461_v54 = vpack.c.bf16 %v1349_v5, %v1333_v55 }
 0x178   : > { %v1290_v58 = vadd.f32 %v1289_v51, %v8367_v52  ;;  %v1291_v32 = vpop.f32.mrb[69].mxu1  ;;  %v8694_v51 = vpop.permute.xlu1 %1543 }
 0x179   : > { %v1292_v40 = vadd.f32 %v1291_v32, %v8367_v52  ;;  %v1293_v59 = vpop.f32.mrb[70].mxu1  ;;  %2110 = vmatprep.subr.bf16.mxu1 %v1461_v54 }
 0x17a   : > { %v1294_v24 = vadd.f32 %v1293_v59, %v8377_v14  ;;  %v1295_v60 = vpop.f32.mrb[71].mxu1  ;;  %2111 = vmatpush1.bf16.msra.mxu1 %v1460_v49  ;;  %v1364_v46 = vmax.f32 %v1290_v58, 0.0 }
 0x17b   : > { %v1296_v63 = vadd.f32 %v1295_v60, %v8377_v14  ;;  %v1365_v19 = vmax.f32 %v1292_v40, 0.0 }
 0x17c   : > { %v1380_v62 = vmax.f32 %v1294_v24, 0.0 }
 0x17d   : > { %v1381_v23 = vmax.f32 %v1296_v63, 0.0  ;;  %7400 = vmatmul.mubr.msk.bf16.gmra.mrb[116].mxu1 %vm1586_vm3, %v8455_v38  ;;  %7404 = vmatmul.mubr.msk.bf16.gmra.mrb[100].mxu0 %vm1586_vm3, %v8455_v38 }
 0x17e   : > { %v1476_v27 = vpack.c.bf16 %v1380_v62, %v1364_v46  ;;  %2016 = vmatprep.mubr.bf16.mxu1 %v7916_v0  ;;  %2089 = vmatprep.mubr.bf16.mxu0 %v7916_v0 }
 0x17f   : > { %v1299_v52 = vpop.f32.mrb[72].mxu1  ;;  %v1477_v1 = vpack.c.bf16 %v1381_v23, %v1365_v19 }
 0x180   : > { %v1300_v2 = vadd.f32 %v1299_v52, %v8391_v43  ;;  %v1301_v14 = vpop.f32.mrb[73].mxu1 }
 0x181   : > { %v1302_v4 = vadd.f32 %v1301_v14, %v8391_v43  ;;  %v1303_v7 = vpop.f32.mrb[74].mxu1  ;;  %2112 = vmatprep.subr.bf16.mxu1 %v1477_v1 }
 0x182   : > { %v1304_v8 = vadd.f32 %v1303_v7, %v8393_v44  ;;  %v1305_v56 = vpop.f32.mrb[75].mxu1  ;;  %2113 = vmatpush1.bf16.msra.mxu1 %v1476_v27  ;;  %v1396_v10 = vmax.f32 %v1300_v2, 0.0  ;;  %v8702_v2 = vpop.permute.xlu1 %1553 }
 0x183   : > { %v1306_v18 = vadd.f32 %v1305_v56, %v8393_v44  ;;  %v1397_v12 = vmax.f32 %v1302_v4, 0.0 }
 0x184   : > { %v1412_v11 = vmax.f32 %v1304_v8, 0.0 }
 0x185   : > { %v1413_v17 = vmax.f32 %v1306_v18, 0.0  ;;  %7401 = vmatmul.mubr.msk.bf16.gmra.mrb[120].mxu1 %vm1586_vm3, %v8479_v57  ;;  %7405 = vmatmul.mubr.msk.bf16.gmra.mrb[104].mxu0 %vm1586_vm3, %v8479_v57 }
 0x186   : > { %v1492_v61 = vpack.c.bf16 %v1412_v11, %v1396_v10  ;;  %2026 = vmatprep.mubr.bf16.mxu1 %v7916_v0  ;;  %2099 = vmatprep.mubr.bf16.mxu0 %v7916_v0 }
 0x187   : > { %v1309_v43 = vpop.f32.mrb[76].mxu1  ;;  %v1493_v20 = vpack.c.bf16 %v1413_v17, %v1397_v12 }
 0x188   : > { %v1310_v21 = vadd.f32 %v1309_v43, %v8407_v13  ;;  %v1311_v44 = vpop.f32.mrb[77].mxu1 }
 0x189   : > { %v1312_v22 = vadd.f32 %v1311_v44, %v8407_v13  ;;  %v1313_v25 = vpop.f32.mrb[78].mxu1  ;;  %2114 = vmatprep.subr.bf16.mxu1 %v1493_v20 }
 0x18a   : > { %v1314_v26 = vadd.f32 %v1313_v25, %v8409_v15  ;;  %v1315_v28 = vpop.f32.mrb[79].mxu1  ;;  %2115 = vmatpush1.bf16.msra.mxu1 %v1492_v61  ;;  %v1428_v30 = vmax.f32 %v1310_v21, 0.0 }
 0x18b   : > { %v1316_v29 = vadd.f32 %v1315_v28, %v8409_v15  ;;  %v1429_v31 = vmax.f32 %v1312_v22, 0.0  ;;  %v8683_v15 = vpop.permute.xlu0 %1528  ;;  %v8710_v22 = vpop.permute.xlu1 %1563 }
 0x18c   : > { %v1444_v34 = vmax.f32 %v1314_v26, 0.0 }
 0x18d   : > { %v1445_v33 = vmax.f32 %v1316_v29, 0.0  ;;  %7402 = vmatmul.mubr.msk.bf16.gmra.mrb[124].mxu1 %vm1586_vm3, %v8500_v45  ;;  %7406 = vmatmul.mubr.msk.bf16.gmra.mrb[108].mxu0 %vm1586_vm3, %v8500_v45 }
 0x18e   : > { %v1508_v9 = vpack.c.bf16 %v1444_v34, %v1428_v30  ;;  %2142 = vmatprep.mubr.bf16.mxu1 %v7916_v0  ;;  %2495 = vmatprep.mubr.bf16.mxu0 %v7916_v0 }
 0x18f   : > { %v1509_v13 = vpack.c.bf16 %v1445_v33, %v1429_v31  ;;  %v8691_v47 = vpop.permute.xlu0 %1538 }
 0x191   : > { %2116 = vmatprep.subr.bf16.mxu1 %v1509_v13 }
 0x192   : > { %2117 = vmatpush1.bf16.msra.mxu1 %v1508_v9 }
 0x193   : > { %v8699_v19 = vpop.permute.xlu0 %1548 }
 0x195   : > { %7407 = vmatmul.mubr.msk.bf16.vlgmr.msra.gmra.mrb[128].mxu1 %vm1586_vm3, %v8434_v3 }
 0x196   : > { %2152 = vmatprep.mubr.bf16.mxu1 %v7916_v0 }
 0x197   : > { %v8707_v61 = vpop.permute.xlu0 %1558 }
 0x19d   : > { %7408 = vmatmul.mubr.msk.bf16.gmra.mrb[132].mxu1 %vm1586_vm3, %v8455_v38 }
 0x19e   : > { %2162 = vmatprep.mubr.bf16.mxu1 %v7916_v0 }
 0x1a5   : > { %7409 = vmatmul.mubr.msk.bf16.gmra.mrb[136].mxu1 %vm1586_vm3, %v8479_v57 }
 0x1a6   : > { %2172 = vmatprep.mubr.bf16.mxu1 %v7916_v0 }
 0x1ad   : > { %7410 = vmatmul.mubr.msk.bf16.gmra.mrb[140].mxu1 %vm1586_vm3, %v8500_v45 }
 0x1ae   : > { %2568 = vmatprep.mubr.bf16.mxu1 %v7916_v0 }
 0x1e8   : > { %v1633_v3 = vpop.f32.mrb[48].mxu0 }
 0x1e9   : > { %v1634_v48 = vadd.f32 %v1633_v3, %v8683_v15  ;;  %v1635_v35 = vpop.f32.mrb[49].mxu0 }
 0x1ea   : > { %v1636_v38 = vadd.f32 %v1635_v35, %v8683_v15  ;;  %v1637_v6 = vpop.f32.mrb[50].mxu0 }
 0x1eb   : > { %v1638_v57 = vadd.f32 %v1637_v6, %v8686_v36  ;;  %v1639_v37 = vpop.f32.mrb[51].mxu0  ;;  %v2183_v53 = vmax.f32 %v1634_v48, 0.0 }
 0x1ec   : > { %v1640_v16 = vadd.f32 %v1639_v37, %v8686_v36  ;;  %v2184_v39 = vmax.f32 %v1636_v38, 0.0 }
 0x1ed   : > { %v2199_v45 = vmax.f32 %v1638_v57, 0.0 }
 0x1ee   : > { %v2200_v41 = vmax.f32 %v1640_v16, 0.0 }
 0x1ef   : > { %v2311_v42 = vpack.c.bf16 %v2199_v45, %v2183_v53 }
 0x1f0   : > { %v1643_v50 = vpop.f32.mrb[52].mxu0  ;;  %v2312_v55 = vpack.c.bf16 %v2200_v41, %v2184_v39  ;;  %v8722_v41 = vld [vmem:[%s10955_s5] sm:$0xff]  }
 0x1f1   : > { %v1644_v5 = vadd.f32 %v1643_v50, %v8691_v47  ;;  %v1645_v49 = vpop.f32.mrb[53].mxu0 }
 0x1f2   : > { %v1646_v54 = vadd.f32 %v1645_v49, %v8691_v47  ;;  %v1647_v58 = vpop.f32.mrb[54].mxu0  ;;  %2463 = vmatprep.subr.bf16.mxu0 %v2312_v55 }
 0x1f3   : > { %v1648_v32 = vadd.f32 %v1647_v58, %v8694_v51  ;;  %v1649_v40 = vpop.f32.mrb[55].mxu0  ;;  %2464 = vmatpush1.bf16.msra.mxu0 %v2311_v42  ;;  %v2215_v24 = vmax.f32 %v1644_v5, 0.0 }
 0x1f4   : > { %v1650_v59 = vadd.f32 %v1649_v40, %v8694_v51  ;;  %v2216_v63 = vmax.f32 %v1646_v54, 0.0 }
 0x1f5   : > { %v2231_v60 = vmax.f32 %v1648_v32, 0.0 }
 0x1f6   : > { %v2232_v46 = vmax.f32 %v1650_v59, 0.0 }
 0x1f7   : > { %v2327_v62 = vpack.c.bf16 %v2231_v60, %v2215_v24 }
 0x1f8   : > { %v1653_v23 = vpop.f32.mrb[56].mxu0  ;;  %v2328_v27 = vpack.c.bf16 %v2232_v46, %v2216_v63 }
 0x1f9   : > { %v1654_v52 = vadd.f32 %v1653_v23, %v8699_v19  ;;  %v1655_v1 = vpop.f32.mrb[57].mxu0 }
 0x1fa   : > { %v1656_v14 = vadd.f32 %v1655_v1, %v8699_v19  ;;  %v1657_v4 = vpop.f32.mrb[58].mxu0  ;;  %2465 = vmatprep.subr.bf16.mxu0 %v2328_v27 }
 0x1fb   : > { %v1658_v7 = vadd.f32 %v1657_v4, %v8702_v2  ;;  %v1659_v8 = vpop.f32.mrb[59].mxu0  ;;  %2466 = vmatpush1.bf16.msra.mxu0 %v2327_v62  ;;  %v2247_v18 = vmax.f32 %v1654_v52, 0.0 }
 0x1fc   : > { %v1660_v56 = vadd.f32 %v1659_v8, %v8702_v2  ;;  %v2248_v11 = vmax.f32 %v1656_v14, 0.0 }
 0x1fd   : > { %v2263_v10 = vmax.f32 %v1658_v7, 0.0 }
 0x1fe   : > { %v2264_v12 = vmax.f32 %v1660_v56, 0.0 }
 0x1ff   : > { %v2343_v17 = vpack.c.bf16 %v2263_v10, %v2247_v18 }
 0x200   : > { %v1663_v43 = vpop.f32.mrb[60].mxu0  ;;  %v2344_v20 = vpack.c.bf16 %v2264_v12, %v2248_v11 }
 0x201   : > { %v1664_v21 = vadd.f32 %v1663_v43, %v8707_v61  ;;  %v1665_v44 = vpop.f32.mrb[61].mxu0 }
 0x202   : > { %v1666_v25 = vadd.f32 %v1665_v44, %v8707_v61  ;;  %v1667_v26 = vpop.f32.mrb[62].mxu0  ;;  %2467 = vmatprep.subr.bf16.mxu0 %v2344_v20 }
 0x203   : > { %v1668_v28 = vadd.f32 %v1667_v26, %v8710_v22  ;;  %v1669_v29 = vpop.f32.mrb[63].mxu0  ;;  %2468 = vmatpush1.bf16.msra.mxu0 %v2343_v17  ;;  %v2279_v34 = vmax.f32 %v1664_v21, 0.0  ;;  %v8738_v17 = vld [vmem:[%s10955_s5 + $0x8] sm:$0xff]  }
 0x204   : > { %v1670_v30 = vadd.f32 %v1669_v29, %v8710_v22  ;;  %v2280_v33 = vmax.f32 %v1666_v25, 0.0 }
 0x205   : > { %v2295_v31 = vmax.f32 %v1668_v28, 0.0 }
 0x206   : > { %v2296_v9 = vmax.f32 %v1670_v30, 0.0 }
 0x207   : > { %v2359_v13 = vpack.c.bf16 %v2295_v31, %v2279_v34 }
 0x208   : > { %v1706_v3 = vpop.f32.mrb[80].mxu1  ;;  %v1779_v48 = vpop.f32.mrb[64].mxu0  ;;  %v2360_v35 = vpack.c.bf16 %v2296_v9, %v2280_v33 }
 0x209   : > { %v1707_v38 = vadd.f32 %v1706_v3, %v8683_v15  ;;  %v1780_v6 = vadd.f32 %v1779_v48, %v8683_v15  ;;  %v1708_v57 = vpop.f32.mrb[81].mxu1  ;;  %v1781_v37 = vpop.f32.mrb[65].mxu0 }
 0x20a   : > { %v1709_v16 = vadd.f32 %v1708_v57, %v8683_v15  ;;  %v1782_v53 = vadd.f32 %v1781_v37, %v8683_v15  ;;  %v1710_v45 = vpop.f32.mrb[82].mxu1  ;;  %v1783_v39 = vpop.f32.mrb[66].mxu0  ;;  %2469 = vmatprep.subr.bf16.mxu0 %v2360_v35 }
 0x20b   : > { %v1711_v42 = vadd.f32 %v1710_v45, %v8686_v36  ;;  %v1784_v50 = vadd.f32 %v1783_v39, %v8686_v36  ;;  %v1712_v55 = vpop.f32.mrb[83].mxu1  ;;  %v1785_v5 = vpop.f32.mrb[67].mxu0  ;;  %2470 = vmatpush1.bf16.msra.mxu0 %v2359_v13  ;;  %v2185_v58 = vmax.f32 %v1707_v38, 0.0  ;;  %v2187_v32 = vmax.f32 %v1780_v6, 0.0 }
 0x20c   : > { %v1713_v49 = vadd.f32 %v1712_v55, %v8686_v36  ;;  %v1786_v54 = vadd.f32 %v1785_v5, %v8686_v36  ;;  %v2186_v24 = vmax.f32 %v1709_v16, 0.0  ;;  %v2188_v60 = vmax.f32 %v1782_v53, 0.0  ;;  %v8754_v5 = vld [vmem:[%s10955_s5 + $0x10] sm:$0xff]  }
 0x20d   : > { %v2201_v40 = vmax.f32 %v1711_v42, 0.0  ;;  %v2203_v59 = vmax.f32 %v1784_v50, 0.0 }
 0x20e   : > { %v2202_v63 = vmax.f32 %v1713_v49, 0.0  ;;  %v2204_v46 = vmax.f32 %v1786_v54, 0.0  ;;  %7415 = vmatmul.mubr.msk.bf16.vlgmr.msra.gmra.mrb[112].mxu0 %vm1586_vm3, %v8722_v41 }
 0x20f   : > { %v2313_v62 = vpack.c.bf16 %v2201_v40, %v2185_v58  ;;  %v2315_v23 = vpack.c.bf16 %v2203_v59, %v2187_v32  ;;  %2505 = vmatprep.mubr.bf16.mxu0 %v7916_v0 }
 0x210   : > { %v1716_v27 = vpop.f32.mrb[84].mxu1  ;;  %v1789_v52 = vpop.f32.mrb[68].mxu0  ;;  %v2314_v1 = vpack.c.bf16 %v2202_v63, %v2186_v24  ;;  %v2316_v14 = vpack.c.bf16 %v2204_v46, %v2188_v60 }
 0x211   : > { %v1717_v4 = vadd.f32 %v1716_v27, %v8691_v47  ;;  %v1790_v7 = vadd.f32 %v1789_v52, %v8691_v47  ;;  %v1718_v8 = vpop.f32.mrb[85].mxu1  ;;  %v1791_v56 = vpop.f32.mrb[69].mxu0 }
 0x212   : > { %v1719_v18 = vadd.f32 %v1718_v8, %v8691_v47  ;;  %v1792_v10 = vadd.f32 %v1791_v56, %v8691_v47  ;;  %v1720_v11 = vpop.f32.mrb[86].mxu1  ;;  %v1793_v12 = vpop.f32.mrb[70].mxu0  ;;  %2536 = vmatprep.subr.bf16.mxu1 %v2314_v1  ;;  %2609 = vmatprep.subr.bf16.mxu0 %v2316_v14 }
 0x213   : > { %v1721_v43 = vadd.f32 %v1720_v11, %v8694_v51  ;;  %v1794_v20 = vadd.f32 %v1793_v12, %v8694_v51  ;;  %v1722_v21 = vpop.f32.mrb[87].mxu1  ;;  %v1795_v44 = vpop.f32.mrb[71].mxu0  ;;  %2537 = vmatpush1.bf16.msra.mxu1 %v2313_v62  ;;  %2610 = vmatpush1.bf16.msra.mxu0 %v2315_v23  ;;  %v2217_v28 = vmax.f32 %v1717_v4, 0.0  ;;  %v2219_v29 = vmax.f32 %v1790_v7, 0.0 }
 0x214   : > { %v1723_v25 = vadd.f32 %v1722_v21, %v8694_v51  ;;  %v1796_v26 = vadd.f32 %v1795_v44, %v8694_v51  ;;  %v2218_v31 = vmax.f32 %v1719_v18, 0.0  ;;  %v2220_v33 = vmax.f32 %v1792_v10, 0.0 }
 0x215   : > { %v2233_v30 = vmax.f32 %v1721_v43, 0.0  ;;  %v2235_v34 = vmax.f32 %v1794_v20, 0.0 }
 0x216   : > { %v2234_v9 = vmax.f32 %v1723_v25, 0.0  ;;  %v2236_v13 = vmax.f32 %v1796_v26, 0.0  ;;  %7416 = vmatmul.mubr.msk.bf16.gmra.mrb[116].mxu0 %vm1586_vm3, %v8738_v17  ;;  %v8770_v25 = vld [vmem:[%s10955_s5 + $0x18] sm:$0xff]  }
 0x217   : > { %v2329_v3 = vpack.c.bf16 %v2233_v30, %v2217_v28  ;;  %v2331_v48 = vpack.c.bf16 %v2235_v34, %v2219_v29  ;;  %2515 = vmatprep.mubr.bf16.mxu0 %v7916_v0 }
 0x218   : > { %v1726_v35 = vpop.f32.mrb[88].mxu1  ;;  %v1799_v38 = vpop.f32.mrb[72].mxu0  ;;  %v2330_v6 = vpack.c.bf16 %v2234_v9, %v2218_v31  ;;  %v2332_v57 = vpack.c.bf16 %v2236_v13, %v2220_v33 }
 0x219   : > { %v1727_v37 = vadd.f32 %v1726_v35, %v8699_v19  ;;  %v1800_v16 = vadd.f32 %v1799_v38, %v8699_v19  ;;  %v1728_v53 = vpop.f32.mrb[89].mxu1  ;;  %v1801_v45 = vpop.f32.mrb[73].mxu0 }
 0x21a   : > { %v1729_v39 = vadd.f32 %v1728_v53, %v8699_v19  ;;  %v1802_v42 = vadd.f32 %v1801_v45, %v8699_v19  ;;  %v1730_v50 = vpop.f32.mrb[90].mxu1  ;;  %v1803_v55 = vpop.f32.mrb[74].mxu0  ;;  %2538 = vmatprep.subr.bf16.mxu1 %v2330_v6  ;;  %2611 = vmatprep.subr.bf16.mxu0 %v2332_v57 }
 0x21b   : > { %v1731_v49 = vadd.f32 %v1730_v50, %v8702_v2  ;;  %v1804_v54 = vadd.f32 %v1803_v55, %v8702_v2  ;;  %v1732_v58 = vpop.f32.mrb[91].mxu1  ;;  %v1805_v32 = vpop.f32.mrb[75].mxu0  ;;  %2539 = vmatpush1.bf16.msra.mxu1 %v2329_v3  ;;  %2612 = vmatpush1.bf16.msra.mxu0 %v2331_v48  ;;  %v2249_v24 = vmax.f32 %v1727_v37, 0.0  ;;  %v2251_v60 = vmax.f32 %v1800_v16, 0.0 }
 0x21c   : > { %v1733_v40 = vadd.f32 %v1732_v58, %v8702_v2  ;;  %v1806_v59 = vadd.f32 %v1805_v32, %v8702_v2  ;;  %v2250_v62 = vmax.f32 %v1729_v39, 0.0  ;;  %v2252_v23 = vmax.f32 %v1802_v42, 0.0 }
 0x21d   : > { %v2265_v63 = vmax.f32 %v1731_v49, 0.0  ;;  %v2267_v46 = vmax.f32 %v1804_v54, 0.0 }
 0x21e   : > { %v2266_v27 = vmax.f32 %v1733_v40, 0.0  ;;  %v2268_v52 = vmax.f32 %v1806_v59, 0.0  ;;  %7417 = vmatmul.mubr.msk.bf16.gmra.mrb[120].mxu0 %vm1586_vm3, %v8754_v5 }
 0x21f   : > { %v2345_v1 = vpack.c.bf16 %v2265_v63, %v2249_v24  ;;  %v2347_v14 = vpack.c.bf16 %v2267_v46, %v2251_v60  ;;  %2525 = vmatprep.mubr.bf16.mxu0 %v7916_v0 }
 0x220   : > { %v1736_v4 = vpop.f32.mrb[92].mxu1  ;;  %v1809_v7 = vpop.f32.mrb[76].mxu0  ;;  %v2346_v8 = vpack.c.bf16 %v2266_v27, %v2250_v62  ;;  %v2348_v56 = vpack.c.bf16 %v2268_v52, %v2252_v23 }
 0x221   : > { %v1737_v18 = vadd.f32 %v1736_v4, %v8707_v61  ;;  %v1810_v10 = vadd.f32 %v1809_v7, %v8707_v61  ;;  %v1738_v11 = vpop.f32.mrb[93].mxu1  ;;  %v1811_v12 = vpop.f32.mrb[77].mxu0 }
 0x222   : > { %v1739_v43 = vadd.f32 %v1738_v11, %v8707_v61  ;;  %v1812_v20 = vadd.f32 %v1811_v12, %v8707_v61  ;;  %v1740_v21 = vpop.f32.mrb[94].mxu1  ;;  %v1813_v44 = vpop.f32.mrb[78].mxu0  ;;  %2540 = vmatprep.subr.bf16.mxu1 %v2346_v8  ;;  %2613 = vmatprep.subr.bf16.mxu0 %v2348_v56 }
 0x223   : > { %v1741_v26 = vadd.f32 %v1740_v21, %v8710_v22  ;;  %v1814_v28 = vadd.f32 %v1813_v44, %v8710_v22  ;;  %v1742_v29 = vpop.f32.mrb[95].mxu1  ;;  %v1815_v30 = vpop.f32.mrb[79].mxu0  ;;  %2541 = vmatpush1.bf16.msra.mxu1 %v2345_v1  ;;  %2614 = vmatpush1.bf16.msra.mxu0 %v2347_v14  ;;  %v2281_v33 = vmax.f32 %v1737_v18, 0.0  ;;  %v2283_v9 = vmax.f32 %v1810_v10, 0.0 }
 0x224   : > { %v1743_v34 = vadd.f32 %v1742_v29, %v8710_v22  ;;  %v1816_v31 = vadd.f32 %v1815_v30, %v8710_v22  ;;  %v2282_v48 = vmax.f32 %v1739_v43, 0.0  ;;  %v2284_v35 = vmax.f32 %v1812_v20, 0.0 }
 0x225   : > { %v2297_v13 = vmax.f32 %v1741_v26, 0.0  ;;  %v2299_v3 = vmax.f32 %v1814_v28, 0.0 }
 0x226   : > { %v2298_v38 = vmax.f32 %v1743_v34, 0.0  ;;  %v2300_v6 = vmax.f32 %v1816_v31, 0.0  ;;  %7418 = vmatmul.mubr.msk.bf16.gmra.mrb[124].mxu0 %vm1586_vm3, %v8770_v25 }
 0x227   : > { %v2361_v57 = vpack.c.bf16 %v2297_v13, %v2281_v33  ;;  %v2363_v37 = vpack.c.bf16 %v2299_v3, %v2283_v9  ;;  %2641 = vmatprep.mubr.bf16.mxu0 %v7916_v0 }
 0x228   : > { %v1852_v16 = vpop.f32.mrb[96].mxu1  ;;  %v1925_v53 = vpop.f32.mrb[80].mxu0  ;;  %v2362_v45 = vpack.c.bf16 %v2298_v38, %v2282_v48  ;;  %v2364_v39 = vpack.c.bf16 %v2300_v6, %v2284_v35 }
 0x229   : > { %v1853_v42 = vadd.f32 %v1852_v16, %v8683_v15  ;;  %v1926_v50 = vadd.f32 %v1925_v53, %v8683_v15  ;;  %v1854_v55 = vpop.f32.mrb[97].mxu1  ;;  %v1927_v49 = vpop.f32.mrb[81].mxu0 }
 0x22a   : > { %v1855_v54 = vadd.f32 %v1854_v55, %v8683_v15  ;;  %v1928_v58 = vadd.f32 %v1927_v49, %v8683_v15  ;;  %v1856_v32 = vpop.f32.mrb[98].mxu1  ;;  %v1929_v40 = vpop.f32.mrb[82].mxu0  ;;  %2542 = vmatprep.subr.bf16.mxu1 %v2362_v45  ;;  %2615 = vmatprep.subr.bf16.mxu0 %v2364_v39 }
 0x22b   : > { %v1857_v59 = vadd.f32 %v1856_v32, %v8686_v36  ;;  %v1930_v24 = vadd.f32 %v1929_v40, %v8686_v36  ;;  %v1858_v60 = vpop.f32.mrb[99].mxu1  ;;  %v1931_v63 = vpop.f32.mrb[83].mxu0  ;;  %2543 = vmatpush1.bf16.msra.mxu1 %v2361_v57  ;;  %2616 = vmatpush1.bf16.msra.mxu0 %v2363_v37  ;;  %v2189_v23 = vmax.f32 %v1853_v42, 0.0  ;;  %v2191_v27 = vmax.f32 %v1926_v50, 0.0 }
 0x22c   : > { %v1859_v46 = vadd.f32 %v1858_v60, %v8686_v36  ;;  %v1932_v62 = vadd.f32 %v1931_v63, %v8686_v36  ;;  %v2190_v14 = vmax.f32 %v1855_v54, 0.0  ;;  %v2192_v4 = vmax.f32 %v1928_v58, 0.0 }
 0x22d   : > { %v2205_v52 = vmax.f32 %v1857_v59, 0.0  ;;  %v2207_v1 = vmax.f32 %v1930_v24, 0.0 }
 0x22e   : > { %v2206_v7 = vmax.f32 %v1859_v46, 0.0  ;;  %v2208_v8 = vmax.f32 %v1932_v62, 0.0  ;;  %7419 = vmatmul.mubr.msk.bf16.vlgmr.msra.gmra.mrb[144].mxu1 %vm1586_vm3, %v8722_v41  ;;  %7423 = vmatmul.mubr.msk.bf16.vlgmr.msra.gmra.mrb[128].mxu0 %vm1586_vm3, %v8722_v41 }
 0x22f   : > { %v2317_v56 = vpack.c.bf16 %v2205_v52, %v2189_v23  ;;  %v2319_v18 = vpack.c.bf16 %v2207_v1, %v2191_v27  ;;  %2578 = vmatprep.mubr.bf16.mxu1 %v7916_v0  ;;  %2651 = vmatprep.mubr.bf16.mxu0 %v7916_v0 }
 0x230   : > { %v1862_v10 = vpop.f32.mrb[100].mxu1  ;;  %v1935_v11 = vpop.f32.mrb[84].mxu0  ;;  %v2318_v12 = vpack.c.bf16 %v2206_v7, %v2190_v14  ;;  %v2320_v43 = vpack.c.bf16 %v2208_v8, %v2192_v4 }
 0x231   : > { %v1863_v20 = vadd.f32 %v1862_v10, %v8691_v47  ;;  %v1936_v21 = vadd.f32 %v1935_v11, %v8691_v47  ;;  %v1864_v44 = vpop.f32.mrb[101].mxu1  ;;  %v1937_v26 = vpop.f32.mrb[85].mxu0 }
 0x232   : > { %v1865_v28 = vadd.f32 %v1864_v44, %v8691_v47  ;;  %v1938_v29 = vadd.f32 %v1937_v26, %v8691_v47  ;;  %v1866_v30 = vpop.f32.mrb[102].mxu1  ;;  %v1939_v34 = vpop.f32.mrb[86].mxu0  ;;  %2682 = vmatprep.subr.bf16.mxu1 %v2318_v12  ;;  %2755 = vmatprep.subr.bf16.mxu0 %v2320_v43 }
 0x233   : > { %v1867_v31 = vadd.f32 %v1866_v30, %v8694_v51  ;;  %v1940_v33 = vadd.f32 %v1939_v34, %v8694_v51  ;;  %v1868_v9 = vpop.f32.mrb[103].mxu1  ;;  %v1941_v13 = vpop.f32.mrb[87].mxu0  ;;  %2683 = vmatpush1.bf16.msra.mxu1 %v2317_v56  ;;  %2756 = vmatpush1.bf16.msra.mxu0 %v2319_v18  ;;  %v2221_v35 = vmax.f32 %v1863_v20, 0.0  ;;  %v2223_v38 = vmax.f32 %v1936_v21, 0.0 }
 0x234   : > { %v1869_v3 = vadd.f32 %v1868_v9, %v8694_v51  ;;  %v1942_v48 = vadd.f32 %v1941_v13, %v8694_v51  ;;  %v2222_v37 = vmax.f32 %v1865_v28, 0.0  ;;  %v2224_v16 = vmax.f32 %v1938_v29, 0.0 }
 0x235   : > { %v2237_v6 = vmax.f32 %v1867_v31, 0.0  ;;  %v2239_v57 = vmax.f32 %v1940_v33, 0.0 }
 0x236   : > { %v2238_v53 = vmax.f32 %v1869_v3, 0.0  ;;  %v2240_v45 = vmax.f32 %v1942_v48, 0.0  ;;  %7420 = vmatmul.mubr.msk.bf16.gmra.mrb[148].mxu1 %vm1586_vm3, %v8738_v17  ;;  %7424 = vmatmul.mubr.msk.bf16.gmra.mrb[132].mxu0 %vm1586_vm3, %v8738_v17 }
 0x237   : > { %v2333_v39 = vpack.c.bf16 %v2237_v6, %v2221_v35  ;;  %v2335_v42 = vpack.c.bf16 %v2239_v57, %v2223_v38  ;;  %2588 = vmatprep.mubr.bf16.mxu1 %v7916_v0  ;;  %2661 = vmatprep.mubr.bf16.mxu0 %v7916_v0 }
 0x238   : > { %v1872_v50 = vpop.f32.mrb[104].mxu1  ;;  %v1945_v55 = vpop.f32.mrb[88].mxu0  ;;  %v2334_v49 = vpack.c.bf16 %v2238_v53, %v2222_v37  ;;  %v2336_v54 = vpack.c.bf16 %v2240_v45, %v2224_v16 }
 0x239   : > { %v1873_v58 = vadd.f32 %v1872_v50, %v8699_v19  ;;  %v1946_v32 = vadd.f32 %v1945_v55, %v8699_v19  ;;  %v1874_v40 = vpop.f32.mrb[105].mxu1  ;;  %v1947_v59 = vpop.f32.mrb[89].mxu0 }
 0x23a   : > { %v1875_v24 = vadd.f32 %v1874_v40, %v8699_v19  ;;  %v1948_v60 = vadd.f32 %v1947_v59, %v8699_v19  ;;  %v1876_v63 = vpop.f32.mrb[106].mxu1  ;;  %v1949_v46 = vpop.f32.mrb[90].mxu0  ;;  %2684 = vmatprep.subr.bf16.mxu1 %v2334_v49  ;;  %2757 = vmatprep.subr.bf16.mxu0 %v2336_v54 }
 0x23b   : > { %v1877_v62 = vadd.f32 %v1876_v63, %v8702_v2  ;;  %v1950_v23 = vadd.f32 %v1949_v46, %v8702_v2  ;;  %v1878_v27 = vpop.f32.mrb[107].mxu1  ;;  %v1951_v52 = vpop.f32.mrb[91].mxu0  ;;  %2685 = vmatpush1.bf16.msra.mxu1 %v2333_v39  ;;  %2758 = vmatpush1.bf16.msra.mxu0 %v2335_v42  ;;  %v2253_v4 = vmax.f32 %v1873_v58, 0.0  ;;  %v2255_v7 = vmax.f32 %v1946_v32, 0.0 }
 0x23c   : > { %v1879_v1 = vadd.f32 %v1878_v27, %v8702_v2  ;;  %v1952_v14 = vadd.f32 %v1951_v52, %v8702_v2  ;;  %v2254_v18 = vmax.f32 %v1875_v24, 0.0  ;;  %v2256_v10 = vmax.f32 %v1948_v60, 0.0 }
 0x23d   : > { %v2269_v8 = vmax.f32 %v1877_v62, 0.0  ;;  %v2271_v56 = vmax.f32 %v1950_v23, 0.0 }
 0x23e   : > { %v2270_v11 = vmax.f32 %v1879_v1, 0.0  ;;  %v2272_v12 = vmax.f32 %v1952_v14, 0.0  ;;  %7421 = vmatmul.mubr.msk.bf16.gmra.mrb[152].mxu1 %vm1586_vm3, %v8754_v5  ;;  %7425 = vmatmul.mubr.msk.bf16.gmra.mrb[136].mxu0 %vm1586_vm3, %v8754_v5 }
 0x23f   : > { %v2349_v43 = vpack.c.bf16 %v2269_v8, %v2253_v4  ;;  %v2351_v20 = vpack.c.bf16 %v2271_v56, %v2255_v7  ;;  %2598 = vmatprep.mubr.bf16.mxu1 %v7916_v0  ;;  %2671 = vmatprep.mubr.bf16.mxu0 %v7916_v0 }
 0x240   : > { %v1882_v21 = vpop.f32.mrb[108].mxu1  ;;  %v1955_v44 = vpop.f32.mrb[92].mxu0  ;;  %v2350_v26 = vpack.c.bf16 %v2270_v11, %v2254_v18  ;;  %v2352_v28 = vpack.c.bf16 %v2272_v12, %v2256_v10 }
 0x241   : > { %v1883_v29 = vadd.f32 %v1882_v21, %v8707_v61  ;;  %v1956_v30 = vadd.f32 %v1955_v44, %v8707_v61  ;;  %v1884_v34 = vpop.f32.mrb[109].mxu1  ;;  %v1957_v31 = vpop.f32.mrb[93].mxu0 }
 0x242   : > { %v1885_v33 = vadd.f32 %v1884_v34, %v8707_v61  ;;  %v1958_v9 = vadd.f32 %v1957_v31, %v8707_v61  ;;  %v1886_v13 = vpop.f32.mrb[110].mxu1  ;;  %v1959_v3 = vpop.f32.mrb[94].mxu0  ;;  %2686 = vmatprep.subr.bf16.mxu1 %v2350_v26  ;;  %2759 = vmatprep.subr.bf16.mxu0 %v2352_v28 }
 0x243   : > { %v1887_v48 = vadd.f32 %v1886_v13, %v8710_v22  ;;  %v1960_v35 = vadd.f32 %v1959_v3, %v8710_v22  ;;  %v1888_v38 = vpop.f32.mrb[111].mxu1  ;;  %v1961_v6 = vpop.f32.mrb[95].mxu0  ;;  %2687 = vmatpush1.bf16.msra.mxu1 %v2349_v43  ;;  %2760 = vmatpush1.bf16.msra.mxu0 %v2351_v20  ;;  %v2285_v16 = vmax.f32 %v1883_v29, 0.0  ;;  %v2287_v53 = vmax.f32 %v1956_v30, 0.0 }
 0x244   : > { %v1889_v57 = vadd.f32 %v1888_v38, %v8710_v22  ;;  %v1962_v37 = vadd.f32 %v1961_v6, %v8710_v22  ;;  %v2286_v42 = vmax.f32 %v1885_v33, 0.0  ;;  %v2288_v50 = vmax.f32 %v1958_v9, 0.0 }
 0x245   : > { %v2301_v45 = vmax.f32 %v1887_v48, 0.0  ;;  %v2303_v39 = vmax.f32 %v1960_v35, 0.0 }
 0x246   : > { %v2302_v55 = vmax.f32 %v1889_v57, 0.0  ;;  %v2304_v49 = vmax.f32 %v1962_v37, 0.0  ;;  %7422 = vmatmul.mubr.msk.bf16.gmra.mrb[156].mxu1 %vm1586_vm3, %v8770_v25  ;;  %7426 = vmatmul.mubr.msk.bf16.gmra.mrb[140].mxu0 %vm1586_vm3, %v8770_v25 }
 0x247   : > { %v2365_v54 = vpack.c.bf16 %v2301_v45, %v2285_v16  ;;  %v2367_v58 = vpack.c.bf16 %v2303_v39, %v2287_v53  ;;  %2714 = vmatprep.mubr.bf16.mxu1 %v7916_v0  ;;  %2787 = vmatprep.mubr.bf16.mxu0 %v7916_v0 }
 0x248   : > { %v1998_v32 = vpop.f32.mrb[112].mxu1  ;;  %v2071_v40 = vpop.f32.mrb[96].mxu0  ;;  %v2366_v59 = vpack.c.bf16 %v2302_v55, %v2286_v42  ;;  %v2368_v24 = vpack.c.bf16 %v2304_v49, %v2288_v50 }
 0x249   : > { %v1999_v60 = vadd.f32 %v1998_v32, %v8683_v15  ;;  %v2072_v63 = vadd.f32 %v2071_v40, %v8683_v15  ;;  %v2000_v46 = vpop.f32.mrb[113].mxu1  ;;  %v2073_v62 = vpop.f32.mrb[97].mxu0 }
 0x24a   : > { %v2001_v23 = vadd.f32 %v2000_v46, %v8683_v15  ;;  %v2074_v27 = vadd.f32 %v2073_v62, %v8683_v15  ;;  %v2002_v52 = vpop.f32.mrb[114].mxu1  ;;  %v2075_v1 = vpop.f32.mrb[98].mxu0  ;;  %2688 = vmatprep.subr.bf16.mxu1 %v2366_v59  ;;  %2761 = vmatprep.subr.bf16.mxu0 %v2368_v24 }
 0x24b   : > { %v2003_v14 = vadd.f32 %v2002_v52, %v8686_v36  ;;  %v2076_v4 = vadd.f32 %v2075_v1, %v8686_v36  ;;  %v2004_v7 = vpop.f32.mrb[115].mxu1  ;;  %v2077_v8 = vpop.f32.mrb[99].mxu0  ;;  %2689 = vmatpush1.bf16.msra.mxu1 %v2365_v54  ;;  %2762 = vmatpush1.bf16.msra.mxu0 %v2367_v58  ;;  %v2193_v10 = vmax.f32 %v1999_v60, 0.0  ;;  %v2195_v11 = vmax.f32 %v2072_v63, 0.0 }
 0x24c   : > { %v2005_v56 = vadd.f32 %v2004_v7, %v8686_v36  ;;  %v2078_v18 = vadd.f32 %v2077_v8, %v8686_v36  ;;  %v2194_v20 = vmax.f32 %v2001_v23, 0.0  ;;  %v2196_v21 = vmax.f32 %v2074_v27, 0.0 }
 0x24d   : > { %v2209_v12 = vmax.f32 %v2003_v14, 0.0  ;;  %v2211_v43 = vmax.f32 %v2076_v4, 0.0 }
 0x24e   : > { %v2210_v44 = vmax.f32 %v2005_v56, 0.0  ;;  %v2212_v26 = vmax.f32 %v2078_v18, 0.0  ;;  %7427 = vmatmul.mubr.msk.bf16.vlgmr.msra.gmra.mrb[160].mxu1 %vm1586_vm3, %v8722_v41  ;;  %7431 = vmatmul.mubr.msk.bf16.vlgmr.msra.gmra.mrb[144].mxu0 %vm1586_vm3, %v8722_v41 }
 0x24f   : > { %v2321_v28 = vpack.c.bf16 %v2209_v12, %v2193_v10  ;;  %v2323_v29 = vpack.c.bf16 %v2211_v43, %v2195_v11  ;;  %2724 = vmatprep.mubr.bf16.mxu1 %v7916_v0  ;;  %2797 = vmatprep.mubr.bf16.mxu0 %v7916_v0 }
 0x250   : > { %v2008_v30 = vpop.f32.mrb[116].mxu1  ;;  %v2081_v34 = vpop.f32.mrb[100].mxu0  ;;  %v2322_v31 = vpack.c.bf16 %v2210_v44, %v2194_v20  ;;  %v2324_v33 = vpack.c.bf16 %v2212_v26, %v2196_v21 }
 0x251   : > { %v2009_v9 = vadd.f32 %v2008_v30, %v8691_v47  ;;  %v2082_v13 = vadd.f32 %v2081_v34, %v8691_v47  ;;  %v2010_v3 = vpop.f32.mrb[117].mxu1  ;;  %v2083_v48 = vpop.f32.mrb[101].mxu0 }
 0x252   : > { %v2011_v35 = vadd.f32 %v2010_v3, %v8691_v47  ;;  %v2084_v38 = vadd.f32 %v2083_v48, %v8691_v47  ;;  %v2012_v6 = vpop.f32.mrb[118].mxu1  ;;  %v2085_v57 = vpop.f32.mrb[102].mxu0  ;;  %2828 = vmatprep.subr.bf16.mxu1 %v2322_v31  ;;  %2901 = vmatprep.subr.bf16.mxu0 %v2324_v33 }
 0x253   : > { %v2013_v37 = vadd.f32 %v2012_v6, %v8694_v51  ;;  %v2086_v16 = vadd.f32 %v2085_v57, %v8694_v51  ;;  %v2014_v53 = vpop.f32.mrb[119].mxu1  ;;  %v2087_v45 = vpop.f32.mrb[103].mxu0  ;;  %2829 = vmatpush1.bf16.msra.mxu1 %v2321_v28  ;;  %2902 = vmatpush1.bf16.msra.mxu0 %v2323_v29  ;;  %v2225_v50 = vmax.f32 %v2009_v9, 0.0  ;;  %v2227_v55 = vmax.f32 %v2082_v13, 0.0 }
 0x254   : > { %v2015_v39 = vadd.f32 %v2014_v53, %v8694_v51  ;;  %v2088_v42 = vadd.f32 %v2087_v45, %v8694_v51  ;;  %v2226_v58 = vmax.f32 %v2011_v35, 0.0  ;;  %v2228_v32 = vmax.f32 %v2084_v38, 0.0 }
 0x255   : > { %v2241_v49 = vmax.f32 %v2013_v37, 0.0  ;;  %v2243_v54 = vmax.f32 %v2086_v16, 0.0 }
 0x256   : > { %v2242_v40 = vmax.f32 %v2015_v39, 0.0  ;;  %v2244_v59 = vmax.f32 %v2088_v42, 0.0  ;;  %7428 = vmatmul.mubr.msk.bf16.gmra.mrb[164].mxu1 %vm1586_vm3, %v8738_v17  ;;  %7432 = vmatmul.mubr.msk.bf16.gmra.mrb[148].mxu0 %vm1586_vm3, %v8738_v17 }
 0x257   : > { %v2337_v24 = vpack.c.bf16 %v2241_v49, %v2225_v50  ;;  %v2339_v60 = vpack.c.bf16 %v2243_v54, %v2227_v55  ;;  %2734 = vmatprep.mubr.bf16.mxu1 %v7916_v0  ;;  %2807 = vmatprep.mubr.bf16.mxu0 %v7916_v0 }
 0x258   : > { %v2018_v63 = vpop.f32.mrb[120].mxu1  ;;  %v2091_v46 = vpop.f32.mrb[104].mxu0  ;;  %v2338_v62 = vpack.c.bf16 %v2242_v40, %v2226_v58  ;;  %v2340_v23 = vpack.c.bf16 %v2244_v59, %v2228_v32 }
 0x259   : > { %v2019_v27 = vadd.f32 %v2018_v63, %v8699_v19  ;;  %v2092_v52 = vadd.f32 %v2091_v46, %v8699_v19  ;;  %v2020_v1 = vpop.f32.mrb[121].mxu1  ;;  %v2093_v14 = vpop.f32.mrb[105].mxu0 }
 0x25a   : > { %v2021_v4 = vadd.f32 %v2020_v1, %v8699_v19  ;;  %v2094_v7 = vadd.f32 %v2093_v14, %v8699_v19  ;;  %v2022_v8 = vpop.f32.mrb[122].mxu1  ;;  %v2095_v56 = vpop.f32.mrb[106].mxu0  ;;  %2830 = vmatprep.subr.bf16.mxu1 %v2338_v62  ;;  %2903 = vmatprep.subr.bf16.mxu0 %v2340_v23 }
 0x25b   : > { %v2023_v18 = vadd.f32 %v2022_v8, %v8702_v2  ;;  %v2096_v10 = vadd.f32 %v2095_v56, %v8702_v2  ;;  %v2024_v11 = vpop.f32.mrb[123].mxu1  ;;  %v2097_v12 = vpop.f32.mrb[107].mxu0  ;;  %2831 = vmatpush1.bf16.msra.mxu1 %v2337_v24  ;;  %2904 = vmatpush1.bf16.msra.mxu0 %v2339_v60  ;;  %v2257_v21 = vmax.f32 %v2019_v27, 0.0  ;;  %v2259_v44 = vmax.f32 %v2092_v52, 0.0 }
 0x25c   : > { %v2025_v43 = vadd.f32 %v2024_v11, %v8702_v2  ;;  %v2098_v20 = vadd.f32 %v2097_v12, %v8702_v2  ;;  %v2258_v29 = vmax.f32 %v2021_v4, 0.0  ;;  %v2260_v30 = vmax.f32 %v2094_v7, 0.0 }
 0x25d   : > { %v2273_v26 = vmax.f32 %v2023_v18, 0.0  ;;  %v2275_v28 = vmax.f32 %v2096_v10, 0.0 }
 0x25e   : > { %v2274_v34 = vmax.f32 %v2025_v43, 0.0  ;;  %v2276_v31 = vmax.f32 %v2098_v20, 0.0  ;;  %7429 = vmatmul.mubr.msk.bf16.gmra.mrb[168].mxu1 %vm1586_vm3, %v8754_v5  ;;  %7433 = vmatmul.mubr.msk.bf16.gmra.mrb[152].mxu0 %vm1586_vm3, %v8754_v5 }
 0x25f   : > { %v2353_v33 = vpack.c.bf16 %v2273_v26, %v2257_v21  ;;  %v2355_v9 = vpack.c.bf16 %v2275_v28, %v2259_v44  ;;  %2744 = vmatprep.mubr.bf16.mxu1 %v7916_v0  ;;  %2817 = vmatprep.mubr.bf16.mxu0 %v7916_v0 }
 0x260   : > { %v2028_v13 = vpop.f32.mrb[124].mxu1  ;;  %v2101_v3 = vpop.f32.mrb[108].mxu0  ;;  %v2354_v48 = vpack.c.bf16 %v2274_v34, %v2258_v29  ;;  %v2356_v35 = vpack.c.bf16 %v2276_v31, %v2260_v30 }
 0x261   : > { %v2029_v38 = vadd.f32 %v2028_v13, %v8707_v61  ;;  %v2102_v6 = vadd.f32 %v2101_v3, %v8707_v61  ;;  %v2030_v57 = vpop.f32.mrb[125].mxu1  ;;  %v2103_v37 = vpop.f32.mrb[109].mxu0 }
 0x262   : > { %v2031_v16 = vadd.f32 %v2030_v57, %v8707_v61  ;;  %v2104_v53 = vadd.f32 %v2103_v37, %v8707_v61  ;;  %v2032_v45 = vpop.f32.mrb[126].mxu1  ;;  %v2105_v39 = vpop.f32.mrb[110].mxu0  ;;  %2832 = vmatprep.subr.bf16.mxu1 %v2354_v48  ;;  %2905 = vmatprep.subr.bf16.mxu0 %v2356_v35 }
 0x263   : > { %v2033_v42 = vadd.f32 %v2032_v45, %v8710_v22  ;;  %v2106_v50 = vadd.f32 %v2105_v39, %v8710_v22  ;;  %v2034_v55 = vpop.f32.mrb[127].mxu1  ;;  %v2107_v49 = vpop.f32.mrb[111].mxu0  ;;  %2833 = vmatpush1.bf16.msra.mxu1 %v2353_v33  ;;  %2906 = vmatpush1.bf16.msra.mxu0 %v2355_v9  ;;  %v2289_v32 = vmax.f32 %v2029_v38, 0.0  ;;  %v2291_v40 = vmax.f32 %v2102_v6, 0.0 }
 0x264   : > { %v2035_v54 = vadd.f32 %v2034_v55, %v8710_v22  ;;  %v2108_v58 = vadd.f32 %v2107_v49, %v8710_v22  ;;  %v2290_v60 = vmax.f32 %v2031_v16, 0.0  ;;  %v2292_v63 = vmax.f32 %v2104_v53, 0.0 }
 0x265   : > { %v2305_v59 = vmax.f32 %v2033_v42, 0.0  ;;  %v2307_v24 = vmax.f32 %v2106_v50, 0.0 }
 0x266   : > { %v2306_v46 = vmax.f32 %v2035_v54, 0.0  ;;  %v2308_v62 = vmax.f32 %v2108_v58, 0.0  ;;  %7430 = vmatmul.mubr.msk.bf16.gmra.mrb[172].mxu1 %vm1586_vm3, %v8770_v25  ;;  %7434 = vmatmul.mubr.msk.bf16.gmra.mrb[156].mxu0 %vm1586_vm3, %v8770_v25 }
 0x267   : > { %v2369_v23 = vpack.c.bf16 %v2305_v59, %v2289_v32  ;;  %v2371_v27 = vpack.c.bf16 %v2307_v24, %v2291_v40  ;;  %2860 = vmatprep.mubr.bf16.mxu1 %v7916_v0  ;;  %2933 = vmatprep.mubr.bf16.mxu0 %v7916_v0 }
 0x268   : > { %v2144_v52 = vpop.f32.mrb[128].mxu1  ;;  %v2370_v1 = vpack.c.bf16 %v2306_v46, %v2290_v60  ;;  %v2372_v14 = vpack.c.bf16 %v2308_v62, %v2292_v63 }
 0x269   : > { %v2145_v4 = vadd.f32 %v2144_v52, %v8683_v15  ;;  %v2146_v7 = vpop.f32.mrb[129].mxu1 }
 0x26a   : > { %v2147_v8 = vadd.f32 %v2146_v7, %v8683_v15  ;;  %v2148_v56 = vpop.f32.mrb[130].mxu1  ;;  %2834 = vmatprep.subr.bf16.mxu1 %v2370_v1  ;;  %2907 = vmatprep.subr.bf16.mxu0 %v2372_v14  ;;  %v8946_v14 = vpop.permute.xlu1 %2398 }
 0x26b   : > { %v2149_v18 = vadd.f32 %v2148_v56, %v8686_v36  ;;  %v2150_v10 = vpop.f32.mrb[131].mxu1  ;;  %2835 = vmatpush1.bf16.msra.mxu1 %v2369_v23  ;;  %2908 = vmatpush1.bf16.msra.mxu0 %v2371_v27  ;;  %v2197_v12 = vmax.f32 %v2145_v4, 0.0 }
 0x26c   : > { %v2151_v11 = vadd.f32 %v2150_v10, %v8686_v36  ;;  %v2198_v20 = vmax.f32 %v2147_v8, 0.0 }
 0x26d   : > { %v2213_v43 = vmax.f32 %v2149_v18, 0.0 }
 0x26e   : > { %v2214_v21 = vmax.f32 %v2151_v11, 0.0  ;;  %7435 = vmatmul.mubr.msk.bf16.vlgmr.msra.gmra.mrb[176].mxu1 %vm1586_vm3, %v8722_v41  ;;  %7439 = vmatmul.mubr.msk.bf16.vlgmr.msra.gmra.mrb[160].mxu0 %vm1586_vm3, %v8722_v41 }
 0x26f   : > { %v2325_v15 = vpack.c.bf16 %v2213_v43, %v2197_v12  ;;  %2870 = vmatprep.mubr.bf16.mxu1 %v7916_v0  ;;  %2943 = vmatprep.mubr.bf16.mxu0 %v7916_v0 }
 0x270   : > { %v2154_v44 = vpop.f32.mrb[132].mxu1  ;;  %v2326_v26 = vpack.c.bf16 %v2214_v21, %v2198_v20 }
 0x271   : > { %v2155_v28 = vadd.f32 %v2154_v44, %v8691_v47  ;;  %v2156_v36 = vpop.f32.mrb[133].mxu1  ;;  %v8954_v44 = vpop.permute.xlu1 %2408 }
 0x272   : > { %v2157_v29 = vadd.f32 %v2156_v36, %v8691_v47  ;;  %v2158_v30 = vpop.f32.mrb[134].mxu1  ;;  %2974 = vmatprep.subr.bf16.mxu1 %v2326_v26 }
 0x273   : > { %v2159_v34 = vadd.f32 %v2158_v30, %v8694_v51  ;;  %v2160_v31 = vpop.f32.mrb[135].mxu1  ;;  %2975 = vmatpush1.bf16.msra.mxu1 %v2325_v15  ;;  %v2229_v9 = vmax.f32 %v2155_v28, 0.0 }
 0x274   : > { %v2161_v33 = vadd.f32 %v2160_v31, %v8694_v51  ;;  %v2230_v3 = vmax.f32 %v2157_v29, 0.0 }
 0x275   : > { %v2245_v13 = vmax.f32 %v2159_v34, 0.0 }
 0x276   : > { %v2246_v48 = vmax.f32 %v2161_v33, 0.0  ;;  %7436 = vmatmul.mubr.msk.bf16.gmra.mrb[180].mxu1 %vm1586_vm3, %v8738_v17  ;;  %7440 = vmatmul.mubr.msk.bf16.gmra.mrb[164].mxu0 %vm1586_vm3, %v8738_v17 }
 0x277   : > { %v2341_v35 = vpack.c.bf16 %v2245_v13, %v2229_v9  ;;  %2880 = vmatprep.mubr.bf16.mxu1 %v7916_v0  ;;  %2953 = vmatprep.mubr.bf16.mxu0 %v7916_v0 }
 0x278   : > { %v2164_v47 = vpop.f32.mrb[136].mxu1  ;;  %v2342_v38 = vpack.c.bf16 %v2246_v48, %v2230_v3 }
 0x279   : > { %v2165_v6 = vadd.f32 %v2164_v47, %v8699_v19  ;;  %v2166_v51 = vpop.f32.mrb[137].mxu1 }
 0x27a   : > { %v2167_v57 = vadd.f32 %v2166_v51, %v8699_v19  ;;  %v2168_v37 = vpop.f32.mrb[138].mxu1  ;;  %2976 = vmatprep.subr.bf16.mxu1 %v2342_v38 }
 0x27b   : > { %v2169_v16 = vadd.f32 %v2168_v37, %v8702_v2  ;;  %v2170_v53 = vpop.f32.mrb[139].mxu1  ;;  %2977 = vmatpush1.bf16.msra.mxu1 %v2341_v35  ;;  %v2261_v39 = vmax.f32 %v2165_v6, 0.0  ;;  %v8962_v6 = vpop.permute.xlu1 %2418 }
 0x27c   : > { %v2171_v45 = vadd.f32 %v2170_v53, %v8702_v2  ;;  %v2262_v50 = vmax.f32 %v2167_v57, 0.0 }
 0x27d   : > { %v2277_v42 = vmax.f32 %v2169_v16, 0.0 }
 0x27e   : > { %v2278_v55 = vmax.f32 %v2171_v45, 0.0  ;;  %7437 = vmatmul.mubr.msk.bf16.gmra.mrb[184].mxu1 %vm1586_vm3, %v8754_v5  ;;  %7441 = vmatmul.mubr.msk.bf16.gmra.mrb[168].mxu0 %vm1586_vm3, %v8754_v5 }
 0x27f   : > { %v2357_v49 = vpack.c.bf16 %v2277_v42, %v2261_v39  ;;  %2890 = vmatprep.mubr.bf16.mxu1 %v7916_v0  ;;  %2963 = vmatprep.mubr.bf16.mxu0 %v7916_v0 }
 0x280   : > { %v2174_v19 = vpop.f32.mrb[140].mxu1  ;;  %v2358_v54 = vpack.c.bf16 %v2278_v55, %v2262_v50 }
 0x281   : > { %v2175_v58 = vadd.f32 %v2174_v19, %v8707_v61  ;;  %v2176_v2 = vpop.f32.mrb[141].mxu1 }
 0x282   : > { %v2177_v32 = vadd.f32 %v2176_v2, %v8707_v61  ;;  %v2178_v40 = vpop.f32.mrb[142].mxu1  ;;  %2978 = vmatprep.subr.bf16.mxu1 %v2358_v54 }
 0x283   : > { %v2179_v59 = vadd.f32 %v2178_v40, %v8710_v22  ;;  %v2180_v24 = vpop.f32.mrb[143].mxu1  ;;  %2979 = vmatpush1.bf16.msra.mxu1 %v2357_v49  ;;  %v2293_v63 = vmax.f32 %v2175_v58, 0.0 }
 0x284   : > { %v2181_v60 = vadd.f32 %v2180_v24, %v8710_v22  ;;  %v2294_v62 = vmax.f32 %v2177_v32, 0.0  ;;  %v8943_v22 = vpop.permute.xlu0 %2393  ;;  %v8970_v32 = vpop.permute.xlu1 %2428 }
 0x285   : > { %v2309_v46 = vmax.f32 %v2179_v59, 0.0 }
 0x286   : > { %v2310_v23 = vmax.f32 %v2181_v60, 0.0  ;;  %7438 = vmatmul.mubr.msk.bf16.gmra.mrb[188].mxu1 %vm1586_vm3, %v8770_v25  ;;  %7442 = vmatmul.mubr.msk.bf16.gmra.mrb[172].mxu0 %vm1586_vm3, %v8770_v25 }
 0x287   : > { %v2373_v27 = vpack.c.bf16 %v2309_v46, %v2293_v63  ;;  %3006 = vmatprep.mubr.bf16.mxu1 %v7916_v0  ;;  %3447 = vmatprep.mubr.bf16.mxu0 %v7916_v0 }
 0x288   : > { %v2374_v61 = vpack.c.bf16 %v2310_v23, %v2294_v62  ;;  %v8951_v12 = vpop.permute.xlu0 %2403 }
 0x28a   : > { %2980 = vmatprep.subr.bf16.mxu1 %v2374_v61 }
 0x28b   : > { %2981 = vmatpush1.bf16.msra.mxu1 %v2373_v27 }
 0x28c   : > { %v8959_v3 = vpop.permute.xlu0 %2413 }
 0x28e   : > { %7443 = vmatmul.mubr.msk.bf16.vlgmr.msra.gmra.mrb[192].mxu1 %vm1586_vm3, %v8722_v41 }
 0x28f   : > { %3016 = vmatprep.mubr.bf16.mxu1 %v7916_v0 }
 0x290   : > { %v8967_v49 = vpop.permute.xlu0 %2423 }
 0x296   : > { %7444 = vmatmul.mubr.msk.bf16.gmra.mrb[196].mxu1 %vm1586_vm3, %v8738_v17 }
 0x297   : > { %3026 = vmatprep.mubr.bf16.mxu1 %v7916_v0 }
 0x29e   : > { %7445 = vmatmul.mubr.msk.bf16.gmra.mrb[200].mxu1 %vm1586_vm3, %v8754_v5 }
 0x29f   : > { %3036 = vmatprep.mubr.bf16.mxu1 %v7916_v0 }
 0x2a6   : > { %7446 = vmatmul.mubr.msk.bf16.gmra.mrb[204].mxu1 %vm1586_vm3, %v8770_v25 }
 0x2a7   : > { %3560 = vmatprep.mubr.bf16.mxu1 %v7916_v0 }
 0x2e1   : > { %v2497_v41 = vpop.f32.mrb[112].mxu0 }
 0x2e2   : > { %v2498_v52 = vadd.f32 %v2497_v41, %v8943_v22  ;;  %v2499_v1 = vpop.f32.mrb[113].mxu0 }
 0x2e3   : > { %v2500_v17 = vadd.f32 %v2499_v1, %v8943_v22  ;;  %v2501_v4 = vpop.f32.mrb[114].mxu0 }
 0x2e4   : > { %v2502_v5 = vadd.f32 %v2501_v4, %v8946_v14  ;;  %v2503_v7 = vpop.f32.mrb[115].mxu0  ;;  %v3047_v56 = vmax.f32 %v2498_v52, 0.0 }
 0x2e5   : > { %v2504_v8 = vadd.f32 %v2503_v7, %v8946_v14  ;;  %v3048_v18 = vmax.f32 %v2500_v17, 0.0 }
 0x2e6   : > { %v3063_v25 = vmax.f32 %v2502_v5, 0.0 }
 0x2e7   : > { %v3064_v10 = vmax.f32 %v2504_v8, 0.0 }
 0x2e8   : > { %v3175_v11 = vpack.c.bf16 %v3063_v25, %v3047_v56 }
 0x2e9   : > { %v2507_v43 = vpop.f32.mrb[116].mxu0  ;;  %v3176_v20 = vpack.c.bf16 %v3064_v10, %v3048_v18  ;;  %v8982_v10 = vld [vmem:[%s10957_s7] sm:$0xff]  }
 0x2ea   : > { %v2508_v21 = vadd.f32 %v2507_v43, %v8951_v12  ;;  %v2509_v15 = vpop.f32.mrb[117].mxu0 }
 0x2eb   : > { %v2510_v26 = vadd.f32 %v2509_v15, %v8951_v12  ;;  %v2511_v28 = vpop.f32.mrb[118].mxu0  ;;  %3415 = vmatprep.subr.bf16.mxu0 %v3176_v20 }
 0x2ec   : > { %v2512_v36 = vadd.f32 %v2511_v28, %v8954_v44  ;;  %v2513_v29 = vpop.f32.mrb[119].mxu0  ;;  %3416 = vmatpush1.bf16.msra.mxu0 %v3175_v11  ;;  %v3079_v34 = vmax.f32 %v2508_v21, 0.0 }
 0x2ed   : > { %v2514_v30 = vadd.f32 %v2513_v29, %v8954_v44  ;;  %v3080_v33 = vmax.f32 %v2510_v26, 0.0 }
 0x2ee   : > { %v3095_v31 = vmax.f32 %v2512_v36, 0.0 }
 0x2ef   : > { %v3096_v9 = vmax.f32 %v2514_v30, 0.0 }
 0x2f0   : > { %v3191_v13 = vpack.c.bf16 %v3095_v31, %v3079_v34 }
 0x2f1   : > { %v2517_v48 = vpop.f32.mrb[120].mxu0  ;;  %v3192_v35 = vpack.c.bf16 %v3096_v9, %v3080_v33 }
 0x2f2   : > { %v2518_v47 = vadd.f32 %v2517_v48, %v8959_v3  ;;  %v2519_v38 = vpop.f32.mrb[121].mxu0 }
 0x2f3   : > { %v2520_v51 = vadd.f32 %v2519_v38, %v8959_v3  ;;  %v2521_v57 = vpop.f32.mrb[122].mxu0  ;;  %3417 = vmatprep.subr.bf16.mxu0 %v3192_v35 }
 0x2f4   : > { %v2522_v37 = vadd.f32 %v2521_v57, %v8962_v6  ;;  %v2523_v16 = vpop.f32.mrb[123].mxu0  ;;  %3418 = vmatpush1.bf16.msra.mxu0 %v3191_v13  ;;  %v3111_v45 = vmax.f32 %v2518_v47, 0.0 }
 0x2f5   : > { %v2524_v53 = vadd.f32 %v2523_v16, %v8962_v6  ;;  %v3112_v42 = vmax.f32 %v2520_v51, 0.0 }
 0x2f6   : > { %v3127_v39 = vmax.f32 %v2522_v37, 0.0 }
 0x2f7   : > { %v3128_v50 = vmax.f32 %v2524_v53, 0.0 }
 0x2f8   : > { %v3207_v55 = vpack.c.bf16 %v3127_v39, %v3111_v45 }
 0x2f9   : > { %v2527_v19 = vpop.f32.mrb[124].mxu0  ;;  %v3208_v54 = vpack.c.bf16 %v3128_v50, %v3112_v42 }
 0x2fa   : > { %v2528_v58 = vadd.f32 %v2527_v19, %v8967_v49  ;;  %v2529_v2 = vpop.f32.mrb[125].mxu0 }
 0x2fb   : > { %v2530_v40 = vadd.f32 %v2529_v2, %v8967_v49  ;;  %v2531_v59 = vpop.f32.mrb[126].mxu0  ;;  %3419 = vmatprep.subr.bf16.mxu0 %v3208_v54 }
 0x2fc   : > { %v2532_v24 = vadd.f32 %v2531_v59, %v8970_v32  ;;  %v2533_v60 = vpop.f32.mrb[127].mxu0  ;;  %3420 = vmatpush1.bf16.msra.mxu0 %v3207_v55  ;;  %v3143_v46 = vmax.f32 %v2528_v58, 0.0  ;;  %v8998_v55 = vld [vmem:[%s10957_s7 + $0x8] sm:$0xff]  }
 0x2fd   : > { %v2534_v63 = vadd.f32 %v2533_v60, %v8970_v32  ;;  %v3144_v23 = vmax.f32 %v2530_v40, 0.0 }
 0x2fe   : > { %v3159_v62 = vmax.f32 %v2532_v24, 0.0 }
 0x2ff   : > { %v3160_v27 = vmax.f32 %v2534_v63, 0.0 }
 0x300   : > { %v3223_v61 = vpack.c.bf16 %v3159_v62, %v3143_v46 }
 0x301   : > { %v2570_v41 = vpop.f32.mrb[144].mxu1  ;;  %v2643_v52 = vpop.f32.mrb[128].mxu0  ;;  %v3224_v1 = vpack.c.bf16 %v3160_v27, %v3144_v23 }
 0x302   : > { %v2571_v17 = vadd.f32 %v2570_v41, %v8943_v22  ;;  %v2644_v4 = vadd.f32 %v2643_v52, %v8943_v22  ;;  %v2572_v5 = vpop.f32.mrb[145].mxu1  ;;  %v2645_v7 = vpop.f32.mrb[129].mxu0 }
 0x303   : > { %v2573_v8 = vadd.f32 %v2572_v5, %v8943_v22  ;;  %v2646_v56 = vadd.f32 %v2645_v7, %v8943_v22  ;;  %v2574_v25 = vpop.f32.mrb[146].mxu1  ;;  %v2647_v18 = vpop.f32.mrb[130].mxu0  ;;  %3421 = vmatprep.subr.bf16.mxu0 %v3224_v1 }
 0x304   : > { %v2575_v11 = vadd.f32 %v2574_v25, %v8946_v14  ;;  %v2648_v43 = vadd.f32 %v2647_v18, %v8946_v14  ;;  %v2576_v20 = vpop.f32.mrb[147].mxu1  ;;  %v2649_v21 = vpop.f32.mrb[131].mxu0  ;;  %3422 = vmatpush1.bf16.msra.mxu0 %v3223_v61  ;;  %v3049_v28 = vmax.f32 %v2571_v17, 0.0  ;;  %v3051_v36 = vmax.f32 %v2644_v4, 0.0 }
 0x305   : > { %v2577_v15 = vadd.f32 %v2576_v20, %v8946_v14  ;;  %v2650_v26 = vadd.f32 %v2649_v21, %v8946_v14  ;;  %v3050_v34 = vmax.f32 %v2573_v8, 0.0  ;;  %v3052_v31 = vmax.f32 %v2646_v56, 0.0  ;;  %v9014_v21 = vld [vmem:[%s10957_s7 + $0x10] sm:$0xff]  }
 0x306   : > { %v3065_v29 = vmax.f32 %v2575_v11, 0.0  ;;  %v3067_v30 = vmax.f32 %v2648_v43, 0.0 }
 0x307   : > { %v3066_v33 = vmax.f32 %v2577_v15, 0.0  ;;  %v3068_v9 = vmax.f32 %v2650_v26, 0.0  ;;  %7455 = vmatmul.mubr.msk.bf16.vlgmr.msra.gmra.mrb[176].mxu0 %vm1586_vm3, %v8982_v10 }
 0x308   : > { %v3177_v13 = vpack.c.bf16 %v3065_v29, %v3049_v28  ;;  %v3179_v48 = vpack.c.bf16 %v3067_v30, %v3051_v36  ;;  %3457 = vmatprep.mubr.bf16.mxu0 %v7916_v0 }
 0x309   : > { %v2580_v35 = vpop.f32.mrb[148].mxu1  ;;  %v2653_v47 = vpop.f32.mrb[132].mxu0  ;;  %v3178_v38 = vpack.c.bf16 %v3066_v33, %v3050_v34  ;;  %v3180_v51 = vpack.c.bf16 %v3068_v9, %v3052_v31 }
 0x30a   : > { %v2581_v57 = vadd.f32 %v2580_v35, %v8951_v12  ;;  %v2654_v37 = vadd.f32 %v2653_v47, %v8951_v12  ;;  %v2582_v16 = vpop.f32.mrb[149].mxu1  ;;  %v2655_v53 = vpop.f32.mrb[133].mxu0 }
 0x30b   : > { %v2583_v45 = vadd.f32 %v2582_v16, %v8951_v12  ;;  %v2656_v39 = vadd.f32 %v2655_v53, %v8951_v12  ;;  %v2584_v42 = vpop.f32.mrb[150].mxu1  ;;  %v2657_v50 = vpop.f32.mrb[134].mxu0  ;;  %3528 = vmatprep.subr.bf16.mxu1 %v3178_v38  ;;  %3641 = vmatprep.subr.bf16.mxu0 %v3180_v51 }
 0x30c   : > { %v2585_v19 = vadd.f32 %v2584_v42, %v8954_v44  ;;  %v2658_v54 = vadd.f32 %v2657_v50, %v8954_v44  ;;  %v2586_v58 = vpop.f32.mrb[151].mxu1  ;;  %v2659_v2 = vpop.f32.mrb[135].mxu0  ;;  %3529 = vmatpush1.bf16.msra.mxu1 %v3177_v13  ;;  %3642 = vmatpush1.bf16.msra.mxu0 %v3179_v48  ;;  %v3081_v24 = vmax.f32 %v2581_v57, 0.0  ;;  %v3083_v60 = vmax.f32 %v2654_v37, 0.0 }
 0x30d   : > { %v2587_v40 = vadd.f32 %v2586_v58, %v8954_v44  ;;  %v2660_v59 = vadd.f32 %v2659_v2, %v8954_v44  ;;  %v3082_v62 = vmax.f32 %v2583_v45, 0.0  ;;  %v3084_v23 = vmax.f32 %v2656_v39, 0.0 }
 0x30e   : > { %v3097_v63 = vmax.f32 %v2585_v19, 0.0  ;;  %v3099_v46 = vmax.f32 %v2658_v54, 0.0 }
 0x30f   : > { %v3098_v27 = vmax.f32 %v2587_v40, 0.0  ;;  %v3100_v61 = vmax.f32 %v2660_v59, 0.0  ;;  %7456 = vmatmul.mubr.msk.bf16.gmra.mrb[180].mxu0 %vm1586_vm3, %v8998_v55  ;;  %v9030_v40 = vld [vmem:[%s10957_s7 + $0x18] sm:$0xff]  }
 0x310   : > { %v3193_v41 = vpack.c.bf16 %v3097_v63, %v3081_v24  ;;  %v3195_v52 = vpack.c.bf16 %v3099_v46, %v3083_v60  ;;  %3467 = vmatprep.mubr.bf16.mxu0 %v7916_v0 }
 0x311   : > { %v2590_v1 = vpop.f32.mrb[152].mxu1  ;;  %v2663_v17 = vpop.f32.mrb[136].mxu0  ;;  %v3194_v4 = vpack.c.bf16 %v3098_v27, %v3082_v62  ;;  %v3196_v5 = vpack.c.bf16 %v3100_v61, %v3084_v23 }
 0x312   : > { %v2591_v7 = vadd.f32 %v2590_v1, %v8959_v3  ;;  %v2664_v8 = vadd.f32 %v2663_v17, %v8959_v3  ;;  %v2592_v56 = vpop.f32.mrb[153].mxu1  ;;  %v2665_v25 = vpop.f32.mrb[137].mxu0 }
 0x313   : > { %v2593_v18 = vadd.f32 %v2592_v56, %v8959_v3  ;;  %v2666_v11 = vadd.f32 %v2665_v25, %v8959_v3  ;;  %v2594_v43 = vpop.f32.mrb[154].mxu1  ;;  %v2667_v20 = vpop.f32.mrb[138].mxu0  ;;  %3530 = vmatprep.subr.bf16.mxu1 %v3194_v4  ;;  %3643 = vmatprep.subr.bf16.mxu0 %v3196_v5 }
 0x314   : > { %v2595_v15 = vadd.f32 %v2594_v43, %v8962_v6  ;;  %v2668_v26 = vadd.f32 %v2667_v20, %v8962_v6  ;;  %v2596_v28 = vpop.f32.mrb[155].mxu1  ;;  %v2669_v36 = vpop.f32.mrb[139].mxu0  ;;  %3531 = vmatpush1.bf16.msra.mxu1 %v3193_v41  ;;  %3644 = vmatpush1.bf16.msra.mxu0 %v3195_v52  ;;  %v3113_v34 = vmax.f32 %v2591_v7, 0.0  ;;  %v3115_v31 = vmax.f32 %v2664_v8, 0.0 }
 0x315   : > { %v2597_v29 = vadd.f32 %v2596_v28, %v8962_v6  ;;  %v2670_v30 = vadd.f32 %v2669_v36, %v8962_v6  ;;  %v3114_v13 = vmax.f32 %v2593_v18, 0.0  ;;  %v3116_v48 = vmax.f32 %v2666_v11, 0.0 }
 0x316   : > { %v3129_v33 = vmax.f32 %v2595_v15, 0.0  ;;  %v3131_v9 = vmax.f32 %v2668_v26, 0.0 }
 0x317   : > { %v3130_v35 = vmax.f32 %v2597_v29, 0.0  ;;  %v3132_v47 = vmax.f32 %v2670_v30, 0.0  ;;  %7457 = vmatmul.mubr.msk.bf16.gmra.mrb[184].mxu0 %vm1586_vm3, %v9014_v21  ;;  %v9046_v30 = vld [vmem:[%s10957_s7 + $0x20] sm:$0xff]  }
 0x318   : > { %v3209_v38 = vpack.c.bf16 %v3129_v33, %v3113_v34  ;;  %v3211_v51 = vpack.c.bf16 %v3131_v9, %v3115_v31  ;;  %3477 = vmatprep.mubr.bf16.mxu0 %v7916_v0 }
 0x319   : > { %v2600_v57 = vpop.f32.mrb[156].mxu1  ;;  %v2673_v37 = vpop.f32.mrb[140].mxu0  ;;  %v3210_v16 = vpack.c.bf16 %v3130_v35, %v3114_v13  ;;  %v3212_v53 = vpack.c.bf16 %v3132_v47, %v3116_v48 }
 0x31a   : > { %v2601_v45 = vadd.f32 %v2600_v57, %v8967_v49  ;;  %v2674_v39 = vadd.f32 %v2673_v37, %v8967_v49  ;;  %v2602_v42 = vpop.f32.mrb[157].mxu1  ;;  %v2675_v50 = vpop.f32.mrb[141].mxu0 }
 0x31b   : > { %v2603_v19 = vadd.f32 %v2602_v42, %v8967_v49  ;;  %v2676_v54 = vadd.f32 %v2675_v50, %v8967_v49  ;;  %v2604_v58 = vpop.f32.mrb[158].mxu1  ;;  %v2677_v2 = vpop.f32.mrb[142].mxu0  ;;  %3532 = vmatprep.subr.bf16.mxu1 %v3210_v16  ;;  %3645 = vmatprep.subr.bf16.mxu0 %v3212_v53 }
 0x31c   : > { %v2605_v59 = vadd.f32 %v2604_v58, %v8970_v32  ;;  %v2678_v24 = vadd.f32 %v2677_v2, %v8970_v32  ;;  %v2606_v60 = vpop.f32.mrb[159].mxu1  ;;  %v2679_v63 = vpop.f32.mrb[143].mxu0  ;;  %3533 = vmatpush1.bf16.msra.mxu1 %v3209_v38  ;;  %3646 = vmatpush1.bf16.msra.mxu0 %v3211_v51  ;;  %v3145_v23 = vmax.f32 %v2601_v45, 0.0  ;;  %v3147_v27 = vmax.f32 %v2674_v39, 0.0 }
 0x31d   : > { %v2607_v46 = vadd.f32 %v2606_v60, %v8970_v32  ;;  %v2680_v62 = vadd.f32 %v2679_v63, %v8970_v32  ;;  %v3146_v52 = vmax.f32 %v2603_v19, 0.0  ;;  %v3148_v1 = vmax.f32 %v2676_v54, 0.0 }
 0x31e   : > { %v3161_v61 = vmax.f32 %v2605_v59, 0.0  ;;  %v3163_v41 = vmax.f32 %v2678_v24, 0.0 }
 0x31f   : > { %v3162_v17 = vmax.f32 %v2607_v46, 0.0  ;;  %v3164_v4 = vmax.f32 %v2680_v62, 0.0  ;;  %7458 = vmatmul.mubr.msk.bf16.gmra.mrb[188].mxu0 %vm1586_vm3, %v9030_v40 }
 0x320   : > { %v3225_v5 = vpack.c.bf16 %v3161_v61, %v3145_v23  ;;  %v3227_v7 = vpack.c.bf16 %v3163_v41, %v3147_v27  ;;  %3487 = vmatprep.mubr.bf16.mxu0 %v7916_v0  ;;  %v9067_v23 = vld [vmem:[%s10957_s7 + $0x28] sm:$0xff]  }
 0x321   : > { %v2716_v8 = vpop.f32.mrb[160].mxu1  ;;  %v2789_v56 = vpop.f32.mrb[144].mxu0  ;;  %v3226_v25 = vpack.c.bf16 %v3162_v17, %v3146_v52  ;;  %v3228_v18 = vpack.c.bf16 %v3164_v4, %v3148_v1 }
 0x322   : > { %v2717_v11 = vadd.f32 %v2716_v8, %v8943_v22  ;;  %v2790_v43 = vadd.f32 %v2789_v56, %v8943_v22  ;;  %v2718_v20 = vpop.f32.mrb[161].mxu1  ;;  %v2791_v15 = vpop.f32.mrb[145].mxu0 }
 0x323   : > { %v2719_v26 = vadd.f32 %v2718_v20, %v8943_v22  ;;  %v2792_v28 = vadd.f32 %v2791_v15, %v8943_v22  ;;  %v2720_v36 = vpop.f32.mrb[162].mxu1  ;;  %v2793_v29 = vpop.f32.mrb[146].mxu0  ;;  %3534 = vmatprep.subr.bf16.mxu1 %v3226_v25  ;;  %3647 = vmatprep.subr.bf16.mxu0 %v3228_v18 }
 0x324   : > { %v2721_v34 = vadd.f32 %v2720_v36, %v8946_v14  ;;  %v2794_v31 = vadd.f32 %v2793_v29, %v8946_v14  ;;  %v2722_v33 = vpop.f32.mrb[163].mxu1  ;;  %v2795_v9 = vpop.f32.mrb[147].mxu0  ;;  %3535 = vmatpush1.bf16.msra.mxu1 %v3225_v5  ;;  %3648 = vmatpush1.bf16.msra.mxu0 %v3227_v7  ;;  %v3053_v35 = vmax.f32 %v2717_v11, 0.0  ;;  %v3055_v47 = vmax.f32 %v2790_v43, 0.0 }
 0x325   : > { %v2723_v13 = vadd.f32 %v2722_v33, %v8946_v14  ;;  %v2796_v48 = vadd.f32 %v2795_v9, %v8946_v14  ;;  %v3054_v57 = vmax.f32 %v2719_v26, 0.0  ;;  %v3056_v37 = vmax.f32 %v2792_v28, 0.0 }
 0x326   : > { %v3069_v38 = vmax.f32 %v2721_v34, 0.0  ;;  %v3071_v51 = vmax.f32 %v2794_v31, 0.0 }
 0x327   : > { %v3070_v16 = vmax.f32 %v2723_v13, 0.0  ;;  %v3072_v53 = vmax.f32 %v2796_v48, 0.0  ;;  %7459 = vmatmul.mubr.msk.bf16.gmra.mrb[192].mxu0 %vm1586_vm3, %v9046_v30  ;;  %7463 = vmatmul.mubr.msk.bf16.vlgmr.msra.gmra.mrb[208].mxu1 %vm1586_vm3, %v8982_v10 }
 0x328   : > { %v3181_v45 = vpack.c.bf16 %v3069_v38, %v3053_v35  ;;  %v9056_v39 = vpack.c.bf16 %v3071_v51, %v3055_v47  ;;  %3497 = vmatprep.mubr.bf16.mxu0 %v7916_v0  ;;  %3570 = vmatprep.mubr.bf16.mxu1 %v7916_v0  ;;  %v9090_v47 = vld [vmem:[%s10957_s7 + $0x30] sm:$0xff]  }
 0x329   : > { %v2726_v42 = vpop.f32.mrb[164].mxu1  ;;  %v2799_v50 = vpop.f32.mrb[148].mxu0  ;;  %v3182_v19 = vpack.c.bf16 %v3070_v16, %v3054_v57  ;;  %v3184_v54 = vpack.c.bf16 %v3072_v53, %v3056_v37 }
 0x32a   : > { %v2727_v58 = vadd.f32 %v2726_v42, %v8951_v12  ;;  %v2800_v2 = vadd.f32 %v2799_v50, %v8951_v12  ;;  %v2728_v59 = vpop.f32.mrb[165].mxu1  ;;  %v2801_v24 = vpop.f32.mrb[149].mxu0 }
 0x32b   : > { %v2729_v60 = vadd.f32 %v2728_v59, %v8951_v12  ;;  %v2802_v63 = vadd.f32 %v2801_v24, %v8951_v12  ;;  %v2730_v46 = vpop.f32.mrb[166].mxu1  ;;  %v2803_v62 = vpop.f32.mrb[150].mxu0  ;;  %3754 = vmatprep.subr.bf16.mxu1 %v3182_v19  ;;  %3867 = vmatprep.subr.bf16.mxu0 %v3184_v54 }
 0x32c   : > { %v2731_v27 = vadd.f32 %v2730_v46, %v8954_v44  ;;  %v2804_v61 = vadd.f32 %v2803_v62, %v8954_v44  ;;  %v2732_v41 = vpop.f32.mrb[167].mxu1  ;;  %v2805_v52 = vpop.f32.mrb[151].mxu0  ;;  %3755 = vmatpush1.bf16.msra.mxu1 %v3181_v45  ;;  %v3085_v4 = vmax.f32 %v2727_v58, 0.0  ;;  %v3087_v5 = vmax.f32 %v2800_v2, 0.0 }
 0x32d   : > { %v2733_v1 = vadd.f32 %v2732_v41, %v8954_v44  ;;  %v2806_v17 = vadd.f32 %v2805_v52, %v8954_v44  ;;  %v3086_v56 = vmax.f32 %v2729_v60, 0.0  ;;  %v3088_v25 = vmax.f32 %v2802_v63, 0.0 }
 0x32e   : > { %v3101_v7 = vmax.f32 %v2731_v27, 0.0  ;;  %v3103_v8 = vmax.f32 %v2804_v61, 0.0 }
 0x32f   : > { %v3102_v18 = vmax.f32 %v2733_v1, 0.0  ;;  %v3104_v11 = vmax.f32 %v2806_v17, 0.0  ;;  %7460 = vmatmul.mubr.msk.bf16.gmra.mrb[196].mxu0 %vm1586_vm3, %v9067_v23  ;;  %7464 = vmatmul.mubr.msk.bf16.gmra.mrb[212].mxu1 %vm1586_vm3, %v8998_v55 }
 0x330   : > { %v3197_v43 = vpack.c.bf16 %v3101_v7, %v3085_v4  ;;  %v9077_v20 = vpack.c.bf16 %v3103_v8, %v3087_v5  ;;  %3507 = vmatprep.mubr.bf16.mxu0 %v7916_v0  ;;  %3580 = vmatprep.mubr.bf16.mxu1 %v7916_v0  ;;  %v9113_v8 = vld [vmem:[%s10957_s7 + $0x38] sm:$0xff]  }
 0x331   : > { %v2736_v15 = vpop.f32.mrb[168].mxu1  ;;  %v2809_v26 = vpop.f32.mrb[152].mxu0  ;;  %v3198_v28 = vpack.c.bf16 %v3102_v18, %v3086_v56  ;;  %v9081_v36 = vpack.c.bf16 %v3104_v11, %v3088_v25 }
 0x332   : > { %v2737_v29 = vadd.f32 %v2736_v15, %v8959_v3  ;;  %v2810_v34 = vadd.f32 %v2809_v26, %v8959_v3  ;;  %v2738_v31 = vpop.f32.mrb[169].mxu1  ;;  %v2811_v33 = vpop.f32.mrb[153].mxu0 }
 0x333   : > { %v2739_v9 = vadd.f32 %v2738_v31, %v8959_v3  ;;  %v2812_v13 = vadd.f32 %v2811_v33, %v8959_v3  ;;  %v2740_v48 = vpop.f32.mrb[170].mxu1  ;;  %v2813_v35 = vpop.f32.mrb[154].mxu0  ;;  %3756 = vmatprep.subr.bf16.mxu1 %v3198_v28 }
 0x334   : > { %v2741_v38 = vadd.f32 %v2740_v48, %v8962_v6  ;;  %v2814_v51 = vadd.f32 %v2813_v35, %v8962_v6  ;;  %v2742_v57 = vpop.f32.mrb[171].mxu1  ;;  %v2815_v37 = vpop.f32.mrb[155].mxu0  ;;  %3757 = vmatpush1.bf16.msra.mxu1 %v3197_v43  ;;  %v3117_v45 = vmax.f32 %v2737_v29, 0.0  ;;  %v3119_v42 = vmax.f32 %v2810_v34, 0.0 }
 0x335   : > { %v2743_v16 = vadd.f32 %v2742_v57, %v8962_v6  ;;  %v2816_v53 = vadd.f32 %v2815_v37, %v8962_v6  ;;  %v3118_v54 = vmax.f32 %v2739_v9, 0.0  ;;  %v3120_v58 = vmax.f32 %v2812_v13, 0.0 }
 0x336   : > { %v3133_v50 = vmax.f32 %v2741_v38, 0.0  ;;  %v3135_v19 = vmax.f32 %v2814_v51, 0.0 }
 0x337   : > { %v3134_v2 = vmax.f32 %v2743_v16, 0.0  ;;  %v3136_v59 = vmax.f32 %v2816_v53, 0.0  ;;  %7461 = vmatmul.mubr.msk.bf16.gmra.mrb[200].mxu0 %vm1586_vm3, %v9090_v47  ;;  %7465 = vmatmul.mubr.msk.bf16.gmra.mrb[216].mxu1 %vm1586_vm3, %v9014_v21 }
 0x338   : > { %v3213_v24 = vpack.c.bf16 %v3133_v50, %v3117_v45  ;;  %v9100_v60 = vpack.c.bf16 %v3135_v19, %v3119_v42  ;;  %3517 = vmatprep.mubr.bf16.mxu0 %v7916_v0  ;;  %3590 = vmatprep.mubr.bf16.mxu1 %v7916_v0 }
 0x339   : > { %v2746_v63 = vpop.f32.mrb[172].mxu1  ;;  %v2819_v46 = vpop.f32.mrb[156].mxu0  ;;  %v3214_v62 = vpack.c.bf16 %v3134_v2, %v3118_v54  ;;  %v9104_v27 = vpack.c.bf16 %v3136_v59, %v3120_v58 }
 0x33a   : > { %v2747_v61 = vadd.f32 %v2746_v63, %v8967_v49  ;;  %v2820_v41 = vadd.f32 %v2819_v46, %v8967_v49  ;;  %v2748_v52 = vpop.f32.mrb[173].mxu1  ;;  %v2821_v1 = vpop.f32.mrb[157].mxu0 }
 0x33b   : > { %v2749_v17 = vadd.f32 %v2748_v52, %v8967_v49  ;;  %v2822_v4 = vadd.f32 %v2821_v1, %v8967_v49  ;;  %v2750_v5 = vpop.f32.mrb[174].mxu1  ;;  %v2823_v7 = vpop.f32.mrb[158].mxu0  ;;  %3758 = vmatprep.subr.bf16.mxu1 %v3214_v62 }
 0x33c   : > { %v2751_v56 = vadd.f32 %v2750_v5, %v8970_v32  ;;  %v2824_v25 = vadd.f32 %v2823_v7, %v8970_v32  ;;  %v2752_v18 = vpop.f32.mrb[175].mxu1  ;;  %v2825_v11 = vpop.f32.mrb[159].mxu0  ;;  %3759 = vmatpush1.bf16.msra.mxu1 %v3213_v24  ;;  %v3149_v26 = vmax.f32 %v2747_v61, 0.0  ;;  %v3151_v28 = vmax.f32 %v2820_v41, 0.0 }
 0x33d   : > { %v2753_v43 = vadd.f32 %v2752_v18, %v8970_v32  ;;  %v2826_v15 = vadd.f32 %v2825_v11, %v8970_v32  ;;  %v3150_v31 = vmax.f32 %v2749_v17, 0.0  ;;  %v3152_v33 = vmax.f32 %v2822_v4, 0.0 }
 0x33e   : > { %v3165_v29 = vmax.f32 %v2751_v56, 0.0  ;;  %v3167_v34 = vmax.f32 %v2824_v25, 0.0 }
 0x33f   : > { %v3166_v9 = vmax.f32 %v2753_v43, 0.0  ;;  %v3168_v13 = vmax.f32 %v2826_v15, 0.0  ;;  %7462 = vmatmul.mubr.msk.bf16.gmra.mrb[204].mxu0 %vm1586_vm3, %v9113_v8  ;;  %7466 = vmatmul.mubr.msk.bf16.gmra.mrb[220].mxu1 %vm1586_vm3, %v9030_v40 }
 0x340   : > { %v3229_v48 = vpack.c.bf16 %v3165_v29, %v3149_v26  ;;  %v9123_v35 = vpack.c.bf16 %v3167_v34, %v3151_v28  ;;  %3600 = vmatprep.mubr.bf16.mxu1 %v7916_v0  ;;  %3673 = vmatprep.mubr.bf16.mxu0 %v7916_v0 }
 0x341   : > { %v2862_v38 = vpop.f32.mrb[176].mxu1  ;;  %v2935_v51 = vpop.f32.mrb[160].mxu0  ;;  %v3230_v57 = vpack.c.bf16 %v3166_v9, %v3150_v31  ;;  %v9127_v37 = vpack.c.bf16 %v3168_v13, %v3152_v33 }
 0x342   : > { %v2863_v16 = vadd.f32 %v2862_v38, %v8943_v22  ;;  %v2936_v53 = vadd.f32 %v2935_v51, %v8943_v22  ;;  %v2864_v45 = vpop.f32.mrb[177].mxu1  ;;  %v2937_v42 = vpop.f32.mrb[161].mxu0 }
 0x343   : > { %v2865_v50 = vadd.f32 %v2864_v45, %v8943_v22  ;;  %v2938_v19 = vadd.f32 %v2937_v42, %v8943_v22  ;;  %v2866_v54 = vpop.f32.mrb[178].mxu1  ;;  %v2939_v58 = vpop.f32.mrb[162].mxu0  ;;  %3760 = vmatprep.subr.bf16.mxu1 %v3230_v57 }
 0x344   : > { %v2867_v2 = vadd.f32 %v2866_v54, %v8946_v14  ;;  %v2940_v59 = vadd.f32 %v2939_v58, %v8946_v14  ;;  %v2868_v24 = vpop.f32.mrb[179].mxu1  ;;  %v2941_v63 = vpop.f32.mrb[163].mxu0  ;;  %3761 = vmatpush1.bf16.msra.mxu1 %v3229_v48  ;;  %v3057_v61 = vmax.f32 %v2863_v16, 0.0  ;;  %v3059_v41 = vmax.f32 %v2936_v53, 0.0 }
 0x345   : > { %v2869_v46 = vadd.f32 %v2868_v24, %v8946_v14  ;;  %v2942_v62 = vadd.f32 %v2941_v63, %v8946_v14  ;;  %v3058_v17 = vmax.f32 %v2865_v50, 0.0  ;;  %v3060_v4 = vmax.f32 %v2938_v19, 0.0 }
 0x346   : > { %v3073_v52 = vmax.f32 %v2867_v2, 0.0  ;;  %v3075_v1 = vmax.f32 %v2940_v59, 0.0 }
 0x347   : > { %v3074_v5 = vmax.f32 %v2869_v46, 0.0  ;;  %v3076_v7 = vmax.f32 %v2942_v62, 0.0  ;;  %7467 = vmatmul.mubr.msk.bf16.gmra.mrb[224].mxu1 %vm1586_vm3, %v9046_v30  ;;  %7471 = vmatmul.mubr.msk.bf16.vlgmr.msra.gmra.mrb[208].mxu0 %vm1586_vm3, %v8982_v10 }
 0x348   : > { %v9141_v56 = vpack.c.bf16 %v3073_v52, %v3057_v61  ;;  %v9143_v25 = vpack.c.bf16 %v3075_v1, %v3059_v41  ;;  %3868 = vmatpush1.bf16.msra.mxu0 %v9056_v39  ;;  %3610 = vmatprep.mubr.bf16.mxu1 %v7916_v0 }
 0x349   : > { %3869 = vmatprep.subr.bf16.mxu0 %v9081_v36  ;;  %v2872_v18 = vpop.f32.mrb[180].mxu1  ;;  %v2945_v11 = vpop.f32.mrb[164].mxu0  ;;  %v3186_v43 = vpack.c.bf16 %v3074_v5, %v3058_v17  ;;  %3683 = vmatprep.mubr.bf16.mxu0 %v7916_v0  ;;  %v3188_v15 = vpack.c.bf16 %v3076_v7, %v3060_v4 }
 0x34a   : > { %v2873_v26 = vadd.f32 %v2872_v18, %v8951_v12  ;;  %v2946_v28 = vadd.f32 %v2945_v11, %v8951_v12  ;;  %v2874_v29 = vpop.f32.mrb[181].mxu1  ;;  %v2947_v34 = vpop.f32.mrb[165].mxu0 }
 0x34b   : > { %v2875_v31 = vadd.f32 %v2874_v29, %v8951_v12  ;;  %v2948_v39 = vadd.f32 %v2947_v34, %v8951_v12  ;;  %v2876_v33 = vpop.f32.mrb[182].mxu1  ;;  %v2949_v9 = vpop.f32.mrb[166].mxu0  ;;  %3980 = vmatprep.subr.bf16.mxu1 %v3186_v43 }
 0x34c   : > { %v2877_v36 = vadd.f32 %v2876_v33, %v8954_v44  ;;  %v2950_v13 = vadd.f32 %v2949_v9, %v8954_v44  ;;  %3870 = vmatpush1.bf16.msra.mxu0 %v9077_v20  ;;  %v2878_v48 = vpop.f32.mrb[183].mxu1  ;;  %v2951_v38 = vpop.f32.mrb[167].mxu0  ;;  %v3089_v16 = vmax.f32 %v2873_v26, 0.0  ;;  %v3091_v53 = vmax.f32 %v2946_v28, 0.0 }
 0x34d   : > { %v2879_v51 = vadd.f32 %v2878_v48, %v8954_v44  ;;  %v2952_v57 = vadd.f32 %v2951_v38, %v8954_v44  ;;  %3871 = vmatprep.subr.bf16.mxu0 %v9104_v27  ;;  %v3090_v50 = vmax.f32 %v2875_v31, 0.0  ;;  %v3092_v19 = vmax.f32 %v2948_v39, 0.0 }
 0x34e   : > { %v3105_v45 = vmax.f32 %v2877_v36, 0.0  ;;  %v3107_v42 = vmax.f32 %v2950_v13, 0.0 }
 0x34f   : > { %v3106_v54 = vmax.f32 %v2879_v51, 0.0  ;;  %v3108_v58 = vmax.f32 %v2952_v57, 0.0  ;;  %7468 = vmatmul.mubr.msk.bf16.gmra.mrb[228].mxu1 %vm1586_vm3, %v9067_v23  ;;  %7472 = vmatmul.mubr.msk.bf16.gmra.mrb[212].mxu0 %vm1586_vm3, %v8998_v55 }
 0x350   : > { %v9163_v20 = vpack.c.bf16 %v3105_v45, %v3089_v16  ;;  %v9165_v2 = vpack.c.bf16 %v3107_v42, %v3091_v53  ;;  %3872 = vmatpush1.bf16.msra.mxu0 %v9100_v60  ;;  %3620 = vmatprep.mubr.bf16.mxu1 %v7916_v0 }
 0x351   : > { %3873 = vmatprep.subr.bf16.mxu0 %v9127_v37  ;;  %v2882_v27 = vpop.f32.mrb[184].mxu1  ;;  %v2955_v59 = vpop.f32.mrb[168].mxu0  ;;  %3693 = vmatprep.mubr.bf16.mxu0 %v7916_v0  ;;  %v9171_v24 = vpack.c.bf16 %v3106_v54, %v3090_v50  ;;  %v9173_v63 = vpack.c.bf16 %v3108_v58, %v3092_v19 }
 0x352   : > { %v2883_v46 = vadd.f32 %v2882_v27, %v8959_v3  ;;  %v2956_v62 = vadd.f32 %v2955_v59, %v8959_v3  ;;  %v2884_v61 = vpop.f32.mrb[185].mxu1  ;;  %v2957_v41 = vpop.f32.mrb[169].mxu0 }
 0x353   : > { %v2885_v60 = vadd.f32 %v2884_v61, %v8959_v3  ;;  %v2958_v52 = vadd.f32 %v2957_v41, %v8959_v3  ;;  %v2886_v1 = vpop.f32.mrb[186].mxu1  ;;  %v2959_v37 = vpop.f32.mrb[170].mxu0 }
 0x354   : > { %v2887_v17 = vadd.f32 %v2886_v1, %v8962_v6  ;;  %v2960_v4 = vadd.f32 %v2959_v37, %v8962_v6  ;;  %3874 = vmatpush1.bf16.msra.mxu0 %v9123_v35  ;;  %v2888_v5 = vpop.f32.mrb[187].mxu1  ;;  %v2961_v7 = vpop.f32.mrb[171].mxu0  ;;  %v3121_v43 = vmax.f32 %v2883_v46, 0.0  ;;  %v3123_v26 = vmax.f32 %v2956_v62, 0.0 }
 0x355   : > { %v2889_v18 = vadd.f32 %v2888_v5, %v8962_v6  ;;  %v2962_v11 = vadd.f32 %v2961_v7, %v8962_v6  ;;  %4093 = vmatprep.subr.bf16.mxu0 %v3188_v15  ;;  %v3122_v34 = vmax.f32 %v2885_v60, 0.0  ;;  %v3124_v31 = vmax.f32 %v2958_v52, 0.0 }
 0x356   : > { %v3137_v28 = vmax.f32 %v2887_v17, 0.0  ;;  %v3139_v29 = vmax.f32 %v2960_v4, 0.0 }
 0x357   : > { %v3138_v39 = vmax.f32 %v2889_v18, 0.0  ;;  %v3140_v33 = vmax.f32 %v2962_v11, 0.0  ;;  %7469 = vmatmul.mubr.msk.bf16.gmra.mrb[232].mxu1 %vm1586_vm3, %v9090_v47  ;;  %7473 = vmatmul.mubr.msk.bf16.gmra.mrb[216].mxu0 %vm1586_vm3, %v9014_v21 }
 0x358   : > { %v9188_v35 = vpack.c.bf16 %v3137_v28, %v3121_v43  ;;  %v9190_v9 = vpack.c.bf16 %v3139_v29, %v3123_v26  ;;  %3630 = vmatprep.mubr.bf16.mxu1 %v7916_v0  ;;  %3703 = vmatprep.mubr.bf16.mxu0 %v7916_v0 }
 0x359   : > { %v2892_v15 = vpop.f32.mrb[188].mxu1  ;;  %v2965_v36 = vpop.f32.mrb[172].mxu0  ;;  %v3218_v13 = vpack.c.bf16 %v3138_v39, %v3122_v34  ;;  %v9194_v48 = vpack.c.bf16 %v3140_v33, %v3124_v31 }
 0x35a   : > { %v2893_v38 = vadd.f32 %v2892_v15, %v8967_v49  ;;  %v2966_v51 = vadd.f32 %v2965_v36, %v8967_v49  ;;  %v2894_v57 = vpop.f32.mrb[189].mxu1  ;;  %v2967_v16 = vpop.f32.mrb[173].mxu0 }
 0x35b   : > { %v2895_v53 = vadd.f32 %v2894_v57, %v8967_v49  ;;  %v2968_v45 = vadd.f32 %v2967_v16, %v8967_v49  ;;  %v2896_v42 = vpop.f32.mrb[190].mxu1  ;;  %v2969_v50 = vpop.f32.mrb[174].mxu0 }
 0x35c   : > { %v2897_v19 = vadd.f32 %v2896_v42, %v8970_v32  ;;  %v2970_v54 = vadd.f32 %v2969_v50, %v8970_v32  ;;  %v2898_v58 = vpop.f32.mrb[191].mxu1  ;;  %v2971_v27 = vpop.f32.mrb[175].mxu0  ;;  %v3153_v62 = vmax.f32 %v2893_v38, 0.0  ;;  %v3155_v61 = vmax.f32 %v2966_v51, 0.0 }
 0x35d   : > { %v2899_v59 = vadd.f32 %v2898_v58, %v8970_v32  ;;  %v2972_v46 = vadd.f32 %v2971_v27, %v8970_v32  ;;  %v3154_v52 = vmax.f32 %v2895_v53, 0.0  ;;  %v3156_v1 = vmax.f32 %v2968_v45, 0.0 }
 0x35e   : > { %v3169_v41 = vmax.f32 %v2897_v19, 0.0  ;;  %v3171_v60 = vmax.f32 %v2970_v54, 0.0 }
 0x35f   : > { %v3170_v37 = vmax.f32 %v2899_v59, 0.0  ;;  %v3172_v17 = vmax.f32 %v2972_v46, 0.0  ;;  %7470 = vmatmul.mubr.msk.bf16.gmra.mrb[236].mxu1 %vm1586_vm3, %v9113_v8  ;;  %7474 = vmatmul.mubr.msk.bf16.gmra.mrb[220].mxu0 %vm1586_vm3, %v9030_v40 }
 0x360   : > { %v3233_v4 = vpack.c.bf16 %v3169_v41, %v3153_v62  ;;  %v9208_v5 = vpack.c.bf16 %v3171_v60, %v3155_v61  ;;  %3713 = vmatprep.mubr.bf16.mxu0 %v7916_v0  ;;  %3786 = vmatprep.mubr.bf16.mxu1 %v7916_v0 }
 0x361   : > { %v3008_v7 = vpop.f32.mrb[192].mxu1  ;;  %v3234_v18 = vpack.c.bf16 %v3170_v37, %v3154_v52  ;;  %v9212_v11 = vpack.c.bf16 %v3172_v17, %v3156_v1 }
 0x362   : > { %v3009_v43 = vadd.f32 %v3008_v7, %v8943_v22  ;;  %v3010_v26 = vpop.f32.mrb[193].mxu1 }
 0x363   : > { %v3011_v28 = vadd.f32 %v3010_v26, %v8943_v22  ;;  %v3012_v29 = vpop.f32.mrb[194].mxu1 }
 0x364   : > { %v3013_v34 = vadd.f32 %v3012_v29, %v8946_v14  ;;  %v3014_v31 = vpop.f32.mrb[195].mxu1  ;;  %v3061_v33 = vmax.f32 %v3009_v43, 0.0 }
 0x365   : > { %v3015_v39 = vadd.f32 %v3014_v31, %v8946_v14  ;;  %v3062_v36 = vmax.f32 %v3011_v28, 0.0 }
 0x366   : > { %v3077_v15 = vmax.f32 %v3013_v34, 0.0 }
 0x367   : > { %v3078_v38 = vmax.f32 %v3015_v39, 0.0  ;;  %7475 = vmatmul.mubr.msk.bf16.gmra.mrb[224].mxu0 %vm1586_vm3, %v9046_v30  ;;  %7479 = vmatmul.mubr.msk.bf16.vlgmr.msra.gmra.mrb[240].mxu1 %vm1586_vm3, %v8982_v10 }
 0x368   : > { %v9222_v51 = vpack.c.bf16 %v3077_v15, %v3061_v33  ;;  %3981 = vmatpush1.bf16.msra.mxu1 %v9141_v56  ;;  %3723 = vmatprep.mubr.bf16.mxu0 %v7916_v0 }
 0x369   : > { %3982 = vmatprep.subr.bf16.mxu1 %v9171_v24  ;;  %v3018_v22 = vpop.f32.mrb[196].mxu1  ;;  %3796 = vmatprep.mubr.bf16.mxu1 %v7916_v0  ;;  %v3190_v14 = vpack.c.bf16 %v3078_v38, %v3062_v36 }
 0x36a   : > { %v3019_v57 = vadd.f32 %v3018_v22, %v8951_v12  ;;  %v3020_v16 = vpop.f32.mrb[197].mxu1 }
 0x36b   : > { %v3021_v53 = vadd.f32 %v3020_v16, %v8951_v12  ;;  %v3022_v45 = vpop.f32.mrb[198].mxu1 }
 0x36c   : > { %v3023_v42 = vadd.f32 %v3022_v45, %v8954_v44  ;;  %3983 = vmatpush1.bf16.msra.mxu1 %v9163_v20  ;;  %v3024_v50 = vpop.f32.mrb[199].mxu1  ;;  %v3093_v19 = vmax.f32 %v3019_v57, 0.0 }
 0x36d   : > { %v3025_v56 = vadd.f32 %v3024_v50, %v8954_v44  ;;  %3984 = vmatprep.subr.bf16.mxu1 %v3218_v13  ;;  %v3094_v54 = vmax.f32 %v3021_v53, 0.0 }
 0x36e   : > { %v3109_v24 = vmax.f32 %v3023_v42, 0.0 }
 0x36f   : > { %v3110_v58 = vmax.f32 %v3025_v56, 0.0  ;;  %7476 = vmatmul.mubr.msk.bf16.gmra.mrb[228].mxu0 %vm1586_vm3, %v9067_v23  ;;  %7480 = vmatmul.mubr.msk.bf16.gmra.mrb[244].mxu1 %vm1586_vm3, %v8998_v55 }
 0x370   : > { %v9237_v12 = vpack.c.bf16 %v3109_v24, %v3093_v19  ;;  %3985 = vmatpush1.bf16.msra.mxu1 %v9188_v35  ;;  %3733 = vmatprep.mubr.bf16.mxu0 %v7916_v0 }
 0x371   : > { %3986 = vmatprep.subr.bf16.mxu1 %v3234_v18  ;;  %v3028_v20 = vpop.f32.mrb[200].mxu1  ;;  %3806 = vmatprep.mubr.bf16.mxu1 %v7916_v0  ;;  %v9242_v44 = vpack.c.bf16 %v3110_v58, %v3094_v54 }
 0x372   : > { %v3029_v13 = vadd.f32 %v3028_v20, %v8959_v3  ;;  %v3030_v27 = vpop.f32.mrb[201].mxu1 }
 0x373   : > { %v3031_v59 = vadd.f32 %v3030_v27, %v8959_v3  ;;  %v3032_v46 = vpop.f32.mrb[202].mxu1 }
 0x374   : > { %v3033_v62 = vadd.f32 %v3032_v46, %v8962_v6  ;;  %3987 = vmatpush1.bf16.msra.mxu1 %v3233_v4  ;;  %v3034_v61 = vpop.f32.mrb[203].mxu1  ;;  %v3125_v41 = vmax.f32 %v3029_v13, 0.0 }
 0x375   : > { %v3035_v35 = vadd.f32 %v3034_v61, %v8962_v6  ;;  %4206 = vmatprep.subr.bf16.mxu1 %v3190_v14  ;;  %v3126_v52 = vmax.f32 %v3031_v59, 0.0 }
 0x376   : > { %v3141_v60 = vmax.f32 %v3033_v62, 0.0 }
 0x377   : > { %v3142_v1 = vmax.f32 %v3035_v35, 0.0  ;;  %7477 = vmatmul.mubr.msk.bf16.gmra.mrb[232].mxu0 %vm1586_vm3, %v9090_v47  ;;  %7481 = vmatmul.mubr.msk.bf16.gmra.mrb[248].mxu1 %vm1586_vm3, %v9014_v21 }
 0x378   : > { %v3221_v37 = vpack.c.bf16 %v3141_v60, %v3125_v41  ;;  %3743 = vmatprep.mubr.bf16.mxu0 %v7916_v0  ;;  %3816 = vmatprep.mubr.bf16.mxu1 %v7916_v0 }
 0x379   : > { %v3038_v3 = vpop.f32.mrb[204].mxu1  ;;  %v3222_v17 = vpack.c.bf16 %v3142_v1, %v3126_v52 }
 0x37a   : > { %v3039_v6 = vadd.f32 %v3038_v3, %v8967_v49  ;;  %v3040_v4 = vpop.f32.mrb[205].mxu1  ;;  %v7877_v3 = vld [vmem:[%s10957_s7 + $0x8] sm:$0xff]  }
 0x37b   : > { %v3041_v7 = vadd.f32 %v3040_v4, %v8967_v49  ;;  %v3042_v18 = vpop.f32.mrb[206].mxu1 }
 0x37c   : > { %v3043_v43 = vadd.f32 %v3042_v18, %v8970_v32  ;;  %v3044_v26 = vpop.f32.mrb[207].mxu1  ;;  %v3157_v29 = vmax.f32 %v3039_v6, 0.0 }
 0x37d   : > { %v3045_v28 = vadd.f32 %v3044_v26, %v8970_v32  ;;  %v3158_v31 = vmax.f32 %v3041_v7, 0.0  ;;  %v9300_v32 = vld [vmem:[%s10957_s7] sm:$0xff]  }
 0x37e   : > { %v3173_v34 = vmax.f32 %v3043_v43, 0.0 }
 0x37f   : > { %v3174_v39 = vmax.f32 %v3045_v28, 0.0  ;;  %7478 = vmatmul.mubr.msk.bf16.gmra.mrb[236].mxu0 %vm1586_vm3, %v9113_v8  ;;  %7482 = vmatmul.mubr.msk.bf16.gmra.mrb[252].mxu1 %vm1586_vm3, %v9030_v40 }
 0x380   : > { %v3237_v33 = vpack.c.bf16 %v3173_v34, %v3157_v29  ;;  %3826 = vmatprep.mubr.bf16.mxu1 %v7916_v0  ;;  %3899 = vmatprep.mubr.bf16.mxu0 %v7916_v0 }
 0x381   : > { %v3238_v49 = vpack.c.bf16 %v3174_v39, %v3158_v31 }
 0x387   : > { %7483 = vmatmul.mubr.msk.bf16.gmra.mrb[0].mxu1 %vm1586_vm3, %v9046_v30  ;;  %7487 = vmatmul.mubr.msk.bf16.vlgmr.msra.gmra.mrb[240].mxu0 %vm1586_vm3, %v8982_v10  ;;  %v9345_v10 = vpop.permute.xlu0 %3273 }
 0x388   : > { %4094 = vmatpush1.bf16.msra.mxu0 %v9143_v25  ;;  %3836 = vmatprep.mubr.bf16.mxu1 %v7916_v0 }
 0x389   : > { %4095 = vmatprep.subr.bf16.mxu0 %v9173_v63  ;;  %3909 = vmatprep.mubr.bf16.mxu0 %v7916_v0  ;;  %v9348_v63 = vpop.permute.xlu1 %3278 }
 0x38b   : > { %v9359_v14 = vpop.permute.xlu0 %3283 }
 0x38c   : > { %4096 = vmatpush1.bf16.msra.mxu0 %v9165_v2 }
 0x38d   : > { %4097 = vmatprep.subr.bf16.mxu0 %v9194_v48  ;;  %v9362_v42 = vpop.permute.xlu1 %3288 }
 0x38f   : > { %7484 = vmatmul.mubr.msk.bf16.gmra.mrb[4].mxu1 %vm1586_vm3, %v9067_v23  ;;  %7488 = vmatmul.mubr.msk.bf16.gmra.mrb[244].mxu0 %vm1586_vm3, %v8998_v55  ;;  %v9373_v13 = vpop.permute.xlu0 %3293 }
 0x390   : > { %4098 = vmatpush1.bf16.msra.mxu0 %v9190_v9  ;;  %3846 = vmatprep.mubr.bf16.mxu1 %v7916_v0 }
 0x391   : > { %4099 = vmatprep.subr.bf16.mxu0 %v9212_v11  ;;  %3919 = vmatprep.mubr.bf16.mxu0 %v7916_v0  ;;  %v9376_v61 = vpop.permute.xlu1 %3298 }
 0x393   : > { %v9389_v7 = vpop.permute.xlu0 %3303 }
 0x394   : > { %4100 = vmatpush1.bf16.msra.mxu0 %v9208_v5 }
 0x395   : > { %v9391_v26 = vpop.permute.xlu1 %3308 }
 0x397   : > { %7485 = vmatmul.mubr.msk.bf16.gmra.mrb[8].mxu1 %vm1586_vm3, %v9090_v47  ;;  %7489 = vmatmul.mubr.msk.bf16.gmra.mrb[248].mxu0 %vm1586_vm3, %v9014_v21 }
 0x398   : > { %3856 = vmatprep.mubr.bf16.mxu1 %v7916_v0  ;;  %3929 = vmatprep.mubr.bf16.mxu0 %v7916_v0 }
 0x39f   : > { %7486 = vmatmul.mubr.msk.bf16.gmra.mrb[12].mxu1 %vm1586_vm3, %v9113_v8  ;;  %7490 = vmatmul.mubr.msk.bf16.gmra.mrb[252].mxu0 %vm1586_vm3, %v9030_v40 }
 0x3a0   : > { %3939 = vmatprep.mubr.bf16.mxu0 %v7916_v0  ;;  %4012 = vmatprep.mubr.bf16.mxu1 %v7916_v0 }
 0x3a7   : > { %7491 = vmatmul.mubr.msk.bf16.gmra.mrb[0].mxu0 %vm1586_vm3, %v9046_v30  ;;  %7495 = vmatmul.mubr.msk.bf16.vlgmr.msra.gmra.mrb[16].mxu1 %vm1586_vm3, %v9300_v32 }
 0x3a8   : > { %4207 = vmatpush1.bf16.msra.mxu1 %v9222_v51  ;;  %3949 = vmatprep.mubr.bf16.mxu0 %v7916_v0 }
 0x3a9   : > { %4208 = vmatprep.subr.bf16.mxu1 %v9242_v44  ;;  %4022 = vmatprep.mubr.bf16.mxu1 %v7916_v0 }
 0x3ac   : > { %4209 = vmatpush1.bf16.msra.mxu1 %v9237_v12 }
 0x3ad   : > { %4210 = vmatprep.subr.bf16.mxu1 %v3222_v17 }
 0x3af   : > { %7492 = vmatmul.mubr.msk.bf16.gmra.mrb[4].mxu0 %vm1586_vm3, %v9067_v23  ;;  %7496 = vmatmul.mubr.msk.bf16.gmra.mrb[20].mxu1 %vm1586_vm3, %v8998_v55 }
 0x3b0   : > { %4211 = vmatpush1.bf16.msra.mxu1 %v3221_v37  ;;  %3959 = vmatprep.mubr.bf16.mxu0 %v7916_v0 }
 0x3b1   : > { %4212 = vmatprep.subr.bf16.mxu1 %v3238_v49  ;;  %4032 = vmatprep.mubr.bf16.mxu1 %v7916_v0 }
 0x3b4   : > { %4213 = vmatpush1.bf16.msra.mxu1 %v3237_v33 }
 0x3b7   : > { %7493 = vmatmul.mubr.msk.bf16.gmra.mrb[8].mxu0 %vm1586_vm3, %v9090_v47  ;;  %7497 = vmatmul.mubr.msk.bf16.gmra.mrb[24].mxu1 %vm1586_vm3, %v9014_v21 }
 0x3b8   : > { %3969 = vmatprep.mubr.bf16.mxu0 %v7916_v0  ;;  %4042 = vmatprep.mubr.bf16.mxu1 %v7916_v0 }
 0x3bf   : > { %7494 = vmatmul.mubr.msk.bf16.gmra.mrb[12].mxu0 %vm1586_vm3, %v9113_v8  ;;  %7498 = vmatmul.mubr.msk.bf16.gmra.mrb[28].mxu1 %vm1586_vm3, %v9030_v40 }
 0x3c0   : > { %4052 = vmatprep.mubr.bf16.mxu1 %v7916_v0  ;;  %4125 = vmatprep.mubr.bf16.mxu0 %v7916_v0 }
 0x3c7   : > { %7499 = vmatmul.mubr.msk.bf16.gmra.mrb[32].mxu1 %vm1586_vm3, %v9046_v30  ;;  %7503 = vmatmul.mubr.msk.bf16.vlgmr.msra.gmra.mrb[16].mxu0 %vm1586_vm3, %v9300_v32 }
 0x3c8   : > { %4062 = vmatprep.mubr.bf16.mxu1 %v7916_v0  ;;  %4135 = vmatprep.mubr.bf16.mxu0 %v7916_v0 }
 0x3cf   : > { %7500 = vmatmul.mubr.msk.bf16.gmra.mrb[36].mxu1 %vm1586_vm3, %v9067_v23  ;;  %7504 = vmatmul.mubr.msk.bf16.gmra.mrb[20].mxu0 %vm1586_vm3, %v8998_v55 }
 0x3d0   : > { %4072 = vmatprep.mubr.bf16.mxu1 %v7916_v0  ;;  %4145 = vmatprep.mubr.bf16.mxu0 %v7916_v0 }
 0x3d7   : > { %7501 = vmatmul.mubr.msk.bf16.gmra.mrb[40].mxu1 %vm1586_vm3, %v9090_v47  ;;  %7505 = vmatmul.mubr.msk.bf16.gmra.mrb[24].mxu0 %vm1586_vm3, %v9014_v21 }
 0x3d8   : > { %4082 = vmatprep.mubr.bf16.mxu1 %v7916_v0  ;;  %4155 = vmatprep.mubr.bf16.mxu0 %v7916_v0 }
 0x3da   : > { %v3449_v25 = vpop.f32.mrb[176].mxu0 }
 0x3db   : > { %v3450_v2 = vadd.f32 %v3449_v25, %v9345_v10  ;;  %v3451_v55 = vpop.f32.mrb[177].mxu0  ;;  %v7878_v25 = vld [vmem:[%s10957_s7 + $0x10] sm:$0xff]  }
 0x3dc   : > { %v3452_v9 = vadd.f32 %v3451_v55, %v9345_v10  ;;  %v3453_v48 = vpop.f32.mrb[178].mxu0 }
 0x3dd   : > { %v3454_v5 = vadd.f32 %v3453_v48, %v9348_v63  ;;  %v3455_v11 = vpop.f32.mrb[179].mxu0  ;;  %v4319_v15 = vmax.f32 %v3450_v2, 0.0  ;;  %v9407_v48 = vpop.permute.xlu1 %3318 }
 0x3de   : > { %v3456_v21 = vadd.f32 %v3455_v11, %v9348_v63  ;;  %v4320_v38 = vmax.f32 %v3452_v9, 0.0  ;;  %v9405_v9 = vpop.permute.xlu0 %3313 }
 0x3df   : > { %v4335_v36 = vmax.f32 %v3454_v5, 0.0  ;;  %7502 = vmatmul.mubr.msk.bf16.gmra.mrb[44].mxu1 %vm1586_vm3, %v9113_v8  ;;  %7506 = vmatmul.mubr.msk.bf16.gmra.mrb[28].mxu0 %vm1586_vm3, %v9030_v40 }
 0x3e0   : > { %v4336_v51 = vmax.f32 %v3456_v21, 0.0  ;;  %4165 = vmatprep.mubr.bf16.mxu0 %v7916_v0  ;;  %4238 = vmatprep.mubr.bf16.mxu1 %v7916_v0 }
 0x3e1   : > { %v4575_v22 = vpack.c.bf16 %v4335_v36, %v4319_v15 }
 0x3e2   : > { %v3459_v57 = vpop.f32.mrb[180].mxu0  ;;  %v4576_v16 = vpack.c.bf16 %v4336_v51, %v4320_v38 }
 0x3e3   : > { %v3460_v53 = vadd.f32 %v3459_v57, %v9359_v14  ;;  %v3461_v45 = vpop.f32.mrb[181].mxu0 }
 0x3e4   : > { %v3462_v50 = vadd.f32 %v3461_v45, %v9359_v14  ;;  %v3463_v56 = vpop.f32.mrb[182].mxu0  ;;  %4863 = vmatprep.subr.bf16.mxu0 %v4576_v16 }
 0x3e5   : > { %v3464_v40 = vadd.f32 %v3463_v56, %v9362_v42  ;;  %v3465_v19 = vpop.f32.mrb[183].mxu0  ;;  %4864 = vmatpush1.bf16.msra.mxu0 %v4575_v22  ;;  %v4351_v54 = vmax.f32 %v3460_v53, 0.0 }
 0x3e6   : > { %v3466_v24 = vadd.f32 %v3465_v19, %v9362_v42  ;;  %v4352_v12 = vmax.f32 %v3462_v50, 0.0 }
 0x3e7   : > { %v4367_v58 = vmax.f32 %v3464_v40, 0.0  ;;  %7507 = vmatmul.mubr.msk.bf16.gmra.mrb[32].mxu0 %vm1586_vm3, %v9046_v30  ;;  %7511 = vmatmul.mubr.msk.bf16.vlgmr.msra.gmra.mrb[48].mxu1 %vm1586_vm3, %v9300_v32 }
 0x3e8   : > { %v4368_v20 = vmax.f32 %v3466_v24, 0.0  ;;  %4175 = vmatprep.mubr.bf16.mxu0 %v7916_v0  ;;  %4248 = vmatprep.mubr.bf16.mxu1 %v7916_v0 }
 0x3e9   : > { %v4591_v44 = vpack.c.bf16 %v4367_v58, %v4351_v54 }
 0x3ea   : > { %v3469_v27 = vpop.f32.mrb[184].mxu0  ;;  %v4592_v59 = vpack.c.bf16 %v4368_v20, %v4352_v12 }
 0x3eb   : > { %v3470_v46 = vadd.f32 %v3469_v27, %v9373_v13  ;;  %v3471_v62 = vpop.f32.mrb[185].mxu0 }
 0x3ec   : > { %v3472_v30 = vadd.f32 %v3471_v62, %v9373_v13  ;;  %v3473_v35 = vpop.f32.mrb[186].mxu0  ;;  %4865 = vmatprep.subr.bf16.mxu0 %v4592_v59 }
 0x3ed   : > { %v3474_v41 = vadd.f32 %v3473_v35, %v9376_v61  ;;  %v3475_v60 = vpop.f32.mrb[187].mxu0  ;;  %4866 = vmatpush1.bf16.msra.mxu0 %v4591_v44  ;;  %v4383_v1 = vmax.f32 %v3470_v46, 0.0  ;;  %v7879_v44 = vld [vmem:[%s10957_s7 + $0x18] sm:$0xff]   ;;  %v9427_v35 = vpop.permute.xlu1 %3328 }
 0x3ee   : > { %v3476_v52 = vadd.f32 %v3475_v60, %v9376_v61  ;;  %v4384_v17 = vmax.f32 %v3472_v30, 0.0  ;;  %v9425_v30 = vpop.permute.xlu0 %3323 }
 0x3ef   : > { %v4399_v37 = vmax.f32 %v3474_v41, 0.0  ;;  %7508 = vmatmul.mubr.msk.bf16.gmra.mrb[36].mxu0 %vm1586_vm3, %v9067_v23  ;;  %7512 = vmatmul.mubr.msk.bf16.gmra.mrb[52].mxu1 %vm1586_vm3, %v7877_v3 }
 0x3f0   : > { %v4400_v6 = vmax.f32 %v3476_v52, 0.0  ;;  %4185 = vmatprep.mubr.bf16.mxu0 %v7916_v0  ;;  %4258 = vmatprep.mubr.bf16.mxu1 %v7916_v0 }
 0x3f1   : > { %v4607_v4 = vpack.c.bf16 %v4399_v37, %v4383_v1 }
 0x3f2   : > { %v3479_v18 = vpop.f32.mrb[188].mxu0  ;;  %v4608_v43 = vpack.c.bf16 %v4400_v6, %v4384_v17 }
 0x3f3   : > { %v3480_v23 = vadd.f32 %v3479_v18, %v9389_v7  ;;  %v3481_v28 = vpop.f32.mrb[189].mxu0 }
 0x3f4   : > { %v3482_v29 = vadd.f32 %v3481_v28, %v9389_v7  ;;  %v3483_v34 = vpop.f32.mrb[190].mxu0  ;;  %4867 = vmatprep.subr.bf16.mxu0 %v4608_v43 }
 0x3f5   : > { %v3484_v31 = vadd.f32 %v3483_v34, %v9391_v26  ;;  %v3485_v39 = vpop.f32.mrb[191].mxu0  ;;  %4868 = vmatpush1.bf16.msra.mxu0 %v4607_v4  ;;  %v4415_v49 = vmax.f32 %v3480_v23, 0.0 }
 0x3f6   : > { %v3486_v33 = vadd.f32 %v3485_v39, %v9391_v26  ;;  %v4416_v2 = vmax.f32 %v3482_v29, 0.0 }
 0x3f7   : > { %v4431_v32 = vmax.f32 %v3484_v31, 0.0  ;;  %7509 = vmatmul.mubr.msk.bf16.gmra.mrb[40].mxu0 %vm1586_vm3, %v9090_v47  ;;  %7513 = vmatmul.mubr.msk.bf16.gmra.mrb[56].mxu1 %vm1586_vm3, %v7878_v25 }
 0x3f8   : > { %v4432_v55 = vmax.f32 %v3486_v33, 0.0  ;;  %4195 = vmatprep.mubr.bf16.mxu0 %v7916_v0  ;;  %4268 = vmatprep.mubr.bf16.mxu1 %v7916_v0 }
 0x3f9   : > { %v4623_v5 = vpack.c.bf16 %v4431_v32, %v4415_v49 }
 0x3fa   : > { %v3489_v11 = vpop.f32.mrb[192].mxu0  ;;  %v3562_v21 = vpop.f32.mrb[208].mxu1  ;;  %v4624_v47 = vpack.c.bf16 %v4432_v55, %v4416_v2 }
 0x3fb   : > { %v3490_v15 = vadd.f32 %v3489_v11, %v9405_v9  ;;  %v3563_v36 = vadd.f32 %v3562_v21, %v9345_v10  ;;  %v3491_v38 = vpop.f32.mrb[193].mxu0  ;;  %v3564_v51 = vpop.f32.mrb[209].mxu1 }
 0x3fc   : > { %v3492_v22 = vadd.f32 %v3491_v38, %v9405_v9  ;;  %v3565_v57 = vadd.f32 %v3564_v51, %v9345_v10  ;;  %v3493_v16 = vpop.f32.mrb[194].mxu0  ;;  %v3566_v53 = vpop.f32.mrb[210].mxu1  ;;  %4869 = vmatprep.subr.bf16.mxu0 %v4624_v47 }
 0x3fd   : > { %v3494_v45 = vadd.f32 %v3493_v16, %v9407_v48  ;;  %v3567_v50 = vadd.f32 %v3566_v53, %v9348_v63  ;;  %v3495_v56 = vpop.f32.mrb[195].mxu0  ;;  %v3568_v40 = vpop.f32.mrb[211].mxu1  ;;  %4870 = vmatpush1.bf16.msra.mxu0 %v4623_v5  ;;  %v4447_v54 = vmax.f32 %v3490_v15, 0.0  ;;  %v4321_v58 = vmax.f32 %v3563_v36, 0.0  ;;  %v7880_v5 = vld [vmem:[%s10957_s7 + $0x20] sm:$0xff]  }
 0x3fe   : > { %v3496_v19 = vadd.f32 %v3495_v56, %v9407_v48  ;;  %v3569_v24 = vadd.f32 %v3568_v40, %v9348_v63  ;;  %v4448_v27 = vmax.f32 %v3492_v22, 0.0  ;;  %v4322_v59 = vmax.f32 %v3565_v57, 0.0  ;;  %v9442_v36 = vpop.permute.xlu0 %3333  ;;  %v9444_v38 = vpop.permute.xlu1 %3338 }
 0x3ff   : > { %v4463_v12 = vmax.f32 %v3494_v45, 0.0  ;;  %v4337_v20 = vmax.f32 %v3567_v50, 0.0  ;;  %7510 = vmatmul.mubr.msk.bf16.gmra.mrb[44].mxu0 %vm1586_vm3, %v9113_v8  ;;  %7514 = vmatmul.mubr.msk.bf16.gmra.mrb[60].mxu1 %vm1586_vm3, %v7879_v44 }
 0x400   : > { %v4464_v46 = vmax.f32 %v3496_v19, 0.0  ;;  %v4338_v62 = vmax.f32 %v3569_v24, 0.0  ;;  %4278 = vmatprep.mubr.bf16.mxu1 %v7916_v0  ;;  %4895 = vmatprep.mubr.bf16.mxu0 %v7916_v0 }
 0x401   : > { %v4639_v41 = vpack.c.bf16 %v4463_v12, %v4447_v54  ;;  %v4577_v8 = vpack.c.bf16 %v4337_v20, %v4321_v58 }
 0x402   : > { %v3499_v60 = vpop.f32.mrb[196].mxu0  ;;  %v3572_v52 = vpop.f32.mrb[212].mxu1  ;;  %v4640_v1 = vpack.c.bf16 %v4464_v46, %v4448_v27  ;;  %v4578_v37 = vpack.c.bf16 %v4338_v62, %v4322_v59 }
 0x403   : > { %v3500_v3 = vadd.f32 %v3499_v60, %v9425_v30  ;;  %v3573_v17 = vadd.f32 %v3572_v52, %v9359_v14  ;;  %v3501_v6 = vpop.f32.mrb[197].mxu0  ;;  %v3574_v4 = vpop.f32.mrb[213].mxu1 }
 0x404   : > { %v3502_v18 = vadd.f32 %v3501_v6, %v9425_v30  ;;  %v3575_v43 = vadd.f32 %v3574_v4, %v9359_v14  ;;  %v3503_v23 = vpop.f32.mrb[198].mxu0  ;;  %v3576_v28 = vpop.f32.mrb[214].mxu1  ;;  %4871 = vmatprep.subr.bf16.mxu0 %v4640_v1  ;;  %4976 = vmatprep.subr.bf16.mxu1 %v4578_v37  ;;  %v7881_v1 = vld [vmem:[%s10957_s7 + $0x28] sm:$0xff]  }
 0x405   : > { %v3504_v29 = vadd.f32 %v3503_v23, %v9427_v35  ;;  %v3577_v34 = vadd.f32 %v3576_v28, %v9362_v42  ;;  %v3505_v31 = vpop.f32.mrb[199].mxu0  ;;  %v3578_v39 = vpop.f32.mrb[215].mxu1  ;;  %4872 = vmatpush1.bf16.msra.mxu0 %v4639_v41  ;;  %4977 = vmatpush1.bf16.msra.mxu1 %v4577_v8  ;;  %v4479_v32 = vmax.f32 %v3500_v3, 0.0  ;;  %v4353_v25 = vmax.f32 %v3573_v17, 0.0 }
 0x406   : > { %v3506_v33 = vadd.f32 %v3505_v31, %v9427_v35  ;;  %v3579_v49 = vadd.f32 %v3578_v39, %v9362_v42  ;;  %v4480_v11 = vmax.f32 %v3502_v18, 0.0  ;;  %v4354_v21 = vmax.f32 %v3575_v43, 0.0  ;;  %v9459_v4 = vpop.permute.xlu0 %3343  ;;  %v9461_v18 = vpop.permute.xlu1 %3348 }
 0x407   : > { %v4495_v2 = vmax.f32 %v3504_v29, 0.0  ;;  %v4369_v55 = vmax.f32 %v3577_v34, 0.0  ;;  %7515 = vmatmul.mubr.msk.bf16.gmra.mrb[64].mxu1 %vm1586_vm3, %v7880_v5 }
 0x408   : > { %v4496_v47 = vmax.f32 %v3506_v33, 0.0  ;;  %v4370_v15 = vmax.f32 %v3579_v49, 0.0  ;;  %4288 = vmatprep.mubr.bf16.mxu1 %v7916_v0 }
 0x409   : > { %v4655_v51 = vpack.c.bf16 %v4495_v2, %v4479_v32  ;;  %v4593_v22 = vpack.c.bf16 %v4369_v55, %v4353_v25 }
 0x40a   : > { %v3509_v57 = vpop.f32.mrb[200].mxu0  ;;  %v3582_v16 = vpop.f32.mrb[216].mxu1  ;;  %v4656_v53 = vpack.c.bf16 %v4496_v47, %v4480_v11  ;;  %v4594_v45 = vpack.c.bf16 %v4370_v15, %v4354_v21 }
 0x40b   : > { %v3510_v50 = vadd.f32 %v3509_v57, %v9442_v36  ;;  %v3583_v56 = vadd.f32 %v3582_v16, %v9373_v13  ;;  %v3511_v40 = vpop.f32.mrb[201].mxu0  ;;  %v3584_v19 = vpop.f32.mrb[217].mxu1 }
 0x40c   : > { %v3512_v24 = vadd.f32 %v3511_v40, %v9442_v36  ;;  %v3585_v54 = vadd.f32 %v3584_v19, %v9373_v13  ;;  %v3513_v58 = vpop.f32.mrb[202].mxu0  ;;  %v3586_v12 = vpop.f32.mrb[218].mxu1  ;;  %4873 = vmatprep.subr.bf16.mxu0 %v4656_v53  ;;  %4978 = vmatprep.subr.bf16.mxu1 %v4594_v45 }
 0x40d   : > { %v3514_v20 = vadd.f32 %v3513_v58, %v9444_v38  ;;  %v3587_v44 = vadd.f32 %v3586_v12, %v9376_v61  ;;  %v3515_v27 = vpop.f32.mrb[203].mxu0  ;;  %v3588_v59 = vpop.f32.mrb[219].mxu1  ;;  %4874 = vmatpush1.bf16.msra.mxu0 %v4655_v51  ;;  %4979 = vmatpush1.bf16.msra.mxu1 %v4593_v22  ;;  %v4511_v41 = vmax.f32 %v3510_v50, 0.0  ;;  %v4385_v8 = vmax.f32 %v3583_v56, 0.0  ;;  %v7882_v50 = vld [vmem:[%s10957_s7 + $0x30] sm:$0xff]  }
 0x40e   : > { %v3516_v46 = vadd.f32 %v3515_v27, %v9444_v38  ;;  %v3589_v62 = vadd.f32 %v3588_v59, %v9376_v61  ;;  %v4512_v37 = vmax.f32 %v3512_v24, 0.0  ;;  %v4386_v3 = vmax.f32 %v3585_v54, 0.0 }
 0x40f   : > { %v4527_v60 = vmax.f32 %v3514_v20, 0.0  ;;  %v4401_v52 = vmax.f32 %v3587_v44, 0.0  ;;  %7516 = vmatmul.mubr.msk.bf16.gmra.mrb[68].mxu1 %vm1586_vm3, %v7881_v1 }
 0x410   : > { %v4528_v17 = vmax.f32 %v3516_v46, 0.0  ;;  %v4402_v6 = vmax.f32 %v3589_v62, 0.0  ;;  %4298 = vmatprep.mubr.bf16.mxu1 %v7916_v0 }
 0x411   : > { %v4671_v43 = vpack.c.bf16 %v4527_v60, %v4511_v41  ;;  %v4609_v23 = vpack.c.bf16 %v4401_v52, %v4385_v8 }
 0x412   : > { %v3519_v28 = vpop.f32.mrb[204].mxu0  ;;  %v3592_v29 = vpop.f32.mrb[220].mxu1  ;;  %v4672_v34 = vpack.c.bf16 %v4528_v17, %v4512_v37  ;;  %v4610_v31 = vpack.c.bf16 %v4402_v6, %v4386_v3  ;;  %v9483_v37 = vld [vmem:[%s10959_s9] sm:$0xff]  }
 0x413   : > { %v3520_v39 = vadd.f32 %v3519_v28, %v9459_v4  ;;  %v3593_v33 = vadd.f32 %v3592_v29, %v9389_v7  ;;  %v3521_v49 = vpop.f32.mrb[205].mxu0  ;;  %v3594_v32 = vpop.f32.mrb[221].mxu1 }
 0x414   : > { %v3522_v25 = vadd.f32 %v3521_v49, %v9459_v4  ;;  %v3595_v2 = vadd.f32 %v3594_v32, %v9389_v7  ;;  %v3523_v55 = vpop.f32.mrb[206].mxu0  ;;  %v3596_v5 = vpop.f32.mrb[222].mxu1  ;;  %4875 = vmatprep.subr.bf16.mxu0 %v4672_v34  ;;  %4980 = vmatprep.subr.bf16.mxu1 %v4610_v31 }
 0x415   : > { %v3524_v11 = vadd.f32 %v3523_v55, %v9461_v18  ;;  %v3597_v21 = vadd.f32 %v3596_v5, %v9391_v26  ;;  %v3525_v47 = vpop.f32.mrb[207].mxu0  ;;  %v3598_v15 = vpop.f32.mrb[223].mxu1  ;;  %4876 = vmatpush1.bf16.msra.mxu0 %v4671_v43  ;;  %4981 = vmatpush1.bf16.msra.mxu1 %v4609_v23  ;;  %v4543_v57 = vmax.f32 %v3520_v39, 0.0  ;;  %v4417_v16 = vmax.f32 %v3593_v33, 0.0  ;;  %v7883_v33 = vld [vmem:[%s10957_s7 + $0x38] sm:$0xff]  }
 0x416   : > { %v3526_v51 = vadd.f32 %v3525_v47, %v9461_v18  ;;  %v3599_v22 = vadd.f32 %v3598_v15, %v9391_v26  ;;  %v4544_v56 = vmax.f32 %v3522_v25, 0.0  ;;  %v4418_v40 = vmax.f32 %v3595_v2, 0.0 }
 0x417   : > { %v4559_v53 = vmax.f32 %v3524_v11, 0.0  ;;  %v4433_v45 = vmax.f32 %v3597_v21, 0.0  ;;  %7517 = vmatmul.mubr.msk.bf16.gmra.mrb[72].mxu1 %vm1586_vm3, %v7882_v50 }
 0x418   : > { %v4560_v19 = vmax.f32 %v3526_v51, 0.0  ;;  %v4434_v24 = vmax.f32 %v3599_v22, 0.0  ;;  %4308 = vmatprep.mubr.bf16.mxu1 %v7916_v0 }
 0x419   : > { %v4687_v54 = vpack.c.bf16 %v4559_v53, %v4543_v57  ;;  %v4625_v58 = vpack.c.bf16 %v4433_v45, %v4417_v16 }
 0x41a   : > { %v3602_v12 = vpop.f32.mrb[224].mxu1  ;;  %v3675_v20 = vpop.f32.mrb[208].mxu0  ;;  %v4688_v44 = vpack.c.bf16 %v4560_v19, %v4544_v56  ;;  %v4626_v27 = vpack.c.bf16 %v4434_v24, %v4418_v40  ;;  %v9503_v40 = vld [vmem:[%s10959_s9 + $0x8] sm:$0xff]  }
 0x41b   : > { %v3603_v59 = vadd.f32 %v3602_v12, %v9405_v9  ;;  %v3676_v46 = vadd.f32 %v3675_v20, %v9345_v10  ;;  %v3604_v62 = vpop.f32.mrb[225].mxu1  ;;  %v3677_v41 = vpop.f32.mrb[209].mxu0 }
 0x41c   : > { %v3605_v8 = vadd.f32 %v3604_v62, %v9405_v9  ;;  %v3678_v60 = vadd.f32 %v3677_v41, %v9345_v10  ;;  %v3606_v52 = vpop.f32.mrb[226].mxu1  ;;  %v3679_v1 = vpop.f32.mrb[210].mxu0  ;;  %4877 = vmatprep.subr.bf16.mxu0 %v4688_v44  ;;  %4982 = vmatprep.subr.bf16.mxu1 %v4626_v27 }
 0x41d   : > { %v3607_v3 = vadd.f32 %v3606_v52, %v9407_v48  ;;  %v3680_v17 = vadd.f32 %v3679_v1, %v9348_v63  ;;  %v3608_v6 = vpop.f32.mrb[227].mxu1  ;;  %v3681_v43 = vpop.f32.mrb[211].mxu0  ;;  %4878 = vmatpush1.bf16.msra.mxu0 %v4687_v54  ;;  %4983 = vmatpush1.bf16.msra.mxu1 %v4625_v58  ;;  %v4449_v29 = vmax.f32 %v3603_v59, 0.0  ;;  %v4323_v34 = vmax.f32 %v3676_v46, 0.0 }
 0x41e   : > { %v3609_v23 = vadd.f32 %v3608_v6, %v9407_v48  ;;  %v3682_v28 = vadd.f32 %v3681_v43, %v9348_v63  ;;  %v4450_v49 = vmax.f32 %v3605_v8, 0.0  ;;  %v4324_v32 = vmax.f32 %v3678_v60, 0.0 }
 0x41f   : > { %v4465_v31 = vmax.f32 %v3607_v3, 0.0  ;;  %v4339_v39 = vmax.f32 %v3680_v17, 0.0  ;;  %7518 = vmatmul.mubr.msk.bf16.gmra.mrb[76].mxu1 %vm1586_vm3, %v7883_v33 }
 0x420   : > { %v4466_v25 = vmax.f32 %v3609_v23, 0.0  ;;  %v4340_v2 = vmax.f32 %v3682_v28, 0.0  ;;  %4896 = vmatmul.mubr.bf16.vlgmr.msra.gmra.mrb[48].mxu0 %v9483_v37  ;;  %5008 = vmatprep.mubr.bf16.mxu1 %v7916_v0 }
 0x421   : > { %v4641_v55 = vpack.c.bf16 %v4465_v31, %v4449_v29  ;;  %v4579_v5 = vpack.c.bf16 %v4339_v39, %v4323_v34  ;;  %4905 = vmatprep.mubr.bf16.mxu0 %v7916_v0 }
 0x422   : > { %v3612_v11 = vpop.f32.mrb[228].mxu1  ;;  %v3685_v21 = vpop.f32.mrb[212].mxu0  ;;  %v4642_v47 = vpack.c.bf16 %v4466_v25, %v4450_v49  ;;  %v4580_v15 = vpack.c.bf16 %v4340_v2, %v4324_v32  ;;  %v9518_v32 = vld [vmem:[%s10959_s9 + $0x10] sm:$0xff]  }
 0x423   : > { %v3613_v51 = vadd.f32 %v3612_v11, %v9425_v30  ;;  %v3686_v22 = vadd.f32 %v3685_v21, %v9359_v14  ;;  %v3614_v57 = vpop.f32.mrb[229].mxu1  ;;  %v3687_v16 = vpop.f32.mrb[213].mxu0 }
 0x424   : > { %v3615_v53 = vadd.f32 %v3614_v57, %v9425_v30  ;;  %v3688_v45 = vadd.f32 %v3687_v16, %v9359_v14  ;;  %v3616_v50 = vpop.f32.mrb[230].mxu1  ;;  %v3689_v56 = vpop.f32.mrb[214].mxu0  ;;  %4984 = vmatprep.subr.bf16.mxu1 %v4642_v47  ;;  %5089 = vmatprep.subr.bf16.mxu0 %v4580_v15 }
 0x425   : > { %v3617_v19 = vadd.f32 %v3616_v50, %v9427_v35  ;;  %v3690_v24 = vadd.f32 %v3689_v56, %v9362_v42  ;;  %v3618_v54 = vpop.f32.mrb[231].mxu1  ;;  %v3691_v58 = vpop.f32.mrb[215].mxu0  ;;  %4985 = vmatpush1.bf16.msra.mxu1 %v4641_v55  ;;  %5090 = vmatpush1.bf16.msra.mxu0 %v4579_v5  ;;  %v4481_v44 = vmax.f32 %v3613_v51, 0.0  ;;  %v4355_v27 = vmax.f32 %v3686_v22, 0.0 }
 0x426   : > { %v3619_v12 = vadd.f32 %v3618_v54, %v9427_v35  ;;  %v3692_v20 = vadd.f32 %v3691_v58, %v9362_v42  ;;  %v4482_v62 = vmax.f32 %v3615_v53, 0.0  ;;  %v4356_v41 = vmax.f32 %v3688_v45, 0.0 }
 0x427   : > { %v4497_v59 = vmax.f32 %v3617_v19, 0.0  ;;  %v4371_v46 = vmax.f32 %v3690_v24, 0.0 }
 0x428   : > { %v4498_v8 = vmax.f32 %v3619_v12, 0.0  ;;  %v4372_v60 = vmax.f32 %v3692_v20, 0.0  ;;  %4906 = vmatmul.mubr.bf16.gmra.mrb[52].mxu0 %v9503_v40 }
 0x429   : > { %v4657_v52 = vpack.c.bf16 %v4497_v59, %v4481_v44  ;;  %v4595_v1 = vpack.c.bf16 %v4371_v46, %v4355_v27  ;;  %4915 = vmatprep.mubr.bf16.mxu0 %v7916_v0 }
 0x42a   : > { %v3622_v3 = vpop.f32.mrb[232].mxu1  ;;  %v3695_v17 = vpop.f32.mrb[216].mxu0  ;;  %v4658_v6 = vpack.c.bf16 %v4498_v8, %v4482_v62  ;;  %v4596_v43 = vpack.c.bf16 %v4372_v60, %v4356_v41  ;;  %v9533_v8 = vld [vmem:[%s10959_s9 + $0x18] sm:$0xff]  }
 0x42b   : > { %v3623_v23 = vadd.f32 %v3622_v3, %v9442_v36  ;;  %v3696_v28 = vadd.f32 %v3695_v17, %v9373_v13  ;;  %v3624_v29 = vpop.f32.mrb[233].mxu1  ;;  %v3697_v34 = vpop.f32.mrb[217].mxu0 }
 0x42c   : > { %v3625_v31 = vadd.f32 %v3624_v29, %v9442_v36  ;;  %v3698_v39 = vadd.f32 %v3697_v34, %v9373_v13  ;;  %v3626_v33 = vpop.f32.mrb[234].mxu1  ;;  %v3699_v49 = vpop.f32.mrb[218].mxu0  ;;  %4986 = vmatprep.subr.bf16.mxu1 %v4658_v6  ;;  %5091 = vmatprep.subr.bf16.mxu0 %v4596_v43 }
 0x42d   : > { %v3627_v25 = vadd.f32 %v3626_v33, %v9444_v38  ;;  %v3700_v2 = vadd.f32 %v3699_v49, %v9376_v61  ;;  %v3628_v55 = vpop.f32.mrb[235].mxu1  ;;  %v3701_v5 = vpop.f32.mrb[219].mxu0  ;;  %4987 = vmatpush1.bf16.msra.mxu1 %v4657_v52  ;;  %5092 = vmatpush1.bf16.msra.mxu0 %v4595_v1  ;;  %v4513_v47 = vmax.f32 %v3623_v23, 0.0  ;;  %v4387_v15 = vmax.f32 %v3696_v28, 0.0 }
 0x42e   : > { %v3629_v11 = vadd.f32 %v3628_v55, %v9444_v38  ;;  %v3702_v21 = vadd.f32 %v3701_v5, %v9376_v61  ;;  %v4514_v57 = vmax.f32 %v3625_v31, 0.0  ;;  %v4388_v16 = vmax.f32 %v3698_v39, 0.0 }
 0x42f   : > { %v4529_v51 = vmax.f32 %v3627_v25, 0.0  ;;  %v4403_v22 = vmax.f32 %v3700_v2, 0.0 }
 0x430   : > { %v4530_v53 = vmax.f32 %v3629_v11, 0.0  ;;  %v4404_v45 = vmax.f32 %v3702_v21, 0.0  ;;  %4916 = vmatmul.mubr.bf16.gmra.mrb[56].mxu0 %v9518_v32 }
 0x431   : > { %v4673_v50 = vpack.c.bf16 %v4529_v51, %v4513_v47  ;;  %v4611_v56 = vpack.c.bf16 %v4403_v22, %v4387_v15  ;;  %4925 = vmatprep.mubr.bf16.mxu0 %v7916_v0 }
 0x432   : > { %v4674_v19 = vpack.c.bf16 %v4530_v53, %v4514_v57  ;;  %v3632_v24 = vpop.f32.mrb[236].mxu1  ;;  %v3705_v54 = vpop.f32.mrb[220].mxu0  ;;  %v4612_v58 = vpack.c.bf16 %v4404_v45, %v4388_v16  ;;  %v9548_v45 = vld [vmem:[%s10959_s9 + $0x20] sm:$0xff]  }
 0x433   : > { %v3633_v12 = vadd.f32 %v3632_v24, %v9459_v4  ;;  %v3706_v20 = vadd.f32 %v3705_v54, %v9389_v7  ;;  %v3634_v44 = vpop.f32.mrb[237].mxu1  ;;  %v3707_v27 = vpop.f32.mrb[221].mxu0 }
 0x434   : > { %v3635_v59 = vadd.f32 %v3634_v44, %v9459_v4  ;;  %v3708_v46 = vadd.f32 %v3707_v27, %v9389_v7  ;;  %v3636_v62 = vpop.f32.mrb[238].mxu1  ;;  %v3709_v41 = vpop.f32.mrb[222].mxu0  ;;  %4988 = vmatprep.subr.bf16.mxu1 %v4674_v19  ;;  %5093 = vmatprep.subr.bf16.mxu0 %v4612_v58 }
 0x435   : > { %v3637_v60 = vadd.f32 %v3636_v62, %v9461_v18  ;;  %v3710_v52 = vadd.f32 %v3709_v41, %v9391_v26  ;;  %v3638_v1 = vpop.f32.mrb[239].mxu1  ;;  %v3711_v3 = vpop.f32.mrb[223].mxu0  ;;  %4989 = vmatpush1.bf16.msra.mxu1 %v4673_v50  ;;  %5094 = vmatpush1.bf16.msra.mxu0 %v4611_v56  ;;  %v4545_v43 = vmax.f32 %v3633_v12, 0.0  ;;  %v4419_v23 = vmax.f32 %v3706_v20, 0.0 }
 0x436   : > { %v3639_v17 = vadd.f32 %v3638_v1, %v9461_v18  ;;  %v3712_v6 = vadd.f32 %v3711_v3, %v9391_v26  ;;  %v4546_v34 = vmax.f32 %v3635_v59, 0.0  ;;  %v4420_v31 = vmax.f32 %v3708_v46, 0.0 }
 0x437   : > { %v4561_v28 = vmax.f32 %v3637_v60, 0.0  ;;  %v4435_v29 = vmax.f32 %v3710_v52, 0.0 }
 0x438   : > { %v4562_v39 = vmax.f32 %v3639_v17, 0.0  ;;  %v4436_v33 = vmax.f32 %v3712_v6, 0.0  ;;  %4926 = vmatmul.mubr.bf16.gmra.mrb[60].mxu0 %v9533_v8 }
 0x439   : > { %v4689_v49 = vpack.c.bf16 %v4561_v28, %v4545_v43  ;;  %v4627_v25 = vpack.c.bf16 %v4435_v29, %v4419_v23  ;;  %4935 = vmatprep.mubr.bf16.mxu0 %v7916_v0 }
 0x43a   : > { %v4690_v2 = vpack.c.bf16 %v4562_v39, %v4546_v34  ;;  %v3715_v55 = vpop.f32.mrb[224].mxu0  ;;  %v3788_v5 = vpop.f32.mrb[240].mxu1  ;;  %v4628_v11 = vpack.c.bf16 %v4436_v33, %v4420_v31 }
 0x43b   : > { %v3716_v21 = vadd.f32 %v3715_v55, %v9405_v9  ;;  %v3789_v47 = vadd.f32 %v3788_v5, %v9345_v10  ;;  %v3717_v15 = vpop.f32.mrb[225].mxu0  ;;  %v3790_v51 = vpop.f32.mrb[241].mxu1 }
 0x43c   : > { %v3718_v22 = vadd.f32 %v3717_v15, %v9405_v9  ;;  %v3791_v57 = vadd.f32 %v3790_v51, %v9345_v10  ;;  %v3719_v16 = vpop.f32.mrb[226].mxu0  ;;  %v3792_v53 = vpop.f32.mrb[242].mxu1  ;;  %4990 = vmatprep.subr.bf16.mxu1 %v4690_v2  ;;  %5095 = vmatprep.subr.bf16.mxu0 %v4628_v11 }
 0x43d   : > { %v3720_v50 = vadd.f32 %v3719_v16, %v9407_v48  ;;  %v3793_v56 = vadd.f32 %v3792_v53, %v9348_v63  ;;  %v3721_v19 = vpop.f32.mrb[227].mxu0  ;;  %v3794_v24 = vpop.f32.mrb[243].mxu1  ;;  %4991 = vmatpush1.bf16.msra.mxu1 %v4689_v49  ;;  %5096 = vmatpush1.bf16.msra.mxu0 %v4627_v25  ;;  %v4451_v12 = vmax.f32 %v3716_v21, 0.0  ;;  %v4325_v20 = vmax.f32 %v3789_v47, 0.0  ;;  %v9565_v49 = vld [vmem:[%s10959_s9 + $0x28] sm:$0xff]  }
 0x43e   : > { %v3722_v54 = vadd.f32 %v3721_v19, %v9407_v48  ;;  %v3795_v58 = vadd.f32 %v3794_v24, %v9348_v63  ;;  %v4452_v59 = vmax.f32 %v3718_v22, 0.0  ;;  %v4326_v46 = vmax.f32 %v3791_v57, 0.0 }
 0x43f   : > { %v4467_v44 = vmax.f32 %v3720_v50, 0.0  ;;  %v4341_v27 = vmax.f32 %v3793_v56, 0.0 }
 0x440   : > { %v4468_v62 = vmax.f32 %v3722_v54, 0.0  ;;  %v4342_v41 = vmax.f32 %v3795_v58, 0.0  ;;  %4936 = vmatmul.mubr.bf16.gmra.mrb[64].mxu0 %v9548_v45  ;;  %5009 = vmatmul.mubr.bf16.vlgmr.msra.gmra.mrb[80].mxu1 %v9483_v37 }
 0x441   : > { %v4643_v60 = vpack.c.bf16 %v4467_v44, %v4451_v12  ;;  %v4581_v52 = vpack.c.bf16 %v4341_v27, %v4325_v20  ;;  %4945 = vmatprep.mubr.bf16.mxu0 %v7916_v0  ;;  %5018 = vmatprep.mubr.bf16.mxu1 %v7916_v0 }
 0x442   : > { %v4582_v1 = vpack.c.bf16 %v4342_v41, %v4326_v46  ;;  %v3725_v3 = vpop.f32.mrb[228].mxu0  ;;  %v3798_v17 = vpop.f32.mrb[244].mxu1  ;;  %v4644_v6 = vpack.c.bf16 %v4468_v62, %v4452_v59 }
 0x443   : > { %v3726_v43 = vadd.f32 %v3725_v3, %v9425_v30  ;;  %v3799_v23 = vadd.f32 %v3798_v17, %v9359_v14  ;;  %v3727_v28 = vpop.f32.mrb[229].mxu0  ;;  %v3800_v29 = vpop.f32.mrb[245].mxu1 }
 0x444   : > { %v3728_v34 = vadd.f32 %v3727_v28, %v9425_v30  ;;  %v3801_v31 = vadd.f32 %v3800_v29, %v9359_v14  ;;  %v3729_v39 = vpop.f32.mrb[230].mxu0  ;;  %v3802_v33 = vpop.f32.mrb[246].mxu1  ;;  %5097 = vmatprep.subr.bf16.mxu0 %v4644_v6  ;;  %5202 = vmatprep.subr.bf16.mxu1 %v4582_v1 }
 0x445   : > { %v3730_v25 = vadd.f32 %v3729_v39, %v9427_v35  ;;  %v3803_v2 = vadd.f32 %v3802_v33, %v9362_v42  ;;  %v3731_v55 = vpop.f32.mrb[231].mxu0  ;;  %v3804_v5 = vpop.f32.mrb[247].mxu1  ;;  %5098 = vmatpush1.bf16.msra.mxu0 %v4643_v60  ;;  %5203 = vmatpush1.bf16.msra.mxu1 %v4581_v52  ;;  %v4483_v47 = vmax.f32 %v3726_v43, 0.0  ;;  %v4357_v15 = vmax.f32 %v3799_v23, 0.0  ;;  %v9582_v52 = vld [vmem:[%s10959_s9 + $0x30] sm:$0xff]  }
 0x446   : > { %v3732_v11 = vadd.f32 %v3731_v55, %v9427_v35  ;;  %v3805_v21 = vadd.f32 %v3804_v5, %v9362_v42  ;;  %v4484_v57 = vmax.f32 %v3728_v34, 0.0  ;;  %v4358_v16 = vmax.f32 %v3801_v31, 0.0 }
 0x447   : > { %v4499_v51 = vmax.f32 %v3730_v25, 0.0  ;;  %v4373_v22 = vmax.f32 %v3803_v2, 0.0 }
 0x448   : > { %v4500_v53 = vmax.f32 %v3732_v11, 0.0  ;;  %v4374_v50 = vmax.f32 %v3805_v21, 0.0  ;;  %4946 = vmatmul.mubr.bf16.gmra.mrb[68].mxu0 %v9565_v49  ;;  %5019 = vmatmul.mubr.bf16.gmra.mrb[84].mxu1 %v9503_v40 }
 0x449   : > { %v4659_v56 = vpack.c.bf16 %v4499_v51, %v4483_v47  ;;  %v4597_v19 = vpack.c.bf16 %v4373_v22, %v4357_v15  ;;  %4955 = vmatprep.mubr.bf16.mxu0 %v7916_v0  ;;  %5028 = vmatprep.mubr.bf16.mxu1 %v7916_v0 }
 0x44a   : > { %v4598_v24 = vpack.c.bf16 %v4374_v50, %v4358_v16  ;;  %v3735_v54 = vpop.f32.mrb[232].mxu0  ;;  %v3808_v58 = vpop.f32.mrb[248].mxu1  ;;  %v4660_v12 = vpack.c.bf16 %v4500_v53, %v4484_v57 }
 0x44b   : > { %v3736_v20 = vadd.f32 %v3735_v54, %v9442_v36  ;;  %v3809_v44 = vadd.f32 %v3808_v58, %v9373_v13  ;;  %v3737_v27 = vpop.f32.mrb[233].mxu0  ;;  %v3810_v59 = vpop.f32.mrb[249].mxu1 }
 0x44c   : > { %v3738_v46 = vadd.f32 %v3737_v27, %v9442_v36  ;;  %v3811_v62 = vadd.f32 %v3810_v59, %v9373_v13  ;;  %v3739_v41 = vpop.f32.mrb[234].mxu0  ;;  %v3812_v60 = vpop.f32.mrb[250].mxu1  ;;  %5099 = vmatprep.subr.bf16.mxu0 %v4660_v12  ;;  %5204 = vmatprep.subr.bf16.mxu1 %v4598_v24  ;;  %v9599_v24 = vld [vmem:[%s10959_s9 + $0x38] sm:$0xff]  }
 0x44d   : > { %v3740_v1 = vadd.f32 %v3739_v41, %v9444_v38  ;;  %v3813_v3 = vadd.f32 %v3812_v60, %v9376_v61  ;;  %v3741_v17 = vpop.f32.mrb[235].mxu0  ;;  %v3814_v6 = vpop.f32.mrb[251].mxu1  ;;  %5100 = vmatpush1.bf16.msra.mxu0 %v4659_v56  ;;  %5205 = vmatpush1.bf16.msra.mxu1 %v4597_v19  ;;  %v4515_v28 = vmax.f32 %v3736_v20, 0.0  ;;  %v4389_v29 = vmax.f32 %v3809_v44, 0.0 }
 0x44e   : > { %v3742_v43 = vadd.f32 %v3741_v17, %v9444_v38  ;;  %v3815_v23 = vadd.f32 %v3814_v6, %v9376_v61  ;;  %v4516_v39 = vmax.f32 %v3738_v46, 0.0  ;;  %v4390_v33 = vmax.f32 %v3811_v62, 0.0 }
 0x44f   : > { %v4531_v34 = vmax.f32 %v3740_v1, 0.0  ;;  %v4405_v31 = vmax.f32 %v3813_v3, 0.0 }
 0x450   : > { %v4532_v25 = vmax.f32 %v3742_v43, 0.0  ;;  %v4406_v2 = vmax.f32 %v3815_v23, 0.0  ;;  %4956 = vmatmul.mubr.bf16.gmra.mrb[72].mxu0 %v9582_v52  ;;  %5029 = vmatmul.mubr.bf16.gmra.mrb[88].mxu1 %v9518_v32 }
 0x451   : > { %v4675_v55 = vpack.c.bf16 %v4531_v34, %v4515_v28  ;;  %v4613_v5 = vpack.c.bf16 %v4405_v31, %v4389_v29  ;;  %4965 = vmatprep.mubr.bf16.mxu0 %v7916_v0  ;;  %5038 = vmatprep.mubr.bf16.mxu1 %v7916_v0 }
 0x452   : > { %v4614_v11 = vpack.c.bf16 %v4406_v2, %v4390_v33  ;;  %v3745_v21 = vpop.f32.mrb[236].mxu0  ;;  %v3818_v47 = vpop.f32.mrb[252].mxu1  ;;  %v4676_v15 = vpack.c.bf16 %v4532_v25, %v4516_v39 }
 0x453   : > { %v3746_v51 = vadd.f32 %v3745_v21, %v9459_v4  ;;  %v3819_v22 = vadd.f32 %v3818_v47, %v9389_v7  ;;  %v3747_v57 = vpop.f32.mrb[237].mxu0  ;;  %v3820_v16 = vpop.f32.mrb[253].mxu1 }
 0x454   : > { %v3748_v53 = vadd.f32 %v3747_v57, %v9459_v4  ;;  %v3821_v50 = vadd.f32 %v3820_v16, %v9389_v7  ;;  %v3749_v56 = vpop.f32.mrb[238].mxu0  ;;  %v3822_v19 = vpop.f32.mrb[254].mxu1  ;;  %5101 = vmatprep.subr.bf16.mxu0 %v4676_v15  ;;  %5206 = vmatprep.subr.bf16.mxu1 %v4614_v11 }
 0x455   : > { %v3750_v54 = vadd.f32 %v3749_v56, %v9461_v18  ;;  %v3823_v58 = vadd.f32 %v3822_v19, %v9391_v26  ;;  %v3751_v12 = vpop.f32.mrb[239].mxu0  ;;  %v3824_v20 = vpop.f32.mrb[255].mxu1  ;;  %5102 = vmatpush1.bf16.msra.mxu0 %v4675_v55  ;;  %5207 = vmatpush1.bf16.msra.mxu1 %v4613_v5  ;;  %v4547_v59 = vmax.f32 %v3746_v51, 0.0  ;;  %v4421_v46 = vmax.f32 %v3819_v22, 0.0 }
 0x456   : > { %v3752_v44 = vadd.f32 %v3751_v12, %v9461_v18  ;;  %v3825_v27 = vadd.f32 %v3824_v20, %v9391_v26  ;;  %v4548_v60 = vmax.f32 %v3748_v53, 0.0  ;;  %v4422_v1 = vmax.f32 %v3821_v50, 0.0 }
 0x457   : > { %v4563_v62 = vmax.f32 %v3750_v54, 0.0  ;;  %v4437_v41 = vmax.f32 %v3823_v58, 0.0 }
 0x458   : > { %v4564_v3 = vmax.f32 %v3752_v44, 0.0  ;;  %v4438_v17 = vmax.f32 %v3825_v27, 0.0  ;;  %4966 = vmatmul.mubr.bf16.gmra.mrb[76].mxu0 %v9599_v24  ;;  %5039 = vmatmul.mubr.bf16.gmra.mrb[92].mxu1 %v9533_v8 }
 0x459   : > { %v4691_v6 = vpack.c.bf16 %v4563_v62, %v4547_v59  ;;  %v4629_v43 = vpack.c.bf16 %v4437_v41, %v4421_v46  ;;  %5048 = vmatprep.mubr.bf16.mxu1 %v7916_v0  ;;  %5121 = vmatprep.mubr.bf16.mxu0 %v7916_v0 }
 0x45a   : > { %v4630_v23 = vpack.c.bf16 %v4438_v17, %v4422_v1  ;;  %v3828_v28 = vpop.f32.mrb[0].mxu1  ;;  %v3901_v29 = vpop.f32.mrb[240].mxu0  ;;  %v4692_v34 = vpack.c.bf16 %v4564_v3, %v4548_v60 }
 0x45b   : > { %v3829_v31 = vadd.f32 %v3828_v28, %v9405_v9  ;;  %v3902_v39 = vadd.f32 %v3901_v29, %v9345_v10  ;;  %v3830_v33 = vpop.f32.mrb[1].mxu1  ;;  %v3903_v25 = vpop.f32.mrb[241].mxu0 }
 0x45c   : > { %v3831_v2 = vadd.f32 %v3830_v33, %v9405_v9  ;;  %v3904_v55 = vadd.f32 %v3903_v25, %v9345_v10  ;;  %v3832_v5 = vpop.f32.mrb[2].mxu1  ;;  %v3905_v11 = vpop.f32.mrb[242].mxu0  ;;  %5103 = vmatprep.subr.bf16.mxu0 %v4692_v34  ;;  %5208 = vmatprep.subr.bf16.mxu1 %v4630_v23 }
 0x45d   : > { %v3833_v21 = vadd.f32 %v3832_v5, %v9407_v48  ;;  %v3906_v47 = vadd.f32 %v3905_v11, %v9348_v63  ;;  %v3834_v15 = vpop.f32.mrb[3].mxu1  ;;  %v3907_v51 = vpop.f32.mrb[243].mxu0  ;;  %5104 = vmatpush1.bf16.msra.mxu0 %v4691_v6  ;;  %5209 = vmatpush1.bf16.msra.mxu1 %v4629_v43  ;;  %v4453_v16 = vmax.f32 %v3829_v31, 0.0  ;;  %v4327_v53 = vmax.f32 %v3902_v39, 0.0 }
 0x45e   : > { %v3835_v22 = vadd.f32 %v3834_v15, %v9407_v48  ;;  %v3908_v57 = vadd.f32 %v3907_v51, %v9348_v63  ;;  %v4454_v19 = vmax.f32 %v3831_v2, 0.0  ;;  %v4328_v54 = vmax.f32 %v3904_v55, 0.0 }
 0x45f   : > { %v4469_v50 = vmax.f32 %v3833_v21, 0.0  ;;  %v4343_v56 = vmax.f32 %v3906_v47, 0.0 }
 0x460   : > { %v4470_v58 = vmax.f32 %v3835_v22, 0.0  ;;  %v4344_v12 = vmax.f32 %v3908_v57, 0.0  ;;  %5049 = vmatmul.mubr.bf16.gmra.mrb[96].mxu1 %v9548_v45  ;;  %5122 = vmatmul.mubr.bf16.vlgmr.msra.gmra.mrb[80].mxu0 %v9483_v37 }
 0x461   : > { %v4645_v20 = vpack.c.bf16 %v4469_v50, %v4453_v16  ;;  %v4583_v44 = vpack.c.bf16 %v4343_v56, %v4327_v53  ;;  %5058 = vmatprep.mubr.bf16.mxu1 %v7916_v0  ;;  %5131 = vmatprep.mubr.bf16.mxu0 %v7916_v0 }
 0x462   : > { %v4646_v27 = vpack.c.bf16 %v4470_v58, %v4454_v19  ;;  %v4584_v59 = vpack.c.bf16 %v4344_v12, %v4328_v54  ;;  %v3838_v46 = vpop.f32.mrb[4].mxu1  ;;  %v3911_v62 = vpop.f32.mrb[244].mxu0 }
 0x463   : > { %v3839_v41 = vadd.f32 %v3838_v46, %v9425_v30  ;;  %v3912_v60 = vadd.f32 %v3911_v62, %v9359_v14  ;;  %v3840_v1 = vpop.f32.mrb[5].mxu1  ;;  %v3913_v3 = vpop.f32.mrb[245].mxu0 }
 0x464   : > { %v3841_v17 = vadd.f32 %v3840_v1, %v9425_v30  ;;  %v3914_v6 = vadd.f32 %v3913_v3, %v9359_v14  ;;  %v3842_v43 = vpop.f32.mrb[6].mxu1  ;;  %v3915_v23 = vpop.f32.mrb[246].mxu0  ;;  %5210 = vmatprep.subr.bf16.mxu1 %v4646_v27  ;;  %5315 = vmatprep.subr.bf16.mxu0 %v4584_v59 }
 0x465   : > { %v3843_v28 = vadd.f32 %v3842_v43, %v9427_v35  ;;  %v3916_v29 = vadd.f32 %v3915_v23, %v9362_v42  ;;  %v3844_v34 = vpop.f32.mrb[7].mxu1  ;;  %v3917_v31 = vpop.f32.mrb[247].mxu0  ;;  %5211 = vmatpush1.bf16.msra.mxu1 %v4645_v20  ;;  %5316 = vmatpush1.bf16.msra.mxu0 %v4583_v44  ;;  %v4485_v25 = vmax.f32 %v3839_v41, 0.0  ;;  %v4359_v2 = vmax.f32 %v3912_v60, 0.0 }
 0x466   : > { %v3845_v39 = vadd.f32 %v3844_v34, %v9427_v35  ;;  %v3918_v33 = vadd.f32 %v3917_v31, %v9362_v42  ;;  %v4486_v11 = vmax.f32 %v3841_v17, 0.0  ;;  %v4360_v21 = vmax.f32 %v3914_v6, 0.0 }
 0x467   : > { %v4501_v55 = vmax.f32 %v3843_v28, 0.0  ;;  %v4375_v5 = vmax.f32 %v3916_v29, 0.0 }
 0x468   : > { %v4502_v47 = vmax.f32 %v3845_v39, 0.0  ;;  %v4376_v15 = vmax.f32 %v3918_v33, 0.0  ;;  %5059 = vmatmul.mubr.bf16.gmra.mrb[100].mxu1 %v9565_v49  ;;  %5132 = vmatmul.mubr.bf16.gmra.mrb[84].mxu0 %v9503_v40 }
 0x469   : > { %v4661_v51 = vpack.c.bf16 %v4501_v55, %v4485_v25  ;;  %v4599_v22 = vpack.c.bf16 %v4375_v5, %v4359_v2  ;;  %5068 = vmatprep.mubr.bf16.mxu1 %v7916_v0  ;;  %5141 = vmatprep.mubr.bf16.mxu0 %v7916_v0 }
 0x46a   : > { %v4662_v57 = vpack.c.bf16 %v4502_v47, %v4486_v11  ;;  %v4600_v16 = vpack.c.bf16 %v4376_v15, %v4360_v21  ;;  %v3848_v53 = vpop.f32.mrb[8].mxu1  ;;  %v3921_v50 = vpop.f32.mrb[248].mxu0 }
 0x46b   : > { %v3849_v56 = vadd.f32 %v3848_v53, %v9442_v36  ;;  %v3922_v19 = vadd.f32 %v3921_v50, %v9373_v13  ;;  %v3850_v54 = vpop.f32.mrb[9].mxu1  ;;  %v3923_v58 = vpop.f32.mrb[249].mxu0 }
 0x46c   : > { %v3851_v12 = vadd.f32 %v3850_v54, %v9442_v36  ;;  %v3924_v20 = vadd.f32 %v3923_v58, %v9373_v13  ;;  %v3852_v44 = vpop.f32.mrb[10].mxu1  ;;  %v3925_v27 = vpop.f32.mrb[250].mxu0  ;;  %5212 = vmatprep.subr.bf16.mxu1 %v4662_v57  ;;  %5317 = vmatprep.subr.bf16.mxu0 %v4600_v16 }
 0x46d   : > { %v3853_v59 = vadd.f32 %v3852_v44, %v9444_v38  ;;  %v3926_v46 = vadd.f32 %v3925_v27, %v9376_v61  ;;  %v3854_v62 = vpop.f32.mrb[11].mxu1  ;;  %v3927_v41 = vpop.f32.mrb[251].mxu0  ;;  %5213 = vmatpush1.bf16.msra.mxu1 %v4661_v51  ;;  %5318 = vmatpush1.bf16.msra.mxu0 %v4599_v22  ;;  %v4517_v3 = vmax.f32 %v3849_v56, 0.0  ;;  %v4391_v17 = vmax.f32 %v3922_v19, 0.0 }
 0x46e   : > { %v3855_v60 = vadd.f32 %v3854_v62, %v9444_v38  ;;  %v3928_v1 = vadd.f32 %v3927_v41, %v9376_v61  ;;  %v4518_v23 = vmax.f32 %v3851_v12, 0.0  ;;  %v4392_v28 = vmax.f32 %v3924_v20, 0.0 }
 0x46f   : > { %v4533_v6 = vmax.f32 %v3853_v59, 0.0  ;;  %v4407_v43 = vmax.f32 %v3926_v46, 0.0 }
 0x470   : > { %v4534_v29 = vmax.f32 %v3855_v60, 0.0  ;;  %v4408_v34 = vmax.f32 %v3928_v1, 0.0  ;;  %5069 = vmatmul.mubr.bf16.gmra.mrb[104].mxu1 %v9582_v52  ;;  %5142 = vmatmul.mubr.bf16.gmra.mrb[88].mxu0 %v9518_v32 }
 0x471   : > { %v4677_v31 = vpack.c.bf16 %v4533_v6, %v4517_v3  ;;  %v4615_v39 = vpack.c.bf16 %v4407_v43, %v4391_v17  ;;  %5078 = vmatprep.mubr.bf16.mxu1 %v7916_v0  ;;  %5151 = vmatprep.mubr.bf16.mxu0 %v7916_v0 }
 0x472   : > { %v4678_v33 = vpack.c.bf16 %v4534_v29, %v4518_v23  ;;  %v4616_v25 = vpack.c.bf16 %v4408_v34, %v4392_v28  ;;  %v3858_v2 = vpop.f32.mrb[12].mxu1  ;;  %v3931_v55 = vpop.f32.mrb[252].mxu0 }
 0x473   : > { %v3859_v5 = vadd.f32 %v3858_v2, %v9459_v4  ;;  %v3932_v11 = vadd.f32 %v3931_v55, %v9389_v7  ;;  %v3860_v21 = vpop.f32.mrb[13].mxu1  ;;  %v3933_v47 = vpop.f32.mrb[253].mxu0 }
 0x474   : > { %v3861_v15 = vadd.f32 %v3860_v21, %v9459_v4  ;;  %v3934_v51 = vadd.f32 %v3933_v47, %v9389_v7  ;;  %v3862_v22 = vpop.f32.mrb[14].mxu1  ;;  %v3935_v57 = vpop.f32.mrb[254].mxu0  ;;  %5214 = vmatprep.subr.bf16.mxu1 %v4678_v33  ;;  %5319 = vmatprep.subr.bf16.mxu0 %v4616_v25 }
 0x475   : > { %v3863_v16 = vadd.f32 %v3862_v22, %v9461_v18  ;;  %v3936_v53 = vadd.f32 %v3935_v57, %v9391_v26  ;;  %v3864_v50 = vpop.f32.mrb[15].mxu1  ;;  %v3937_v56 = vpop.f32.mrb[255].mxu0  ;;  %5215 = vmatpush1.bf16.msra.mxu1 %v4677_v31  ;;  %5320 = vmatpush1.bf16.msra.mxu0 %v4615_v39  ;;  %v4549_v58 = vmax.f32 %v3859_v5, 0.0  ;;  %v4423_v12 = vmax.f32 %v3932_v11, 0.0 }
 0x476   : > { %v3865_v19 = vadd.f32 %v3864_v50, %v9461_v18  ;;  %v3938_v54 = vadd.f32 %v3937_v56, %v9391_v26  ;;  %v4550_v27 = vmax.f32 %v3861_v15, 0.0  ;;  %v4424_v59 = vmax.f32 %v3934_v51, 0.0 }
 0x477   : > { %v4565_v20 = vmax.f32 %v3863_v16, 0.0  ;;  %v4439_v44 = vmax.f32 %v3936_v53, 0.0 }
 0x478   : > { %v4566_v46 = vmax.f32 %v3865_v19, 0.0  ;;  %v4440_v62 = vmax.f32 %v3938_v54, 0.0  ;;  %5079 = vmatmul.mubr.bf16.gmra.mrb[108].mxu1 %v9599_v24  ;;  %5152 = vmatmul.mubr.bf16.gmra.mrb[92].mxu0 %v9533_v8 }
 0x479   : > { %v4693_v41 = vpack.c.bf16 %v4565_v20, %v4549_v58  ;;  %v4631_v60 = vpack.c.bf16 %v4439_v44, %v4423_v12  ;;  %5161 = vmatprep.mubr.bf16.mxu0 %v7916_v0  ;;  %5234 = vmatprep.mubr.bf16.mxu1 %v7916_v0 }
 0x47a   : > { %v4694_v1 = vpack.c.bf16 %v4566_v46, %v4550_v27  ;;  %v4632_v3 = vpack.c.bf16 %v4440_v62, %v4424_v59  ;;  %v3941_v17 = vpop.f32.mrb[0].mxu0  ;;  %v4014_v6 = vpop.f32.mrb[16].mxu1 }
 0x47b   : > { %v3942_v43 = vadd.f32 %v3941_v17, %v9405_v9  ;;  %v4015_v23 = vadd.f32 %v4014_v6, %v9345_v10  ;;  %v3943_v28 = vpop.f32.mrb[1].mxu0  ;;  %v4016_v29 = vpop.f32.mrb[17].mxu1 }
 0x47c   : > { %v3944_v34 = vadd.f32 %v3943_v28, %v9405_v9  ;;  %v4017_v31 = vadd.f32 %v4016_v29, %v9345_v10  ;;  %v3945_v39 = vpop.f32.mrb[2].mxu0  ;;  %v4018_v33 = vpop.f32.mrb[18].mxu1  ;;  %5216 = vmatprep.subr.bf16.mxu1 %v4694_v1  ;;  %5321 = vmatprep.subr.bf16.mxu0 %v4632_v3 }
 0x47d   : > { %v3946_v25 = vadd.f32 %v3945_v39, %v9407_v48  ;;  %v4019_v2 = vadd.f32 %v4018_v33, %v9348_v63  ;;  %v3947_v55 = vpop.f32.mrb[3].mxu0  ;;  %v4020_v5 = vpop.f32.mrb[19].mxu1  ;;  %5217 = vmatpush1.bf16.msra.mxu1 %v4693_v41  ;;  %5322 = vmatpush1.bf16.msra.mxu0 %v4631_v60  ;;  %v4455_v47 = vmax.f32 %v3942_v43, 0.0  ;;  %v4329_v15 = vmax.f32 %v4015_v23, 0.0 }
 0x47e   : > { %v3948_v11 = vadd.f32 %v3947_v55, %v9407_v48  ;;  %v4021_v21 = vadd.f32 %v4020_v5, %v9348_v63  ;;  %v4456_v57 = vmax.f32 %v3944_v34, 0.0  ;;  %v4330_v16 = vmax.f32 %v4017_v31, 0.0 }
 0x47f   : > { %v4471_v51 = vmax.f32 %v3946_v25, 0.0  ;;  %v4345_v22 = vmax.f32 %v4019_v2, 0.0 }
 0x480   : > { %v4472_v53 = vmax.f32 %v3948_v11, 0.0  ;;  %v4346_v50 = vmax.f32 %v4021_v21, 0.0  ;;  %5162 = vmatmul.mubr.bf16.gmra.mrb[96].mxu0 %v9548_v45  ;;  %5235 = vmatmul.mubr.bf16.vlgmr.msra.gmra.mrb[112].mxu1 %v9483_v37 }
 0x481   : > { %v4647_v56 = vpack.c.bf16 %v4471_v51, %v4455_v47  ;;  %v4585_v19 = vpack.c.bf16 %v4345_v22, %v4329_v15  ;;  %5171 = vmatprep.mubr.bf16.mxu0 %v7916_v0  ;;  %5244 = vmatprep.mubr.bf16.mxu1 %v7916_v0 }
 0x482   : > { %v4648_v54 = vpack.c.bf16 %v4472_v53, %v4456_v57  ;;  %v4586_v58 = vpack.c.bf16 %v4346_v50, %v4330_v16  ;;  %v3951_v12 = vpop.f32.mrb[4].mxu0  ;;  %v4024_v20 = vpop.f32.mrb[20].mxu1 }
 0x483   : > { %v3952_v44 = vadd.f32 %v3951_v12, %v9425_v30  ;;  %v4025_v27 = vadd.f32 %v4024_v20, %v9359_v14  ;;  %v3953_v59 = vpop.f32.mrb[5].mxu0  ;;  %v4026_v46 = vpop.f32.mrb[21].mxu1 }
 0x484   : > { %v3954_v62 = vadd.f32 %v3953_v59, %v9425_v30  ;;  %v4027_v37 = vadd.f32 %v4026_v46, %v9359_v14  ;;  %v3955_v41 = vpop.f32.mrb[6].mxu0  ;;  %v4028_v60 = vpop.f32.mrb[22].mxu1  ;;  %5323 = vmatprep.subr.bf16.mxu0 %v4648_v54  ;;  %5428 = vmatprep.subr.bf16.mxu1 %v4586_v58 }
 0x485   : > { %v3956_v1 = vadd.f32 %v3955_v41, %v9427_v35  ;;  %v4029_v3 = vadd.f32 %v4028_v60, %v9362_v42  ;;  %v3957_v17 = vpop.f32.mrb[7].mxu0  ;;  %v4030_v6 = vpop.f32.mrb[23].mxu1  ;;  %5324 = vmatpush1.bf16.msra.mxu0 %v4647_v56  ;;  %5429 = vmatpush1.bf16.msra.mxu1 %v4585_v19  ;;  %v4487_v28 = vmax.f32 %v3952_v44, 0.0  ;;  %v4361_v29 = vmax.f32 %v4025_v27, 0.0 }
 0x486   : > { %v3958_v43 = vadd.f32 %v3957_v17, %v9427_v35  ;;  %v4031_v23 = vadd.f32 %v4030_v6, %v9362_v42  ;;  %v4488_v39 = vmax.f32 %v3954_v62, 0.0  ;;  %v4362_v33 = vmax.f32 %v4027_v37, 0.0 }
 0x487   : > { %v4503_v34 = vmax.f32 %v3956_v1, 0.0  ;;  %v4377_v31 = vmax.f32 %v4029_v3, 0.0 }
 0x488   : > { %v4504_v25 = vmax.f32 %v3958_v43, 0.0  ;;  %v4378_v2 = vmax.f32 %v4031_v23, 0.0  ;;  %5172 = vmatmul.mubr.bf16.gmra.mrb[100].mxu0 %v9565_v49  ;;  %5245 = vmatmul.mubr.bf16.gmra.mrb[116].mxu1 %v9503_v40 }
 0x489   : > { %v4663_v55 = vpack.c.bf16 %v4503_v34, %v4487_v28  ;;  %v4601_v5 = vpack.c.bf16 %v4377_v31, %v4361_v29  ;;  %5181 = vmatprep.mubr.bf16.mxu0 %v7916_v0  ;;  %5254 = vmatprep.mubr.bf16.mxu1 %v7916_v0 }
 0x48a   : > { %v4664_v11 = vpack.c.bf16 %v4504_v25, %v4488_v39  ;;  %v4602_v21 = vpack.c.bf16 %v4378_v2, %v4362_v33  ;;  %v3961_v47 = vpop.f32.mrb[8].mxu0  ;;  %v4034_v15 = vpop.f32.mrb[24].mxu1 }
 0x48b   : > { %v3962_v51 = vadd.f32 %v3961_v47, %v9442_v36  ;;  %v4035_v22 = vadd.f32 %v4034_v15, %v9373_v13  ;;  %v3963_v57 = vpop.f32.mrb[9].mxu0  ;;  %v4036_v16 = vpop.f32.mrb[25].mxu1 }
 0x48c   : > { %v3964_v53 = vadd.f32 %v3963_v57, %v9442_v36  ;;  %v4037_v40 = vadd.f32 %v4036_v16, %v9373_v13  ;;  %v3965_v50 = vpop.f32.mrb[10].mxu0  ;;  %v4038_v56 = vpop.f32.mrb[26].mxu1  ;;  %5325 = vmatprep.subr.bf16.mxu0 %v4664_v11  ;;  %5430 = vmatprep.subr.bf16.mxu1 %v4602_v21 }
 0x48d   : > { %v3966_v19 = vadd.f32 %v3965_v50, %v9444_v38  ;;  %v4039_v54 = vadd.f32 %v4038_v56, %v9376_v61  ;;  %v3967_v58 = vpop.f32.mrb[11].mxu0  ;;  %v4040_v12 = vpop.f32.mrb[27].mxu1  ;;  %5326 = vmatpush1.bf16.msra.mxu0 %v4663_v55  ;;  %5431 = vmatpush1.bf16.msra.mxu1 %v4601_v5  ;;  %v4519_v27 = vmax.f32 %v3962_v51, 0.0  ;;  %v4393_v59 = vmax.f32 %v4035_v22, 0.0 }
 0x48e   : > { %v3968_v20 = vadd.f32 %v3967_v58, %v9444_v38  ;;  %v4041_v44 = vadd.f32 %v4040_v12, %v9376_v61  ;;  %v4520_v37 = vmax.f32 %v3964_v53, 0.0  ;;  %v4394_v41 = vmax.f32 %v4037_v40, 0.0 }
 0x48f   : > { %v4535_v46 = vmax.f32 %v3966_v19, 0.0  ;;  %v4409_v62 = vmax.f32 %v4039_v54, 0.0 }
 0x490   : > { %v4536_v60 = vmax.f32 %v3968_v20, 0.0  ;;  %v4410_v1 = vmax.f32 %v4041_v44, 0.0  ;;  %5182 = vmatmul.mubr.bf16.gmra.mrb[104].mxu0 %v9582_v52  ;;  %5255 = vmatmul.mubr.bf16.gmra.mrb[120].mxu1 %v9518_v32 }
 0x491   : > { %v4679_v3 = vpack.c.bf16 %v4535_v46, %v4519_v27  ;;  %v4617_v17 = vpack.c.bf16 %v4409_v62, %v4393_v59  ;;  %5191 = vmatprep.mubr.bf16.mxu0 %v7916_v0  ;;  %5264 = vmatprep.mubr.bf16.mxu1 %v7916_v0 }
 0x492   : > { %v4680_v6 = vpack.c.bf16 %v4536_v60, %v4520_v37  ;;  %v4618_v43 = vpack.c.bf16 %v4410_v1, %v4394_v41  ;;  %v3971_v23 = vpop.f32.mrb[12].mxu0  ;;  %v4044_v28 = vpop.f32.mrb[28].mxu1 }
 0x493   : > { %v3972_v29 = vadd.f32 %v3971_v23, %v9459_v4  ;;  %v4045_v34 = vadd.f32 %v4044_v28, %v9389_v7  ;;  %v3973_v31 = vpop.f32.mrb[13].mxu0  ;;  %v4046_v39 = vpop.f32.mrb[29].mxu1 }
 0x494   : > { %v3974_v33 = vadd.f32 %v3973_v31, %v9459_v4  ;;  %v4047_v32 = vadd.f32 %v4046_v39, %v9389_v7  ;;  %v3975_v25 = vpop.f32.mrb[14].mxu0  ;;  %v4048_v2 = vpop.f32.mrb[30].mxu1  ;;  %5327 = vmatprep.subr.bf16.mxu0 %v4680_v6  ;;  %5432 = vmatprep.subr.bf16.mxu1 %v4618_v43 }
 0x495   : > { %v3976_v55 = vadd.f32 %v3975_v25, %v9461_v18  ;;  %v4049_v5 = vadd.f32 %v4048_v2, %v9391_v26  ;;  %v3977_v11 = vpop.f32.mrb[15].mxu0  ;;  %v4050_v21 = vpop.f32.mrb[31].mxu1  ;;  %5328 = vmatpush1.bf16.msra.mxu0 %v4679_v3  ;;  %5433 = vmatpush1.bf16.msra.mxu1 %v4617_v17  ;;  %v4551_v51 = vmax.f32 %v3972_v29, 0.0  ;;  %v4425_v22 = vmax.f32 %v4045_v34, 0.0  ;;  %v9717_v2 = vld [vmem:[%s10959_s9] sm:$0xff]  }
 0x496   : > { %v3978_v47 = vadd.f32 %v3977_v11, %v9461_v18  ;;  %v4051_v15 = vadd.f32 %v4050_v21, %v9391_v26  ;;  %v4552_v53 = vmax.f32 %v3974_v33, 0.0  ;;  %v4426_v40 = vmax.f32 %v4047_v32, 0.0 }
 0x497   : > { %v4567_v57 = vmax.f32 %v3976_v55, 0.0  ;;  %v4441_v16 = vmax.f32 %v4049_v5, 0.0 }
 0x498   : > { %v4568_v50 = vmax.f32 %v3978_v47, 0.0  ;;  %v4442_v56 = vmax.f32 %v4051_v15, 0.0  ;;  %5192 = vmatmul.mubr.bf16.gmra.mrb[108].mxu0 %v9599_v24  ;;  %5265 = vmatmul.mubr.bf16.gmra.mrb[124].mxu1 %v9533_v8 }
 0x499   : > { %v4695_v19 = vpack.c.bf16 %v4567_v57, %v4551_v51  ;;  %v4633_v54 = vpack.c.bf16 %v4441_v16, %v4425_v22  ;;  %5274 = vmatprep.mubr.bf16.mxu1 %v7916_v0  ;;  %5347 = vmatprep.mubr.bf16.mxu0 %v7916_v0 }
 0x49a   : > { %v4696_v58 = vpack.c.bf16 %v4568_v50, %v4552_v53  ;;  %v4634_v12 = vpack.c.bf16 %v4442_v56, %v4426_v40  ;;  %v4054_v20 = vpop.f32.mrb[32].mxu1  ;;  %v4127_v44 = vpop.f32.mrb[16].mxu0 }
 0x49b   : > { %v4055_v27 = vadd.f32 %v4054_v20, %v9405_v9  ;;  %v4128_v59 = vadd.f32 %v4127_v44, %v9345_v10  ;;  %v4056_v46 = vpop.f32.mrb[33].mxu1  ;;  %v4129_v62 = vpop.f32.mrb[17].mxu0 }
 0x49c   : > { %v4057_v37 = vadd.f32 %v4056_v46, %v9405_v9  ;;  %v4130_v8 = vadd.f32 %v4129_v62, %v9345_v10  ;;  %v4058_v41 = vpop.f32.mrb[34].mxu1  ;;  %v4131_v60 = vpop.f32.mrb[18].mxu0  ;;  %5329 = vmatprep.subr.bf16.mxu0 %v4696_v58  ;;  %5434 = vmatprep.subr.bf16.mxu1 %v4634_v12 }
 0x49d   : > { %v4059_v1 = vadd.f32 %v4058_v41, %v9407_v48  ;;  %v4132_v3 = vadd.f32 %v4131_v60, %v9348_v63  ;;  %v4060_v17 = vpop.f32.mrb[35].mxu1  ;;  %v4133_v6 = vpop.f32.mrb[19].mxu0  ;;  %5330 = vmatpush1.bf16.msra.mxu0 %v4695_v19  ;;  %5435 = vmatpush1.bf16.msra.mxu1 %v4633_v54  ;;  %v4457_v28 = vmax.f32 %v4055_v27, 0.0  ;;  %v4331_v29 = vmax.f32 %v4128_v59, 0.0  ;;  %v9734_v60 = vld [vmem:[%s10959_s9 + $0x8] sm:$0xff]  }
 0x49e   : > { %v4061_v43 = vadd.f32 %v4060_v17, %v9407_v48  ;;  %v4134_v23 = vadd.f32 %v4133_v6, %v9348_v63  ;;  %v4458_v39 = vmax.f32 %v4057_v37, 0.0  ;;  %v4332_v33 = vmax.f32 %v4130_v8, 0.0 }
 0x49f   : > { %v4473_v34 = vmax.f32 %v4059_v1, 0.0  ;;  %v4347_v31 = vmax.f32 %v4132_v3, 0.0 }
 0x4a0   : > { %v4474_v32 = vmax.f32 %v4061_v43, 0.0  ;;  %v4348_v25 = vmax.f32 %v4134_v23, 0.0  ;;  %5275 = vmatmul.mubr.bf16.gmra.mrb[128].mxu1 %v9548_v45  ;;  %5348 = vmatmul.mubr.bf16.vlgmr.msra.gmra.mrb[112].mxu0 %v9717_v2 }
 0x4a1   : > { %v4649_v55 = vpack.c.bf16 %v4473_v34, %v4457_v28  ;;  %v4587_v5 = vpack.c.bf16 %v4347_v31, %v4331_v29  ;;  %5284 = vmatprep.mubr.bf16.mxu1 %v7916_v0  ;;  %5357 = vmatprep.mubr.bf16.mxu0 %v7916_v0 }
 0x4a2   : > { %v4650_v11 = vpack.c.bf16 %v4474_v32, %v4458_v39  ;;  %v4588_v21 = vpack.c.bf16 %v4348_v25, %v4332_v33  ;;  %v4064_v47 = vpop.f32.mrb[36].mxu1  ;;  %v4137_v15 = vpop.f32.mrb[20].mxu0 }
 0x4a3   : > { %v4065_v51 = vadd.f32 %v4064_v47, %v9425_v30  ;;  %v4138_v45 = vadd.f32 %v4137_v15, %v9359_v14  ;;  %v4066_v22 = vpop.f32.mrb[37].mxu1  ;;  %v4139_v57 = vpop.f32.mrb[21].mxu0 }
 0x4a4   : > { %v4067_v16 = vadd.f32 %v4066_v22, %v9425_v30  ;;  %v4140_v53 = vadd.f32 %v4139_v57, %v9359_v14  ;;  %v4068_v40 = vpop.f32.mrb[38].mxu1  ;;  %v4141_v50 = vpop.f32.mrb[22].mxu0  ;;  %5436 = vmatprep.subr.bf16.mxu1 %v4650_v11  ;;  %5541 = vmatprep.subr.bf16.mxu0 %v4588_v21 }
 0x4a5   : > { %v4069_v56 = vadd.f32 %v4068_v40, %v9427_v35  ;;  %v4142_v19 = vadd.f32 %v4141_v50, %v9362_v42  ;;  %v4070_v54 = vpop.f32.mrb[39].mxu1  ;;  %v4143_v58 = vpop.f32.mrb[23].mxu0  ;;  %5437 = vmatpush1.bf16.msra.mxu1 %v4649_v55  ;;  %5542 = vmatpush1.bf16.msra.mxu0 %v4587_v5  ;;  %v4489_v44 = vmax.f32 %v4065_v51, 0.0  ;;  %v4363_v27 = vmax.f32 %v4138_v45, 0.0  ;;  %v9751_v50 = vld [vmem:[%s10959_s9 + $0x10] sm:$0xff]  }
 0x4a6   : > { %v4071_v12 = vadd.f32 %v4070_v54, %v9427_v35  ;;  %v4144_v20 = vadd.f32 %v4143_v58, %v9362_v42  ;;  %v4490_v62 = vmax.f32 %v4067_v16, 0.0  ;;  %v4364_v37 = vmax.f32 %v4140_v53, 0.0 }
 0x4a7   : > { %v4505_v59 = vmax.f32 %v4069_v56, 0.0  ;;  %v4379_v46 = vmax.f32 %v4142_v19, 0.0 }
 0x4a8   : > { %v4506_v8 = vmax.f32 %v4071_v12, 0.0  ;;  %v4380_v41 = vmax.f32 %v4144_v20, 0.0  ;;  %5285 = vmatmul.mubr.bf16.gmra.mrb[132].mxu1 %v9565_v49  ;;  %5358 = vmatmul.mubr.bf16.gmra.mrb[116].mxu0 %v9734_v60 }
 0x4a9   : > { %v4665_v1 = vpack.c.bf16 %v4505_v59, %v4489_v44  ;;  %v4603_v3 = vpack.c.bf16 %v4379_v46, %v4363_v27  ;;  %5294 = vmatprep.mubr.bf16.mxu1 %v7916_v0  ;;  %5367 = vmatprep.mubr.bf16.mxu0 %v7916_v0 }
 0x4aa   : > { %v4666_v17 = vpack.c.bf16 %v4506_v8, %v4490_v62  ;;  %v4604_v6 = vpack.c.bf16 %v4380_v41, %v4364_v37  ;;  %v4074_v43 = vpop.f32.mrb[40].mxu1  ;;  %v4147_v23 = vpop.f32.mrb[24].mxu0 }
 0x4ab   : > { %v4075_v28 = vadd.f32 %v4074_v43, %v9442_v36  ;;  %v4148_v49 = vadd.f32 %v4147_v23, %v9373_v13  ;;  %v4076_v29 = vpop.f32.mrb[41].mxu1  ;;  %v4149_v34 = vpop.f32.mrb[25].mxu0 }
 0x4ac   : > { %v4077_v31 = vadd.f32 %v4076_v29, %v9442_v36  ;;  %v4150_v39 = vadd.f32 %v4149_v34, %v9373_v13  ;;  %v4078_v33 = vpop.f32.mrb[42].mxu1  ;;  %v4151_v32 = vpop.f32.mrb[26].mxu0  ;;  %5438 = vmatprep.subr.bf16.mxu1 %v4666_v17  ;;  %5543 = vmatprep.subr.bf16.mxu0 %v4604_v6 }
 0x4ad   : > { %v4079_v25 = vadd.f32 %v4078_v33, %v9444_v38  ;;  %v4152_v55 = vadd.f32 %v4151_v32, %v9376_v61  ;;  %v4080_v5 = vpop.f32.mrb[43].mxu1  ;;  %v4153_v11 = vpop.f32.mrb[27].mxu0  ;;  %5439 = vmatpush1.bf16.msra.mxu1 %v4665_v1  ;;  %5544 = vmatpush1.bf16.msra.mxu0 %v4603_v3  ;;  %v4521_v15 = vmax.f32 %v4075_v28, 0.0  ;;  %v4395_v51 = vmax.f32 %v4148_v49, 0.0  ;;  %v9768_v32 = vld [vmem:[%s10959_s9 + $0x18] sm:$0xff]  }
 0x4ae   : > { %v4081_v21 = vadd.f32 %v4080_v5, %v9444_v38  ;;  %v4154_v47 = vadd.f32 %v4153_v11, %v9376_v61  ;;  %v4522_v57 = vmax.f32 %v4077_v31, 0.0  ;;  %v4396_v16 = vmax.f32 %v4150_v39, 0.0 }
 0x4af   : > { %v4537_v45 = vmax.f32 %v4079_v25, 0.0  ;;  %v4411_v22 = vmax.f32 %v4152_v55, 0.0 }
 0x4b0   : > { %v4538_v53 = vmax.f32 %v4081_v21, 0.0  ;;  %v4412_v40 = vmax.f32 %v4154_v47, 0.0  ;;  %5295 = vmatmul.mubr.bf16.gmra.mrb[136].mxu1 %v9582_v52  ;;  %5368 = vmatmul.mubr.bf16.gmra.mrb[120].mxu0 %v9751_v50 }
 0x4b1   : > { %v4681_v56 = vpack.c.bf16 %v4537_v45, %v4521_v15  ;;  %v4619_v19 = vpack.c.bf16 %v4411_v22, %v4395_v51  ;;  %5304 = vmatprep.mubr.bf16.mxu1 %v7916_v0  ;;  %5377 = vmatprep.mubr.bf16.mxu0 %v7916_v0 }
 0x4b2   : > { %v4682_v54 = vpack.c.bf16 %v4538_v53, %v4522_v57  ;;  %v4620_v58 = vpack.c.bf16 %v4412_v40, %v4396_v16  ;;  %v4084_v12 = vpop.f32.mrb[44].mxu1  ;;  %v4157_v20 = vpop.f32.mrb[28].mxu0 }
 0x4b3   : > { %v4085_v44 = vadd.f32 %v4084_v12, %v9459_v4  ;;  %v4158_v52 = vadd.f32 %v4157_v20, %v9389_v7  ;;  %v4086_v27 = vpop.f32.mrb[45].mxu1  ;;  %v4159_v59 = vpop.f32.mrb[29].mxu0 }
 0x4b4   : > { %v4087_v46 = vadd.f32 %v4086_v27, %v9459_v4  ;;  %v4160_v62 = vadd.f32 %v4159_v59, %v9389_v7  ;;  %v4088_v37 = vpop.f32.mrb[46].mxu1  ;;  %v4161_v8 = vpop.f32.mrb[30].mxu0  ;;  %5440 = vmatprep.subr.bf16.mxu1 %v4682_v54  ;;  %5545 = vmatprep.subr.bf16.mxu0 %v4620_v58 }
 0x4b5   : > { %v4089_v41 = vadd.f32 %v4088_v37, %v9461_v18  ;;  %v4162_v1 = vadd.f32 %v4161_v8, %v9391_v26  ;;  %v4090_v3 = vpop.f32.mrb[47].mxu1  ;;  %v4163_v17 = vpop.f32.mrb[31].mxu0  ;;  %5441 = vmatpush1.bf16.msra.mxu1 %v4681_v56  ;;  %5546 = vmatpush1.bf16.msra.mxu0 %v4619_v19  ;;  %v4553_v23 = vmax.f32 %v4085_v44, 0.0  ;;  %v4427_v28 = vmax.f32 %v4158_v52, 0.0  ;;  %v9784_v37 = vld [vmem:[%s10959_s9 + $0x20] sm:$0xff]  }
 0x4b6   : > { %v4091_v6 = vadd.f32 %v4090_v3, %v9461_v18  ;;  %v4164_v43 = vadd.f32 %v4163_v17, %v9391_v26  ;;  %v4554_v34 = vmax.f32 %v4087_v46, 0.0  ;;  %v4428_v31 = vmax.f32 %v4160_v62, 0.0 }
 0x4b7   : > { %v4569_v49 = vmax.f32 %v4089_v41, 0.0  ;;  %v4443_v29 = vmax.f32 %v4162_v1, 0.0 }
 0x4b8   : > { %v4570_v39 = vmax.f32 %v4091_v6, 0.0  ;;  %v4444_v33 = vmax.f32 %v4164_v43, 0.0  ;;  %5305 = vmatmul.mubr.bf16.gmra.mrb[140].mxu1 %v9599_v24  ;;  %5378 = vmatmul.mubr.bf16.gmra.mrb[124].mxu0 %v9768_v32 }
 0x4b9   : > { %v4697_v25 = vpack.c.bf16 %v4569_v49, %v4553_v23  ;;  %v4635_v55 = vpack.c.bf16 %v4443_v29, %v4427_v28  ;;  %5387 = vmatprep.mubr.bf16.mxu0 %v7916_v0  ;;  %5460 = vmatprep.mubr.bf16.mxu1 %v7916_v0 }
 0x4ba   : > { %v4698_v5 = vpack.c.bf16 %v4570_v39, %v4554_v34  ;;  %v4636_v11 = vpack.c.bf16 %v4444_v33, %v4428_v31  ;;  %v4167_v21 = vpop.f32.mrb[32].mxu0  ;;  %v4240_v47 = vpop.f32.mrb[48].mxu1 }
 0x4bb   : > { %v4168_v15 = vadd.f32 %v4167_v21, %v9405_v9  ;;  %v4241_v24 = vadd.f32 %v4240_v47, %v9345_v10  ;;  %v4169_v51 = vpop.f32.mrb[33].mxu0  ;;  %v4242_v45 = vpop.f32.mrb[49].mxu1 }
 0x4bc   : > { %v4170_v22 = vadd.f32 %v4169_v51, %v9405_v9  ;;  %v4243_v57 = vadd.f32 %v4242_v45, %v9345_v10  ;;  %v4171_v16 = vpop.f32.mrb[34].mxu0  ;;  %v4244_v53 = vpop.f32.mrb[50].mxu1  ;;  %5442 = vmatprep.subr.bf16.mxu1 %v4698_v5  ;;  %5547 = vmatprep.subr.bf16.mxu0 %v4636_v11 }
 0x4bd   : > { %v4172_v40 = vadd.f32 %v4171_v16, %v9407_v48  ;;  %v4245_v56 = vadd.f32 %v4244_v53, %v9348_v63  ;;  %v4173_v19 = vpop.f32.mrb[35].mxu0  ;;  %v4246_v54 = vpop.f32.mrb[51].mxu1  ;;  %5443 = vmatpush1.bf16.msra.mxu1 %v4697_v25  ;;  %5548 = vmatpush1.bf16.msra.mxu0 %v4635_v55  ;;  %v4459_v20 = vmax.f32 %v4168_v15, 0.0  ;;  %v4333_v44 = vmax.f32 %v4241_v24, 0.0 }
 0x4be   : > { %v4174_v58 = vadd.f32 %v4173_v19, %v9407_v48  ;;  %v4247_v12 = vadd.f32 %v4246_v54, %v9348_v63  ;;  %v4460_v27 = vmax.f32 %v4170_v22, 0.0  ;;  %v4334_v59 = vmax.f32 %v4243_v57, 0.0  ;;  %v9801_v57 = vld [vmem:[%s10959_s9 + $0x28] sm:$0xff]  }
 0x4bf   : > { %v4475_v52 = vmax.f32 %v4172_v40, 0.0  ;;  %v4349_v10 = vmax.f32 %v4245_v56, 0.0 }
 0x4c0   : > { %v4476_v46 = vmax.f32 %v4174_v58, 0.0  ;;  %v4350_v62 = vmax.f32 %v4247_v12, 0.0  ;;  %5388 = vmatmul.mubr.bf16.gmra.mrb[128].mxu0 %v9784_v37  ;;  %5461 = vmatmul.mubr.bf16.vlgmr.msra.gmra.mrb[144].mxu1 %v9717_v2 }
 0x4c1   : > { %v4651_v8 = vpack.c.bf16 %v4475_v52, %v4459_v20  ;;  %v4589_v41 = vpack.c.bf16 %v4349_v10, %v4333_v44  ;;  %5397 = vmatprep.mubr.bf16.mxu0 %v7916_v0  ;;  %5470 = vmatprep.mubr.bf16.mxu1 %v7916_v0 }
 0x4c2   : > { %v4652_v63 = vpack.c.bf16 %v4476_v46, %v4460_v27  ;;  %v4590_v1 = vpack.c.bf16 %v4350_v62, %v4334_v59  ;;  %v4177_v3 = vpop.f32.mrb[36].mxu0  ;;  %v4250_v17 = vpop.f32.mrb[52].mxu1 }
 0x4c3   : > { %v4178_v6 = vadd.f32 %v4177_v3, %v9425_v30  ;;  %v4251_v43 = vadd.f32 %v4250_v17, %v9359_v14  ;;  %v4179_v23 = vpop.f32.mrb[37].mxu0  ;;  %v4252_v28 = vpop.f32.mrb[53].mxu1 }
 0x4c4   : > { %v4180_v49 = vadd.f32 %v4179_v23, %v9425_v30  ;;  %v4253_v29 = vadd.f32 %v4252_v28, %v9359_v14  ;;  %v4181_v34 = vpop.f32.mrb[38].mxu0  ;;  %v4254_v31 = vpop.f32.mrb[54].mxu1  ;;  %5549 = vmatprep.subr.bf16.mxu0 %v4652_v63  ;;  %5654 = vmatprep.subr.bf16.mxu1 %v4590_v1 }
 0x4c5   : > { %v4182_v39 = vadd.f32 %v4181_v34, %v9427_v35  ;;  %v4255_v33 = vadd.f32 %v4254_v31, %v9362_v42  ;;  %v4183_v25 = vpop.f32.mrb[39].mxu0  ;;  %v4256_v55 = vpop.f32.mrb[55].mxu1  ;;  %5550 = vmatpush1.bf16.msra.mxu0 %v4651_v8  ;;  %5655 = vmatpush1.bf16.msra.mxu1 %v4589_v41  ;;  %v4491_v21 = vmax.f32 %v4178_v6, 0.0  ;;  %v4365_v47 = vmax.f32 %v4251_v43, 0.0 }
 0x4c6   : > { %v4184_v5 = vadd.f32 %v4183_v25, %v9427_v35  ;;  %v4257_v11 = vadd.f32 %v4256_v55, %v9362_v42  ;;  %v4492_v24 = vmax.f32 %v4180_v49, 0.0  ;;  %v4366_v51 = vmax.f32 %v4253_v29, 0.0  ;;  %v9818_v49 = vld [vmem:[%s10959_s9 + $0x30] sm:$0xff]  }
 0x4c7   : > { %v4507_v15 = vmax.f32 %v4182_v39, 0.0  ;;  %v4381_v14 = vmax.f32 %v4255_v33, 0.0 }
 0x4c8   : > { %v4508_v45 = vmax.f32 %v4184_v5, 0.0  ;;  %v4382_v22 = vmax.f32 %v4257_v11, 0.0  ;;  %5398 = vmatmul.mubr.bf16.gmra.mrb[132].mxu0 %v9801_v57  ;;  %5471 = vmatmul.mubr.bf16.gmra.mrb[148].mxu1 %v9734_v60 }
 0x4c9   : > { %v4667_v16 = vpack.c.bf16 %v4507_v15, %v4491_v21  ;;  %v4605_v53 = vpack.c.bf16 %v4381_v14, %v4365_v47  ;;  %5407 = vmatprep.mubr.bf16.mxu0 %v7916_v0  ;;  %5480 = vmatprep.mubr.bf16.mxu1 %v7916_v0 }
 0x4ca   : > { %v4668_v42 = vpack.c.bf16 %v4508_v45, %v4492_v24  ;;  %v4606_v40 = vpack.c.bf16 %v4382_v22, %v4366_v51  ;;  %v4187_v56 = vpop.f32.mrb[40].mxu0  ;;  %v4260_v19 = vpop.f32.mrb[56].mxu1 }
 0x4cb   : > { %v4188_v54 = vadd.f32 %v4187_v56, %v9442_v36  ;;  %v4261_v58 = vadd.f32 %v4260_v19, %v9373_v13  ;;  %v4189_v12 = vpop.f32.mrb[41].mxu0  ;;  %v4262_v20 = vpop.f32.mrb[57].mxu1 }
 0x4cc   : > { %v4190_v44 = vadd.f32 %v4189_v12, %v9442_v36  ;;  %v4263_v52 = vadd.f32 %v4262_v20, %v9373_v13  ;;  %v4191_v10 = vpop.f32.mrb[42].mxu0  ;;  %v4264_v27 = vpop.f32.mrb[58].mxu1  ;;  %5551 = vmatprep.subr.bf16.mxu0 %v4668_v42  ;;  %5656 = vmatprep.subr.bf16.mxu1 %v4606_v40  ;;  %v9835_v20 = vld [vmem:[%s10959_s9 + $0x38] sm:$0xff]  }
 0x4cd   : > { %v4192_v59 = vadd.f32 %v4191_v10, %v9444_v38  ;;  %v4265_v46 = vadd.f32 %v4264_v27, %v9376_v61  ;;  %v4193_v62 = vpop.f32.mrb[43].mxu0  ;;  %v4266_v8 = vpop.f32.mrb[59].mxu1  ;;  %5552 = vmatpush1.bf16.msra.mxu0 %v4667_v16  ;;  %5657 = vmatpush1.bf16.msra.mxu1 %v4605_v53  ;;  %v4523_v1 = vmax.f32 %v4188_v54, 0.0  ;;  %v4397_v3 = vmax.f32 %v4261_v58, 0.0 }
 0x4ce   : > { %v4194_v41 = vadd.f32 %v4193_v62, %v9444_v38  ;;  %v4267_v63 = vadd.f32 %v4266_v8, %v9376_v61  ;;  %v4524_v6 = vmax.f32 %v4190_v44, 0.0  ;;  %v4398_v43 = vmax.f32 %v4263_v52, 0.0 }
 0x4cf   : > { %v4539_v17 = vmax.f32 %v4192_v59, 0.0  ;;  %v4413_v13 = vmax.f32 %v4265_v46, 0.0 }
 0x4d0   : > { %v4540_v23 = vmax.f32 %v4194_v41, 0.0  ;;  %v4414_v28 = vmax.f32 %v4267_v63, 0.0  ;;  %5408 = vmatmul.mubr.bf16.gmra.mrb[136].mxu0 %v9818_v49  ;;  %5481 = vmatmul.mubr.bf16.gmra.mrb[152].mxu1 %v9751_v50 }
 0x4d1   : > { %v4683_v29 = vpack.c.bf16 %v4539_v17, %v4523_v1  ;;  %v4621_v34 = vpack.c.bf16 %v4413_v13, %v4397_v3  ;;  %5417 = vmatprep.mubr.bf16.mxu0 %v7916_v0  ;;  %5490 = vmatprep.mubr.bf16.mxu1 %v7916_v0 }
 0x4d2   : > { %v4684_v61 = vpack.c.bf16 %v4540_v23, %v4524_v6  ;;  %v4622_v31 = vpack.c.bf16 %v4414_v28, %v4398_v43  ;;  %v4197_v39 = vpop.f32.mrb[44].mxu0  ;;  %v4270_v33 = vpop.f32.mrb[60].mxu1 }
 0x4d3   : > { %v4198_v25 = vadd.f32 %v4197_v39, %v9459_v4  ;;  %v4271_v55 = vadd.f32 %v4270_v33, %v9389_v7  ;;  %v4199_v5 = vpop.f32.mrb[45].mxu0  ;;  %v4272_v11 = vpop.f32.mrb[61].mxu1 }
 0x4d4   : > { %v4200_v21 = vadd.f32 %v4199_v5, %v9459_v4  ;;  %v4273_v47 = vadd.f32 %v4272_v11, %v9389_v7  ;;  %v4201_v15 = vpop.f32.mrb[46].mxu0  ;;  %v4274_v14 = vpop.f32.mrb[62].mxu1  ;;  %5553 = vmatprep.subr.bf16.mxu0 %v4684_v61  ;;  %5658 = vmatprep.subr.bf16.mxu1 %v4622_v31 }
 0x4d5   : > { %v4202_v24 = vadd.f32 %v4201_v15, %v9461_v18  ;;  %v4275_v51 = vadd.f32 %v4274_v14, %v9391_v26  ;;  %v4203_v45 = vpop.f32.mrb[47].mxu0  ;;  %v4276_v22 = vpop.f32.mrb[63].mxu1  ;;  %5554 = vmatpush1.bf16.msra.mxu0 %v4683_v29  ;;  %5659 = vmatpush1.bf16.msra.mxu1 %v4621_v34  ;;  %v4555_v42 = vmax.f32 %v4198_v25, 0.0  ;;  %v4429_v40 = vmax.f32 %v4271_v55, 0.0 }
 0x4d6   : > { %v4204_v16 = vadd.f32 %v4203_v45, %v9461_v18  ;;  %v4277_v53 = vadd.f32 %v4276_v22, %v9391_v26  ;;  %v4556_v19 = vmax.f32 %v4200_v21, 0.0  ;;  %v4430_v54 = vmax.f32 %v4273_v47, 0.0 }
 0x4d7   : > { %v4571_v56 = vmax.f32 %v4202_v24, 0.0  ;;  %v4445_v7 = vmax.f32 %v4275_v51, 0.0 }
 0x4d8   : > { %v4572_v58 = vmax.f32 %v4204_v16, 0.0  ;;  %v4446_v12 = vmax.f32 %v4277_v53, 0.0  ;;  %5418 = vmatmul.mubr.bf16.gmra.mrb[140].mxu0 %v9835_v20  ;;  %5491 = vmatmul.mubr.bf16.gmra.mrb[156].mxu1 %v9768_v32 }
 0x4d9   : > { %v4699_v44 = vpack.c.bf16 %v4571_v56, %v4555_v42  ;;  %v4637_v52 = vpack.c.bf16 %v4445_v7, %v4429_v40  ;;  %5500 = vmatprep.mubr.bf16.mxu1 %v7916_v0  ;;  %5573 = vmatprep.mubr.bf16.mxu0 %v7916_v0  ;;  %v9863_v40 = vpop.permute.xlu0 %4737 }
 0x4da   : > { %v4700_v26 = vpack.c.bf16 %v4572_v58, %v4556_v19  ;;  %v4638_v10 = vpack.c.bf16 %v4446_v12, %v4430_v54  ;;  %v4280_v27 = vpop.f32.mrb[64].mxu1 }
 0x4db   : > { %v4281_v59 = vadd.f32 %v4280_v27, %v9405_v9  ;;  %v4282_v46 = vpop.f32.mrb[65].mxu1 }
 0x4dc   : > { %v4283_v62 = vadd.f32 %v4282_v46, %v9405_v9  ;;  %v4284_v8 = vpop.f32.mrb[66].mxu1  ;;  %5555 = vmatprep.subr.bf16.mxu0 %v4700_v26  ;;  %5660 = vmatprep.subr.bf16.mxu1 %v4638_v10 }
 0x4dd   : > { %v4285_v41 = vadd.f32 %v4284_v8, %v9407_v48  ;;  %v4286_v63 = vpop.f32.mrb[67].mxu1  ;;  %5556 = vmatpush1.bf16.msra.mxu0 %v4699_v44  ;;  %5661 = vmatpush1.bf16.msra.mxu1 %v4637_v52  ;;  %v4461_v3 = vmax.f32 %v4281_v59, 0.0 }
 0x4de   : > { %v4287_v1 = vadd.f32 %v4286_v63, %v9407_v48  ;;  %v4462_v13 = vmax.f32 %v4283_v62, 0.0 }
 0x4df   : > { %v4477_v17 = vmax.f32 %v4285_v41, 0.0 }
 0x4e0   : > { %v4478_v6 = vmax.f32 %v4287_v1, 0.0  ;;  %5501 = vmatmul.mubr.bf16.gmra.mrb[160].mxu1 %v9784_v37  ;;  %5574 = vmatmul.mubr.bf16.vlgmr.msra.gmra.mrb[144].mxu0 %v9717_v2 }
 0x4e1   : > { %v4653_v43 = vpack.c.bf16 %v4477_v17, %v4461_v3  ;;  %5510 = vmatprep.mubr.bf16.mxu1 %v7916_v0  ;;  %5583 = vmatprep.mubr.bf16.mxu0 %v7916_v0 }
 0x4e2   : > { %v4654_v9 = vpack.c.bf16 %v4478_v6, %v4462_v13  ;;  %v4290_v23 = vpop.f32.mrb[68].mxu1 }
 0x4e3   : > { %v4291_v28 = vadd.f32 %v4290_v23, %v9425_v30  ;;  %v4292_v29 = vpop.f32.mrb[69].mxu1 }
 0x4e4   : > { %v4293_v48 = vadd.f32 %v4292_v29, %v9425_v30  ;;  %v4294_v34 = vpop.f32.mrb[70].mxu1  ;;  %5662 = vmatprep.subr.bf16.mxu1 %v4654_v9  ;;  %v9883_v29 = vpop.permute.xlu0 %4747 }
 0x4e5   : > { %v4295_v61 = vadd.f32 %v4294_v34, %v9427_v35  ;;  %v4296_v31 = vpop.f32.mrb[71].mxu1  ;;  %5663 = vmatpush1.bf16.msra.mxu1 %v4653_v43  ;;  %v4493_v33 = vmax.f32 %v4291_v28, 0.0 }
 0x4e6   : > { %v4297_v39 = vadd.f32 %v4296_v31, %v9427_v35  ;;  %v4494_v55 = vmax.f32 %v4293_v48, 0.0 }
 0x4e7   : > { %v4509_v25 = vmax.f32 %v4295_v61, 0.0 }
 0x4e8   : > { %v4510_v5 = vmax.f32 %v4297_v39, 0.0  ;;  %5511 = vmatmul.mubr.bf16.gmra.mrb[164].mxu1 %v9801_v57  ;;  %5584 = vmatmul.mubr.bf16.gmra.mrb[148].mxu0 %v9734_v60 }
 0x4e9   : > { %v4669_v11 = vpack.c.bf16 %v4509_v25, %v4493_v33  ;;  %5520 = vmatprep.mubr.bf16.mxu1 %v7916_v0  ;;  %5593 = vmatprep.mubr.bf16.mxu0 %v7916_v0 }
 0x4ea   : > { %v4670_v30 = vpack.c.bf16 %v4510_v5, %v4494_v55  ;;  %v4300_v21 = vpop.f32.mrb[72].mxu1 }
 0x4eb   : > { %v4301_v47 = vadd.f32 %v4300_v21, %v9442_v36  ;;  %v4302_v15 = vpop.f32.mrb[73].mxu1 }
 0x4ec   : > { %v4303_v35 = vadd.f32 %v4302_v15, %v9442_v36  ;;  %v4304_v14 = vpop.f32.mrb[74].mxu1  ;;  %5664 = vmatprep.subr.bf16.mxu1 %v4670_v30  ;;  %v9867_v36 = vpop.permute.xlu1 %4742 }
 0x4ed   : > { %v4305_v24 = vadd.f32 %v4304_v14, %v9444_v38  ;;  %v4306_v51 = vpop.f32.mrb[75].mxu1  ;;  %5665 = vmatpush1.bf16.msra.mxu1 %v4669_v11  ;;  %v4525_v22 = vmax.f32 %v4301_v47, 0.0  ;;  %v9899_v14 = vpop.permute.xlu0 %4757 }
 0x4ee   : > { %v4307_v45 = vadd.f32 %v4306_v51, %v9444_v38  ;;  %v4526_v53 = vmax.f32 %v4303_v35, 0.0 }
 0x4ef   : > { %v4541_v16 = vmax.f32 %v4305_v24, 0.0 }
 0x4f0   : > { %v4542_v42 = vmax.f32 %v4307_v45, 0.0  ;;  %5521 = vmatmul.mubr.bf16.gmra.mrb[168].mxu1 %v9818_v49  ;;  %5594 = vmatmul.mubr.bf16.gmra.mrb[152].mxu0 %v9751_v50  ;;  %v9888_v39 = vpop.permute.xlu1 %4752 }
 0x4f1   : > { %v4685_v56 = vpack.c.bf16 %v4541_v16, %v4525_v22  ;;  %5530 = vmatprep.mubr.bf16.mxu1 %v7916_v0  ;;  %5603 = vmatprep.mubr.bf16.mxu0 %v7916_v0 }
 0x4f2   : > { %v4686_v7 = vpack.c.bf16 %v4542_v42, %v4526_v53  ;;  %v4310_v19 = vpop.f32.mrb[76].mxu1 }
 0x4f3   : > { %v4311_v38 = vadd.f32 %v4310_v19, %v9459_v4  ;;  %v4312_v54 = vpop.f32.mrb[77].mxu1  ;;  %v4897_v58 = vpop.f32.mrb[48].mxu0 }
 0x4f4   : > { %v4313_v12 = vadd.f32 %v4312_v54, %v9459_v4  ;;  %v4898_v44 = vadd.f32 %v4897_v58, %v9863_v40  ;;  %v4314_v52 = vpop.f32.mrb[78].mxu1  ;;  %v4899_v26 = vpop.f32.mrb[49].mxu0  ;;  %5666 = vmatprep.subr.bf16.mxu1 %v4686_v7 }
 0x4f5   : > { %v4315_v10 = vadd.f32 %v4314_v52, %v9461_v18  ;;  %v4900_v27 = vadd.f32 %v4899_v26, %v9863_v40  ;;  %v4316_v59 = vpop.f32.mrb[79].mxu1  ;;  %v4901_v46 = vpop.f32.mrb[50].mxu0  ;;  %5667 = vmatpush1.bf16.msra.mxu1 %v4685_v56  ;;  %v4557_v1 = vmax.f32 %v4311_v38, 0.0 }
 0x4f6   : > { %v5767_v62 = vmax.f32 %v4898_v44, 0.0  ;;  %v4317_v8 = vadd.f32 %v4316_v59, %v9461_v18  ;;  %v4902_v41 = vadd.f32 %v4901_v46, %v9867_v36  ;;  %v4903_v63 = vpop.f32.mrb[51].mxu0  ;;  %v4558_v13 = vmax.f32 %v4313_v12, 0.0  ;;  %v9904_v16 = vpop.permute.xlu1 %4762 }
 0x4f7   : > { %v4573_v4 = vmax.f32 %v4315_v10, 0.0  ;;  %v5768_v3 = vmax.f32 %v4900_v27, 0.0  ;;  %v4904_v17 = vadd.f32 %v4903_v63, %v9867_v36  ;;  %v9915_v44 = vpop.permute.xlu0 %4767 }
 0x4f8   : > { %v4574_v6 = vmax.f32 %v4317_v8, 0.0  ;;  %v5783_v43 = vmax.f32 %v4902_v41, 0.0  ;;  %5531 = vmatmul.mubr.bf16.gmra.mrb[172].mxu1 %v9835_v20  ;;  %5604 = vmatmul.mubr.bf16.gmra.mrb[156].mxu0 %v9768_v32 }
 0x4f9   : > { %v4701_v9 = vpack.c.bf16 %v4573_v4, %v4557_v1  ;;  %v9879_v23 = vmax.f32 %v5767_v62, %v5768_v3  ;;  %v5784_v28 = vmax.f32 %v4904_v17, 0.0  ;;  %5613 = vmatprep.mubr.bf16.mxu0 %v7916_v0  ;;  %5686 = vmatprep.mubr.bf16.mxu1 %v7916_v0 }
 0x4fa   : > { %v4702_v18 = vpack.c.bf16 %v4574_v6, %v4558_v13  ;;  %v9919_v10 = vpop.permute.xlu1 %4772 }
 0x4fb   : > { %v9885_v48 = vmax.f32 %v5783_v43, %v5784_v28  ;;  %v4907_v34 = vpop.f32.mrb[52].mxu0  ;;  %v9931_v13 = vpop.permute.xlu0 %4777 }
 0x4fc   : > { %v4908_v61 = vadd.f32 %v4907_v34, %v9883_v29  ;;  %v4909_v31 = vpop.f32.mrb[53].mxu0  ;;  %5668 = vmatprep.subr.bf16.mxu1 %v4702_v18 }
 0x4fd   : > { %v4910_v33 = vadd.f32 %v4909_v31, %v9883_v29  ;;  %v4911_v25 = vpop.f32.mrb[54].mxu0  ;;  %5669 = vmatpush1.bf16.msra.mxu1 %v4701_v9 }
 0x4fe   : > { %v5799_v55 = vmax.f32 %v4908_v61, 0.0  ;;  %v4912_v5 = vadd.f32 %v4911_v25, %v9888_v39  ;;  %v4913_v11 = vpop.f32.mrb[55].mxu0  ;;  %v9933_v6 = vpop.permute.xlu1 %4782 }
 0x4ff   : > { %v5800_v30 = vmax.f32 %v4910_v33, 0.0  ;;  %v4914_v21 = vadd.f32 %v4913_v11, %v9888_v39 }
 0x500   : > { %v5815_v47 = vmax.f32 %v4912_v5, 0.0  ;;  %5614 = vmatmul.mubr.bf16.gmra.mrb[160].mxu0 %v9784_v37  ;;  %5687 = vmatmul.mubr.bf16.vlgmr.msra.gmra.mrb[176].mxu1 %v9717_v2 }
 0x501   : > { %v9895_v15 = vmax.f32 %v5799_v55, %v5800_v30  ;;  %v5816_v35 = vmax.f32 %v4914_v21, 0.0  ;;  %5623 = vmatprep.mubr.bf16.mxu0 %v7916_v0  ;;  %5696 = vmatprep.mubr.bf16.mxu1 %v7916_v0 }
 0x503   : > { %v9901_v24 = vmax.f32 %v5815_v47, %v5816_v35  ;;  %v4917_v51 = vpop.f32.mrb[56].mxu0 }
 0x504   : > { %v4918_v45 = vadd.f32 %v4917_v51, %v9899_v14  ;;  %v4919_v22 = vpop.f32.mrb[57].mxu0 }
 0x505   : > { %v4920_v53 = vadd.f32 %v4919_v22, %v9899_v14  ;;  %v4921_v2 = vpop.f32.mrb[58].mxu0 }
 0x506   : > { %v5831_v42 = vmax.f32 %v4918_v45, 0.0  ;;  %v4922_v56 = vadd.f32 %v4921_v2, %v9904_v16  ;;  %v4923_v7 = vpop.f32.mrb[59].mxu0 }
 0x507   : > { %v5832_v19 = vmax.f32 %v4920_v53, 0.0  ;;  %v4924_v38 = vadd.f32 %v4923_v7, %v9904_v16 }
 0x508   : > { %v5847_v54 = vmax.f32 %v4922_v56, 0.0  ;;  %5624 = vmatmul.mubr.bf16.gmra.mrb[164].mxu0 %v9801_v57  ;;  %5697 = vmatmul.mubr.bf16.gmra.mrb[180].mxu1 %v9734_v60 }
 0x509   : > { %v9911_v58 = vmax.f32 %v5831_v42, %v5832_v19  ;;  %v5848_v12 = vmax.f32 %v4924_v38, 0.0  ;;  %5633 = vmatprep.mubr.bf16.mxu0 %v7916_v0  ;;  %5706 = vmatprep.mubr.bf16.mxu1 %v7916_v0 }
 0x50b   : > { %v9917_v52 = vmax.f32 %v5847_v54, %v5848_v12  ;;  %v4927_v26 = vpop.f32.mrb[60].mxu0  ;;  %v9951_v54 = vpop.permute.xlu0 %4787 }
 0x50c   : > { %v4928_v27 = vadd.f32 %v4927_v26, %v9915_v44  ;;  %v4929_v59 = vpop.f32.mrb[61].mxu0  ;;  %v9953_v12 = vpop.permute.xlu1 %4792 }
 0x50d   : > { %v4930_v46 = vadd.f32 %v4929_v59, %v9915_v44  ;;  %v4931_v60 = vpop.f32.mrb[62].mxu0 }
 0x50e   : > { %v5863_v62 = vmax.f32 %v4928_v27, 0.0  ;;  %v4932_v8 = vadd.f32 %v4931_v60, %v9919_v10  ;;  %v4933_v41 = vpop.f32.mrb[63].mxu0 }
 0x50f   : > { %v5864_v63 = vmax.f32 %v4930_v46, 0.0  ;;  %v4934_v1 = vadd.f32 %v4933_v41, %v9919_v10 }
 0x510   : > { %v5879_v4 = vmax.f32 %v4932_v8, 0.0  ;;  %5634 = vmatmul.mubr.bf16.gmra.mrb[168].mxu0 %v9818_v49  ;;  %5707 = vmatmul.mubr.bf16.gmra.mrb[184].mxu1 %v9751_v50 }
 0x511   : > { %v9927_v3 = vmax.f32 %v5863_v62, %v5864_v63  ;;  %v5880_v17 = vmax.f32 %v4934_v1, 0.0  ;;  %5643 = vmatprep.mubr.bf16.mxu0 %v7916_v0  ;;  %5716 = vmatprep.mubr.bf16.mxu1 %v7916_v0 }
 0x513   : > { %v9935_v43 = vmax.f32 %v5879_v4, %v5880_v17  ;;  %v4937_v9 = vpop.f32.mrb[64].mxu0  ;;  %v5010_v28 = vpop.f32.mrb[80].mxu1 }
 0x514   : > { %v4938_v18 = vadd.f32 %v4937_v9, %v9931_v13  ;;  %v5011_v34 = vadd.f32 %v5010_v28, %v9863_v40  ;;  %v4939_v50 = vpop.f32.mrb[65].mxu0  ;;  %v5012_v61 = vpop.f32.mrb[81].mxu1 }
 0x515   : > { %v4940_v31 = vadd.f32 %v4939_v50, %v9931_v13  ;;  %v5013_v33 = vadd.f32 %v5012_v61, %v9863_v40  ;;  %v4941_v25 = vpop.f32.mrb[66].mxu0  ;;  %v5014_v55 = vpop.f32.mrb[82].mxu1 }
 0x516   : > { %v5895_v5 = vmax.f32 %v4938_v18, 0.0  ;;  %v5769_v11 = vmax.f32 %v5011_v34, 0.0  ;;  %v4942_v30 = vadd.f32 %v4941_v25, %v9933_v6  ;;  %v5015_v21 = vadd.f32 %v5014_v55, %v9867_v36  ;;  %v4943_v47 = vpop.f32.mrb[67].mxu0  ;;  %v5016_v35 = vpop.f32.mrb[83].mxu1 }
 0x517   : > { %v5896_v51 = vmax.f32 %v4940_v31, 0.0  ;;  %v5770_v45 = vmax.f32 %v5013_v33, 0.0  ;;  %v4944_v22 = vadd.f32 %v4943_v47, %v9933_v6  ;;  %v5017_v53 = vadd.f32 %v5016_v35, %v9867_v36  ;;  %v9975_v35 = vpop.permute.xlu0 %4797 }
 0x518   : > { %v6024_v2 = vmax.f32 %v9879_v23, %v5769_v11  ;;  %v5911_v42 = vmax.f32 %v4942_v30, 0.0  ;;  %v5785_v56 = vmax.f32 %v5015_v21, 0.0  ;;  %5644 = vmatmul.mubr.bf16.gmra.mrb[172].mxu0 %v9835_v20  ;;  %5717 = vmatmul.mubr.bf16.gmra.mrb[188].mxu1 %v9768_v32 }
 0x519   : > { %v9948_v7 = vmax.f32 %v5895_v5, %v5896_v51  ;;  %v5912_v19 = vmax.f32 %v4944_v22, 0.0  ;;  %v5786_v38 = vmax.f32 %v5017_v53, 0.0  ;;  %5726 = vmatprep.mubr.bf16.mxu1 %v7916_v0  ;;  %v9977_v51 = vpop.permute.xlu1 %4802 }
 0x51a   : > { %v9955_v26 = vmax.f32 %v6024_v2, %v5770_v45  ;;  %v6041_v23 = vmax.f32 %v9885_v48, %v5785_v56 }
 0x51b   : > { %v9958_v27 = vmax.f32 %v5911_v42, %v5912_v19  ;;  %v4947_v59 = vpop.f32.mrb[68].mxu0  ;;  %v5020_v46 = vpop.f32.mrb[84].mxu1 }
 0x51c   : > { %v9960_v60 = vmax.f32 %v6041_v23, %v5786_v38  ;;  %v4948_v32 = vadd.f32 %v4947_v59, %v9951_v54  ;;  %v5021_v62 = vadd.f32 %v5020_v46, %v9883_v29  ;;  %v4949_v8 = vpop.f32.mrb[69].mxu0  ;;  %v5022_v41 = vpop.f32.mrb[85].mxu1 }
 0x51d   : > { %v4950_v63 = vadd.f32 %v4949_v8, %v9951_v54  ;;  %v5023_v1 = vadd.f32 %v5022_v41, %v9883_v29  ;;  %v4951_v4 = vpop.f32.mrb[70].mxu0  ;;  %v5024_v17 = vpop.f32.mrb[86].mxu1 }
 0x51e   : > { %v5927_v9 = vmax.f32 %v4948_v32, 0.0  ;;  %v5801_v48 = vmax.f32 %v5021_v62, 0.0  ;;  %v4952_v28 = vadd.f32 %v4951_v4, %v9953_v12  ;;  %v5025_v18 = vadd.f32 %v5024_v17, %v9888_v39  ;;  %v4953_v34 = vpop.f32.mrb[71].mxu0  ;;  %v5026_v50 = vpop.f32.mrb[87].mxu1 }
 0x51f   : > { %v5928_v61 = vmax.f32 %v4950_v63, 0.0  ;;  %v5802_v31 = vmax.f32 %v5023_v1, 0.0  ;;  %v4954_v33 = vadd.f32 %v4953_v34, %v9953_v12  ;;  %v5027_v25 = vadd.f32 %v5026_v50, %v9888_v39 }
 0x520   : > { %v6058_v55 = vmax.f32 %v9895_v15, %v5801_v48  ;;  %v5943_v5 = vmax.f32 %v4952_v28, 0.0  ;;  %v5817_v11 = vmax.f32 %v5025_v18, 0.0  ;;  %5727 = vmatmul.mubr.bf16.gmra.mrb[192].mxu1 %v9784_v37 }
 0x521   : > { %v9972_v30 = vmax.f32 %v5927_v9, %v5928_v61  ;;  %v5944_v21 = vmax.f32 %v4954_v33, 0.0  ;;  %v5818_v47 = vmax.f32 %v5027_v25, 0.0  ;;  %5736 = vmatprep.mubr.bf16.mxu1 %v7916_v0  ;;  %v9999_v33 = vpop.permute.xlu0 %4807  ;;  %v10001_v25 = vpop.permute.xlu1 %4812 }
 0x522   : > { %v9979_v45 = vmax.f32 %v6058_v55, %v5802_v31  ;;  %v6075_v22 = vmax.f32 %v9901_v24, %v5817_v11 }
 0x523   : > { %v9982_v53 = vmax.f32 %v5943_v5, %v5944_v21  ;;  %v4957_v15 = vpop.f32.mrb[72].mxu0  ;;  %v5030_v2 = vpop.f32.mrb[88].mxu1 }
 0x524   : > { %v9984_v42 = vmax.f32 %v6075_v22, %v5818_v47  ;;  %v4958_v37 = vadd.f32 %v4957_v15, %v9975_v35  ;;  %v5031_v56 = vadd.f32 %v5030_v2, %v9899_v14  ;;  %v4959_v19 = vpop.f32.mrb[73].mxu0  ;;  %v5032_v38 = vpop.f32.mrb[89].mxu1 }
 0x525   : > { %v4960_v23 = vadd.f32 %v4959_v19, %v9975_v35  ;;  %v5033_v59 = vadd.f32 %v5032_v38, %v9899_v14  ;;  %v4961_v46 = vpop.f32.mrb[74].mxu0  ;;  %v5034_v32 = vpop.f32.mrb[90].mxu1 }
 0x526   : > { %v5959_v62 = vmax.f32 %v4958_v37, 0.0  ;;  %v5833_v24 = vmax.f32 %v5031_v56, 0.0  ;;  %v4962_v8 = vadd.f32 %v4961_v46, %v9977_v51  ;;  %v5035_v41 = vadd.f32 %v5034_v32, %v9904_v16  ;;  %v4963_v63 = vpop.f32.mrb[75].mxu0  ;;  %v5036_v1 = vpop.f32.mrb[91].mxu1 }
 0x527   : > { %v5960_v4 = vmax.f32 %v4960_v23, 0.0  ;;  %v5834_v17 = vmax.f32 %v5033_v59, 0.0  ;;  %v4964_v9 = vadd.f32 %v4963_v63, %v9977_v51  ;;  %v5037_v48 = vadd.f32 %v5036_v1, %v9904_v16 }
 0x528   : > { %v6092_v28 = vmax.f32 %v9911_v58, %v5833_v24  ;;  %v5975_v18 = vmax.f32 %v4962_v8, 0.0  ;;  %v5849_v34 = vmax.f32 %v5035_v41, 0.0  ;;  %5737 = vmatmul.mubr.bf16.gmra.mrb[196].mxu1 %v9801_v57 }
 0x529   : > { %v9996_v50 = vmax.f32 %v5959_v62, %v5960_v4  ;;  %v5976_v61 = vmax.f32 %v4964_v9, 0.0  ;;  %v5850_v31 = vmax.f32 %v5037_v48, 0.0  ;;  %5746 = vmatprep.mubr.bf16.mxu1 %v7916_v0 }
 0x52a   : > { %v10003_v55 = vmax.f32 %v6092_v28, %v5834_v17  ;;  %v6109_v5 = vmax.f32 %v9917_v52, %v5849_v34 }
 0x52b   : > { %v10006_v11 = vmax.f32 %v5975_v18, %v5976_v61  ;;  %v4967_v58 = vpop.f32.mrb[76].mxu0  ;;  %v5040_v21 = vpop.f32.mrb[92].mxu1 }
 0x52c   : > { %v10008_v47 = vmax.f32 %v6109_v5, %v5850_v31  ;;  %v4968_v57 = vadd.f32 %v4967_v58, %v9999_v33  ;;  %v5041_v22 = vadd.f32 %v5040_v21, %v9915_v44  ;;  %v4969_v15 = vpop.f32.mrb[77].mxu0  ;;  %v5042_v2 = vpop.f32.mrb[93].mxu1 }
 0x52d   : > { %v4970_v37 = vadd.f32 %v4969_v15, %v9999_v33  ;;  %v5043_v56 = vadd.f32 %v5042_v2, %v9915_v44  ;;  %v4971_v19 = vpop.f32.mrb[78].mxu0  ;;  %v5044_v38 = vpop.f32.mrb[94].mxu1 }
 0x52e   : > { %v5991_v23 = vmax.f32 %v4968_v57, 0.0  ;;  %v5865_v52 = vmax.f32 %v5041_v22, 0.0  ;;  %v4972_v59 = vadd.f32 %v4971_v19, %v10001_v25  ;;  %v5045_v46 = vadd.f32 %v5044_v38, %v9919_v10  ;;  %v4973_v32 = vpop.f32.mrb[79].mxu0  ;;  %v5046_v62 = vpop.f32.mrb[95].mxu1 }
 0x52f   : > { %v5992_v24 = vmax.f32 %v4970_v37, 0.0  ;;  %v5866_v8 = vmax.f32 %v5043_v56, 0.0  ;;  %v4974_v41 = vadd.f32 %v4973_v32, %v10001_v25  ;;  %v5047_v63 = vadd.f32 %v5046_v62, %v9919_v10 }
 0x530   : > { %v6126_v1 = vmax.f32 %v9927_v3, %v5865_v52  ;;  %v6007_v4 = vmax.f32 %v4972_v59, 0.0  ;;  %v5881_v17 = vmax.f32 %v5045_v46, 0.0  ;;  %5747 = vmatmul.mubr.bf16.gmra.mrb[200].mxu1 %v9818_v49 }
 0x531   : > { %v10020_v9 = vmax.f32 %v5991_v23, %v5992_v24  ;;  %v6008_v48 = vmax.f32 %v4974_v41, 0.0  ;;  %v5882_v28 = vmax.f32 %v5047_v63, 0.0  ;;  %5756 = vmatprep.mubr.bf16.mxu1 %v7916_v0 }
 0x532   : > { %v10023_v18 = vmax.f32 %v6126_v1, %v5866_v8  ;;  %v6143_v34 = vmax.f32 %v9935_v43, %v5881_v17 }
 0x533   : > { %v10026_v61 = vmax.f32 %v6007_v4, %v6008_v48  ;;  %v5050_v31 = vpop.f32.mrb[96].mxu1  ;;  %v5123_v5 = vpop.f32.mrb[80].mxu0 }
 0x534   : > { %v10028_v58 = vmax.f32 %v6143_v34, %v5882_v28  ;;  %v5051_v3 = vadd.f32 %v5050_v31, %v9931_v13  ;;  %v5124_v49 = vadd.f32 %v5123_v5, %v9863_v40  ;;  %v5052_v21 = vpop.f32.mrb[97].mxu1  ;;  %v5125_v57 = vpop.f32.mrb[81].mxu0 }
 0x535   : > { %v5053_v22 = vadd.f32 %v5052_v21, %v9931_v13  ;;  %v5126_v0 = vadd.f32 %v5125_v57, %v9863_v40  ;;  %v5054_v15 = vpop.f32.mrb[98].mxu1  ;;  %v5127_v2 = vpop.f32.mrb[82].mxu0 }
 0x536   : > { %v5897_v37 = vmax.f32 %v5051_v3, 0.0  ;;  %v5771_v43 = vmax.f32 %v5124_v49, 0.0  ;;  %v5055_v56 = vadd.f32 %v5054_v15, %v9933_v6  ;;  %v5128_v19 = vadd.f32 %v5127_v2, %v9867_v36  ;;  %v5056_v38 = vpop.f32.mrb[99].mxu1  ;;  %v5129_v23 = vpop.f32.mrb[83].mxu0 }
 0x537   : > { %v5898_v52 = vmax.f32 %v5053_v22, 0.0  ;;  %v5772_v59 = vmax.f32 %v5126_v0, 0.0  ;;  %v5057_v46 = vadd.f32 %v5056_v38, %v9933_v6  ;;  %v5130_v32 = vadd.f32 %v5129_v23, %v9867_v36 }
 0x538   : > { %v6160_v62 = vmax.f32 %v9948_v7, %v5897_v37  ;;  %v6026_v24 = vmax.f32 %v9955_v26, %v5771_v43  ;;  %v5913_v8 = vmax.f32 %v5055_v56, 0.0  ;;  %v5787_v41 = vmax.f32 %v5128_v19, 0.0  ;;  %5757 = vmatmul.mubr.bf16.gmra.mrb[204].mxu1 %v9835_v20 }
 0x539   : > { %v5914_v63 = vmax.f32 %v5057_v46, 0.0  ;;  %v5788_v1 = vmax.f32 %v5130_v32, 0.0 }
 0x53a   : > { %v10041_v4 = vmax.f32 %v6160_v62, %v5898_v52  ;;  %v10043_v17 = vmax.f32 %v6026_v24, %v5772_v59  ;;  %v6177_v48 = vmax.f32 %v9958_v27, %v5913_v8  ;;  %v6043_v28 = vmax.f32 %v9960_v60, %v5787_v41 }
 0x53b   : > { %v5060_v34 = vpop.f32.mrb[100].mxu1  ;;  %v5133_v31 = vpop.f32.mrb[84].mxu0 }
 0x53c   : > { %v10047_v5 = vmax.f32 %v6177_v48, %v5914_v63  ;;  %v10049_v7 = vmax.f32 %v6043_v28, %v5788_v1  ;;  %v5061_v26 = vadd.f32 %v5060_v34, %v9951_v54  ;;  %v5134_v20 = vadd.f32 %v5133_v31, %v9883_v29  ;;  %v5062_v3 = vpop.f32.mrb[101].mxu1  ;;  %v5135_v49 = vpop.f32.mrb[85].mxu0 }
 0x53d   : > { %v5063_v21 = vadd.f32 %v5062_v3, %v9951_v54  ;;  %v5136_v57 = vadd.f32 %v5135_v49, %v9883_v29  ;;  %v5064_v22 = vpop.f32.mrb[102].mxu1  ;;  %v5137_v27 = vpop.f32.mrb[86].mxu0 }
 0x53e   : > { %v5929_v0 = vmax.f32 %v5061_v26, 0.0  ;;  %v5803_v60 = vmax.f32 %v5134_v20, 0.0  ;;  %v5065_v15 = vadd.f32 %v5064_v22, %v9953_v12  ;;  %v5138_v2 = vadd.f32 %v5137_v27, %v9888_v39  ;;  %v5066_v37 = vpop.f32.mrb[103].mxu1  ;;  %v5139_v43 = vpop.f32.mrb[87].mxu0 }
 0x53f   : > { %v5930_v56 = vmax.f32 %v5063_v21, 0.0  ;;  %v5804_v19 = vmax.f32 %v5136_v57, 0.0  ;;  %v5067_v38 = vadd.f32 %v5066_v37, %v9953_v12  ;;  %v5140_v23 = vadd.f32 %v5139_v43, %v9888_v39 }
 0x540   : > { %v6194_v52 = vmax.f32 %v9972_v30, %v5929_v0  ;;  %v6060_v59 = vmax.f32 %v9979_v45, %v5803_v60  ;;  %v5945_v46 = vmax.f32 %v5065_v15, 0.0  ;;  %v5819_v32 = vmax.f32 %v5138_v2, 0.0 }
 0x541   : > { %v5946_v62 = vmax.f32 %v5067_v38, 0.0  ;;  %v5820_v24 = vmax.f32 %v5140_v23, 0.0 }
 0x542   : > { %v10061_v8 = vmax.f32 %v6194_v52, %v5930_v56  ;;  %v10063_v41 = vmax.f32 %v6060_v59, %v5804_v19  ;;  %v6211_v63 = vmax.f32 %v9982_v53, %v5945_v46  ;;  %v6077_v1 = vmax.f32 %v9984_v42, %v5819_v32 }
 0x543   : > { %v5070_v48 = vpop.f32.mrb[104].mxu1  ;;  %v5143_v28 = vpop.f32.mrb[88].mxu0 }
 0x544   : > { %v10067_v34 = vmax.f32 %v6211_v63, %v5946_v62  ;;  %v10069_v31 = vmax.f32 %v6077_v1, %v5820_v24  ;;  %v5071_v30 = vadd.f32 %v5070_v48, %v9975_v35  ;;  %v5144_v45 = vadd.f32 %v5143_v28, %v9899_v14  ;;  %v5072_v26 = vpop.f32.mrb[105].mxu1  ;;  %v5145_v20 = vpop.f32.mrb[89].mxu0 }
 0x545   : > { %v5073_v3 = vadd.f32 %v5072_v26, %v9975_v35  ;;  %v5146_v49 = vadd.f32 %v5145_v20, %v9899_v14  ;;  %v5074_v21 = vpop.f32.mrb[106].mxu1  ;;  %v5147_v53 = vpop.f32.mrb[90].mxu0 }
 0x546   : > { %v5961_v57 = vmax.f32 %v5071_v30, 0.0  ;;  %v5835_v42 = vmax.f32 %v5144_v45, 0.0  ;;  %v5075_v22 = vadd.f32 %v5074_v21, %v9977_v51  ;;  %v5148_v27 = vadd.f32 %v5147_v53, %v9904_v16  ;;  %v5076_v0 = vpop.f32.mrb[107].mxu1  ;;  %v5149_v60 = vpop.f32.mrb[91].mxu0 }
 0x547   : > { %v5962_v15 = vmax.f32 %v5073_v3, 0.0  ;;  %v5836_v2 = vmax.f32 %v5146_v49, 0.0  ;;  %v5077_v37 = vadd.f32 %v5076_v0, %v9977_v51  ;;  %v5150_v43 = vadd.f32 %v5149_v60, %v9904_v16 }
 0x548   : > { %v6228_v56 = vmax.f32 %v9996_v50, %v5961_v57  ;;  %v6094_v19 = vmax.f32 %v10003_v55, %v5835_v42  ;;  %v5977_v38 = vmax.f32 %v5075_v22, 0.0  ;;  %v5851_v23 = vmax.f32 %v5148_v27, 0.0 }
 0x549   : > { %v5978_v52 = vmax.f32 %v5077_v37, 0.0  ;;  %v5852_v59 = vmax.f32 %v5150_v43, 0.0 }
 0x54a   : > { %v10081_v46 = vmax.f32 %v6228_v56, %v5962_v15  ;;  %v10083_v32 = vmax.f32 %v6094_v19, %v5836_v2  ;;  %v6245_v62 = vmax.f32 %v10006_v11, %v5977_v38  ;;  %v6111_v24 = vmax.f32 %v10008_v47, %v5851_v23 }
 0x54b   : > { %v5080_v63 = vpop.f32.mrb[108].mxu1  ;;  %v5153_v1 = vpop.f32.mrb[92].mxu0 }
 0x54c   : > { %v10087_v48 = vmax.f32 %v6245_v62, %v5978_v52  ;;  %v10089_v28 = vmax.f32 %v6111_v24, %v5852_v59  ;;  %v5081_v50 = vadd.f32 %v5080_v63, %v9999_v33  ;;  %v5154_v55 = vadd.f32 %v5153_v1, %v9915_v44  ;;  %v5082_v30 = vpop.f32.mrb[109].mxu1  ;;  %v5155_v45 = vpop.f32.mrb[93].mxu0 }
 0x54d   : > { %v5083_v26 = vadd.f32 %v5082_v30, %v9999_v33  ;;  %v5156_v20 = vadd.f32 %v5155_v45, %v9915_v44  ;;  %v5084_v3 = vpop.f32.mrb[110].mxu1  ;;  %v5157_v11 = vpop.f32.mrb[94].mxu0 }
 0x54e   : > { %v5993_v49 = vmax.f32 %v5081_v50, 0.0  ;;  %v5867_v47 = vmax.f32 %v5154_v55, 0.0  ;;  %v5085_v21 = vadd.f32 %v5084_v3, %v10001_v25  ;;  %v5158_v53 = vadd.f32 %v5157_v11, %v9919_v10  ;;  %v5086_v57 = vpop.f32.mrb[111].mxu1  ;;  %v5159_v42 = vpop.f32.mrb[95].mxu0 }
 0x54f   : > { %v5994_v22 = vmax.f32 %v5083_v26, 0.0  ;;  %v5868_v27 = vmax.f32 %v5156_v20, 0.0  ;;  %v5087_v0 = vadd.f32 %v5086_v57, %v10001_v25  ;;  %v5160_v60 = vadd.f32 %v5159_v42, %v9919_v10 }
 0x550   : > { %v6262_v15 = vmax.f32 %v10020_v9, %v5993_v49  ;;  %v6128_v2 = vmax.f32 %v10023_v18, %v5867_v47  ;;  %v6009_v37 = vmax.f32 %v5085_v21, 0.0  ;;  %v5883_v43 = vmax.f32 %v5158_v53, 0.0 }
 0x551   : > { %v6010_v56 = vmax.f32 %v5087_v0, 0.0  ;;  %v5884_v19 = vmax.f32 %v5160_v60, 0.0 }
 0x552   : > { %v10101_v38 = vmax.f32 %v6262_v15, %v5994_v22  ;;  %v10103_v23 = vmax.f32 %v6128_v2, %v5868_v27  ;;  %v6279_v52 = vmax.f32 %v10026_v61, %v6009_v37  ;;  %v6145_v59 = vmax.f32 %v10028_v58, %v5883_v43 }
 0x553   : > { %v5163_v62 = vpop.f32.mrb[96].mxu0  ;;  %v5236_v24 = vpop.f32.mrb[112].mxu1 }
 0x554   : > { %v10107_v63 = vmax.f32 %v6279_v52, %v6010_v56  ;;  %v10109_v1 = vmax.f32 %v6145_v59, %v5884_v19  ;;  %v5164_v9 = vadd.f32 %v5163_v62, %v9931_v13  ;;  %v5237_v18 = vadd.f32 %v5236_v24, %v9863_v40  ;;  %v5165_v50 = vpop.f32.mrb[97].mxu0  ;;  %v5238_v55 = vpop.f32.mrb[113].mxu1 }
 0x555   : > { %v5166_v30 = vadd.f32 %v5165_v50, %v9931_v13  ;;  %v5239_v45 = vadd.f32 %v5238_v55, %v9863_v40  ;;  %v5167_v26 = vpop.f32.mrb[98].mxu0  ;;  %v5240_v61 = vpop.f32.mrb[114].mxu1 }
 0x556   : > { %v5899_v20 = vmax.f32 %v5164_v9, 0.0  ;;  %v5773_v58 = vmax.f32 %v5237_v18, 0.0  ;;  %v5168_v3 = vadd.f32 %v5167_v26, %v9933_v6  ;;  %v5241_v11 = vadd.f32 %v5240_v61, %v9867_v36  ;;  %v5169_v49 = vpop.f32.mrb[99].mxu0  ;;  %v5242_v47 = vpop.f32.mrb[115].mxu1 }
 0x557   : > { %v5900_v21 = vmax.f32 %v5166_v30, 0.0  ;;  %v5774_v53 = vmax.f32 %v5239_v45, 0.0  ;;  %v5170_v57 = vadd.f32 %v5169_v49, %v9933_v6  ;;  %v5243_v42 = vadd.f32 %v5242_v47, %v9867_v36 }
 0x558   : > { %v6162_v22 = vmax.f32 %v10041_v4, %v5899_v20  ;;  %v6028_v27 = vmax.f32 %v10043_v17, %v5773_v58  ;;  %v5915_v0 = vmax.f32 %v5168_v3, 0.0  ;;  %v5789_v60 = vmax.f32 %v5241_v11, 0.0 }
 0x559   : > { %v5916_v15 = vmax.f32 %v5170_v57, 0.0  ;;  %v5790_v2 = vmax.f32 %v5243_v42, 0.0 }
 0x55a   : > { %v10121_v37 = vmax.f32 %v6162_v22, %v5900_v21  ;;  %v10123_v43 = vmax.f32 %v6028_v27, %v5774_v53  ;;  %v6179_v56 = vmax.f32 %v10047_v5, %v5915_v0  ;;  %v6045_v19 = vmax.f32 %v10049_v7, %v5789_v60 }
 0x55b   : > { %v5173_v52 = vpop.f32.mrb[100].mxu0  ;;  %v5246_v59 = vpop.f32.mrb[116].mxu1 }
 0x55c   : > { %v10127_v62 = vmax.f32 %v6179_v56, %v5916_v15  ;;  %v10129_v24 = vmax.f32 %v6045_v19, %v5790_v2  ;;  %v5174_v4 = vadd.f32 %v5173_v52, %v9951_v54  ;;  %v5247_v17 = vadd.f32 %v5246_v59, %v9883_v29  ;;  %v5175_v9 = vpop.f32.mrb[101].mxu0  ;;  %v5248_v18 = vpop.f32.mrb[117].mxu1 }
 0x55d   : > { %v5176_v50 = vadd.f32 %v5175_v9, %v9951_v54  ;;  %v5249_v55 = vadd.f32 %v5248_v18, %v9883_v29  ;;  %v5177_v30 = vpop.f32.mrb[102].mxu0  ;;  %v5250_v5 = vpop.f32.mrb[118].mxu1 }
 0x55e   : > { %v5931_v45 = vmax.f32 %v5174_v4, 0.0  ;;  %v5805_v7 = vmax.f32 %v5247_v17, 0.0  ;;  %v5178_v26 = vadd.f32 %v5177_v30, %v9953_v12  ;;  %v5251_v61 = vadd.f32 %v5250_v5, %v9888_v39  ;;  %v5179_v20 = vpop.f32.mrb[103].mxu0  ;;  %v5252_v58 = vpop.f32.mrb[119].mxu1 }
 0x55f   : > { %v5932_v3 = vmax.f32 %v5176_v50, 0.0  ;;  %v5806_v11 = vmax.f32 %v5249_v55, 0.0  ;;  %v5180_v49 = vadd.f32 %v5179_v20, %v9953_v12  ;;  %v5253_v47 = vadd.f32 %v5252_v58, %v9888_v39 }
 0x560   : > { %v6196_v21 = vmax.f32 %v10061_v8, %v5931_v45  ;;  %v6062_v53 = vmax.f32 %v10063_v41, %v5805_v7  ;;  %v5947_v57 = vmax.f32 %v5178_v26, 0.0  ;;  %v5821_v42 = vmax.f32 %v5251_v61, 0.0 }
 0x561   : > { %v5948_v22 = vmax.f32 %v5180_v49, 0.0  ;;  %v5822_v27 = vmax.f32 %v5253_v47, 0.0 }
 0x562   : > { %v10141_v0 = vmax.f32 %v6196_v21, %v5932_v3  ;;  %v10143_v60 = vmax.f32 %v6062_v53, %v5806_v11  ;;  %v6213_v15 = vmax.f32 %v10067_v34, %v5947_v57  ;;  %v6079_v2 = vmax.f32 %v10069_v31, %v5821_v42 }
 0x563   : > { %v5183_v56 = vpop.f32.mrb[104].mxu0  ;;  %v5256_v19 = vpop.f32.mrb[120].mxu1 }
 0x564   : > { %v10147_v52 = vmax.f32 %v6213_v15, %v5948_v22  ;;  %v10149_v59 = vmax.f32 %v6079_v2, %v5822_v27  ;;  %v5184_v8 = vadd.f32 %v5183_v56, %v9975_v35  ;;  %v5257_v41 = vadd.f32 %v5256_v19, %v9899_v14  ;;  %v5185_v4 = vpop.f32.mrb[105].mxu0  ;;  %v5258_v17 = vpop.f32.mrb[121].mxu1 }
 0x565   : > { %v5186_v9 = vadd.f32 %v5185_v4, %v9975_v35  ;;  %v5259_v18 = vadd.f32 %v5258_v17, %v9899_v14  ;;  %v5187_v50 = vpop.f32.mrb[106].mxu0  ;;  %v5260_v34 = vpop.f32.mrb[122].mxu1 }
 0x566   : > { %v5963_v55 = vmax.f32 %v5184_v8, 0.0  ;;  %v5837_v31 = vmax.f32 %v5257_v41, 0.0  ;;  %v5188_v30 = vadd.f32 %v5187_v50, %v9977_v51  ;;  %v5261_v5 = vadd.f32 %v5260_v34, %v9904_v16  ;;  %v5189_v45 = vpop.f32.mrb[107].mxu0  ;;  %v5262_v7 = vpop.f32.mrb[123].mxu1 }
 0x567   : > { %v5964_v26 = vmax.f32 %v5186_v9, 0.0  ;;  %v5838_v61 = vmax.f32 %v5259_v18, 0.0  ;;  %v5190_v20 = vadd.f32 %v5189_v45, %v9977_v51  ;;  %v5263_v58 = vadd.f32 %v5262_v7, %v9904_v16 }
 0x568   : > { %v6230_v3 = vmax.f32 %v10081_v46, %v5963_v55  ;;  %v6096_v11 = vmax.f32 %v10083_v32, %v5837_v31  ;;  %v5979_v49 = vmax.f32 %v5188_v30, 0.0  ;;  %v5853_v47 = vmax.f32 %v5261_v5, 0.0 }
 0x569   : > { %v5980_v21 = vmax.f32 %v5190_v20, 0.0  ;;  %v5854_v53 = vmax.f32 %v5263_v58, 0.0 }
 0x56a   : > { %v10161_v57 = vmax.f32 %v6230_v3, %v5964_v26  ;;  %v10163_v42 = vmax.f32 %v6096_v11, %v5838_v61  ;;  %v6247_v22 = vmax.f32 %v10087_v48, %v5979_v49  ;;  %v6113_v27 = vmax.f32 %v10089_v28, %v5853_v47 }
 0x56b   : > { %v5193_v15 = vpop.f32.mrb[108].mxu0  ;;  %v5266_v2 = vpop.f32.mrb[124].mxu1 }
 0x56c   : > { %v10167_v56 = vmax.f32 %v6247_v22, %v5980_v21  ;;  %v10169_v19 = vmax.f32 %v6113_v27, %v5854_v53  ;;  %v5194_v46 = vadd.f32 %v5193_v15, %v9999_v33  ;;  %v5267_v32 = vadd.f32 %v5266_v2, %v9915_v44  ;;  %v5195_v8 = vpop.f32.mrb[109].mxu0  ;;  %v5268_v41 = vpop.f32.mrb[125].mxu1 }
 0x56d   : > { %v5196_v4 = vadd.f32 %v5195_v8, %v9999_v33  ;;  %v5269_v17 = vadd.f32 %v5268_v41, %v9915_v44  ;;  %v5197_v9 = vpop.f32.mrb[110].mxu0  ;;  %v5270_v48 = vpop.f32.mrb[126].mxu1 }
 0x56e   : > { %v5995_v18 = vmax.f32 %v5194_v46, 0.0  ;;  %v5869_v28 = vmax.f32 %v5267_v32, 0.0  ;;  %v5198_v50 = vadd.f32 %v5197_v9, %v10001_v25  ;;  %v5271_v34 = vadd.f32 %v5270_v48, %v9919_v10  ;;  %v5199_v55 = vpop.f32.mrb[111].mxu0  ;;  %v5272_v31 = vpop.f32.mrb[127].mxu1 }
 0x56f   : > { %v5996_v30 = vmax.f32 %v5196_v4, 0.0  ;;  %v5870_v5 = vmax.f32 %v5269_v17, 0.0  ;;  %v5200_v45 = vadd.f32 %v5199_v55, %v10001_v25  ;;  %v5273_v7 = vadd.f32 %v5272_v31, %v9919_v10 }
 0x570   : > { %v6264_v26 = vmax.f32 %v10101_v38, %v5995_v18  ;;  %v6130_v61 = vmax.f32 %v10103_v23, %v5869_v28  ;;  %v6011_v20 = vmax.f32 %v5198_v50, 0.0  ;;  %v5885_v58 = vmax.f32 %v5271_v34, 0.0 }
 0x571   : > { %v6012_v3 = vmax.f32 %v5200_v45, 0.0  ;;  %v5886_v11 = vmax.f32 %v5273_v7, 0.0 }
 0x572   : > { %v10181_v49 = vmax.f32 %v6264_v26, %v5996_v30  ;;  %v10183_v47 = vmax.f32 %v6130_v61, %v5870_v5  ;;  %v6281_v21 = vmax.f32 %v10107_v63, %v6011_v20  ;;  %v6147_v53 = vmax.f32 %v10109_v1, %v5885_v58 }
 0x573   : > { %v5276_v22 = vpop.f32.mrb[128].mxu1  ;;  %v5349_v27 = vpop.f32.mrb[112].mxu0 }
 0x574   : > { %v10187_v15 = vmax.f32 %v6281_v21, %v6012_v3  ;;  %v10189_v2 = vmax.f32 %v6147_v53, %v5886_v11  ;;  %v5277_v38 = vadd.f32 %v5276_v22, %v9931_v13  ;;  %v5350_v23 = vadd.f32 %v5349_v27, %v9863_v40  ;;  %v5278_v46 = vpop.f32.mrb[129].mxu1  ;;  %v5351_v32 = vpop.f32.mrb[113].mxu0 }
 0x575   : > { %v5279_v8 = vadd.f32 %v5278_v46, %v9931_v13  ;;  %v5352_v41 = vadd.f32 %v5351_v32, %v9863_v40  ;;  %v5280_v4 = vpop.f32.mrb[130].mxu1  ;;  %v5353_v63 = vpop.f32.mrb[114].mxu0 }
 0x576   : > { %v5901_v17 = vmax.f32 %v5277_v38, 0.0  ;;  %v5775_v1 = vmax.f32 %v5350_v23, 0.0  ;;  %v5281_v9 = vadd.f32 %v5280_v4, %v9933_v6  ;;  %v5354_v48 = vadd.f32 %v5353_v63, %v9867_v36  ;;  %v5282_v18 = vpop.f32.mrb[131].mxu1  ;;  %v5355_v28 = vpop.f32.mrb[115].mxu0 }
 0x577   : > { %v5902_v50 = vmax.f32 %v5279_v8, 0.0  ;;  %v5776_v34 = vmax.f32 %v5352_v41, 0.0  ;;  %v5283_v55 = vadd.f32 %v5282_v18, %v9933_v6  ;;  %v5356_v31 = vadd.f32 %v5355_v28, %v9867_v36 }
 0x578   : > { %v6164_v30 = vmax.f32 %v10121_v37, %v5901_v17  ;;  %v6030_v5 = vmax.f32 %v10123_v43, %v5775_v1  ;;  %v5917_v45 = vmax.f32 %v5281_v9, 0.0  ;;  %v5791_v7 = vmax.f32 %v5354_v48, 0.0 }
 0x579   : > { %v5918_v26 = vmax.f32 %v5283_v55, 0.0  ;;  %v5792_v61 = vmax.f32 %v5356_v31, 0.0 }
 0x57a   : > { %v10201_v20 = vmax.f32 %v6164_v30, %v5902_v50  ;;  %v10203_v58 = vmax.f32 %v6030_v5, %v5776_v34  ;;  %v6181_v3 = vmax.f32 %v10127_v62, %v5917_v45  ;;  %v6047_v11 = vmax.f32 %v10129_v24, %v5791_v7 }
 0x57b   : > { %v5286_v21 = vpop.f32.mrb[132].mxu1  ;;  %v5359_v53 = vpop.f32.mrb[116].mxu0 }
 0x57c   : > { %v10207_v22 = vmax.f32 %v6181_v3, %v5918_v26  ;;  %v10209_v27 = vmax.f32 %v6047_v11, %v5792_v61  ;;  %v5287_v37 = vadd.f32 %v5286_v21, %v9951_v54  ;;  %v5360_v43 = vadd.f32 %v5359_v53, %v9883_v29  ;;  %v5288_v38 = vpop.f32.mrb[133].mxu1  ;;  %v5361_v23 = vpop.f32.mrb[117].mxu0 }
 0x57d   : > { %v5289_v46 = vadd.f32 %v5288_v38, %v9951_v54  ;;  %v5362_v32 = vadd.f32 %v5361_v23, %v9883_v29  ;;  %v5290_v8 = vpop.f32.mrb[134].mxu1  ;;  %v5363_v62 = vpop.f32.mrb[118].mxu0 }
 0x57e   : > { %v5933_v41 = vmax.f32 %v5287_v37, 0.0  ;;  %v5807_v24 = vmax.f32 %v5360_v43, 0.0  ;;  %v5291_v4 = vadd.f32 %v5290_v8, %v9953_v12  ;;  %v5364_v63 = vadd.f32 %v5363_v62, %v9888_v39  ;;  %v5292_v17 = vpop.f32.mrb[135].mxu1  ;;  %v5365_v1 = vpop.f32.mrb[119].mxu0 }
 0x57f   : > { %v5934_v9 = vmax.f32 %v5289_v46, 0.0  ;;  %v5808_v48 = vmax.f32 %v5362_v32, 0.0  ;;  %v5293_v18 = vadd.f32 %v5292_v17, %v9953_v12  ;;  %v5366_v28 = vadd.f32 %v5365_v1, %v9888_v39 }
 0x580   : > { %v6198_v50 = vmax.f32 %v10141_v0, %v5933_v41  ;;  %v6064_v34 = vmax.f32 %v10143_v60, %v5807_v24  ;;  %v5949_v55 = vmax.f32 %v5291_v4, 0.0  ;;  %v5823_v31 = vmax.f32 %v5364_v63, 0.0 }
 0x581   : > { %v5950_v30 = vmax.f32 %v5293_v18, 0.0  ;;  %v5824_v5 = vmax.f32 %v5366_v28, 0.0 }
 0x582   : > { %v10221_v45 = vmax.f32 %v6198_v50, %v5934_v9  ;;  %v10223_v7 = vmax.f32 %v6064_v34, %v5808_v48  ;;  %v6215_v26 = vmax.f32 %v10147_v52, %v5949_v55  ;;  %v6081_v61 = vmax.f32 %v10149_v59, %v5823_v31 }
 0x583   : > { %v5296_v3 = vpop.f32.mrb[136].mxu1  ;;  %v5369_v11 = vpop.f32.mrb[120].mxu0 }
 0x584   : > { %v10227_v21 = vmax.f32 %v6215_v26, %v5950_v30  ;;  %v10229_v53 = vmax.f32 %v6081_v61, %v5824_v5  ;;  %v5297_v0 = vadd.f32 %v5296_v3, %v9975_v35  ;;  %v5370_v60 = vadd.f32 %v5369_v11, %v9899_v14  ;;  %v5298_v37 = vpop.f32.mrb[137].mxu1  ;;  %v5371_v43 = vpop.f32.mrb[121].mxu0 }
 0x585   : > { %v5299_v38 = vadd.f32 %v5298_v37, %v9975_v35  ;;  %v5372_v23 = vadd.f32 %v5371_v43, %v9899_v14  ;;  %v5300_v46 = vpop.f32.mrb[138].mxu1  ;;  %v5373_v52 = vpop.f32.mrb[122].mxu0 }
 0x586   : > { %v5965_v32 = vmax.f32 %v5297_v0, 0.0  ;;  %v5839_v59 = vmax.f32 %v5370_v60, 0.0  ;;  %v5301_v8 = vadd.f32 %v5300_v46, %v9977_v51  ;;  %v5374_v62 = vadd.f32 %v5373_v52, %v9904_v16  ;;  %v5302_v41 = vpop.f32.mrb[139].mxu1  ;;  %v5375_v24 = vpop.f32.mrb[123].mxu0 }
 0x587   : > { %v5966_v4 = vmax.f32 %v5299_v38, 0.0  ;;  %v5840_v63 = vmax.f32 %v5372_v23, 0.0  ;;  %v5303_v17 = vadd.f32 %v5302_v41, %v9977_v51  ;;  %v5376_v1 = vadd.f32 %v5375_v24, %v9904_v16 }
 0x588   : > { %v6232_v9 = vmax.f32 %v10161_v57, %v5965_v32  ;;  %v6098_v48 = vmax.f32 %v10163_v42, %v5839_v59  ;;  %v5981_v18 = vmax.f32 %v5301_v8, 0.0  ;;  %v5855_v28 = vmax.f32 %v5374_v62, 0.0 }
 0x589   : > { %v5982_v50 = vmax.f32 %v5303_v17, 0.0  ;;  %v5856_v34 = vmax.f32 %v5376_v1, 0.0 }
 0x58a   : > { %v10241_v55 = vmax.f32 %v6232_v9, %v5966_v4  ;;  %v10243_v31 = vmax.f32 %v6098_v48, %v5840_v63  ;;  %v6249_v30 = vmax.f32 %v10167_v56, %v5981_v18  ;;  %v6115_v5 = vmax.f32 %v10169_v19, %v5855_v28 }
 0x58b   : > { %v5306_v26 = vpop.f32.mrb[140].mxu1  ;;  %v5379_v61 = vpop.f32.mrb[124].mxu0 }
 0x58c   : > { %v10247_v3 = vmax.f32 %v6249_v30, %v5982_v50  ;;  %v10249_v11 = vmax.f32 %v6115_v5, %v5856_v34  ;;  %v5307_v57 = vadd.f32 %v5306_v26, %v9999_v33  ;;  %v5380_v42 = vadd.f32 %v5379_v61, %v9915_v44  ;;  %v5308_v0 = vpop.f32.mrb[141].mxu1  ;;  %v5381_v60 = vpop.f32.mrb[125].mxu0 }
 0x58d   : > { %v5309_v37 = vadd.f32 %v5308_v0, %v9999_v33  ;;  %v5382_v43 = vadd.f32 %v5381_v60, %v9915_v44  ;;  %v5310_v38 = vpop.f32.mrb[142].mxu1  ;;  %v5383_v56 = vpop.f32.mrb[126].mxu0 }
 0x58e   : > { %v5997_v23 = vmax.f32 %v5307_v57, 0.0  ;;  %v5871_v19 = vmax.f32 %v5380_v42, 0.0  ;;  %v5311_v46 = vadd.f32 %v5310_v38, %v10001_v25  ;;  %v5384_v52 = vadd.f32 %v5383_v56, %v9919_v10  ;;  %v5312_v32 = vpop.f32.mrb[143].mxu1  ;;  %v5385_v59 = vpop.f32.mrb[127].mxu0 }
 0x58f   : > { %v5998_v8 = vmax.f32 %v5309_v37, 0.0  ;;  %v5872_v62 = vmax.f32 %v5382_v43, 0.0  ;;  %v5313_v41 = vadd.f32 %v5312_v32, %v10001_v25  ;;  %v5386_v24 = vadd.f32 %v5385_v59, %v9919_v10 }
 0x590   : > { %v6266_v4 = vmax.f32 %v10181_v49, %v5997_v23  ;;  %v6132_v63 = vmax.f32 %v10183_v47, %v5871_v19  ;;  %v6013_v17 = vmax.f32 %v5311_v46, 0.0  ;;  %v5887_v1 = vmax.f32 %v5384_v52, 0.0 }
 0x591   : > { %v6014_v9 = vmax.f32 %v5313_v41, 0.0  ;;  %v5888_v48 = vmax.f32 %v5386_v24, 0.0 }
 0x592   : > { %v10261_v18 = vmax.f32 %v6266_v4, %v5998_v8  ;;  %v10263_v28 = vmax.f32 %v6132_v63, %v5872_v62  ;;  %v6283_v50 = vmax.f32 %v10187_v15, %v6013_v17  ;;  %v6149_v34 = vmax.f32 %v10189_v2, %v5887_v1 }
 0x593   : > { %v5389_v30 = vpop.f32.mrb[128].mxu0  ;;  %v5462_v5 = vpop.f32.mrb[144].mxu1 }
 0x594   : > { %v10267_v26 = vmax.f32 %v6283_v50, %v6014_v9  ;;  %v10269_v61 = vmax.f32 %v6149_v34, %v5888_v48  ;;  %v5390_v49 = vadd.f32 %v5389_v30, %v9931_v13  ;;  %v5463_v47 = vadd.f32 %v5462_v5, %v9863_v40  ;;  %v5391_v57 = vpop.f32.mrb[129].mxu0  ;;  %v5464_v42 = vpop.f32.mrb[145].mxu1 }
 0x595   : > { %v5392_v0 = vadd.f32 %v5391_v57, %v9931_v13  ;;  %v5465_v60 = vadd.f32 %v5464_v42, %v9863_v40  ;;  %v5393_v37 = vpop.f32.mrb[130].mxu0  ;;  %v5466_v15 = vpop.f32.mrb[146].mxu1  ;;  %v7918_v50 = vmov -inf  }
 0x596   : > { %v5903_v43 = vmax.f32 %v5390_v49, 0.0  ;;  %v5777_v2 = vmax.f32 %v5463_v47, 0.0  ;;  %v5394_v38 = vadd.f32 %v5393_v37, %v9933_v6  ;;  %v5467_v56 = vadd.f32 %v5466_v15, %v9867_v36  ;;  %v5395_v23 = vpop.f32.mrb[131].mxu0  ;;  %v5468_v19 = vpop.f32.mrb[147].mxu1  ;;  %529 = vst.msk [vmem:[#allocation2] sm:$0xff] %vm528_vm4, %v7918_v50  ;;  %530 = vst.msk [vmem:[#allocation2 + $0x8] sm:$0xff] %vm528_vm4, %v7918_v50 }
 0x597   : > { %v5904_v46 = vmax.f32 %v5392_v0, 0.0  ;;  %v5778_v52 = vmax.f32 %v5465_v60, 0.0  ;;  %v5396_v32 = vadd.f32 %v5395_v23, %v9933_v6  ;;  %v5469_v59 = vadd.f32 %v5468_v19, %v9867_v36  ;;  %531 = vst.msk [vmem:[#allocation2 + $0x10] sm:$0xff] %vm528_vm4, %v7918_v50  ;;  %532 = vst.msk [vmem:[#allocation2 + $0x18] sm:$0xff] %vm528_vm4, %v7918_v50 }
 0x598   : > { %v6166_v8 = vmax.f32 %v10201_v20, %v5903_v43  ;;  %v6032_v62 = vmax.f32 %v10203_v58, %v5777_v2  ;;  %v5919_v41 = vmax.f32 %v5394_v38, 0.0  ;;  %v5793_v24 = vmax.f32 %v5467_v56, 0.0  ;;  %533 = vst.msk [vmem:[#allocation2 + $0x20] sm:$0xff] %vm528_vm4, %v7918_v50  ;;  %534 = vst.msk [vmem:[#allocation2 + $0x28] sm:$0xff] %vm528_vm4, %v7918_v50 }
 0x599   : > { %v5920_v4 = vmax.f32 %v5396_v32, 0.0  ;;  %v5794_v63 = vmax.f32 %v5469_v59, 0.0  ;;  %535 = vst.msk [vmem:[#allocation2 + $0x30] sm:$0xff] %vm528_vm4, %v7918_v50  ;;  %536 = vst.msk [vmem:[#allocation2 + $0x38] sm:$0xff] %vm528_vm4, %v7918_v50 }
 0x59a   : > { %v10281_v17 = vmax.f32 %v6166_v8, %v5904_v46  ;;  %v10283_v1 = vmax.f32 %v6032_v62, %v5778_v52  ;;  %v6183_v9 = vmax.f32 %v10207_v22, %v5919_v41  ;;  %v6049_v48 = vmax.f32 %v10209_v27, %v5793_v24  ;;  %537 = vst.msk [vmem:[#allocation2 + $0x40] sm:$0xff] %vm528_vm4, %v7918_v50 }
 0x59b   : > { %538 = vst.msk [vmem:[#allocation2 + $0x48] sm:$0xff] %vm528_vm4, %v7918_v50  ;;  %539 = vst.msk [vmem:[#allocation2 + $0x50] sm:$0xff] %vm528_vm4, %v7918_v50  ;;  %v5399_v20 = vpop.f32.mrb[132].mxu0  ;;  %v5472_v58 = vpop.f32.mrb[148].mxu1 }
 0x59c   : > { %540 = vst.msk [vmem:[#allocation2 + $0x58] sm:$0xff] %vm528_vm4, %v7918_v50  ;;  %541 = vst.msk [vmem:[#allocation2 + $0x60] sm:$0xff] %vm528_vm4, %v7918_v50  ;;  %v10303_v22 = vmax.f32 %v6183_v9, %v5920_v4  ;;  %v10305_v27 = vmax.f32 %v6049_v48, %v5794_v63  ;;  %v5400_v34 = vadd.f32 %v5399_v20, %v9951_v54  ;;  %v5401_v5 = vpop.f32.mrb[133].mxu0  ;;  %v5474_v49 = vpop.f32.mrb[149].mxu1 }
 0x59d   : > { %542 = vst.msk [vmem:[#allocation2 + $0x68] sm:$0xff] %vm528_vm4, %v7918_v50  ;;  %543 = vst.msk [vmem:[#allocation2 + $0x70] sm:$0xff] %vm528_vm4, %v7918_v50  ;;  %v5473_v30 = vadd.f32 %v5472_v58, %v9883_v29  ;;  %v5402_v47 = vadd.f32 %v5401_v5, %v9951_v54  ;;  %v5475_v57 = vadd.f32 %v5474_v49, %v9883_v29  ;;  %v5403_v42 = vpop.f32.mrb[134].mxu0  ;;  %v5476_v0 = vpop.f32.mrb[150].mxu1 }
 0x59e   : > { %544 = vst.msk [vmem:[#allocation2 + $0x78] sm:$0xff] %vm528_vm4, %v7918_v50  ;;  %v5935_v60 = vmax.f32 %v5400_v34, 0.0  ;;  %v5404_v15 = vadd.f32 %v5403_v42, %v9953_v12  ;;  %v5477_v43 = vadd.f32 %v5476_v0, %v9888_v39  ;;  %v5405_v2 = vpop.f32.mrb[135].mxu0  ;;  %v5478_v38 = vpop.f32.mrb[151].mxu1 }
 0x59f   : > { %v5809_v37 = vmax.f32 %v5473_v30, 0.0  ;;  %v5936_v56 = vmax.f32 %v5402_v47, 0.0  ;;  %v5810_v23 = vmax.f32 %v5475_v57, 0.0  ;;  %v5406_v19 = vadd.f32 %v5405_v2, %v9953_v12 }
 0x5a0   : > { %v5479_v46 = vadd.f32 %v5478_v38, %v9888_v39  ;;  %v6200_v52 = vmax.f32 %v10221_v45, %v5935_v60  ;;  %v5951_v59 = vmax.f32 %v5404_v15, 0.0  ;;  %v5825_v8 = vmax.f32 %v5477_v43, 0.0 }
 0x5a1   : > { %v6066_v32 = vmax.f32 %v10223_v7, %v5809_v37  ;;  %v5952_v62 = vmax.f32 %v5406_v19, 0.0 }
 0x5a2   : > { %v5826_v41 = vmax.f32 %v5479_v46, 0.0  ;;  %v10317_v24 = vmax.f32 %v6200_v52, %v5936_v56  ;;  %v6217_v63 = vmax.f32 %v10227_v21, %v5951_v59  ;;  %v6083_v9 = vmax.f32 %v10229_v53, %v5825_v8 }
 0x5a3   : > { %v10319_v4 = vmax.f32 %v6066_v32, %v5810_v23  ;;  %v5409_v48 = vpop.f32.mrb[136].mxu0  ;;  %v5482_v50 = vpop.f32.mrb[152].mxu1 }
 0x5a4   : > { %v10323_v20 = vmax.f32 %v6217_v63, %v5952_v62  ;;  %v10325_v58 = vmax.f32 %v6083_v9, %v5826_v41  ;;  %v5410_v45 = vadd.f32 %v5409_v48, %v9975_v35  ;;  %v5483_v7 = vadd.f32 %v5482_v50, %v9899_v14  ;;  %v5411_v34 = vpop.f32.mrb[137].mxu0  ;;  %v5484_v30 = vpop.f32.mrb[153].mxu1 }
 0x5a5   : > { %v5412_v5 = vadd.f32 %v5411_v34, %v9975_v35  ;;  %v5485_v49 = vadd.f32 %v5484_v30, %v9899_v14  ;;  %v5413_v47 = vpop.f32.mrb[138].mxu0  ;;  %v5486_v21 = vpop.f32.mrb[154].mxu1 }
 0x5a6   : > { %v5967_v57 = vmax.f32 %v5410_v45, 0.0  ;;  %v5841_v53 = vmax.f32 %v5483_v7, 0.0  ;;  %v5414_v42 = vadd.f32 %v5413_v47, %v9977_v51  ;;  %v5487_v0 = vadd.f32 %v5486_v21, %v9904_v16  ;;  %v5415_v60 = vpop.f32.mrb[139].mxu0  ;;  %v5488_v37 = vpop.f32.mrb[155].mxu1 }
 0x5a7   : > { %v5968_v15 = vmax.f32 %v5412_v5, 0.0  ;;  %v5842_v43 = vmax.f32 %v5485_v49, 0.0  ;;  %v5416_v2 = vadd.f32 %v5415_v60, %v9977_v51  ;;  %v5489_v38 = vadd.f32 %v5488_v37, %v9904_v16 }
 0x5a8   : > { %v6234_v56 = vmax.f32 %v10241_v55, %v5967_v57  ;;  %v6100_v23 = vmax.f32 %v10243_v31, %v5841_v53  ;;  %v5983_v19 = vmax.f32 %v5414_v42, 0.0  ;;  %v5857_v46 = vmax.f32 %v5487_v0, 0.0 }
 0x5a9   : > { %v5984_v52 = vmax.f32 %v5416_v2, 0.0  ;;  %v5858_v32 = vmax.f32 %v5489_v38, 0.0 }
 0x5aa   : > { %v10337_v59 = vmax.f32 %v6234_v56, %v5968_v15  ;;  %v10339_v8 = vmax.f32 %v6100_v23, %v5842_v43  ;;  %v6251_v62 = vmax.f32 %v10247_v3, %v5983_v19  ;;  %v6117_v41 = vmax.f32 %v10249_v11, %v5857_v46 }
 0x5ab   : > { %v5419_v63 = vpop.f32.mrb[140].mxu0  ;;  %v5492_v9 = vpop.f32.mrb[156].mxu1 }
 0x5ac   : > { %v10343_v48 = vmax.f32 %v6251_v62, %v5984_v52  ;;  %v10345_v50 = vmax.f32 %v6117_v41, %v5858_v32  ;;  %v5420_v55 = vadd.f32 %v5419_v63, %v9999_v33  ;;  %v5493_v31 = vadd.f32 %v5492_v9, %v9915_v44  ;;  %v5421_v45 = vpop.f32.mrb[141].mxu0  ;;  %v5494_v7 = vpop.f32.mrb[157].mxu1 }
 0x5ad   : > { %v5422_v34 = vadd.f32 %v5421_v45, %v9999_v33  ;;  %v5495_v30 = vadd.f32 %v5494_v7, %v9915_v44  ;;  %v5423_v5 = vpop.f32.mrb[142].mxu0  ;;  %v5496_v3 = vpop.f32.mrb[158].mxu1 }
 0x5ae   : > { %v5999_v49 = vmax.f32 %v5420_v55, 0.0  ;;  %v5873_v11 = vmax.f32 %v5493_v31, 0.0  ;;  %v5424_v47 = vadd.f32 %v5423_v5, %v10001_v25  ;;  %v5497_v21 = vadd.f32 %v5496_v3, %v9919_v10  ;;  %v5425_v57 = vpop.f32.mrb[143].mxu0  ;;  %v5498_v53 = vpop.f32.mrb[159].mxu1 }
 0x5af   : > { %v6000_v42 = vmax.f32 %v5422_v34, 0.0  ;;  %v5874_v0 = vmax.f32 %v5495_v30, 0.0  ;;  %v5426_v60 = vadd.f32 %v5425_v57, %v10001_v25  ;;  %v5499_v37 = vadd.f32 %v5498_v53, %v9919_v10 }
 0x5b0   : > { %v6268_v15 = vmax.f32 %v10261_v18, %v5999_v49  ;;  %v6134_v43 = vmax.f32 %v10263_v28, %v5873_v11  ;;  %v6015_v2 = vmax.f32 %v5424_v47, 0.0  ;;  %v5889_v38 = vmax.f32 %v5497_v21, 0.0 }
 0x5b1   : > { %v6016_v56 = vmax.f32 %v5426_v60, 0.0  ;;  %v5890_v23 = vmax.f32 %v5499_v37, 0.0 }
 0x5b2   : > { %v10357_v19 = vmax.f32 %v6268_v15, %v6000_v42  ;;  %v10359_v46 = vmax.f32 %v6134_v43, %v5874_v0  ;;  %v6285_v52 = vmax.f32 %v10267_v26, %v6015_v2  ;;  %v6151_v32 = vmax.f32 %v10269_v61, %v5889_v38 }
 0x5b3   : > { %v5502_v62 = vpop.f32.mrb[160].mxu1  ;;  %v5575_v41 = vpop.f32.mrb[144].mxu0 }
 0x5b4   : > { %v10363_v63 = vmax.f32 %v6285_v52, %v6016_v56  ;;  %v10365_v9 = vmax.f32 %v6151_v32, %v5890_v23  ;;  %v5503_v18 = vadd.f32 %v5502_v62, %v9931_v13  ;;  %v5576_v28 = vadd.f32 %v5575_v41, %v9863_v40  ;;  %v5504_v55 = vpop.f32.mrb[161].mxu1  ;;  %v5577_v31 = vpop.f32.mrb[145].mxu0 }
 0x5b5   : > { %v5505_v45 = vadd.f32 %v5504_v55, %v9931_v13  ;;  %v5578_v7 = vadd.f32 %v5577_v31, %v9863_v40  ;;  %v5506_v34 = vpop.f32.mrb[162].mxu1  ;;  %v5579_v26 = vpop.f32.mrb[146].mxu0 }
 0x5b6   : > { %v5905_v30 = vmax.f32 %v5503_v18, 0.0  ;;  %v5779_v61 = vmax.f32 %v5576_v28, 0.0  ;;  %v5507_v5 = vadd.f32 %v5506_v34, %v9933_v6  ;;  %v5580_v3 = vadd.f32 %v5579_v26, %v9867_v36  ;;  %v5508_v49 = vpop.f32.mrb[163].mxu1  ;;  %v5581_v11 = vpop.f32.mrb[147].mxu0 }
 0x5b7   : > { %v5906_v47 = vmax.f32 %v5505_v45, 0.0  ;;  %v5780_v21 = vmax.f32 %v5578_v7, 0.0  ;;  %v5509_v57 = vadd.f32 %v5508_v49, %v9933_v6  ;;  %v5582_v53 = vadd.f32 %v5581_v11, %v9867_v36 }
 0x5b8   : > { %v6168_v42 = vmax.f32 %v10281_v17, %v5905_v30  ;;  %v6034_v0 = vmax.f32 %v10283_v1, %v5779_v61  ;;  %v5921_v60 = vmax.f32 %v5507_v5, 0.0  ;;  %v5795_v37 = vmax.f32 %v5580_v3, 0.0 }
 0x5b9   : > { %v5922_v15 = vmax.f32 %v5509_v57, 0.0  ;;  %v5796_v43 = vmax.f32 %v5582_v53, 0.0 }
 0x5ba   : > { %v10377_v2 = vmax.f32 %v6168_v42, %v5906_v47  ;;  %v10379_v38 = vmax.f32 %v6034_v0, %v5780_v21  ;;  %v6185_v56 = vmax.f32 %v10303_v22, %v5921_v60  ;;  %v6051_v23 = vmax.f32 %v10305_v27, %v5795_v37 }
 0x5bb   : > { %v5512_v52 = vpop.f32.mrb[164].mxu1  ;;  %v5585_v32 = vpop.f32.mrb[148].mxu0 }
 0x5bc   : > { %v10383_v62 = vmax.f32 %v6185_v56, %v5922_v15  ;;  %v10385_v41 = vmax.f32 %v6051_v23, %v5796_v43  ;;  %v5513_v17 = vadd.f32 %v5512_v52, %v9951_v54  ;;  %v5586_v1 = vadd.f32 %v5585_v32, %v9883_v29  ;;  %v5514_v18 = vpop.f32.mrb[165].mxu1  ;;  %v5587_v28 = vpop.f32.mrb[149].mxu0 }
 0x5bd   : > { %v5515_v55 = vadd.f32 %v5514_v18, %v9951_v54  ;;  %v5588_v31 = vadd.f32 %v5587_v28, %v9883_v29  ;;  %v5516_v45 = vpop.f32.mrb[166].mxu1  ;;  %v5589_v22 = vpop.f32.mrb[150].mxu0 }
 0x5be   : > { %v5937_v7 = vmax.f32 %v5513_v17, 0.0  ;;  %v5811_v27 = vmax.f32 %v5586_v1, 0.0  ;;  %v5517_v34 = vadd.f32 %v5516_v45, %v9953_v12  ;;  %v5590_v26 = vadd.f32 %v5589_v22, %v9888_v39  ;;  %v5518_v30 = vpop.f32.mrb[167].mxu1  ;;  %v5591_v61 = vpop.f32.mrb[151].mxu0 }
 0x5bf   : > { %v5938_v5 = vmax.f32 %v5515_v55, 0.0  ;;  %v5812_v3 = vmax.f32 %v5588_v31, 0.0  ;;  %v5519_v49 = vadd.f32 %v5518_v30, %v9953_v12  ;;  %v5592_v11 = vadd.f32 %v5591_v61, %v9888_v39 }
 0x5c0   : > { %v6202_v47 = vmax.f32 %v10317_v24, %v5937_v7  ;;  %v6068_v21 = vmax.f32 %v10319_v4, %v5811_v27  ;;  %v5953_v57 = vmax.f32 %v5517_v34, 0.0  ;;  %v5827_v53 = vmax.f32 %v5590_v26, 0.0 }
 0x5c1   : > { %v5954_v42 = vmax.f32 %v5519_v49, 0.0  ;;  %v5828_v0 = vmax.f32 %v5592_v11, 0.0 }
 0x5c2   : > { %v10397_v60 = vmax.f32 %v6202_v47, %v5938_v5  ;;  %v10399_v37 = vmax.f32 %v6068_v21, %v5812_v3  ;;  %v6219_v15 = vmax.f32 %v10323_v20, %v5953_v57  ;;  %v6085_v43 = vmax.f32 %v10325_v58, %v5827_v53 }
 0x5c3   : > { %v5522_v56 = vpop.f32.mrb[168].mxu1  ;;  %v5595_v23 = vpop.f32.mrb[152].mxu0 }
 0x5c4   : > { %v10403_v52 = vmax.f32 %v6219_v15, %v5954_v42  ;;  %v10405_v32 = vmax.f32 %v6085_v43, %v5828_v0  ;;  %v5523_v24 = vadd.f32 %v5522_v56, %v9975_v35  ;;  %v5596_v4 = vadd.f32 %v5595_v23, %v9899_v14  ;;  %v5524_v17 = vpop.f32.mrb[169].mxu1  ;;  %v5597_v1 = vpop.f32.mrb[153].mxu0 }
 0x5c5   : > { %v5525_v18 = vadd.f32 %v5524_v17, %v9975_v35  ;;  %v5598_v28 = vadd.f32 %v5597_v1, %v9899_v14  ;;  %v5526_v55 = vpop.f32.mrb[170].mxu1  ;;  %v5599_v20 = vpop.f32.mrb[154].mxu0 }
 0x5c6   : > { %v5969_v31 = vmax.f32 %v5523_v24, 0.0  ;;  %v5843_v58 = vmax.f32 %v5596_v4, 0.0  ;;  %v5527_v45 = vadd.f32 %v5526_v55, %v9977_v51  ;;  %v5600_v22 = vadd.f32 %v5599_v20, %v9904_v16  ;;  %v5528_v7 = vpop.f32.mrb[171].mxu1  ;;  %v5601_v27 = vpop.f32.mrb[155].mxu0 }
 0x5c7   : > { %v5970_v34 = vmax.f32 %v5525_v18, 0.0  ;;  %v5844_v26 = vmax.f32 %v5598_v28, 0.0  ;;  %v5529_v30 = vadd.f32 %v5528_v7, %v9977_v51  ;;  %v5602_v61 = vadd.f32 %v5601_v27, %v9904_v16 }
 0x5c8   : > { %v6236_v5 = vmax.f32 %v10337_v59, %v5969_v31  ;;  %v6102_v3 = vmax.f32 %v10339_v8, %v5843_v58  ;;  %v5985_v49 = vmax.f32 %v5527_v45, 0.0  ;;  %v5859_v11 = vmax.f32 %v5600_v22, 0.0 }
 0x5c9   : > { %v5986_v47 = vmax.f32 %v5529_v30, 0.0  ;;  %v5860_v21 = vmax.f32 %v5602_v61, 0.0 }
 0x5ca   : > { %v10417_v57 = vmax.f32 %v6236_v5, %v5970_v34  ;;  %v10419_v53 = vmax.f32 %v6102_v3, %v5844_v26  ;;  %v6253_v42 = vmax.f32 %v10343_v48, %v5985_v49  ;;  %v6119_v0 = vmax.f32 %v10345_v50, %v5859_v11 }
 0x5cb   : > { %v5532_v15 = vpop.f32.mrb[172].mxu1  ;;  %v5605_v43 = vpop.f32.mrb[156].mxu0 }
 0x5cc   : > { %v10423_v56 = vmax.f32 %v6253_v42, %v5986_v47  ;;  %v10425_v23 = vmax.f32 %v6119_v0, %v5860_v21  ;;  %v5533_v59 = vadd.f32 %v5532_v15, %v9999_v33  ;;  %v5606_v8 = vadd.f32 %v5605_v43, %v9915_v44  ;;  %v5534_v24 = vpop.f32.mrb[173].mxu1  ;;  %v5607_v4 = vpop.f32.mrb[157].mxu0 }
 0x5cd   : > { %v5535_v17 = vadd.f32 %v5534_v24, %v9999_v33  ;;  %v5608_v1 = vadd.f32 %v5607_v4, %v9915_v44  ;;  %v5536_v18 = vpop.f32.mrb[174].mxu1  ;;  %v5609_v48 = vpop.f32.mrb[158].mxu0 }
 0x5ce   : > { %v6001_v28 = vmax.f32 %v5533_v59, 0.0  ;;  %v5875_v50 = vmax.f32 %v5606_v8, 0.0  ;;  %v5537_v55 = vadd.f32 %v5536_v18, %v10001_v25  ;;  %v5610_v20 = vadd.f32 %v5609_v48, %v9919_v10  ;;  %v5538_v31 = vpop.f32.mrb[175].mxu1  ;;  %v5611_v58 = vpop.f32.mrb[159].mxu0 }
 0x5cf   : > { %v6002_v45 = vmax.f32 %v5535_v17, 0.0  ;;  %v5876_v22 = vmax.f32 %v5608_v1, 0.0  ;;  %v5539_v7 = vadd.f32 %v5538_v31, %v10001_v25  ;;  %v5612_v27 = vadd.f32 %v5611_v58, %v9919_v10 }
 0x5d0   : > { %v6270_v34 = vmax.f32 %v10357_v19, %v6001_v28  ;;  %v6136_v26 = vmax.f32 %v10359_v46, %v5875_v50  ;;  %v6017_v30 = vmax.f32 %v5537_v55, 0.0  ;;  %v5891_v61 = vmax.f32 %v5610_v20, 0.0 }
 0x5d1   : > { %v6018_v5 = vmax.f32 %v5539_v7, 0.0  ;;  %v5892_v3 = vmax.f32 %v5612_v27, 0.0 }
 0x5d2   : > { %v10437_v49 = vmax.f32 %v6270_v34, %v6002_v45  ;;  %v10439_v11 = vmax.f32 %v6136_v26, %v5876_v22  ;;  %v6287_v47 = vmax.f32 %v10363_v63, %v6017_v30  ;;  %v6153_v21 = vmax.f32 %v10365_v9, %v5891_v61 }
 0x5d3   : > { %v5615_v42 = vpop.f32.mrb[160].mxu0  ;;  %v5688_v0 = vpop.f32.mrb[176].mxu1 }
 0x5d4   : > { %v10443_v15 = vmax.f32 %v6287_v47, %v6018_v5  ;;  %v10445_v43 = vmax.f32 %v6153_v21, %v5892_v3  ;;  %v5616_v19 = vadd.f32 %v5615_v42, %v9931_v13  ;;  %v5689_v46 = vadd.f32 %v5688_v0, %v9863_v40  ;;  %v5617_v59 = vpop.f32.mrb[161].mxu0  ;;  %v5690_v8 = vpop.f32.mrb[177].mxu1 }
 0x5d5   : > { %v5618_v24 = vadd.f32 %v5617_v59, %v9931_v13  ;;  %v5691_v4 = vadd.f32 %v5690_v8, %v9863_v40  ;;  %v5619_v17 = vpop.f32.mrb[162].mxu0  ;;  %v5692_v63 = vpop.f32.mrb[178].mxu1 }
 0x5d6   : > { %v5907_v1 = vmax.f32 %v5616_v19, 0.0  ;;  %v5781_v9 = vmax.f32 %v5689_v46, 0.0  ;;  %v5620_v18 = vadd.f32 %v5619_v17, %v9933_v6  ;;  %v5693_v48 = vadd.f32 %v5692_v63, %v9867_v36  ;;  %v5621_v28 = vpop.f32.mrb[163].mxu0  ;;  %v5694_v50 = vpop.f32.mrb[179].mxu1 }
 0x5d7   : > { %v5908_v55 = vmax.f32 %v5618_v24, 0.0  ;;  %v5782_v20 = vmax.f32 %v5691_v4, 0.0  ;;  %v5622_v31 = vadd.f32 %v5621_v28, %v9933_v6  ;;  %v5695_v58 = vadd.f32 %v5694_v50, %v9867_v36 }
 0x5d8   : > { %v6170_v45 = vmax.f32 %v10377_v2, %v5907_v1  ;;  %v6036_v40 = vmax.f32 %v10379_v38, %v5781_v9  ;;  %v5923_v22 = vmax.f32 %v5620_v18, 0.0  ;;  %v5797_v7 = vmax.f32 %v5693_v48, 0.0 }
 0x5d9   : > { %v5924_v27 = vmax.f32 %v5622_v31, 0.0  ;;  %v5798_v34 = vmax.f32 %v5695_v58, 0.0 }
 0x5da   : > { %v10457_v26 = vmax.f32 %v6170_v45, %v5908_v55  ;;  %v6187_v30 = vmax.f32 %v10383_v62, %v5923_v22  ;;  %v6053_v61 = vmax.f32 %v10385_v41, %v5797_v7  ;;  %v6037_v5 = vmax.f32 %v6036_v40, %v5782_v20 }
 0x5db   : > { %v5625_v3 = vpop.f32.mrb[164].mxu0  ;;  %v5698_v47 = vpop.f32.mrb[180].mxu1 }
 0x5dc   : > { %v10461_v21 = vmax.f32 %v6187_v30, %v5924_v27  ;;  %v5626_v36 = vadd.f32 %v5625_v3, %v9951_v54  ;;  %v5699_v2 = vadd.f32 %v5698_v47, %v9883_v29  ;;  %v5627_v38 = vpop.f32.mrb[165].mxu0  ;;  %v5700_v42 = vpop.f32.mrb[181].mxu1  ;;  %6038 = vmax.xlane.f32.xlu0 %v6037_v5  ;;  %v6054_v0 = vmax.f32 %v6053_v61, %v5798_v34 }
 0x5dd   : > { %v5628_v19 = vadd.f32 %v5627_v38, %v9951_v54  ;;  %v5701_v46 = vadd.f32 %v5700_v42, %v9883_v29  ;;  %v5629_v62 = vpop.f32.mrb[166].mxu0  ;;  %v5702_v59 = vpop.f32.mrb[182].mxu1 }
 0x5de   : > { %v5939_v41 = vmax.f32 %v5626_v36, 0.0  ;;  %v5813_v8 = vmax.f32 %v5699_v2, 0.0  ;;  %v5630_v24 = vadd.f32 %v5629_v62, %v9953_v12  ;;  %v5703_v4 = vadd.f32 %v5702_v59, %v9888_v39  ;;  %v5631_v17 = vpop.f32.mrb[167].mxu0  ;;  %v5704_v63 = vpop.f32.mrb[183].mxu1  ;;  %6055 = vmax.xlane.f32.xlu1 %v6054_v0 }
 0x5df   : > { %v5940_v1 = vmax.f32 %v5628_v19, 0.0  ;;  %v5814_v9 = vmax.f32 %v5701_v46, 0.0  ;;  %v5632_v18 = vadd.f32 %v5631_v17, %v9953_v12  ;;  %v5705_v48 = vadd.f32 %v5704_v63, %v9888_v39 }
 0x5e0   : > { %v6204_v28 = vmax.f32 %v10397_v60, %v5939_v41  ;;  %v6070_v29 = vmax.f32 %v10399_v37, %v5813_v8  ;;  %v5955_v50 = vmax.f32 %v5630_v24, 0.0  ;;  %v5829_v55 = vmax.f32 %v5703_v4, 0.0 }
 0x5e1   : > { %v5956_v20 = vmax.f32 %v5632_v18, 0.0  ;;  %v5830_v31 = vmax.f32 %v5705_v48, 0.0 }
 0x5e2   : > { %v10473_v58 = vmax.f32 %v6204_v28, %v5940_v1  ;;  %v6221_v45 = vmax.f32 %v10403_v52, %v5955_v50  ;;  %v6087_v40 = vmax.f32 %v10405_v32, %v5829_v55  ;;  %v6071_v22 = vmax.f32 %v6070_v29, %v5814_v9 }
 0x5e3   : > { %v5635_v7 = vpop.f32.mrb[168].mxu0  ;;  %v5708_v27 = vpop.f32.mrb[184].mxu1 }
 0x5e4   : > { %v10477_v34 = vmax.f32 %v6221_v45, %v5956_v20  ;;  %v5636_v39 = vadd.f32 %v5635_v7, %v9975_v35  ;;  %v5709_v60 = vadd.f32 %v5708_v27, %v9899_v14  ;;  %v5637_v37 = vpop.f32.mrb[169].mxu0  ;;  %v5710_v30 = vpop.f32.mrb[185].mxu1  ;;  %6072 = vmax.xlane.f32.xlu0 %v6071_v22  ;;  %v6088_v61 = vmax.f32 %v6087_v40, %v5830_v31 }
 0x5e5   : > { %v5638_v5 = vadd.f32 %v5637_v37, %v9975_v35  ;;  %v5711_v3 = vadd.f32 %v5710_v30, %v9899_v14  ;;  %v5639_v52 = vpop.f32.mrb[170].mxu0  ;;  %v5712_v47 = vpop.f32.mrb[186].mxu1 }
 0x5e6   : > { %v5971_v32 = vmax.f32 %v5636_v39, 0.0  ;;  %v5845_v36 = vmax.f32 %v5709_v60, 0.0  ;;  %v5640_v2 = vadd.f32 %v5639_v52, %v9977_v51  ;;  %v5713_v38 = vadd.f32 %v5712_v47, %v9904_v16  ;;  %v5641_v42 = vpop.f32.mrb[171].mxu0  ;;  %v5714_v0 = vpop.f32.mrb[187].mxu1 }
 0x5e7   : > { %v5972_v19 = vmax.f32 %v5638_v5, 0.0  ;;  %v5846_v46 = vmax.f32 %v5711_v3, 0.0  ;;  %v5642_v62 = vadd.f32 %v5641_v42, %v9977_v51  ;;  %v5715_v59 = vadd.f32 %v5714_v0, %v9904_v16 }
 0x5e8   : > { %v6238_v41 = vmax.f32 %v10417_v57, %v5971_v32  ;;  %v6104_v14 = vmax.f32 %v10419_v53, %v5845_v36  ;;  %v5987_v8 = vmax.f32 %v5640_v2, 0.0  ;;  %v5861_v24 = vmax.f32 %v5713_v38, 0.0  ;;  %6089 = vmax.xlane.f32.xlu0 %v6088_v61 }
 0x5e9   : > { %v5988_v4 = vmax.f32 %v5642_v62, 0.0  ;;  %v5862_v17 = vmax.f32 %v5715_v59, 0.0 }
 0x5ea   : > { %v10489_v63 = vmax.f32 %v6238_v41, %v5972_v19  ;;  %v6255_v1 = vmax.f32 %v10423_v56, %v5987_v8  ;;  %v6121_v9 = vmax.f32 %v10425_v23, %v5861_v24  ;;  %v6105_v18 = vmax.f32 %v6104_v14, %v5846_v46 }
 0x5eb   : > { %v5645_v48 = vpop.f32.mrb[172].mxu0  ;;  %v5718_v28 = vpop.f32.mrb[188].mxu1 }
 0x5ec   : > { %v10493_v29 = vmax.f32 %v6255_v1, %v5988_v4  ;;  %v5646_v16 = vadd.f32 %v5645_v48, %v9999_v33  ;;  %v5719_v57 = vadd.f32 %v5718_v28, %v9915_v44  ;;  %v5647_v53 = vpop.f32.mrb[173].mxu0  ;;  %v5720_v50 = vpop.f32.mrb[189].mxu1  ;;  %6106 = vmax.xlane.f32.xlu1 %v6105_v18  ;;  %v6122_v55 = vmax.f32 %v6121_v9, %v5862_v17 }
 0x5ed   : > { %v5648_v20 = vadd.f32 %v5647_v53, %v9999_v33  ;;  %v5721_v31 = vadd.f32 %v5720_v50, %v9915_v44  ;;  %v5649_v56 = vpop.f32.mrb[174].mxu0  ;;  %v5722_v45 = vpop.f32.mrb[190].mxu1 }
 0x5ee   : > { %v6003_v23 = vmax.f32 %v5646_v16, 0.0  ;;  %v5877_v40 = vmax.f32 %v5719_v57, 0.0  ;;  %v5650_v22 = vadd.f32 %v5649_v56, %v10001_v25  ;;  %v5723_v7 = vadd.f32 %v5722_v45, %v9919_v10  ;;  %v5651_v27 = vpop.f32.mrb[175].mxu0  ;;  %v5724_v39 = vpop.f32.mrb[191].mxu1  ;;  %6123 = vmax.xlane.f32.xlu0 %v6122_v55 }
 0x5ef   : > { %v6004_v60 = vmax.f32 %v5648_v20, 0.0  ;;  %v5878_v37 = vmax.f32 %v5721_v31, 0.0  ;;  %v5652_v30 = vadd.f32 %v5651_v27, %v10001_v25  ;;  %v5725_v61 = vadd.f32 %v5724_v39, %v9919_v10 }
 0x5f0   : > { %v6272_v5 = vmax.f32 %v10437_v49, %v6003_v23  ;;  %v6138_v44 = vmax.f32 %v10439_v11, %v5877_v40  ;;  %v6019_v3 = vmax.f32 %v5650_v22, 0.0  ;;  %v5893_v52 = vmax.f32 %v5723_v7, 0.0 }
 0x5f1   : > { %v6020_v47 = vmax.f32 %v5652_v30, 0.0  ;;  %v5894_v32 = vmax.f32 %v5725_v61, 0.0 }
 0x5f2   : > { %v10505_v36 = vmax.f32 %v6272_v5, %v6004_v60  ;;  %v6289_v2 = vmax.f32 %v10443_v15, %v6019_v3  ;;  %v6155_v38 = vmax.f32 %v10445_v43, %v5893_v52  ;;  %v6139_v42 = vmax.f32 %v6138_v44, %v5878_v37 }
 0x5f3   : > { %v5728_v0 = vpop.f32.mrb[192].mxu1 }
 0x5f4   : > { %v10509_v19 = vmax.f32 %v6289_v2, %v6020_v47  ;;  %v5729_v10 = vadd.f32 %v5728_v0, %v9931_v13  ;;  %v5730_v46 = vpop.f32.mrb[193].mxu1  ;;  %6140 = vmax.xlane.f32.xlu1 %v6139_v42  ;;  %v6156_v49 = vmax.f32 %v6155_v38, %v5894_v32 }
 0x5f5   : > { %v5731_v11 = vadd.f32 %v5730_v46, %v9931_v13  ;;  %v5732_v62 = vpop.f32.mrb[194].mxu1 }
 0x5f6   : > { %v5909_v59 = vmax.f32 %v5729_v10, 0.0  ;;  %v5733_v41 = vadd.f32 %v5732_v62, %v9933_v6  ;;  %v5734_v14 = vpop.f32.mrb[195].mxu1  ;;  %6157 = vmax.xlane.f32.xlu0 %v6156_v49  ;;  %v6295_v62 = vld [vmem:[#allocation2] sm:$0xff] }
 0x5f7   : > { %v5910_v15 = vmax.f32 %v5731_v11, 0.0  ;;  %v5735_v43 = vadd.f32 %v5734_v14, %v9933_v6 }
 0x5f8   : > { %v6172_v8 = vmax.f32 %v10457_v26, %v5909_v59  ;;  %v5925_v24 = vmax.f32 %v5733_v41, 0.0  ;;  %v6296_v41 = vld [vmem:[#allocation2 + $0x8] sm:$0xff] }
 0x5f9   : > { %v5926_v4 = vmax.f32 %v5735_v43, 0.0 }
 0x5fa   : > { %v6189_v17 = vmax.f32 %v10461_v21, %v5925_v24  ;;  %v6173_v1 = vmax.f32 %v6172_v8, %v5910_v15  ;;  %v6298_v8 = vld [vmem:[#allocation2 + $0x18] sm:$0xff] }
 0x5fb   : > { %v5738_v9 = vpop.f32.mrb[196].mxu1 }
 0x5fc   : > { %v5739_v18 = vadd.f32 %v5738_v9, %v9951_v54  ;;  %v5740_v13 = vpop.f32.mrb[197].mxu1  ;;  %6174 = vmax.xlane.f32.xlu1 %v6173_v1  ;;  %v6190_v48 = vmax.f32 %v6189_v17, %v5926_v4 }
 0x5fd   : > { %v5741_v28 = vadd.f32 %v5740_v13, %v9951_v54  ;;  %v5742_v16 = vpop.f32.mrb[198].mxu1 }
 0x5fe   : > { %v5941_v57 = vmax.f32 %v5739_v18, 0.0  ;;  %v5743_v53 = vadd.f32 %v5742_v16, %v9953_v12  ;;  %v5744_v6 = vpop.f32.mrb[199].mxu1  ;;  %6191 = vmax.xlane.f32.xlu0 %v6190_v48  ;;  %v6299_v18 = vld [vmem:[#allocation2 + $0x20] sm:$0xff]  ;;  %v6300_v48 = vld [vmem:[#allocation2 + $0x28] sm:$0xff] }
 0x5ff   : > { %v5942_v26 = vmax.f32 %v5741_v28, 0.0  ;;  %v5745_v50 = vadd.f32 %v5744_v6, %v9953_v12 }
 0x600   : > { %v6206_v21 = vmax.f32 %v10473_v58, %v5941_v57  ;;  %v5957_v55 = vmax.f32 %v5743_v53, 0.0  ;;  %v6301_v53 = vld [vmem:[#allocation2 + $0x30] sm:$0xff] }
 0x601   : > { %v5958_v20 = vmax.f32 %v5745_v50, 0.0 }
 0x602   : > { %v6223_v31 = vmax.f32 %v10477_v34, %v5957_v55  ;;  %v6207_v56 = vmax.f32 %v6206_v21, %v5942_v26  ;;  %v6302_v55 = vld [vmem:[#allocation2 + $0x38] sm:$0xff] }
 0x603   : > { %v5748_v45 = vpop.f32.mrb[200].mxu1 }
 0x604   : > { %v5749_v23 = vadd.f32 %v5748_v45, %v9975_v35  ;;  %v5750_v54 = vpop.f32.mrb[201].mxu1  ;;  %6208 = vmax.xlane.f32.xlu1 %v6207_v56  ;;  %v6224_v40 = vmax.f32 %v6223_v31, %v5958_v20 }
 0x605   : > { %v5751_v22 = vadd.f32 %v5750_v54, %v9975_v35  ;;  %v5752_v7 = vpop.f32.mrb[202].mxu1 }
 0x606   : > { %v5973_v27 = vmax.f32 %v5749_v23, 0.0  ;;  %v5753_v39 = vadd.f32 %v5752_v7, %v9977_v51  ;;  %v5754_v12 = vpop.f32.mrb[203].mxu1  ;;  %6225 = vmax.xlane.f32.xlu0 %v6224_v40  ;;  %v6303_v40 = vld [vmem:[#allocation2 + $0x40] sm:$0xff]  ;;  %v6304_v7 = vld [vmem:[#allocation2 + $0x48] sm:$0xff] }
 0x607   : > { %v5974_v58 = vmax.f32 %v5751_v22, 0.0  ;;  %v5755_v60 = vadd.f32 %v5754_v12, %v9977_v51 }
 0x608   : > { %v6240_v34 = vmax.f32 %v10489_v63, %v5973_v27  ;;  %v5989_v37 = vmax.f32 %v5753_v39, 0.0 }
 0x609   : > { %v5990_v30 = vmax.f32 %v5755_v60, 0.0 }
 0x60a   : > { %v6257_v61 = vmax.f32 %v10493_v29, %v5989_v37  ;;  %v6241_v5 = vmax.f32 %v6240_v34, %v5974_v58  ;;  %v6305_v37 = vld [vmem:[#allocation2 + $0x50] sm:$0xff] }
 0x60b   : > { %v5758_v44 = vpop.f32.mrb[204].mxu1 }
 0x60c   : > { %v5759_v3 = vadd.f32 %v5758_v44, %v9999_v33  ;;  %v5760_v35 = vpop.f32.mrb[205].mxu1  ;;  %6242 = vmax.xlane.f32.xlu1 %v6241_v5  ;;  %v6258_v52 = vmax.f32 %v6257_v61, %v5990_v30  ;;  %v6306_v61 = vld [vmem:[#allocation2 + $0x58] sm:$0xff] }
 0x60d   : > { %v5761_v47 = vadd.f32 %v5760_v35, %v9999_v33  ;;  %v5762_v32 = vpop.f32.mrb[206].mxu1  ;;  %v7828_v33 = vld [vmem:[%s10961_s11] sm:$0xff]  }
 0x60e   : > { %v6005_v2 = vmax.f32 %v5759_v3, 0.0  ;;  %v5763_v38 = vadd.f32 %v5762_v32, %v10001_v25  ;;  %v5764_v51 = vpop.f32.mrb[207].mxu1  ;;  %6259 = vmax.xlane.f32.xlu0 %v6258_v52  ;;  %7698 = vmatprep.mubr.bf16.mxu0 %v7828_v33  ;;  %v6307_v32 = vld [vmem:[#allocation2 + $0x60] sm:$0xff] }
 0x60f   : > { %v6006_v63 = vmax.f32 %v5761_v47, 0.0  ;;  %v5765_v42 = vadd.f32 %v5764_v51, %v10001_v25 }
 0x610   : > { %v6274_v29 = vmax.f32 %v10505_v36, %v6005_v2  ;;  %v6021_v0 = vmax.f32 %v5763_v38, 0.0  ;;  %v6308_v38 = vld [vmem:[#allocation2 + $0x68] sm:$0xff] }
 0x611   : > { %v6022_v10 = vmax.f32 %v5765_v42, 0.0 }
 0x612   : > { %v6291_v46 = vmax.f32 %v10509_v19, %v6021_v0  ;;  %v6275_v49 = vmax.f32 %v6274_v29, %v6006_v63  ;;  %v6297_v19 = vld [vmem:[#allocation2 + $0x10] sm:$0xff] }
 0x614   : > { %6276 = vmax.xlane.f32.xlu1 %v6275_v49  ;;  %v6292_v11 = vmax.f32 %v6291_v46, %v6022_v10  ;;  %v6309_v46 = vld [vmem:[#allocation2 + $0x70] sm:$0xff] }
 0x616   : > { %6293 = vmax.xlane.f32.xlu0 %v6292_v11  ;;  %v6310_v11 = vld [vmem:[#allocation2 + $0x78] sm:$0xff] }
 0x669   : > { %v6039_v59 = vpop.xlane.xlu0 %6038 }
 0x66a   : > { %v6311_v14 = vmax.f32 %v6295_v62, %v6039_v59 }
 0x66b   : > { %v6056_v25 = vpop.xlane.xlu1 %6055 }
 0x66c   : > { %6328 = vst.msk [vmem:[#allocation2] sm:$0xff] %vm528_vm4, %v6311_v14  ;;  %v6312_v36 = vmax.f32 %v6296_v41, %v6056_v25 }
 0x66e   : > { %6329 = vst.msk [vmem:[#allocation2 + $0x8] sm:$0xff] %vm528_vm4, %v6312_v36 }
 0x671   : > { %v6073_v15 = vpop.xlane.xlu0 %6072 }
 0x672   : > { %v6313_v43 = vmax.f32 %v6297_v19, %v6073_v15 }
 0x673   : > { %v6347_v4 = vld [vmem:[#allocation2] sm:$0xff] }
 0x674   : > { %6330 = vst.msk [vmem:[#allocation2 + $0x10] sm:$0xff] %vm528_vm4, %v6313_v43  ;;  %v7829_v43 = vld [vmem:[%s10961_s11 + $0x8] sm:$0xff]  }
 0x675   : > { %v6090_v24 = vpop.xlane.xlu0 %6089  ;;  %v6348_v17 = vld [vmem:[#allocation2 + $0x8] sm:$0xff] }
 0x676   : > { %v6314_v1 = vmax.f32 %v6298_v8, %v6090_v24  ;;  %v6363_v9 = vpack.c.bf16 %v6348_v17, %v6347_v4  ;;  %v7830_v8 = vld [vmem:[%s10961_s11 + $0x10] sm:$0xff]   ;;  %v7831_v24 = vld [vmem:[%s10961_s11 + $0x18] sm:$0xff]   ;;  %v7832_v4 = vld [vmem:[%s10961_s11 + $0x20] sm:$0xff]  }
 0x677   : > { %v7833_v17 = vld [vmem:[%s10961_s11 + $0x28] sm:$0xff]  }
 0x678   : > { %6331 = vst.msk [vmem:[#allocation2 + $0x18] sm:$0xff] %vm528_vm4, %v6314_v1  ;;  %7682 = vmatprep.subr.bf16.mxu0 %v6363_v9  ;;  %v7834_v1 = vld [vmem:[%s10961_s11 + $0x30] sm:$0xff]  }
 0x679   : > { %v6107_v13 = vpop.xlane.xlu1 %6106  ;;  %7683 = vmatpush3.bf16.msra.mxu0 %v6363_v9  ;;  %v7835_v9 = vld [vmem:[%s10961_s11 + $0x38] sm:$0xff]  }
 0x67a   : > { %v6315_v28 = vmax.f32 %v6299_v18, %v6107_v13  ;;  %v7836_v18 = vld [vmem:[%s10961_s11 + $0x40] sm:$0xff]   ;;  %v7837_v13 = vld [vmem:[%s10961_s11 + $0x48] sm:$0xff]  }
 0x67b   : > { %v6124_v16 = vpop.xlane.xlu0 %6123  ;;  %v6349_v6 = vld [vmem:[#allocation2 + $0x10] sm:$0xff] }
 0x67c   : > { %6332 = vst.msk [vmem:[#allocation2 + $0x20] sm:$0xff] %vm528_vm4, %v6315_v28  ;;  %v6316_v57 = vmax.f32 %v6300_v48, %v6124_v16  ;;  %v7838_v48 = vld [vmem:[%s10961_s11 + $0x50] sm:$0xff]   ;;  %v7839_v28 = vld [vmem:[%s10961_s11 + $0x58] sm:$0xff]   ;;  %v7840_v16 = vld [vmem:[%s10961_s11 + $0x60] sm:$0xff]  }
 0x67e   : > { %6333 = vst.msk [vmem:[#allocation2 + $0x28] sm:$0xff] %vm528_vm4, %v6316_v57  ;;  %v7841_v57 = vld [vmem:[%s10961_s11 + $0x68] sm:$0xff]  }
 0x67f   : > { %v6350_v26 = vld [vmem:[#allocation2 + $0x18] sm:$0xff] }
 0x680   : > { %v6364_v50 = vpack.c.bf16 %v6350_v26, %v6349_v6  ;;  %v7843_v6 = vld [vmem:[%s10961_s11 + $0x78] sm:$0xff]   ;;  %v7844_v26 = vld [vmem:[%s10961_s11 + $0x80] sm:$0xff]  }
 0x681   : > { %v6141_v21 = vpop.xlane.xlu1 %6140 }
 0x682   : > { %v6317_v20 = vmax.f32 %v6301_v53, %v6141_v21  ;;  %7684 = vmatprep.subr.bf16.mxu0 %v6364_v50  ;;  %v7842_v53 = vld [vmem:[%s10961_s11 + $0x70] sm:$0xff]  }
 0x683   : > { %7685 = vmatpush3.bf16.msra.mxu0 %v6364_v50  ;;  %v6158_v31 = vpop.xlane.xlu0 %6157  ;;  %v6351_v45 = vld [vmem:[#allocation2 + $0x20] sm:$0xff]  ;;  %v7845_v50 = vld [vmem:[%s10961_s11 + $0x88] sm:$0xff]   ;;  %v7846_v21 = vld [vmem:[%s10961_s11 + $0x90] sm:$0xff]  }
 0x684   : > { %6334 = vst.msk [vmem:[#allocation2 + $0x30] sm:$0xff] %vm528_vm4, %v6317_v20  ;;  %v6318_v56 = vmax.f32 %v6302_v55, %v6158_v31  ;;  %v7847_v55 = vld [vmem:[%s10961_s11 + $0x98] sm:$0xff]   ;;  %v7848_v20 = vld [vmem:[%s10961_s11 + $0xa0] sm:$0xff]   ;;  %v7849_v31 = vld [vmem:[%s10961_s11 + $0xa8] sm:$0xff]  }
 0x685   : > { %v6352_v23 = vld [vmem:[#allocation2 + $0x28] sm:$0xff] }
 0x686   : > { %6335 = vst.msk [vmem:[#allocation2 + $0x38] sm:$0xff] %vm528_vm4, %v6318_v56  ;;  %v6365_v54 = vpack.c.bf16 %v6352_v23, %v6351_v45  ;;  %v7850_v56 = vld [vmem:[%s10961_s11 + $0xb0] sm:$0xff]   ;;  %v7851_v45 = vld [vmem:[%s10961_s11 + $0xb8] sm:$0xff]   ;;  %v7852_v23 = vld [vmem:[%s10961_s11 + $0xc0] sm:$0xff]  }
 0x688   : > { %7686 = vmatprep.subr.bf16.mxu0 %v6365_v54 }
 0x689   : > { %v6175_v22 = vpop.xlane.xlu1 %6174  ;;  %7687 = vmatpush3.bf16.msra.mxu0 %v6365_v54  ;;  %v7853_v54 = vld [vmem:[%s10961_s11 + $0xc8] sm:$0xff]  }
 0x68a   : > { %v6319_v27 = vmax.f32 %v6303_v40, %v6175_v22  ;;  %v7854_v40 = vld [vmem:[%s10961_s11 + $0xd0] sm:$0xff]   ;;  %v7855_v22 = vld [vmem:[%s10961_s11 + $0xd8] sm:$0xff]  }
 0x68b   : > { %v6192_v39 = vpop.xlane.xlu0 %6191  ;;  %v6353_v58 = vld [vmem:[#allocation2 + $0x30] sm:$0xff] }
 0x68c   : > { %6336 = vst.msk [vmem:[#allocation2 + $0x40] sm:$0xff] %vm528_vm4, %v6319_v27  ;;  %v6320_v12 = vmax.f32 %v6304_v7, %v6192_v39  ;;  %v7856_v7 = vld [vmem:[%s10961_s11 + $0xe0] sm:$0xff]   ;;  %v7857_v27 = vld [vmem:[%s10961_s11 + $0xe8] sm:$0xff]   ;;  %v7858_v39 = vld [vmem:[%s10961_s11 + $0xf0] sm:$0xff]  }
 0x68d   : > { %v6354_v60 = vld [vmem:[#allocation2 + $0x38] sm:$0xff] }
 0x68e   : > { %6337 = vst.msk [vmem:[#allocation2 + $0x48] sm:$0xff] %vm528_vm4, %v6320_v12  ;;  %v6366_v34 = vpack.c.bf16 %v6354_v60, %v6353_v58  ;;  %v7859_v12 = vld [vmem:[%s10961_s11 + $0xf8] sm:$0xff]   ;;  %v7862_v58 = vld [vmem:[%s10963_s13 + $0x4] ss:$16 sps:$4 sm:$0xff]  }
 0x68f   : > { %7177 = vmatprep.mubr.bf16.mxu1 %v7862_v58  ;;  %v6437_v60 = vld [vmem:[%s10962_s12 + $0x10] sm:$0xff] }
 0x690   : > { %7688 = vmatprep.subr.bf16.mxu0 %v6366_v34 }
 0x691   : > { %v6209_v30 = vpop.xlane.xlu1 %6208  ;;  %7689 = vmatpush3.bf16.msra.mxu0 %v6366_v34  ;;  %v6435_v34 = vld [vmem:[%s10962_s12] sm:$0xff] }
 0x692   : > { %v6321_v5 = vmax.f32 %v6305_v37, %v6209_v30  ;;  %v6438_v30 = vld [vmem:[%s10962_s12 + $0x18] sm:$0xff] }
 0x693   : > { %v6226_v44 = vpop.xlane.xlu0 %6225  ;;  %v6355_v35 = vld [vmem:[#allocation2 + $0x40] sm:$0xff] }
 0x694   : > { %6338 = vst.msk [vmem:[#allocation2 + $0x50] sm:$0xff] %vm528_vm4, %v6321_v5  ;;  %v6322_v3 = vmax.f32 %v6306_v61, %v6226_v44  ;;  %v6436_v44 = vld [vmem:[%s10962_s12 + $0x8] sm:$0xff] }
 0x695   : > { %v6356_v52 = vld [vmem:[#allocation2 + $0x48] sm:$0xff] }
 0x696   : > { %6339 = vst.msk [vmem:[#allocation2 + $0x58] sm:$0xff] %vm528_vm4, %v6322_v3  ;;  %v6367_v47 = vpack.c.bf16 %v6356_v52, %v6355_v35 }
 0x698   : > { %7690 = vmatprep.subr.bf16.mxu0 %v6367_v47 }
 0x699   : > { %v6243_v2 = vpop.xlane.xlu1 %6242  ;;  %7691 = vmatpush3.bf16.msra.mxu0 %v6367_v47 }
 0x69a   : > { %v6323_v51 = vmax.f32 %v6307_v32, %v6243_v2 }
 0x69b   : > { %v6260_v63 = vpop.xlane.xlu0 %6259  ;;  %v6357_v29 = vld [vmem:[#allocation2 + $0x50] sm:$0xff] }
 0x69c   : > { %6340 = vst.msk [vmem:[#allocation2 + $0x60] sm:$0xff] %vm528_vm4, %v6323_v51  ;;  %v6324_v42 = vmax.f32 %v6308_v38, %v6260_v63 }
 0x69d   : > { %v6358_v0 = vld [vmem:[#allocation2 + $0x58] sm:$0xff] }
 0x69e   : > { %6341 = vst.msk [vmem:[#allocation2 + $0x68] sm:$0xff] %vm528_vm4, %v6324_v42  ;;  %v6368_v10 = vpack.c.bf16 %v6358_v0, %v6357_v29  ;;  %v6441_v42 = vld [vmem:[%s10962_s12 + $0x30] sm:$0xff]  ;;  %v6439_v0 = vld [vmem:[%s10962_s12 + $0x20] sm:$0xff] }
 0x6a0   : > { %7692 = vmatprep.subr.bf16.mxu0 %v6368_v10 }
 0x6a1   : > { %v6277_v49 = vpop.xlane.xlu1 %6276  ;;  %7693 = vmatpush3.bf16.msra.mxu0 %v6368_v10 }
 0x6a2   : > { %v6325_v33 = vmax.f32 %v6309_v46, %v6277_v49  ;;  %v6442_v49 = vld [vmem:[%s10962_s12 + $0x38] sm:$0xff] }
 0x6a3   : > { %v6294_v62 = vpop.xlane.xlu0 %6293  ;;  %v6359_v41 = vld [vmem:[#allocation2 + $0x60] sm:$0xff] }
 0x6a4   : > { %6342 = vst.msk [vmem:[#allocation2 + $0x70] sm:$0xff] %vm528_vm4, %v6325_v33  ;;  %v6326_v59 = vmax.f32 %v6310_v11, %v6294_v62  ;;  %v6440_v62 = vld [vmem:[%s10962_s12 + $0x28] sm:$0xff] }
 0x6a5   : > { %v6360_v14 = vld [vmem:[#allocation2 + $0x68] sm:$0xff] }
 0x6a6   : > { %6343 = vst.msk [vmem:[#allocation2 + $0x78] sm:$0xff] %vm528_vm4, %v6326_v59  ;;  %v6369_v25 = vpack.c.bf16 %v6360_v14, %v6359_v41 }
 0x6a8   : > { %7694 = vmatprep.subr.bf16.mxu0 %v6369_v25 }
 0x6a9   : > { %7695 = vmatpush3.bf16.msra.mxu0 %v6369_v25 }
 0x6ab   : > { %v6361_v36 = vld [vmem:[#allocation2 + $0x70] sm:$0xff] }
 0x6ad   : > { %v6362_v19 = vld [vmem:[#allocation2 + $0x78] sm:$0xff] }
 0x6ae   : > { %v6370_v15 = vpack.c.bf16 %v6362_v19, %v6361_v36 }
 0x6b0   : > { %7696 = vmatprep.subr.bf16.mxu0 %v6370_v15 }
 0x6b1   : > { %7697 = vmatpush3.bf16.msra.mxu0 %v6370_v15 }
 0x6b4   : > { %7699 = vmatmul.mubr.bf16.vlgmr.msra.gmra.mrb[176].mxu0 %v7829_v43 }
 0x6b5   : > { %7702 = vmatprep.mubr.bf16.mxu0 %v7830_v8 }
 0x6bc   : > { %7703 = vmatmul.mubr.bf16.gmra.mrb[180].mxu0 %v7831_v24  ;;  %v6445_v24 = vld [vmem:[%s10962_s12 + $0x50] sm:$0xff] }
 0x6bd   : > { %7706 = vmatprep.mubr.bf16.mxu0 %v7832_v4 }
 0x6c4   : > { %7707 = vmatmul.mubr.bf16.gmra.mrb[184].mxu0 %v7833_v17  ;;  %v6443_v17 = vld [vmem:[%s10962_s12 + $0x40] sm:$0xff] }
 0x6c5   : > { %7710 = vmatprep.mubr.bf16.mxu0 %v7834_v1 }
 0x6cc   : > { %7711 = vmatmul.mubr.bf16.gmra.mrb[188].mxu0 %v7835_v9 }
 0x6cd   : > { %7714 = vmatprep.mubr.bf16.mxu0 %v7836_v18  ;;  %v6446_v18 = vld [vmem:[%s10962_s12 + $0x58] sm:$0xff] }
 0x6d4   : > { %7715 = vmatmul.mubr.bf16.gmra.mrb[192].mxu0 %v7837_v13 }
 0x6d5   : > { %7718 = vmatprep.mubr.bf16.mxu0 %v7838_v48 }
 0x6dc   : > { %7719 = vmatmul.mubr.bf16.gmra.mrb[196].mxu0 %v7839_v28  ;;  %v6444_v28 = vld [vmem:[%s10962_s12 + $0x48] sm:$0xff] }
 0x6dd   : > { %7722 = vmatprep.mubr.bf16.mxu0 %v7840_v16 }
 0x6e4   : > { %7723 = vmatmul.mubr.bf16.gmra.mrb[200].mxu0 %v7841_v57 }
 0x6e5   : > { %7726 = vmatprep.mubr.bf16.mxu0 %v7842_v53 }
 0x6ec   : > { %7727 = vmatmul.mubr.bf16.gmra.mrb[204].mxu0 %v7843_v6 }
 0x6ed   : > { %7730 = vmatprep.mubr.bf16.mxu0 %v7844_v26 }
 0x6f4   : > { %7731 = vmatmul.mubr.bf16.gmra.mrb[208].mxu0 %v7845_v50 }
 0x6f5   : > { %7734 = vmatprep.mubr.bf16.mxu0 %v7846_v21 }
 0x6fc   : > { %7735 = vmatmul.mubr.bf16.gmra.mrb[212].mxu0 %v7847_v55 }
 0x6fd   : > { %7738 = vmatprep.mubr.bf16.mxu0 %v7848_v20 }
 0x704   : > { %7739 = vmatmul.mubr.bf16.gmra.mrb[216].mxu0 %v7849_v31  ;;  %v6449_v31 = vld [vmem:[%s10962_s12 + $0x70] sm:$0xff] }
 0x705   : > { %7742 = vmatprep.mubr.bf16.mxu0 %v7850_v56 }
 0x70c   : > { %7743 = vmatmul.mubr.bf16.gmra.mrb[220].mxu0 %v7851_v45  ;;  %v6447_v45 = vld [vmem:[%s10962_s12 + $0x60] sm:$0xff] }
 0x70d   : > { %7746 = vmatprep.mubr.bf16.mxu0 %v7852_v23 }
 0x714   : > { %7747 = vmatmul.mubr.bf16.gmra.mrb[224].mxu0 %v7853_v54 }
 0x715   : > { %7750 = vmatprep.mubr.bf16.mxu0 %v7854_v40  ;;  %v6450_v40 = vld [vmem:[%s10962_s12 + $0x78] sm:$0xff] }
 0x71c   : > { %7751 = vmatmul.mubr.bf16.gmra.mrb[228].mxu0 %v7855_v22 }
 0x71d   : > { %7754 = vmatprep.mubr.bf16.mxu0 %v7856_v7 }
 0x724   : > { %7755 = vmatmul.mubr.bf16.gmra.mrb[232].mxu0 %v7857_v27  ;;  %v6448_v27 = vld [vmem:[%s10962_s12 + $0x68] sm:$0xff] }
 0x725   : > { %7758 = vmatprep.mubr.bf16.mxu0 %v7858_v39 }
 0x72c   : > { %7759 = vmatmul.mubr.bf16.gmra.mrb[236].mxu0 %v7859_v12 }
 0x787   : > { %v7700_v37 = vpop.f32.mrb[176].mxu0 }
 0x788   : > { %v6734_v61 = vadd.f32 %v7700_v37, %v6437_v60  ;;  %v6725_v5 = vpop.f32.mrb[177].mxu0 }
 0x789   : > { %v6726_v3 = vadd.f32 %v6725_v5, %v6435_v34  ;;  %v7701_v35 = vpop.f32.mrb[178].mxu0 }
 0x78a   : > { %v6737_v52 = vadd.f32 %v7701_v35, %v6438_v30  ;;  %v6728_v47 = vpop.f32.mrb[179].mxu0  ;;  %v6982_v2 = vmax.f32 %v6734_v61, 0.0  ;;  %v6451_v35 = vld [vmem:[%s10962_s12 + $0x80] sm:$0xff] }
 0x78b   : > { %v6729_v32 = vadd.f32 %v6728_v47, %v6436_v44  ;;  %v6980_v51 = vmax.f32 %v6726_v3, 0.0  ;;  %v6453_v44 = vld [vmem:[%s10962_s12 + $0x90] sm:$0xff] }
 0x78c   : > { %v6983_v38 = vmax.f32 %v6737_v52, 0.0 }
 0x78d   : > { %v6981_v63 = vmax.f32 %v6729_v32, 0.0  ;;  %v6454_v32 = vld [vmem:[%s10962_s12 + $0x98] sm:$0xff] }
 0x78e   : > { %v10665_v29 = vpack.c.bf16 %v6983_v38, %v6982_v2 }
 0x78f   : > { %v10670_v10 = vpack.c.bf16 %v6981_v63, %v6980_v51  ;;  %v7704_v46 = vpop.f32.mrb[180].mxu0  ;;  %v6452_v51 = vld [vmem:[%s10962_s12 + $0x88] sm:$0xff] }
 0x790   : > { %v6750_v11 = vadd.f32 %v7704_v46, %v6441_v42  ;;  %v6741_v33 = vpop.f32.mrb[181].mxu0 }
 0x791   : > { %v6742_v59 = vadd.f32 %v6741_v33, %v6439_v0  ;;  %v7705_v41 = vpop.f32.mrb[182].mxu0 }
 0x792   : > { %v6753_v14 = vadd.f32 %v7705_v41, %v6442_v49  ;;  %v6744_v25 = vpop.f32.mrb[183].mxu0  ;;  %v6986_v19 = vmax.f32 %v6750_v11, 0.0  ;;  %v6457_v41 = vld [vmem:[%s10962_s12 + $0xb0] sm:$0xff] }
 0x793   : > { %v6745_v36 = vadd.f32 %v6744_v25, %v6440_v62  ;;  %v6984_v43 = vmax.f32 %v6742_v59, 0.0  ;;  %v6455_v25 = vld [vmem:[%s10962_s12 + $0xa0] sm:$0xff] }
 0x794   : > { %v6987_v15 = vmax.f32 %v6753_v14, 0.0 }
 0x795   : > { %v6985_v8 = vmax.f32 %v6745_v36, 0.0 }
 0x796   : > { %v10681_v4 = vpack.c.bf16 %v6987_v15, %v6986_v19  ;;  %v6458_v15 = vld [vmem:[%s10962_s12 + $0xb8] sm:$0xff] }
 0x797   : > { %v10686_v1 = vpack.c.bf16 %v6985_v8, %v6984_v43  ;;  %v7708_v9 = vpop.f32.mrb[184].mxu0 }
 0x798   : > { %v6766_v13 = vadd.f32 %v7708_v9, %v6445_v24  ;;  %v6757_v48 = vpop.f32.mrb[185].mxu0  ;;  %v6456_v24 = vld [vmem:[%s10962_s12 + $0xa8] sm:$0xff] }
 0x799   : > { %v6758_v16 = vadd.f32 %v6757_v48, %v6443_v17  ;;  %v7709_v57 = vpop.f32.mrb[186].mxu0 }
 0x79a   : > { %v6769_v53 = vadd.f32 %v7709_v57, %v6446_v18  ;;  %v6760_v6 = vpop.f32.mrb[187].mxu0  ;;  %v6990_v50 = vmax.f32 %v6766_v13, 0.0 }
 0x79b   : > { %v6761_v26 = vadd.f32 %v6760_v6, %v6444_v28  ;;  %v6988_v55 = vmax.f32 %v6758_v16, 0.0  ;;  %v6461_v6 = vld [vmem:[%s10962_s12 + $0xd0] sm:$0xff] }
 0x79c   : > { %v6991_v21 = vmax.f32 %v6769_v53, 0.0 }
 0x79d   : > { %v6989_v20 = vmax.f32 %v6761_v26, 0.0 }
 0x79e   : > { %v10697_v56 = vpack.c.bf16 %v6991_v21, %v6990_v50  ;;  %v6459_v50 = vld [vmem:[%s10962_s12 + $0xc0] sm:$0xff] }
 0x79f   : > { %v10702_v23 = vpack.c.bf16 %v6989_v20, %v6988_v55  ;;  %v7712_v54 = vpop.f32.mrb[188].mxu0 }
 0x7a0   : > { %v6782_v22 = vadd.f32 %v7712_v54, %v6449_v31  ;;  %v6773_v7 = vpop.f32.mrb[189].mxu0 }
 0x7a1   : > { %v6774_v39 = vadd.f32 %v6773_v7, %v6447_v45  ;;  %v7713_v12 = vpop.f32.mrb[190].mxu0  ;;  %v6460_v45 = vld [vmem:[%s10962_s12 + $0xc8] sm:$0xff] }
 0x7a2   : > { %v6785_v58 = vadd.f32 %v7713_v12, %v6450_v40  ;;  %v6776_v60 = vpop.f32.mrb[191].mxu0  ;;  %v6994_v37 = vmax.f32 %v6782_v22, 0.0 }
 0x7a3   : > { %v6777_v34 = vadd.f32 %v6776_v60, %v6448_v27  ;;  %v6992_v61 = vmax.f32 %v6774_v39, 0.0  ;;  %v6465_v60 = vld [vmem:[%s10962_s12 + $0xf0] sm:$0xff] }
 0x7a4   : > { %v6995_v30 = vmax.f32 %v6785_v58, 0.0 }
 0x7a5   : > { %v6993_v5 = vmax.f32 %v6777_v34, 0.0 }
 0x7a6   : > { %v10713_v3 = vpack.c.bf16 %v6995_v30, %v6994_v37  ;;  %v6463_v37 = vld [vmem:[%s10962_s12 + $0xe0] sm:$0xff] }
 0x7a7   : > { %v10718_v52 = vpack.c.bf16 %v6993_v5, %v6992_v61  ;;  %v7716_v47 = vpop.f32.mrb[192].mxu0 }
 0x7a8   : > { %v6798_v2 = vadd.f32 %v7716_v47, %v6453_v44  ;;  %v6789_v38 = vpop.f32.mrb[193].mxu0 }
 0x7a9   : > { %v6790_v63 = vadd.f32 %v6789_v38, %v6451_v35  ;;  %v7717_v42 = vpop.f32.mrb[194].mxu0  ;;  %v6464_v35 = vld [vmem:[%s10962_s12 + $0xe8] sm:$0xff] }
 0x7aa   : > { %v6801_v0 = vadd.f32 %v7717_v42, %v6454_v32  ;;  %v6792_v46 = vpop.f32.mrb[195].mxu0  ;;  %v6998_v11 = vmax.f32 %v6798_v2, 0.0 }
 0x7ab   : > { %v6793_v49 = vadd.f32 %v6792_v46, %v6452_v51  ;;  %v6996_v62 = vmax.f32 %v6790_v63, 0.0  ;;  %v6469_v46 = vld [vmem:[%s10962_s12 + $0x110] sm:$0xff] }
 0x7ac   : > { %v6999_v33 = vmax.f32 %v6801_v0, 0.0 }
 0x7ad   : > { %v6997_v59 = vmax.f32 %v6793_v49, 0.0 }
 0x7ae   : > { %v7063_v14 = vpack.c.bf16 %v6999_v33, %v6998_v11  ;;  %v6467_v11 = vld [vmem:[%s10962_s12 + $0x100] sm:$0xff] }
 0x7af   : > { %v7062_v36 = vpack.c.bf16 %v6997_v59, %v6996_v62  ;;  %v7720_v19 = vpop.f32.mrb[196].mxu0 }
 0x7b0   : > { %v6814_v43 = vadd.f32 %v7720_v19, %v6457_v41  ;;  %v6805_v8 = vpop.f32.mrb[197].mxu0 }
 0x7b1   : > { %v6806_v17 = vadd.f32 %v6805_v8, %v6455_v25  ;;  %v7721_v9 = vpop.f32.mrb[198].mxu0  ;;  %7614 = vmatprep.subr.bf16.mxu1 %v7062_v36 }
 0x7b2   : > { %v6817_v18 = vadd.f32 %v7721_v9, %v6458_v15  ;;  %v6808_v13 = vpop.f32.mrb[199].mxu0  ;;  %7615 = vmatpush3.bf16.msra.mxu1 %v10670_v10  ;;  %v7002_v28 = vmax.f32 %v6814_v43, 0.0  ;;  %v6462_v10 = vld [vmem:[%s10962_s12 + $0xd8] sm:$0xff]  ;;  %v6473_v9 = vld [vmem:[%s10962_s12 + $0x130] sm:$0xff] }
 0x7b3   : > { %v6809_v48 = vadd.f32 %v6808_v13, %v6456_v24  ;;  %7616 = vmatprep.subr.bf16.mxu1 %v7063_v14  ;;  %v7000_v57 = vmax.f32 %v6806_v17, 0.0  ;;  %v6468_v14 = vld [vmem:[%s10962_s12 + $0x108] sm:$0xff] }
 0x7b4   : > { %v7003_v16 = vmax.f32 %v6817_v18, 0.0  ;;  %v7860_v18 = vld [vmem:[%s10963_s13] ss:$16 sps:$4 sm:$0xff]  }
 0x7b5   : > { %v7001_v53 = vmax.f32 %v6809_v48, 0.0  ;;  %v7865_v48 = vld [vmem:[%s10963_s13 + $0x24] ss:$16 sps:$4 sm:$0xff]  }
 0x7b6   : > { %v7065_v26 = vpack.c.bf16 %v7003_v16, %v7002_v28  ;;  %7617 = vmatpush3.bf16.msra.mxu1 %v10665_v29 }
 0x7b7   : > { %v7064_v21 = vpack.c.bf16 %v7001_v53, %v7000_v57  ;;  %v7724_v55 = vpop.f32.mrb[200].mxu0  ;;  %v6474_v57 = vld [vmem:[%s10962_s12 + $0x138] sm:$0xff] }
 0x7b8   : > { %v6830_v20 = vadd.f32 %v7724_v55, %v6461_v6  ;;  %v6821_v31 = vpop.f32.mrb[201].mxu0 }
 0x7b9   : > { %v6822_v54 = vadd.f32 %v6821_v31, %v6459_v50  ;;  %v7725_v40 = vpop.f32.mrb[202].mxu0  ;;  %7618 = vmatprep.subr.bf16.mxu1 %v7064_v21 }
 0x7ba   : > { %v6833_v29 = vadd.f32 %v7725_v40, %v6462_v10  ;;  %v6824_v22 = vpop.f32.mrb[203].mxu0  ;;  %7619 = vmatpush3.bf16.msra.mxu1 %v10686_v1  ;;  %v7006_v27 = vmax.f32 %v6830_v20, 0.0  ;;  %v6466_v1 = vld [vmem:[%s10962_s12 + $0xf8] sm:$0xff]  ;;  %v7052_v20 = vld [vmem:[%s10963_s13 + $0x40] sm:$0xff] }
 0x7bb   : > { %v6825_v7 = vadd.f32 %v6824_v22, %v6460_v45  ;;  %7620 = vmatprep.subr.bf16.mxu1 %v7065_v26  ;;  %v7004_v12 = vmax.f32 %v6822_v54, 0.0  ;;  %v7863_v22 = vld [vmem:[%s10963_s13 + $0x20] ss:$16 sps:$4 sm:$0xff]  }
 0x7bc   : > { %v7007_v39 = vmax.f32 %v6833_v29, 0.0  ;;  %v6477_v29 = vld [vmem:[%s10962_s12 + $0x150] sm:$0xff] }
 0x7bd   : > { %v7005_v58 = vmax.f32 %v6825_v7, 0.0 }
 0x7be   : > { %v7067_v34 = vpack.c.bf16 %v7007_v39, %v7006_v27  ;;  %7621 = vmatpush3.bf16.msra.mxu1 %v10681_v4  ;;  %v6475_v27 = vld [vmem:[%s10962_s12 + $0x140] sm:$0xff]  ;;  %v7568_v39 = vcombine.high %v7052_v20, %v7052_v20 }
 0x7bf   : > { %v7066_v30 = vpack.c.bf16 %v7005_v58, %v7004_v12  ;;  %v7728_v61 = vpop.f32.mrb[204].mxu0 }
 0x7c0   : > { %v6846_v5 = vadd.f32 %v7728_v61, %v6465_v60  ;;  %v6837_v44 = vpop.f32.mrb[205].mxu0  ;;  %v6478_v60 = vld [vmem:[%s10962_s12 + $0x158] sm:$0xff] }
 0x7c1   : > { %v6838_v47 = vadd.f32 %v6837_v44, %v6463_v37  ;;  %v7729_v32 = vpop.f32.mrb[206].mxu0  ;;  %7622 = vmatprep.subr.bf16.mxu1 %v7066_v30  ;;  %v6476_v30 = vld [vmem:[%s10962_s12 + $0x148] sm:$0xff] }
 0x7c2   : > { %v6849_v4 = vadd.f32 %v7729_v32, %v6466_v1  ;;  %v6840_v2 = vpop.f32.mrb[207].mxu0  ;;  %7623 = vmatpush3.bf16.msra.mxu1 %v10702_v23  ;;  %v7010_v51 = vmax.f32 %v6846_v5, 0.0  ;;  %v6470_v23 = vld [vmem:[%s10962_s12 + $0x118] sm:$0xff] }
 0x7c3   : > { %v6841_v38 = vadd.f32 %v6840_v2, %v6464_v35  ;;  %7624 = vmatprep.subr.bf16.mxu1 %v7067_v34  ;;  %v7008_v42 = vmax.f32 %v6838_v47, 0.0 }
 0x7c4   : > { %v7011_v63 = vmax.f32 %v6849_v4, 0.0 }
 0x7c5   : > { %v7009_v0 = vmax.f32 %v6841_v38, 0.0  ;;  %v6481_v38 = vld [vmem:[%s10962_s12 + $0x170] sm:$0xff] }
 0x7c6   : > { %v7069_v49 = vpack.c.bf16 %v7011_v63, %v7010_v51  ;;  %7625 = vmatpush3.bf16.msra.mxu1 %v10697_v56  ;;  %v7567_v51 = vcombine.low %v7052_v20, %v7052_v20 }
 0x7c7   : > { %v7068_v33 = vpack.c.bf16 %v7009_v0, %v7008_v42  ;;  %v7732_v62 = vpop.f32.mrb[208].mxu0  ;;  %v6479_v42 = vld [vmem:[%s10962_s12 + $0x160] sm:$0xff]  ;;  %v7870_v0 = vld [vmem:[%s10963_s13 + $0xc] ss:$16 sps:$4 sm:$0xff]  }
 0x7c8   : > { %v6862_v59 = vadd.f32 %v7732_v62, %v6469_v46  ;;  %v6853_v41 = vpop.f32.mrb[209].mxu0 }
 0x7c9   : > { %7626 = vmatprep.subr.bf16.mxu1 %v7068_v33  ;;  %v6854_v25 = vadd.f32 %v6853_v41, %v6467_v11  ;;  %v7733_v36 = vpop.f32.mrb[210].mxu0  ;;  %v6482_v11 = vld [vmem:[%s10962_s12 + $0x178] sm:$0xff] }
 0x7ca   : > { %7627 = vmatpush3.bf16.msra.mxu1 %v10718_v52  ;;  %v6865_v56 = vadd.f32 %v7733_v36, %v6470_v23  ;;  %v6856_v19 = vpop.f32.mrb[211].mxu0  ;;  %v7014_v43 = vmax.f32 %v6862_v59, 0.0  ;;  %v6471_v52 = vld [vmem:[%s10962_s12 + $0x120] sm:$0xff]  ;;  %v6480_v23 = vld [vmem:[%s10962_s12 + $0x168] sm:$0xff] }
 0x7cb   : > { %7628 = vmatprep.subr.bf16.mxu1 %v7069_v49  ;;  %v6857_v15 = vadd.f32 %v6856_v19, %v6468_v14  ;;  %v7012_v24 = vmax.f32 %v6854_v25, 0.0 }
 0x7cc   : > { %v7015_v8 = vmax.f32 %v6865_v56, 0.0 }
 0x7cd   : > { %v7013_v17 = vmax.f32 %v6857_v15, 0.0 }
 0x7ce   : > { %v10787_v13 = vpack.c.bf16 %v7015_v8, %v7014_v43  ;;  %7629 = vmatpush3.bf16.msra.mxu1 %v10713_v3  ;;  %v6472_v3 = vld [vmem:[%s10962_s12 + $0x128] sm:$0xff]  ;;  %v6485_v8 = vld [vmem:[%s10962_s12 + $0x190] sm:$0xff] }
 0x7cf   : > { %v10796_v28 = vpack.c.bf16 %v7013_v17, %v7012_v24  ;;  %v7736_v16 = vpop.f32.mrb[212].mxu0  ;;  %v6483_v17 = vld [vmem:[%s10962_s12 + $0x180] sm:$0xff] }
 0x7d0   : > { %v6878_v53 = vadd.f32 %v7736_v16, %v6473_v9  ;;  %v6869_v6 = vpop.f32.mrb[213].mxu0 }
 0x7d1   : > { %v6870_v26 = vadd.f32 %v6869_v6, %v6471_v52  ;;  %v7737_v50 = vpop.f32.mrb[214].mxu0  ;;  %7178 = vmatmul.mubr.bf16.vlgmr.msra.gmra.mrb[208].mxu1 %v7860_v18  ;;  %v6486_v52 = vld [vmem:[%s10962_s12 + $0x198] sm:$0xff] }
 0x7d2   : > { %v6881_v21 = vadd.f32 %v7737_v50, %v6474_v57  ;;  %v6872_v55 = vpop.f32.mrb[215].mxu0  ;;  %7185 = vmatprep.mubr.bf16.mxu1 %v7865_v48  ;;  %v7018_v31 = vmax.f32 %v6878_v53, 0.0  ;;  %v6484_v57 = vld [vmem:[%s10962_s12 + $0x188] sm:$0xff] }
 0x7d3   : > { %v6873_v10 = vadd.f32 %v6872_v55, %v6472_v3  ;;  %v7016_v54 = vmax.f32 %v6870_v26, 0.0 }
 0x7d4   : > { %v7019_v45 = vmax.f32 %v6881_v21, 0.0 }
 0x7d5   : > { %v7017_v40 = vmax.f32 %v6873_v10, 0.0 }
 0x7d6   : > { %v10813_v7 = vpack.c.bf16 %v7019_v45, %v7018_v31  ;;  %v6489_v31 = vld [vmem:[%s10962_s12 + $0x1b0] sm:$0xff] }
 0x7d7   : > { %v10818_v12 = vpack.c.bf16 %v7017_v40, %v7016_v54  ;;  %v7740_v58 = vpop.f32.mrb[216].mxu0  ;;  %v6487_v54 = vld [vmem:[%s10962_s12 + $0x1a0] sm:$0xff] }
 0x7d8   : > { %v6894_v34 = vadd.f32 %v7740_v58, %v6477_v29  ;;  %v6885_v37 = vpop.f32.mrb[217].mxu0  ;;  %v6488_v58 = vld [vmem:[%s10962_s12 + $0x1a8] sm:$0xff] }
 0x7d9   : > { %v6886_v61 = vadd.f32 %v6885_v37, %v6475_v27  ;;  %v7741_v1 = vpop.f32.mrb[218].mxu0  ;;  %7186 = vmatmul.mubr.bf16.gmra.mrb[212].mxu1 %v7863_v22  ;;  %v6490_v22 = vld [vmem:[%s10962_s12 + $0x1b8] sm:$0xff] }
 0x7da   : > { %v6897_v5 = vadd.f32 %v7741_v1, %v6478_v60  ;;  %v6888_v44 = vpop.f32.mrb[219].mxu0  ;;  %7193 = vmatprep.mubr.bf16.mxu1 %v7568_v39  ;;  %v7022_v47 = vmax.f32 %v6894_v34, 0.0 }
 0x7db   : > { %v6889_v35 = vadd.f32 %v6888_v44, %v6476_v30  ;;  %v7020_v4 = vmax.f32 %v6886_v61, 0.0 }
 0x7dc   : > { %v7023_v32 = vmax.f32 %v6897_v5, 0.0 }
 0x7dd   : > { %v7021_v2 = vmax.f32 %v6889_v35, 0.0 }
 0x7de   : > { %v10829_v63 = vpack.c.bf16 %v7023_v32, %v7022_v47  ;;  %v6493_v47 = vld [vmem:[%s10962_s12 + $0x1d0] sm:$0xff] }
 0x7df   : > { %v10837_v46 = vpack.c.bf16 %v7021_v2, %v7020_v4  ;;  %v7744_v49 = vpop.f32.mrb[220].mxu0  ;;  %v6491_v4 = vld [vmem:[%s10962_s12 + $0x1c0] sm:$0xff] }
 0x7e0   : > { %v6910_v33 = vadd.f32 %v7744_v49, %v6481_v38  ;;  %v6901_v62 = vpop.f32.mrb[221].mxu0 }
 0x7e1   : > { %v6902_v59 = vadd.f32 %v6901_v62, %v6479_v42  ;;  %v7745_v41 = vpop.f32.mrb[222].mxu0  ;;  %7194 = vmatmul.mubr.bf16.gmra.mrb[216].mxu1 %v7567_v51 }
 0x7e2   : > { %v6913_v14 = vadd.f32 %v7745_v41, %v6482_v11  ;;  %v6904_v25 = vpop.f32.mrb[223].mxu0  ;;  %7233 = vmatprep.mubr.bf16.mxu1 %v7870_v0  ;;  %v7026_v56 = vmax.f32 %v6910_v33, 0.0  ;;  %v6492_v0 = vld [vmem:[%s10962_s12 + $0x1c8] sm:$0xff] }
 0x7e3   : > { %v6905_v36 = vadd.f32 %v6904_v25, %v6480_v23  ;;  %v7024_v15 = vmax.f32 %v6902_v59, 0.0  ;;  %v6497_v25 = vld [vmem:[%s10962_s12 + $0x1f0] sm:$0xff] }
 0x7e4   : > { %v7027_v19 = vmax.f32 %v6913_v14, 0.0 }
 0x7e5   : > { %v7025_v43 = vmax.f32 %v6905_v36, 0.0 }
 0x7e6   : > { %v10848_v24 = vpack.c.bf16 %v7027_v19, %v7026_v56  ;;  %v6495_v56 = vld [vmem:[%s10962_s12 + $0x1e0] sm:$0xff] }
 0x7e7   : > { %v10853_v9 = vpack.c.bf16 %v7025_v43, %v7024_v15  ;;  %v7748_v18 = vpop.f32.mrb[224].mxu0 }
 0x7e8   : > { %v6926_v48 = vadd.f32 %v7748_v18, %v6485_v8  ;;  %v6917_v16 = vpop.f32.mrb[225].mxu0 }
 0x7e9   : > { %v6918_v53 = vadd.f32 %v6917_v16, %v6483_v17  ;;  %v7749_v6 = vpop.f32.mrb[226].mxu0  ;;  %v6496_v17 = vld [vmem:[%s10962_s12 + $0x1e8] sm:$0xff] }
 0x7ea   : > { %v6929_v3 = vadd.f32 %v7749_v6, %v6486_v52  ;;  %v6920_v26 = vpop.f32.mrb[227].mxu0  ;;  %v7030_v21 = vmax.f32 %v6926_v48, 0.0 }
 0x7eb   : > { %v6921_v50 = vadd.f32 %v6920_v26, %v6484_v57  ;;  %v7028_v10 = vmax.f32 %v6918_v53, 0.0 }
 0x7ec   : > { %v7031_v55 = vmax.f32 %v6929_v3, 0.0 }
 0x7ed   : > { %v7029_v20 = vmax.f32 %v6921_v50, 0.0 }
 0x7ee   : > { %v7079_v45 = vpack.c.bf16 %v7031_v55, %v7030_v21  ;;  %v7868_v21 = vld [vmem:[%s10963_s13 + $0x8] ss:$16 sps:$4 sm:$0xff]  }
 0x7ef   : > { %v7078_v40 = vpack.c.bf16 %v7029_v20, %v7028_v10  ;;  %v7752_v29 = vpop.f32.mrb[228].mxu0 }
 0x7f0   : > { %v6942_v27 = vadd.f32 %v7752_v29, %v6489_v31  ;;  %v6933_v39 = vpop.f32.mrb[229].mxu0 }
 0x7f1   : > { %v6934_v60 = vadd.f32 %v6933_v39, %v6487_v54  ;;  %v7753_v34 = vpop.f32.mrb[230].mxu0  ;;  %7648 = vmatprep.subr.bf16.mxu1 %v7078_v40 }
 0x7f2   : > { %v6945_v37 = vadd.f32 %v7753_v34, %v6490_v22  ;;  %v6936_v30 = vpop.f32.mrb[231].mxu0  ;;  %7649 = vmatpush3.bf16.msra.mxu1 %v10796_v28  ;;  %v7034_v1 = vmax.f32 %v6942_v27, 0.0  ;;  %v6494_v28 = vld [vmem:[%s10962_s12 + $0x1d8] sm:$0xff] }
 0x7f3   : > { %v6937_v61 = vadd.f32 %v6936_v30, %v6488_v58  ;;  %7650 = vmatprep.subr.bf16.mxu1 %v7079_v45  ;;  %v7032_v44 = vmax.f32 %v6934_v60, 0.0 }
 0x7f4   : > { %v7035_v5 = vmax.f32 %v6945_v37, 0.0 }
 0x7f5   : > { %v7033_v35 = vmax.f32 %v6937_v61, 0.0 }
 0x7f6   : > { %v7081_v32 = vpack.c.bf16 %v7035_v5, %v7034_v1  ;;  %7651 = vmatpush3.bf16.msra.mxu1 %v10787_v13  ;;  %v7086_v5 = vld [vmem:[%s10964_s14] sm:$0xff] }
 0x7f7   : > { %v7080_v2 = vpack.c.bf16 %v7033_v35, %v7032_v44  ;;  %v7756_v38 = vpop.f32.mrb[232].mxu0  ;;  %v7087_v35 = vld [vmem:[%s10964_s14 + $0x8] sm:$0xff] }
 0x7f8   : > { %v6958_v51 = vadd.f32 %v7756_v38, %v6493_v47  ;;  %v6949_v42 = vpop.f32.mrb[233].mxu0 }
 0x7f9   : > { %v6950_v49 = vadd.f32 %v6949_v42, %v6491_v4  ;;  %v7757_v11 = vpop.f32.mrb[234].mxu0  ;;  %7652 = vmatprep.subr.bf16.mxu1 %v7080_v2 }
 0x7fa   : > { %v6961_v13 = vadd.f32 %v7757_v11, %v6494_v28  ;;  %v6952_v33 = vpop.f32.mrb[235].mxu0  ;;  %7653 = vmatpush3.bf16.msra.mxu1 %v10818_v12  ;;  %v7038_v23 = vmax.f32 %v6958_v51, 0.0  ;;  %v6498_v12 = vld [vmem:[%s10962_s12 + $0x1f8] sm:$0xff] }
 0x7fb   : > { %v6953_v62 = vadd.f32 %v6952_v33, %v6492_v0  ;;  %7654 = vmatprep.subr.bf16.mxu1 %v7081_v32  ;;  %v7036_v41 = vmax.f32 %v6950_v49, 0.0  ;;  %v7088_v49 = vld [vmem:[%s10964_s14 + $0x10] sm:$0xff] }
 0x7fc   : > { %v7039_v59 = vmax.f32 %v6961_v13, 0.0  ;;  %v7089_v13 = vld [vmem:[%s10964_s14 + $0x18] sm:$0xff] }
 0x7fd   : > { %v7037_v14 = vmax.f32 %v6953_v62, 0.0 }
 0x7fe   : > { %v7083_v36 = vpack.c.bf16 %v7039_v59, %v7038_v23  ;;  %7655 = vmatpush3.bf16.msra.mxu1 %v10813_v7 }
 0x7ff   : > { %v7082_v19 = vpack.c.bf16 %v7037_v14, %v7036_v41  ;;  %v7760_v15 = vpop.f32.mrb[236].mxu0 }
 0x800   : > { %v6974_v43 = vadd.f32 %v7760_v15, %v6497_v25  ;;  %v6965_v8 = vpop.f32.mrb[237].mxu0 }
 0x801   : > { %v6966_v18 = vadd.f32 %v6965_v8, %v6495_v56  ;;  %v7761_v52 = vpop.f32.mrb[238].mxu0  ;;  %7656 = vmatprep.subr.bf16.mxu1 %v7082_v19  ;;  %v7090_v19 = vld [vmem:[%s10964_s14 + $0x20] sm:$0xff] }
 0x802   : > { %v6977_v7 = vadd.f32 %v7761_v52, %v6498_v12  ;;  %v6968_v48 = vpop.f32.mrb[239].mxu0  ;;  %7657 = vmatpush3.bf16.msra.mxu1 %v10837_v46  ;;  %v7042_v57 = vmax.f32 %v6974_v43, 0.0  ;;  %v7873_v46 = vld [vmem:[%s10963_s13 + $0x2c] ss:$16 sps:$4 sm:$0xff]  }
 0x803   : > { %v6969_v16 = vadd.f32 %v6968_v48, %v6496_v17  ;;  %7658 = vmatprep.subr.bf16.mxu1 %v7083_v36  ;;  %v7040_v6 = vmax.f32 %v6966_v18, 0.0 }
 0x804   : > { %v7043_v53 = vmax.f32 %v6977_v7, 0.0 }
 0x805   : > { %v7041_v3 = vmax.f32 %v6969_v16, 0.0 }
 0x806   : > { %v7085_v26 = vpack.c.bf16 %v7043_v53, %v7042_v57  ;;  %7659 = vmatpush3.bf16.msra.mxu1 %v10829_v63  ;;  %v7053_v63 = vld [vmem:[%s10963_s13 + $0x48] sm:$0xff] }
 0x807   : > { %v7084_v50 = vpack.c.bf16 %v7041_v3, %v7040_v6  ;;  %v7570_v55 = vcombine.high %v7053_v63, %v7053_v63  ;;  %v7569_v10 = vcombine.low %v7053_v63, %v7053_v63 }
 0x809   : > { %7660 = vmatprep.subr.bf16.mxu1 %v7084_v50 }
 0x80a   : > { %7661 = vmatpush3.bf16.msra.mxu1 %v10853_v9  ;;  %v7871_v9 = vld [vmem:[%s10963_s13 + $0x28] ss:$16 sps:$4 sm:$0xff]  }
 0x80b   : > { %7662 = vmatprep.subr.bf16.mxu1 %v7085_v26 }
 0x80e   : > { %7663 = vmatpush3.bf16.msra.mxu1 %v10848_v24 }
 0x811   : > { %7234 = vmatmul.mubr.bf16.vlgmr.msra.gmra.mrb[220].mxu1 %v7868_v21 }
 0x812   : > { %7241 = vmatprep.mubr.bf16.mxu1 %v7873_v46 }
 0x819   : > { %7242 = vmatmul.mubr.bf16.gmra.mrb[224].mxu1 %v7871_v9 }
 0x81a   : > { %7249 = vmatprep.mubr.bf16.mxu1 %v7570_v55 }
 0x821   : > { %7250 = vmatmul.mubr.bf16.gmra.mrb[228].mxu1 %v7569_v10 }
 0x8a4   : > { %v7630_v24 = vpop.f32.mrb[208].mxu1 }
 0x8a5   : > { %v7631_v20 = vpop.f32.mrb[209].mxu1 }
 0x8a6   : > { %v7632_v31 = vadd.f32 %v7631_v20, %v7630_v24  ;;  %v7633_v45 = vpop.f32.mrb[210].mxu1 }
 0x8a7   : > { %v7634_v54 = vpop.f32.mrb[211].mxu1 }
 0x8a8   : > { %v7635_v40 = vadd.f32 %v7634_v54, %v7633_v45  ;;  %v7180_v32 = vadd.f32 %v7632_v31, %v7086_v5 }
 0x8aa   : > { %v7183_v28 = vadd.f32 %v7635_v40, %v7087_v35 }
 0x8ac   : > { %v7636_v29 = vpop.f32.mrb[212].mxu1 }
 0x8ad   : > { %v7637_v22 = vpop.f32.mrb[213].mxu1 }
 0x8ae   : > { %v7638_v27 = vadd.f32 %v7637_v22, %v7636_v29  ;;  %v7639_v39 = vpop.f32.mrb[214].mxu1 }
 0x8af   : > { %v7640_v58 = vpop.f32.mrb[215].mxu1 }
 0x8b0   : > { %v7641_v60 = vadd.f32 %v7640_v58, %v7639_v39  ;;  %v7188_v62 = vadd.f32 %v7638_v27, %v7088_v49 }
 0x8b2   : > { %v7191_v14 = vadd.f32 %v7641_v60, %v7089_v13 }
 0x8b4   : > { %v7642_v34 = vpop.f32.mrb[216].mxu1 }
 0x8b5   : > { %v7643_v37 = vpop.f32.mrb[217].mxu1 }
 0x8b6   : > { %v7644_v30 = vadd.f32 %v7643_v37, %v7642_v34  ;;  %v7645_v61 = vpop.f32.mrb[218].mxu1 }
 0x8b7   : > { %v7646_v1 = vpop.f32.mrb[219].mxu1 }
 0x8b8   : > { %v7196_v43 = vadd.f32 %v7644_v30, %v7090_v19 }
 0x8e4   : > { %v7664_v44 = vpop.f32.mrb[220].mxu1 }
 0x8e5   : > { %v7665_v47 = vpop.f32.mrb[221].mxu1 }
 0x8e6   : > { %v7666_v4 = vadd.f32 %v7665_v47, %v7664_v44  ;;  %v7667_v2 = vpop.f32.mrb[222].mxu1 }
 0x8e7   : > { %v7668_v38 = vpop.f32.mrb[223].mxu1 }
 0x8e8   : > { %v7236_v51 = vadd.f32 %v7666_v4, %v7180_v32  ;;  %v7669_v42 = vadd.f32 %v7668_v38, %v7667_v2 }
 0x8ea   : > { %7257 = vst.msk [vmem:[%s522_s30] sm:$0xff] %vm528_vm4, %v7236_v51  ;;  %v7239_v0 = vadd.f32 %v7669_v42, %v7183_v28 }
 0x8ec   : > { %7258 = vst.msk [vmem:[%s522_s30 + $0x8] sm:$0xff] %vm528_vm4, %v7239_v0  ;;  %v7670_v11 = vpop.f32.mrb[224].mxu1 }
 0x8ed   : > { %v7671_v33 = vpop.f32.mrb[225].mxu1 }
 0x8ee   : > { %v7672_v23 = vadd.f32 %v7671_v33, %v7670_v11  ;;  %v7673_v59 = vpop.f32.mrb[226].mxu1 }
 0x8ef   : > { %v7674_v41 = vpop.f32.mrb[227].mxu1 }
 0x8f0   : > { %v7244_v25 = vadd.f32 %v7672_v23, %v7188_v62  ;;  %v7675_v36 = vadd.f32 %v7674_v41, %v7673_v59 }
 0x8f2   : > { %7259 = vst.msk [vmem:[%s522_s30 + $0x10] sm:$0xff] %vm528_vm4, %v7244_v25  ;;  %v7247_v56 = vadd.f32 %v7675_v36, %v7191_v14 }
 0x8f4   : > { %7260 = vst.msk [vmem:[%s522_s30 + $0x18] sm:$0xff] %vm528_vm4, %v7247_v56  ;;  %v7676_v15 = vpop.f32.mrb[228].mxu1 }
 0x8f5   : > { %v7677_v12 = vpop.f32.mrb[229].mxu1 }
 0x8f6   : > { %v7678_v8 = vadd.f32 %v7677_v12, %v7676_v15  ;;  %v7679_v17 = vpop.f32.mrb[230].mxu1 }
 0x8f7   : > { %v7680_v18 = vpop.f32.mrb[231].mxu1 }
 0x8f8   : > { %v7252_v52 = vadd.f32 %v7678_v8, %v7196_v43 }
 0x8fa   : > { %7261 = vst.msk [vmem:[%s522_s30 + $0x20] sm:$0xff] %vm528_vm4, %v7252_v52 }
 0x8fb PF: > { %s25_s20 = sadd.s32 1, %s7914_s20   ;;  %s10966_s18 = smov %s7910_s19 }
 0x8fc   : > { %p22_p5 = scmp.ge.s32.totalorder %s25_s20, 4   ;;  %s10967_s19 = smov %s10969_s21 }
 0x8fe   :  { %24 = sbr.rel (!%p22_p5) target bundleno = 2 (0x2), region = 118 }

</bundles_post_ra>
